<compile_context>
chip_gen: v7x
topology: tpu7x:2x2x1
jax: 0.10.0
libtpu: 0.0.40
codegen_flags: <defaults>
</compile_context>

<pallas_src>
import functools
import math

import jax
import jax.numpy as jnp
from jax.experimental import pallas as pl
from jax.experimental.pallas import tpu as pltpu


IN_FEATURES = 784          # 28 * 28
HIDDEN = 1568
HIDDEN_PAD = 1664          # 13 * 128 (lane-dense padding of 1568)


def _round_up(n, m):
    return ((n + m - 1) // m) * m


# ----------------------------------------------------------------------------
# Kernels
# ----------------------------------------------------------------------------
def _mlp_factorized_kernel(x_ref, w1_ref, b1_ref, w2_ref, b2_ref,
                           w3_ref, b3_ref, o_ref):
    """x@W1 + b1 -> @W2 + b2 -> ReLU -> @W3 + b3 on one (tm, 784) row tile."""
    cdt = w1_ref.dtype                                   # compute dtype (bf16/f32)
    x = x_ref[...].astype(cdt)                           # (tm, 784)
    h1 = jnp.dot(x, w1_ref[...],
                 preferred_element_type=jnp.float32)     # (tm, p_pad), f32 acc
    h1 = h1 + b1_ref[...]
    h2 = jnp.dot(h1.astype(cdt), w2_ref[...],
                 preferred_element_type=jnp.float32)     # (tm, 1664), f32 acc
    h2 = jnp.maximum(h2 + b2_ref[...], 0.0)              # bias + ReLU in f32
    o = jnp.dot(h2.astype(cdt), w3_ref[...],
                preferred_element_type=jnp.float32)      # (tm, 784), f32 acc
    o_ref[...] = (o + b3_ref[...]).astype(o_ref.dtype)


def _mlp_fused_kernel(x_ref, w12_ref, b12_ref, w3_ref, b3_ref, o_ref):
    """(Linear @ Linear fused) -> ReLU -> Linear on one (tm, 784) row tile."""
    cdt = w12_ref.dtype
    x = x_ref[...].astype(cdt)                           # (tm, 784)
    h = jnp.dot(x, w12_ref[...],
                preferred_element_type=jnp.float32)      # (tm, 1664), f32 acc
    h = jnp.maximum(h + b12_ref[...], 0.0)
    o = jnp.dot(h.astype(cdt), w3_ref[...],
                preferred_element_type=jnp.float32)      # (tm, 784), f32 acc
    o_ref[...] = (o + b3_ref[...]).astype(o_ref.dtype)


# ----------------------------------------------------------------------------
# One-time parameter preparation (padding / optional fusion / dtype cast)
# ----------------------------------------------------------------------------
def prepare_params(params, weight_dtype=jnp.bfloat16):
    """Pad hidden dims to multiples of 128, cast weights to `weight_dtype`
    (biases stay f32).  For large p, fuse Linear(784,p)·Linear(p,1568) into a
    single (784,1568) matrix; for small p keep the factorized (cheaper) form."""
    w1, b1, w2, b2, w3, b3 = params
    p = w1.shape[1]
    p_pad = _round_up(p, 128)

    w3_p = (jnp.zeros((HIDDEN_PAD, IN_FEATURES), jnp.float32)
            .at[:HIDDEN, :].set(w3.astype(jnp.float32)))
    b3_f = b3.astype(jnp.float32)

    # Fused is cheaper only when p_pad*(784+1664) > 784*1664  (p_pad > ~532).
    fuse = p_pad * (IN_FEATURES + HIDDEN_PAD) > IN_FEATURES * HIDDEN_PAD
    hi = jax.lax.Precision.HIGHEST

    if fuse:
        w1f = w1.astype(jnp.float32)
        w2f = w2.astype(jnp.float32)
        w12 = jnp.dot(w1f, w2f, precision=hi)                       # (784, 1568)
        b12 = jnp.dot(b1.astype(jnp.float32), w2f, precision=hi) + b2
        w12_p = (jnp.zeros((IN_FEATURES, HIDDEN_PAD), jnp.float32)
                 .at[:, :HIDDEN].set(w12))
        b12_p = jnp.zeros((1, HIDDEN_PAD), jnp.float32).at[:, :HIDDEN].set(b12)
        return (w12_p.astype(weight_dtype), b12_p,
                w3_p.astype(weight_dtype), b3_f)

    w1_p = (jnp.zeros((IN_FEATURES, p_pad), jnp.float32)
            .at[:, :p].set(w1.astype(jnp.float32)))
    b1_p = jnp.zeros((1, p_pad), jnp.float32).at[:, :p].set(b1.astype(jnp.float32))
    w2_p = (jnp.zeros((p_pad, HIDDEN_PAD), jnp.float32)
            .at[:p, :HIDDEN].set(w2.astype(jnp.float32)))
    b2_p = (jnp.zeros((1, HIDDEN_PAD), jnp.float32)
            .at[:, :HIDDEN].set(b2.astype(jnp.float32)))
    return (w1_p.astype(weight_dtype), b1_p,
            w2_p.astype(weight_dtype), b2_p,
            w3_p.astype(weight_dtype), b3_f)


# ----------------------------------------------------------------------------
# Forward wrappers
# ----------------------------------------------------------------------------
def _tile_m(block_m, b):
    return max(8, min(_round_up(block_m, 8), _round_up(b, 8)))


_COMPILER_PARAMS = pltpu.CompilerParams(
    dimension_semantics=("parallel",),          # megacore / v7x 2-TC sharding
    vmem_limit_bytes=64 * 1024 * 1024,          # <= v7x physical VMEM, ample here
)


@functools.partial(jax.jit, static_argnames=("block_m",))
def _forward_factorized(x, prepared, block_m=512):
    w1, b1, w2, b2, w3, b3 = prepared
    b = x.shape[0]
    x_flat = x.reshape(b, IN_FEATURES)           # metadata-only, like torch .view
    p_pad = w1.shape[1]
    tm = _tile_m(block_m, b)
    grid_m = pl.cdiv(b, tm)

    flops = 2 * b * (IN_FEATURES * p_pad + p_pad * HIDDEN_PAD
                     + HIDDEN_PAD * IN_FEATURES)
    bytes_accessed = (x_flat.size * x_flat.dtype.itemsize
                      + b * IN_FEATURES * 4
                      + sum(t.size * t.dtype.itemsize for t in prepared))

    out = pl.pallas_call(
        _mlp_factorized_kernel,
        out_shape=jax.ShapeDtypeStruct((b, IN_FEATURES), jnp.float32),
        grid_spec=pltpu.PrefetchScalarGridSpec(
            num_scalar_prefetch=0,
            grid=(grid_m,),
            in_specs=[
                pl.BlockSpec((tm, IN_FEATURES), lambda i: (i, 0)),         # x rows
                pl.BlockSpec((IN_FEATURES, p_pad), lambda i: (0, 0)),      # W1
                pl.BlockSpec((1, p_pad), lambda i: (0, 0)),                # b1
                pl.BlockSpec((p_pad, HIDDEN_PAD), lambda i: (0, 0)),       # W2
                pl.BlockSpec((1, HIDDEN_PAD), lambda i: (0, 0)),           # b2
                pl.BlockSpec((HIDDEN_PAD, IN_FEATURES), lambda i: (0, 0)), # W3
                pl.BlockSpec((1, IN_FEATURES), lambda i: (0, 0)),          # b3
            ],
            out_specs=pl.BlockSpec((tm, IN_FEATURES), lambda i: (i, 0)),
        ),
        compiler_params=_COMPILER_PARAMS,
        cost_estimate=pl.CostEstimate(flops=flops, transcendentals=0,
                                      bytes_accessed=bytes_accessed),
    )(x_flat, w1, b1, w2, b2, w3, b3)

    return out.reshape(b, 1, 28, 28)


@functools.partial(jax.jit, static_argnames=("block_m",))
def _forward_fused(x, prepared, block_m=512):
    w12, b12, w3, b3 = prepared
    b = x.shape[0]
    x_flat = x.reshape(b, IN_FEATURES)
    tm = _tile_m(block_m, b)
    grid_m = pl.cdiv(b, tm)

    flops = 2 * b * (IN_FEATURES * HIDDEN_PAD + HIDDEN_PAD * IN_FEATURES)
    bytes_accessed = (x_flat.size * x_flat.dtype.itemsize
                      + b * IN_FEATURES * 4
                      + sum(t.size * t.dtype.itemsize for t in prepared))

    out = pl.pallas_call(
        _mlp_fused_kernel,
        out_shape=jax.ShapeDtypeStruct((b, IN_FEATURES), jnp.float32),
        grid_spec=pltpu.PrefetchScalarGridSpec(
            num_scalar_prefetch=0,
            grid=(grid_m,),
            in_specs=[
                pl.BlockSpec((tm, IN_FEATURES), lambda i: (i, 0)),         # x rows
                pl.BlockSpec((IN_FEATURES, HIDDEN_PAD), lambda i: (0, 0)), # W12
                pl.BlockSpec((1, HIDDEN_PAD), lambda i: (0, 0)),           # b12
                pl.BlockSpec((HIDDEN_PAD, IN_FEATURES), lambda i: (0, 0)), # W3
                pl.BlockSpec((1, IN_FEATURES), lambda i: (0, 0)),          # b3
            ],
            out_specs=pl.BlockSpec((tm, IN_FEATURES), lambda i: (i, 0)),
        ),
        compiler_params=_COMPILER_PARAMS,
        cost_estimate=pl.CostEstimate(flops=flops, transcendentals=0,
                                      bytes_accessed=bytes_accessed),
    )(x_flat, w12, b12, w3, b3)

    return out.reshape(b, 1, 28, 28)


def network_forward(x, prepared, block_m=512):
    """x: (b, 1, 28, 28) float32 (bf16 also accepted) -> (b, 1, 28, 28) f32.
    block_m: row tile; use >=512 (v5e/v6e up to 1024, keep <=512 on v7x)."""
    if len(prepared) == 6:
        return _forward_factorized(x, prepared, block_m=block_m)
    return _forward_fused(x, prepared, block_m=block_m)


# ----------------------------------------------------------------------------
# Init + plain-JAX reference (matches the torch module)
# ----------------------------------------------------------------------------
def init_params(key, p):
    """torch.nn.Linear-style init; weights stored as (in, out), biases (1, out)."""
    def linear(k, fan_in, fan_out):
        kw, kb = jax.random.split(k)
        bound = 1.0 / math.sqrt(fan_in)
        w = jax.random.uniform(kw, (fan_in, fan_out), jnp.float32, -bound, bound)
        b = jax.random.uniform(kb, (1, fan_out), jnp.float32, -bound, bound)
        return w, b

    k1, k2, k3 = jax.random.split(key, 3)
    w1, b1 = linear(k1, IN_FEATURES, p)
    w2, b2 = linear(k2, p, HIDDEN)
    w3, b3 = linear(k3, HIDDEN, IN_FEATURES)
    return (w1, b1, w2, b2, w3, b3)


def reference_forward(x, params):
    """Plain-JAX f32, unfused reference matching the torch module."""
    w1, b1, w2, b2, w3, b3 = params
    b = x.shape[0]
    h = x.reshape(b, -1)
    h = h @ w1 + b1
    h = h @ w2 + b2
    h = jnp.maximum(h, 0.0)
    h = h @ w3 + b3
    return h.reshape(b, 1, 28, 28)


if __name__ == "__main__":
    BATCH = 2

    key = jax.random.PRNGKey(0)
    k_small, k_big, k_x = jax.random.split(key, 3)
    x = jax.random.normal(k_x, (BATCH, 1, 28, 28), dtype=jnp.float32)

    # --- small p (shipped config) -> factorized 3-matmul path ---------------
    P_SMALL = 32
    params_s = init_params(k_small, P_SMALL)
    ref_s = reference_forward(x, params_s)

    prep_f32 = prepare_params(params_s, weight_dtype=jnp.float32)
    assert len(prep_f32) == 6, "small p should use the factorized path"
    out_f32 = jax.block_until_ready(network_forward(x, prep_f32))
    assert out_f32.shape == (BATCH, 1, 28, 28)
    assert jnp.allclose(out_f32, ref_s, atol=1e-4, rtol=1e-4), "f32 mismatch"

    prep_bf16 = prepare_params(params_s, weight_dtype=jnp.bfloat16)
    out_bf16 = jax.block_until_ready(network_forward(x, prep_bf16))
    assert out_bf16.shape == (BATCH, 1, 28, 28)
    assert jnp.allclose(out_bf16, ref_s, atol=5e-2, rtol=5e-2), "bf16 mismatch"

    # --- large p -> fused (W1@W2) 2-matmul path ------------------------------
    P_BIG = 640
    params_b = init_params(k_big, P_BIG)
    ref_b = reference_forward(x, params_b)

    prep_big = prepare_params(params_b, weight_dtype=jnp.float32)
    assert len(prep_big) == 4, "large p should use the fused path"
    out_big = jax.block_until_ready(network_forward(x, prep_big))
    assert out_big.shape == (BATCH, 1, 28, 28)
    assert jnp.allclose(out_big, ref_b, atol=2e-3, rtol=2e-3), "fused mismatch"

    print("KERNEL_OK")
</pallas_src>

<mosaic_0001>
module attributes {stable_mosaic.version = 11 : i64} {
  func.func @_mlp_factorized_kernel(%arg0: i32, %arg1: memref<8x784xf32, #tpu.memory_space<vmem>>, %arg2: memref<784x128xf32, #tpu.memory_space<vmem>>, %arg3: memref<1x128xf32, #tpu.memory_space<vmem>>, %arg4: memref<128x1664xf32, #tpu.memory_space<vmem>>, %arg5: memref<1x1664xf32, #tpu.memory_space<vmem>>, %arg6: memref<1664x784xf32, #tpu.memory_space<vmem>>, %arg7: memref<1x784xf32, #tpu.memory_space<vmem>>, %arg8: memref<8x784xf32, #tpu.memory_space<vmem>>) attributes {dimension_semantics = [#tpu.dimension_semantics<parallel>], iteration_bounds = array<i64: 1>, scalar_prefetch = 0 : i64, scratch_operands = 0 : i64, tpu.core_type = #tpu.core_type<tc>, window_params = [{transform_indices = @transform_0, window_bounds = array<i64: 8, 784>}, {pipeline_mode = #tpu.pipeline_mode<synchronous>, transform_indices = @transform_1, window_bounds = array<i64: 784, 128>}, {pipeline_mode = #tpu.pipeline_mode<synchronous>, transform_indices = @transform_2, window_bounds = array<i64: 1, 128>}, {pipeline_mode = #tpu.pipeline_mode<synchronous>, transform_indices = @transform_3, window_bounds = array<i64: 128, 1664>}, {pipeline_mode = #tpu.pipeline_mode<synchronous>, transform_indices = @transform_4, window_bounds = array<i64: 1, 1664>}, {pipeline_mode = #tpu.pipeline_mode<synchronous>, transform_indices = @transform_5, window_bounds = array<i64: 1664, 784>}, {pipeline_mode = #tpu.pipeline_mode<synchronous>, transform_indices = @transform_6, window_bounds = array<i64: 1, 784>}, {transform_indices = @transform_7, window_bounds = array<i64: 8, 784>}]} {
    %c0 = arith.constant 0 : index
    %c0_0 = arith.constant 0 : index
    %0 = vector.load %arg1[%c0, %c0_0] : memref<8x784xf32, #tpu.memory_space<vmem>>, vector<8x784xf32>
    %c0_1 = arith.constant 0 : index
    %c0_2 = arith.constant 0 : index
    %1 = vector.load %arg2[%c0_1, %c0_2] : memref<784x128xf32, #tpu.memory_space<vmem>>, vector<784x128xf32>
    %cst = arith.constant dense<0.000000e+00> : vector<8x128xf32>
    %2 = tpu.matmul %0, %1, %cst {dimension_numbers = #tpu.dot_dimension_numbers<[1], [0], [0], [1], [0, 0, 1, 1], [], []>} : vector<8x784xf32>, vector<784x128xf32>, vector<8x128xf32> -> vector<8x128xf32>
    %c0_3 = arith.constant 0 : index
    %c0_4 = arith.constant 0 : index
    %3 = vector.load %arg3[%c0_3, %c0_4] : memref<1x128xf32, #tpu.memory_space<vmem>>, vector<1x128xf32>
    %4 = vector.broadcast %3 : vector<1x128xf32> to vector<8x128xf32>
    %5 = arith.addf %2, %4 : vector<8x128xf32>
    %c0_5 = arith.constant 0 : index
    %c0_6 = arith.constant 0 : index
    %6 = vector.load %arg4[%c0_5, %c0_6] : memref<128x1664xf32, #tpu.memory_space<vmem>>, vector<128x1664xf32>
    %cst_7 = arith.constant dense<0.000000e+00> : vector<8x1664xf32>
    %7 = tpu.matmul %5, %6, %cst_7 {dimension_numbers = #tpu.dot_dimension_numbers<[1], [0], [0], [1], [0, 0, 1, 1], [], []>} : vector<8x128xf32>, vector<128x1664xf32>, vector<8x1664xf32> -> vector<8x1664xf32>
    %c0_8 = arith.constant 0 : index
    %c0_9 = arith.constant 0 : index
    %8 = vector.load %arg5[%c0_8, %c0_9] : memref<1x1664xf32, #tpu.memory_space<vmem>>, vector<1x1664xf32>
    %9 = vector.broadcast %8 : vector<1x1664xf32> to vector<8x1664xf32>
    %10 = arith.addf %7, %9 : vector<8x1664xf32>
    %cst_10 = arith.constant 0.000000e+00 : f32
    %11 = vector.broadcast %cst_10 : f32 to vector<8x1664xf32>
    %12 = arith.maximumf %10, %11 : vector<8x1664xf32>
    %c0_11 = arith.constant 0 : index
    %c0_12 = arith.constant 0 : index
    %13 = vector.load %arg6[%c0_11, %c0_12] : memref<1664x784xf32, #tpu.memory_space<vmem>>, vector<1664x784xf32>
    %cst_13 = arith.constant dense<0.000000e+00> : vector<8x784xf32>
    %14 = tpu.matmul %12, %13, %cst_13 {dimension_numbers = #tpu.dot_dimension_numbers<[1], [0], [0], [1], [0, 0, 1, 1], [], []>} : vector<8x1664xf32>, vector<1664x784xf32>, vector<8x784xf32> -> vector<8x784xf32>
    %c0_14 = arith.constant 0 : index
    %c0_15 = arith.constant 0 : index
    %15 = vector.load %arg7[%c0_14, %c0_15] : memref<1x784xf32, #tpu.memory_space<vmem>>, vector<1x784xf32>
    %16 = vector.broadcast %15 : vector<1x784xf32> to vector<8x784xf32>
    %17 = arith.addf %14, %16 : vector<8x784xf32>
    %c0_16 = arith.constant 0 : index
    %c0_17 = arith.constant 0 : index
    %18 = vector.load %arg8[%c0_16, %c0_17] : memref<8x784xf32, #tpu.memory_space<vmem>>, vector<8x784xf32>
    tpu.vector_store %arg8[%c0_16, %c0_17], %17 {strides = array<i32>} : memref<8x784xf32, #tpu.memory_space<vmem>>, vector<8x784xf32>,
    return
  }
  func.func @transform_0(%arg0: i32) -> (i32, i32) {
    %c0_i32 = arith.constant 0 : i32
    %c0_i32_0 = arith.constant 0 : i32
    return %arg0, %c0_i32 : i32, i32
  }
  func.func @transform_1(%arg0: i32) -> (i32, i32) {
    %c0_i32 = arith.constant 0 : i32
    %c0_i32_0 = arith.constant 0 : i32
    %c0_i32_1 = arith.constant 0 : i32
    return %c0_i32, %c0_i32_0 : i32, i32
  }
  func.func @transform_2(%arg0: i32) -> (i32, i32) {
    %c0_i32 = arith.constant 0 : i32
    %c0_i32_0 = arith.constant 0 : i32
    %c0_i32_1 = arith.constant 0 : i32
    return %c0_i32, %c0_i32_0 : i32, i32
  }
  func.func @transform_3(%arg0: i32) -> (i32, i32) {
    %c0_i32 = arith.constant 0 : i32
    %c0_i32_0 = arith.constant 0 : i32
    %c0_i32_1 = arith.constant 0 : i32
    return %c0_i32, %c0_i32_0 : i32, i32
  }
  func.func @transform_4(%arg0: i32) -> (i32, i32) {
    %c0_i32 = arith.constant 0 : i32
    %c0_i32_0 = arith.constant 0 : i32
    %c0_i32_1 = arith.constant 0 : i32
    return %c0_i32, %c0_i32_0 : i32, i32
  }
  func.func @transform_5(%arg0: i32) -> (i32, i32) {
    %c0_i32 = arith.constant 0 : i32
    %c0_i32_0 = arith.constant 0 : i32
    %c0_i32_1 = arith.constant 0 : i32
    return %c0_i32, %c0_i32_0 : i32, i32
  }
  func.func @transform_6(%arg0: i32) -> (i32, i32) {
    %c0_i32 = arith.constant 0 : i32
    %c0_i32_0 = arith.constant 0 : i32
    %c0_i32_1 = arith.constant 0 : i32
    return %c0_i32, %c0_i32_0 : i32, i32
  }
  func.func @transform_7(%arg0: i32) -> (i32, i32) {
    %c0_i32 = arith.constant 0 : i32
    %c0_i32_0 = arith.constant 0 : i32
    return %arg0, %c0_i32 : i32, i32
  }
}

</mosaic_0001>

<bundles_post_ra>
// kernel: _forward_factorized.1
= control target key start
LH: loop header
LB: loop body
LE: loop exit
PB: predicated region body
PF: predicated region fallthrough
CT: control target
= control target key end

     0   :  { %12 = vsyncpa [#allocation3], 0  ;;  %s7877_s0 = inlined_call_operand.hbm [shape: f32[2,784], index: 0, kind: input, shape index: {}]   ;;  %s7878_s1 = inlined_call_operand.hbm [shape: f32[784,128], index: 1, kind: input, shape index: {}]   ;;  %s7879_s2 = inlined_call_operand.hbm [shape: f32[1,128], index: 2, kind: input, shape index: {}]   ;;  %s7880_s3 = inlined_call_operand.hbm [shape: f32[128,1664], index: 3, kind: input, shape index: {}]   ;;  %s7881_s4 = inlined_call_operand.hbm [shape: f32[1,1664], index: 4, kind: input, shape index: {}]   ;;  %s7882_s5 = inlined_call_operand.hbm [shape: f32[1664,784], index: 5, kind: input, shape index: {}]   ;;  %s7883_s6 = inlined_call_operand.hbm [shape: f32[1,784], index: 6, kind: input, shape index: {}]   ;;  %s7884_s7 = inlined_call_operand.hbm [shape: f32[2,784], index: 7, kind: output, shape index: {}]  }
   0x1   :  { %13 = vsyncpa [#allocation6], 0 }
   0x2   :  { %14 = vsyncpa [#allocation9], 0 }
   0x3   :  { %15 = vsyncpa [#allocation12], 0 }
   0x4   :  { %16 = vsyncpa [#allocation4], 0 }
   0x5   :  { %21 = vsyncadd [#allocation3], 672  ;;  %s7449_s24 = smov [#allocation5]   ;;  %s7263_s28 = scalar_lea.hbm %s7878_s1, 12544 }
   0x6   :  { %s34_s25 = sshll.u32 %s7449_s24, 4  ;;  %p7264_p0 = scmp.ne.s32.totalorder %s7878_s1, %s7263_s28  ;;  %s35_s25 = int_to_ptr.vmem [resolvable:$true] %s34_s25 }
   0x7   :  { %p7267_p1 = scmp.lt.u32.totalorder %s7263_s28, %s7878_s1 }
   0x9   :  { %p7269_p2 = pnand %p7267_p1, %p7264_p0 }
   0xb   :  { %7272 = shalt.err (!%p7269_p2)
}
   0xc   :  { %s7273_s10 = scalar_lea.vmem %s35_s25, 12544  ;;  %p7278_p4 = scmp.lt.s32.totalorder %s35_s25, %s35_s25 }
   0xd   :  { %p7274_p3 = scmp.ne.s32.totalorder %s35_s25, %s7273_s10  ;;  %p7279_p5 = scmp.lt.s32.totalorder %s7273_s10, %s7273_s10 }
   0xf   :  { %p7280_p6 = por %p7279_p5, %p7278_p4 }
  0x11   :  { %p7281_p7 = pnand %p7280_p6, %p7274_p3 }
  0x13   :  { %7284 = shalt.err (!%p7281_p7)
}
  0x14   :  { %s7450_s11 = smov 128   ;;  %s7451_s12 = smov 8  }
  0x15   :  { %40 = dma.hbm_to_vmem [thread:$0]  %s7878_s1, 12544, %s35_s25, [#allocation6], %s7450_s11, %s7450_s11, %s7451_s12  }
  0x16   :  { %s7452_s15 = smov [#allocation8]   ;;  %s7285_s19 = scalar_lea.hbm %s7880_s3, 26624 }
  0x17   :  { %s56_s16 = sshll.u32 %s7452_s15, 4  ;;  %p7286_p8 = scmp.ne.s32.totalorder %s7880_s3, %s7285_s19  ;;  %s57_s16 = int_to_ptr.vmem [resolvable:$true] %s56_s16 }
  0x18   :  { %p7289_p9 = scmp.lt.u32.totalorder %s7285_s19, %s7880_s3 }
  0x1a   :  { %p7291_p10 = pnand %p7289_p9, %p7286_p8 }
  0x1c   :  { %7294 = shalt.err (!%p7291_p10)
}
  0x1d   :  { %s7295_s24 = scalar_lea.vmem %s57_s16, 26624  ;;  %p7300_p12 = scmp.lt.s32.totalorder %s57_s16, %s57_s16 }
  0x1e   :  { %p7296_p11 = scmp.ne.s32.totalorder %s57_s16, %s7295_s24  ;;  %p7301_p13 = scmp.lt.s32.totalorder %s7295_s24, %s7295_s24 }
  0x20   :  { %p7302_p0 = por %p7301_p13, %p7300_p12 }
  0x22   :  { %p7303_p1 = pnand %p7302_p0, %p7296_p11 }
  0x24   :  { %7306 = shalt.err (!%p7303_p1)
}
  0x25   :  { %s7453_s1 = smov 1664   ;;  %s7454_s25 = smov 104  }
  0x26   :  { %62 = dma.hbm_to_vmem [thread:$0]  %s7880_s3, 26624, %s57_s16, [#allocation9], %s7453_s1, %s7453_s1, %s7454_s25  }
  0x27   :  { %s7455_s28 = smov [#allocation11]   ;;  %s7307_s9 = scalar_lea.hbm %s7882_s5, 186368 }
  0x28   :  { %s78_s29 = sshll.u32 %s7455_s28, 4  ;;  %p7308_p2 = scmp.ne.s32.totalorder %s7882_s5, %s7307_s9  ;;  %s79_s29 = int_to_ptr.vmem [resolvable:$true] %s78_s29 }
  0x29   :  { %p7311_p3 = scmp.lt.u32.totalorder %s7307_s9, %s7882_s5 }
  0x2b   :  { %p7313_p4 = pnand %p7311_p3, %p7308_p2 }
  0x2d   :  { %7316 = shalt.err (!%p7313_p4)
}
  0x2e   :  { %s7317_s14 = scalar_lea.vmem %s79_s29, 186368  ;;  %p7322_p6 = scmp.lt.s32.totalorder %s79_s29, %s79_s29 }
  0x2f   :  { %p7318_p5 = scmp.ne.s32.totalorder %s79_s29, %s7317_s14  ;;  %p7323_p7 = scmp.lt.s32.totalorder %s7317_s14, %s7317_s14 }
  0x31   :  { %p7324_p8 = por %p7323_p7, %p7322_p6 }
  0x33   :  { %p7325_p9 = pnand %p7324_p8, %p7318_p5 }
  0x35   :  { %7328 = shalt.err (!%p7325_p9)
}
  0x36   :  { %s7456_s3 = smov 896   ;;  %s7457_s15 = smov 56  }
  0x37   :  { %84 = dma.hbm_to_vmem [thread:$0]  %s7882_s5, 186368, %s79_s29, [#allocation12], %s7456_s3, %s7456_s3, %s7457_s15  }
  0x38   :  { %s7458_s18 = smov [#allocation2]   ;;  %s7329_s22 = scalar_lea.hbm %s7877_s0, 224 }
  0x39   :  { %s22_s19 = sshll.u32 %s7458_s18, 4  ;;  %p7330_p10 = scmp.ne.s32.totalorder %s7877_s0, %s7329_s22  ;;  %s23_s19 = int_to_ptr.vmem [resolvable:$true] %s22_s19 }
  0x3a   :  { %p7333_p11 = scmp.lt.u32.totalorder %s7329_s22, %s7877_s0 }
  0x3c   :  { %p7335_p12 = pnand %p7333_p11, %p7330_p10 }
  0x3e   :  { %7338 = shalt.err (!%p7335_p12)
}
  0x3f   :  { %s7339_s26 = scalar_lea.vmem %s23_s19, 224  ;;  %s7343_s5 = scalar_lea.vmem %s23_s19, 896 }
  0x40   :  { %p7340_p13 = scmp.ne.s32.totalorder %s23_s19, %s7339_s26  ;;  %p7344_p0 = scmp.lt.s32.totalorder %s23_s19, %s23_s19 }
  0x41   :  { %p7345_p1 = scmp.lt.s32.totalorder %s7343_s5, %s7339_s26 }
  0x43   :  { %p7346_p2 = por %p7345_p1, %p7344_p0 }
  0x45   :  { %p7347_p3 = pnand %p7346_p2, %p7340_p13 }
  0x47   :  { %7350 = shalt.err (!%p7347_p3)
}
  0x48   :  { %s7459_s27 = smov 224   ;;  %s7460_s28 = smov 14  }
  0x49   :  { %28 = dma.hbm_to_vmem [thread:$0]  %s7877_s0, 224, %s23_s19, [#allocation3], %s7459_s27, %s7459_s27, %s7460_s28  }
  0x4a   :  { %s7461_s8 = smov [#allocation7]   ;;  %s7462_s10 = smov [#allocation10]  }
  0x4b   :  { %s47_s9 = sshll.u32 %s7461_s8, 4  ;;  %s69_s11 = sshll.u32 %s7462_s10, 4  ;;  %s48_s9 = int_to_ptr.vmem [resolvable:$true] %s47_s9  ;;  %s70_s11 = int_to_ptr.vmem [resolvable:$true] %s69_s11 }
  0x4c   :  { %s7351_s14 = scalar_lea.hbm %s7879_s2, 16 }
  0x4d   :  { %p7352_p4 = scmp.ne.s32.totalorder %s7879_s2, %s7351_s14  ;;  %p7355_p5 = scmp.lt.u32.totalorder %s7351_s14, %s7879_s2 }
  0x4f   :  { %p7357_p6 = pnand %p7355_p5, %p7352_p4 }
  0x51   :  { %7360 = shalt.err (!%p7357_p6)
}
  0x52   :  { %s7361_s0 = scalar_lea.vmem %s48_s9, 16  ;;  %s7365_s18 = scalar_lea.vmem %s48_s9, 32 }
  0x53   :  { %p7362_p7 = scmp.ne.s32.totalorder %s48_s9, %s7361_s0  ;;  %p7366_p8 = scmp.lt.s32.totalorder %s48_s9, %s48_s9 }
  0x54   :  { %p7367_p9 = scmp.lt.s32.totalorder %s7365_s18, %s7361_s0 }
  0x56   :  { %p7368_p10 = por %p7367_p9, %p7366_p8 }
  0x58   :  { %p7369_p11 = pnand %p7368_p10, %p7362_p7 }
  0x5a   :  { %7372 = shalt.err (!%p7369_p11)
}
  0x5b   :  { %50 = dma.hbm_to_vmem [thread:$0]  %s7879_s2, 16, %s48_s9, [#allocation6]  }
  0x5c   :  { %s7373_s23 = scalar_lea.hbm %s7881_s4, 208 }
  0x5d   :  { %p7374_p12 = scmp.ne.s32.totalorder %s7881_s4, %s7373_s23  ;;  %p7377_p13 = scmp.lt.u32.totalorder %s7373_s23, %s7881_s4 }
  0x5f   :  { %p7379_p0 = pnand %p7377_p13, %p7374_p12 }
  0x61   :  { %7382 = shalt.err (!%p7379_p0)
}
  0x62   :  { %s7383_s5 = scalar_lea.vmem %s70_s11, 208  ;;  %s7387_s29 = scalar_lea.vmem %s70_s11, 224 }
  0x63   :  { %p7384_p1 = scmp.ne.s32.totalorder %s70_s11, %s7383_s5  ;;  %p7388_p2 = scmp.lt.s32.totalorder %s70_s11, %s70_s11 }
  0x64   :  { %p7389_p3 = scmp.lt.s32.totalorder %s7387_s29, %s7383_s5 }
  0x66   :  { %p7390_p4 = por %p7389_p3, %p7388_p2 }
  0x68   :  { %p7391_p5 = pnand %p7390_p4, %p7384_p1 }
  0x6a   :  { %7394 = shalt.err (!%p7391_p5)
}
  0x6b   :  { %72 = dma.hbm_to_vmem [thread:$0]  %s7881_s4, 208, %s70_s11, [#allocation9]  }
  0x6c   :  { %s7463_s8 = smov [#allocation13]   ;;  %s7395_s13 = scalar_lea.hbm %s7883_s6, 112 }
  0x6d   :  { %s91_s9 = sshll.u32 %s7463_s8, 4  ;;  %p7396_p6 = scmp.ne.s32.totalorder %s7883_s6, %s7395_s13  ;;  %s92_s9 = int_to_ptr.vmem [resolvable:$true] %s91_s9 }
  0x6e   :  { %p7399_p7 = scmp.lt.u32.totalorder %s7395_s13, %s7883_s6 }
  0x70   :  { %p7401_p8 = pnand %p7399_p7, %p7396_p6 }
  0x72   :  { %7404 = shalt.err (!%p7401_p8)
}
  0x73   :  { %s7405_s17 = scalar_lea.vmem %s92_s9, 112  ;;  %s7409_s4 = scalar_lea.vmem %s92_s9, 128 }
  0x74   :  { %p7406_p9 = scmp.ne.s32.totalorder %s92_s9, %s7405_s17  ;;  %p7410_p10 = scmp.lt.s32.totalorder %s92_s9, %s92_s9 }
  0x75   :  { %p7411_p11 = scmp.lt.s32.totalorder %s7409_s4, %s7405_s17 }
  0x77   :  { %p7412_p12 = por %p7411_p11, %p7410_p10 }
  0x79   :  { %p7413_p13 = pnand %p7412_p12, %p7406_p9 }
  0x7b   :  { %7416 = shalt.err (!%p7413_p13)
}
  0x7c   :  { %94 = dma.hbm_to_vmem [thread:$0]  %s7883_s6, 112, %s92_s9, [#allocation12]  }
  0x7d   :  { %7439 = dma.done.wait [#allocation3], 896  }
  0x7e   :  { %7440 = vsyncadd [#allocation3], 4294966400 }
  0x7f   :  { %7441 = dma.done.wait [#allocation6], 12560  }
  0x80   :  { %7442 = vsyncadd [#allocation6], 4294954736 }
  0x81   :  { %7443 = dma.done.wait [#allocation9], 26832  }
  0x82   :  { %7444 = vsyncadd [#allocation9], 4294940464 }
  0x83   :  { %7445 = dma.done.wait [#allocation12], 186480  }
  0x84   :  { %7446 = vsyncadd [#allocation12], 4294780816  ;;  %v140_v0 = vld [vmem:[#allocation5 + $0x80] sm:$0xff]  ;;  %v141_v1 = vld [vmem:[#allocation5 + $0x88] sm:$0xff]  ;;  %v7464_v12 = vmov 1983009808   ;;  %v244_v14 = vlaneseq }
  0x85   :  { %v124_v2 = vld [vmem:[#allocation5] sm:$0xff]  ;;  %v5407_v3 = vpack.c.bf16 %v141_v1, %v140_v0  ;;  %v125_v4 = vld [vmem:[#allocation5 + $0x8] sm:$0xff]  ;;  %v142_v5 = vld [vmem:[#allocation5 + $0x90] sm:$0xff]  ;;  %v242_v13 = vunpack.c.l.s4 %v7464_v12  ;;  %vm7467_vm0 = vmmov 0   ;;  %vm314_vm1 = vcmask 130048  }
  0x86   :  { %v143_v6 = vld [vmem:[#allocation5 + $0x98] sm:$0xff]  ;;  %v5409_v7 = vpack.c.bf16 %v125_v4, %v124_v2  ;;  %v126_v9 = vld [vmem:[#allocation5 + $0x10] sm:$0xff]  ;;  %v144_v11 = vld [vmem:[#allocation5 + $0xa0] sm:$0xff]  ;;  %v7596_v23 = vshrl.u32 %v244_v14, 7  ;;  %vm4944_vm2 = vcmask 1041408   ;;  %vm4945_vm3 = vcmask 1043458  }
  0x87   :  { %v5411_v8 = vpack.c.bf16 %v143_v6, %v142_v5  ;;  %v127_v10 = vld [vmem:[#allocation5 + $0x18] sm:$0xff]  ;;  %5408 = vmatprep.subr.bf16.mxu1 %v5407_v3  ;;  %v145_v15 = vld [vmem:[#allocation5 + $0xa8] sm:$0xff]  ;;  %v128_v18 = vld [vmem:[#allocation5 + $0x20] sm:$0xff]  ;;  %v243_v22 = vunpack.c.0.s8 %v242_v13  ;;  %vm4947_vm5 = vcmask 128004  }
  0x88   :  { %5410 = vmatpush3.bf16.msra.mxu1 %v5409_v7  ;;  %v5413_v16 = vpack.c.bf16 %v127_v10, %v126_v9  ;;  %v5415_v17 = vpack.c.bf16 %v145_v15, %v144_v11  ;;  %v129_v19 = vld [vmem:[#allocation5 + $0x28] sm:$0xff]  ;;  %v146_v20 = vld [vmem:[#allocation5 + $0xb0] sm:$0xff]  ;;  %v147_v21 = vld [vmem:[#allocation5 + $0xb8] sm:$0xff] }
  0x89   :  { %5412 = vmatprep.subr.bf16.mxu1 %v5411_v8  ;;  %v5417_v24 = vpack.c.bf16 %v129_v19, %v128_v18  ;;  %v5419_v25 = vpack.c.bf16 %v147_v21, %v146_v20  ;;  %v130_v26 = vld [vmem:[#allocation5 + $0x30] sm:$0xff]  ;;  %v131_v27 = vld [vmem:[#allocation5 + $0x38] sm:$0xff]  ;;  %v148_v28 = vld [vmem:[#allocation5 + $0xc0] sm:$0xff]  ;;  %v7599_v30 = vsub.s32 %v243_v22, %v7596_v23 }
  0x8a   :  { %v149_v29 = vld [vmem:[#allocation5 + $0xc8] sm:$0xff]  ;;  %v5421_v31 = vpack.c.bf16 %v131_v27, %v130_v26  ;;  %v7251_v33 = vld [vmem:[#allocation2 + $0x1c] ss:$14 sps:$4 sm:$0xff]   ;;  %v151_v38 = vld [vmem:[#allocation5 + $0xd8] sm:$0xff] }
  0x8b   :  { %v7248_v32 = vld [vmem:[#allocation2] ss:$14 sps:$4 sm:$0xff]   ;;  %v5423_v34 = vpack.c.bf16 %v149_v29, %v148_v28  ;;  %v132_v35 = vld [vmem:[#allocation5 + $0x40] sm:$0xff]  ;;  %v7605_v40 = vrot.slane %v7251_v33, %v7599_v30  ;;  %v7250_v13 = vld [vmem:[#allocation2 + $0x4] ss:$14 sps:$4 sm:$0xff]  }
  0x8c   :  { %5414 = vmatpush3.bf16.msra.mxu1 %v5413_v16  ;;  %v133_v36 = vld [vmem:[#allocation5 + $0x48] sm:$0xff]  ;;  %v150_v37 = vld [vmem:[#allocation5 + $0xd0] sm:$0xff]  ;;  %v7602_v39 = vrot.slane %v7248_v32, %v7599_v30  ;;  %v204_v41 = vld [vmem:[#allocation5 + $0x280] sm:$0xff] }
  0x8d   :  { %5416 = vmatprep.subr.bf16.mxu1 %v5415_v17  ;;  %v205_v42 = vld [vmem:[#allocation5 + $0x288] sm:$0xff]  ;;  %v188_v43 = vld [vmem:[#allocation5 + $0x200] sm:$0xff]  ;;  %v5425_v45 = vpack.c.bf16 %v133_v36, %v132_v35  ;;  %v134_v46 = vld [vmem:[#allocation5 + $0x50] sm:$0xff]  ;;  %v5427_v51 = vpack.c.bf16 %v151_v38, %v150_v37  ;;  %v7610_v35 = vrot.slane %v7250_v13, %v7599_v30 }
  0x8e   :  { %v189_v44 = vld [vmem:[#allocation5 + $0x208] sm:$0xff]  ;;  %v135_v47 = vld [vmem:[#allocation5 + $0x58] sm:$0xff]  ;;  %v270_v48 = vcombine.high %v7602_v39, %v7605_v40  ;;  %v5471_v49 = vpack.c.bf16 %v205_v42, %v204_v41  ;;  %v152_v52 = vld [vmem:[#allocation5 + $0xe0] sm:$0xff]  ;;  %v269_v41 = vcombine.low %v7602_v39, %v7605_v40 }
  0x8f   :  { %v5473_v50 = vpack.c.bf16 %v189_v44, %v188_v43  ;;  %v206_v53 = vld [vmem:[#allocation5 + $0x290] sm:$0xff]  ;;  %v207_v54 = vld [vmem:[#allocation5 + $0x298] sm:$0xff]  ;;  %v153_v55 = vld [vmem:[#allocation5 + $0xe8] sm:$0xff]  ;;  %v5429_v60 = vpack.c.bf16 %v135_v47, %v134_v46 }
  0x90   :  { %5418 = vmatpush3.bf16.msra.mxu1 %v5417_v24  ;;  %381 = vmatprep.mubr.f32.mxu1 %v270_v48  ;;  %v5475_v56 = vpack.c.bf16 %v207_v54, %v206_v53  ;;  %v190_v57 = vld [vmem:[#allocation5 + $0x210] sm:$0xff]  ;;  %v191_v58 = vld [vmem:[#allocation5 + $0x218] sm:$0xff]  ;;  %v208_v61 = vld [vmem:[#allocation5 + $0x2a0] sm:$0xff]  ;;  %v5431_v0 = vpack.c.bf16 %v153_v55, %v152_v52 }
  0x91   :  { %5420 = vmatprep.subr.bf16.mxu1 %v5419_v25  ;;  %5472 = vmatprep.subr.bf16.mxu0 %v5471_v49  ;;  %v5477_v59 = vpack.c.bf16 %v191_v58, %v190_v57  ;;  %v209_v62 = vld [vmem:[#allocation5 + $0x2a8] sm:$0xff]  ;;  %v192_v63 = vld [vmem:[#allocation5 + $0x220] sm:$0xff]  ;;  %v154_v5 = vld [vmem:[#allocation5 + $0xf0] sm:$0xff] }
  0x92   :  { %5474 = vmatpush3.bf16.msra.mxu0 %v5473_v50  ;;  %v136_v1 = vld [vmem:[#allocation5 + $0x60] sm:$0xff]  ;;  %v137_v2 = vld [vmem:[#allocation5 + $0x68] sm:$0xff]  ;;  %v5479_v3 = vpack.c.bf16 %v209_v62, %v208_v61  ;;  %v155_v6 = vld [vmem:[#allocation5 + $0xf8] sm:$0xff] }
  0x93   :  { %5476 = vmatprep.subr.bf16.mxu0 %v5475_v56  ;;  %v193_v4 = vld [vmem:[#allocation5 + $0x228] sm:$0xff]  ;;  %v210_v7 = vld [vmem:[#allocation5 + $0x2b0] sm:$0xff]  ;;  %v139_v9 = vld [vmem:[#allocation5 + $0x78] sm:$0xff]  ;;  %v5433_v12 = vpack.c.bf16 %v137_v2, %v136_v1  ;;  %v5435_v17 = vpack.c.bf16 %v155_v6, %v154_v5 }
  0x94   :  { %5422 = vmatpush3.bf16.msra.mxu1 %v5421_v31  ;;  %v138_v8 = vld [vmem:[#allocation5 + $0x70] sm:$0xff]  ;;  %v5481_v10 = vpack.c.bf16 %v193_v4, %v192_v63  ;;  %v211_v11 = vld [vmem:[#allocation5 + $0x2b8] sm:$0xff]  ;;  %v212_v19 = vld [vmem:[#allocation5 + $0x2c0] sm:$0xff] }
  0x95   :  { %5424 = vmatprep.subr.bf16.mxu1 %v5423_v34  ;;  %v5483_v14 = vpack.c.bf16 %v211_v11, %v210_v7  ;;  %v194_v15 = vld [vmem:[#allocation5 + $0x230] sm:$0xff]  ;;  %v195_v16 = vld [vmem:[#allocation5 + $0x238] sm:$0xff]  ;;  %v213_v20 = vld [vmem:[#allocation5 + $0x2c8] sm:$0xff]  ;;  %v5437_v25 = vpack.c.bf16 %v139_v9, %v138_v8 }
  0x96   :  { %5478 = vmatpush3.bf16.msra.mxu0 %v5477_v59  ;;  %v7253_v18 = vld [vmem:[#allocation2 + $0x20] ss:$14 sps:$4 sm:$0xff]   ;;  %v172_v21 = vld [vmem:[#allocation5 + $0x180] sm:$0xff]  ;;  %v5485_v24 = vpack.c.bf16 %v195_v16, %v194_v15  ;;  %v5487_v27 = vpack.c.bf16 %v213_v20, %v212_v19  ;;  %vm4946_vm4 = vmor %vm4945_vm3, %vm4944_vm2 }
  0x97   :  { %5480 = vmatprep.subr.bf16.mxu0 %v5479_v3  ;;  %v173_v22 = vld [vmem:[#allocation5 + $0x188] sm:$0xff]  ;;  %v156_v26 = vld [vmem:[#allocation5 + $0x100] sm:$0xff]  ;;  %v214_v33 = vld [vmem:[#allocation5 + $0x2d0] sm:$0xff]  ;;  %v7613_v36 = vrot.slane %v7253_v18, %v7599_v30 }
  0x98   :  { %5426 = vmatpush3.bf16.msra.mxu1 %v5425_v45  ;;  %v196_v28 = vld [vmem:[#allocation5 + $0x240] sm:$0xff]  ;;  %v197_v29 = vld [vmem:[#allocation5 + $0x248] sm:$0xff]  ;;  %v5439_v31 = vpack.c.bf16 %v173_v22, %v172_v21  ;;  %v215_v34 = vld [vmem:[#allocation5 + $0x2d8] sm:$0xff] }
  0x99   :  { %5428 = vmatprep.subr.bf16.mxu1 %v5427_v51  ;;  %v157_v32 = vld [vmem:[#allocation5 + $0x108] sm:$0xff]  ;;  %v174_v37 = vld [vmem:[#allocation5 + $0x190] sm:$0xff]  ;;  %v175_v38 = vld [vmem:[#allocation5 + $0x198] sm:$0xff]  ;;  %v5489_v42 = vpack.c.bf16 %v197_v29, %v196_v28  ;;  %v5491_v45 = vpack.c.bf16 %v215_v34, %v214_v33  ;;  %v272_v52 = vcombine.high %v7610_v35, %v7613_v36 }
  0x9a   :  { %5482 = vmatpush3.bf16.msra.mxu0 %v5481_v10  ;;  %v5441_v43 = vpack.c.bf16 %v157_v32, %v156_v26  ;;  %v158_v44 = vld [vmem:[#allocation5 + $0x110] sm:$0xff]  ;;  %v199_v47 = vld [vmem:[#allocation5 + $0x258] sm:$0xff]  ;;  %v5443_v48 = vpack.c.bf16 %v175_v38, %v174_v37  ;;  %v216_v50 = vld [vmem:[#allocation5 + $0x2e0] sm:$0xff]  ;;  %v7465_v32 = vmov 0.0  }
  0x9b   :  { %5484 = vmatprep.subr.bf16.mxu0 %v5483_v14  ;;  %v198_v46 = vld [vmem:[#allocation5 + $0x250] sm:$0xff]  ;;  %v159_v49 = vld [vmem:[#allocation5 + $0x118] sm:$0xff]  ;;  %v217_v51 = vld [vmem:[#allocation5 + $0x2e8] sm:$0xff] }
  0x9c   :  { %5430 = vmatpush3.bf16.msra.mxu1 %v5429_v60  ;;  %v176_v53 = vld [vmem:[#allocation5 + $0x1a0] sm:$0xff]  ;;  %v177_v54 = vld [vmem:[#allocation5 + $0x1a8] sm:$0xff]  ;;  %v5493_v55 = vpack.c.bf16 %v199_v47, %v198_v46  ;;  %v5445_v56 = vpack.c.bf16 %v159_v49, %v158_v44  ;;  %v5495_v57 = vpack.c.bf16 %v217_v51, %v216_v50  ;;  %v218_v62 = vld [vmem:[#allocation5 + $0x2f0] sm:$0xff] }
  0x9d   :  { %5432 = vmatprep.subr.bf16.mxu1 %v5431_v0  ;;  %v160_v39 = vld [vmem:[#allocation5 + $0x120] sm:$0xff]  ;;  %v161_v40 = vld [vmem:[#allocation5 + $0x128] sm:$0xff]  ;;  %v5447_v61 = vpack.c.bf16 %v177_v54, %v176_v53  ;;  %v219_v63 = vld [vmem:[#allocation5 + $0x2f8] sm:$0xff] }
  0x9e   :  { %5486 = vmatpush3.bf16.msra.mxu0 %v5485_v24  ;;  %v200_v58 = vld [vmem:[#allocation5 + $0x260] sm:$0xff]  ;;  %v201_v59 = vld [vmem:[#allocation5 + $0x268] sm:$0xff]  ;;  %v178_v1 = vld [vmem:[#allocation5 + $0x1b0] sm:$0xff]  ;;  %v5449_v6 = vpack.c.bf16 %v161_v40, %v160_v39  ;;  %v5499_v7 = vpack.c.bf16 %v219_v63, %v218_v62  ;;  %v7466_v40 = vmov 0.0|0.0  }
  0x9f   :  { %5488 = vmatprep.subr.bf16.mxu0 %v5487_v27  ;;  %v7254_v60 = vld [vmem:[#allocation2 + $0x8] ss:$14 sps:$4 sm:$0xff]   ;;  %v7257_v0 = vld [vmem:[#allocation2 + $0x24] ss:$14 sps:$4 sm:$0xff]   ;;  %v5497_v4 = vpack.c.bf16 %v201_v59, %v200_v58  ;;  %v599_v63 = vld [vmem:[#allocation8 + $0x10] sm:$0xff] }
  0xa0   :  { %5434 = vmatpush3.bf16.msra.mxu1 %v5433_v12  ;;  %v179_v2 = vld [vmem:[#allocation5 + $0x1b8] sm:$0xff]  ;;  %v283_v3 = vrot.slane %v7254_v60, %v7599_v30  ;;  %v297_v5 = vrot.slane %v7257_v0, %v7599_v30  ;;  %v202_v8 = vld [vmem:[#allocation5 + $0x270] sm:$0xff]  ;;  %v180_v14 = vld [vmem:[#allocation5 + $0x1c0] sm:$0xff] }
  0xa1   :  { %5436 = vmatprep.subr.bf16.mxu1 %v5435_v17  ;;  %v203_v9 = vld [vmem:[#allocation5 + $0x278] sm:$0xff]  ;;  %v5451_v10 = vpack.c.bf16 %v179_v2, %v178_v1  ;;  %v162_v11 = vld [vmem:[#allocation5 + $0x130] sm:$0xff]  ;;  %v181_v15 = vld [vmem:[#allocation5 + $0x1c8] sm:$0xff] }
  0xa2   :  { %5490 = vmatpush3.bf16.msra.mxu0 %v5489_v42  ;;  %v163_v12 = vld [vmem:[#allocation5 + $0x138] sm:$0xff]  ;;  %v306_v13 = vcombine.high %v283_v3, %v297_v5  ;;  %v5501_v16 = vpack.c.bf16 %v203_v9, %v202_v8  ;;  %v5455_v18 = vpack.c.bf16 %v181_v15, %v180_v14  ;;  %v164_v19 = vld [vmem:[#allocation5 + $0x140] sm:$0xff]  ;;  %v165_v20 = vld [vmem:[#allocation5 + $0x148] sm:$0xff]  ;;  %v305_v24 = vcombine.low %v283_v3, %v297_v5 }
  0xa3   :  { %5492 = vmatprep.subr.bf16.mxu0 %v5491_v45  ;;  %v5453_v17 = vpack.c.bf16 %v163_v12, %v162_v11  ;;  %v182_v21 = vld [vmem:[#allocation5 + $0x1d0] sm:$0xff]  ;;  %v183_v22 = vld [vmem:[#allocation5 + $0x1d8] sm:$0xff]  ;;  %v184_v29 = vld [vmem:[#allocation5 + $0x1e0] sm:$0xff] }
  0xa4   :  { %5438 = vmatpush3.bf16.msra.mxu1 %v5437_v25  ;;  %521 = vmatprep.mubr.f32.mxu0 %v306_v13  ;;  %v5457_v25 = vpack.c.bf16 %v165_v20, %v164_v19  ;;  %v5459_v26 = vpack.c.bf16 %v183_v22, %v182_v21  ;;  %v166_v27 = vld [vmem:[#allocation5 + $0x150] sm:$0xff]  ;;  %v167_v28 = vld [vmem:[#allocation5 + $0x158] sm:$0xff]  ;;  %v168_v37 = vld [vmem:[#allocation5 + $0x160] sm:$0xff] }
  0xa5   :  { %5440 = vmatprep.subr.bf16.mxu1 %v5439_v31  ;;  %v185_v31 = vld [vmem:[#allocation5 + $0x1e8] sm:$0xff]  ;;  %v5461_v33 = vpack.c.bf16 %v167_v28, %v166_v27  ;;  %v187_v42 = vld [vmem:[#allocation5 + $0x1f8] sm:$0xff]  ;;  %v170_v45 = vld [vmem:[#allocation5 + $0x170] sm:$0xff] }
  0xa6   :  { %5494 = vmatpush3.bf16.msra.mxu0 %v5493_v55  ;;  %v5463_v34 = vpack.c.bf16 %v185_v31, %v184_v29  ;;  %v169_v38 = vld [vmem:[#allocation5 + $0x168] sm:$0xff]  ;;  %v171_v46 = vld [vmem:[#allocation5 + $0x178] sm:$0xff]  ;;  %v7256_v47 = vld [vmem:[#allocation2 + $0xc] ss:$14 sps:$4 sm:$0x33]  }
  0xa7   :  { %382 = vmatmul.mubr.f32.vlgmr.msra.gmra.mrb[0].mxu1 %v269_v41  ;;  %5496 = vmatprep.subr.bf16.mxu0 %v5495_v57  ;;  %v186_v41 = vld [vmem:[#allocation5 + $0x1f0] sm:$0xff]  ;;  %v5469_v49 = vpack.c.bf16 %v171_v46, %v170_v45  ;;  %v220_v50 = vld [vmem:[#allocation5 + $0x300] sm:$0xff]  ;;  %v221_v51 = vld [vmem:[#allocation5 + $0x308] sm:$0xff]  ;;  %v290_v53 = vrot.slane %v7256_v47, %v7599_v30 }
  0xa8   :  { %5442 = vmatpush3.bf16.msra.mxu1 %v5441_v43  ;;  %451 = vmatprep.mubr.f32.mxu1 %v272_v52  ;;  %v5465_v43 = vpack.c.bf16 %v169_v38, %v168_v37  ;;  %v5467_v44 = vpack.c.bf16 %v187_v42, %v186_v41  ;;  %v271_v52 = vcombine.low %v7610_v35, %v7613_v36  ;;  %v598_v35 = vld [vmem:[#allocation8 + $0x8] sm:$0xff]  ;;  %v611_v36 = vld [vmem:[#allocation8 + $0x70] sm:$0xff]  ;;  %v613_v58 = vld [vmem:[#allocation8 + $0x80] sm:$0xff] }
  0xa9   :  { %5444 = vmatprep.subr.bf16.mxu1 %v5443_v48  ;;  %v7259_v48 = vld [vmem:[#allocation2 + $0x28] ss:$14 sps:$4 sm:$0x33]   ;;  %v5504_v39 = vpack.c.bf16 %v221_v51, %v220_v50  ;;  %v5506_v57 = vpack.c.bf16 %v611_v36, %v598_v35  ;;  %v597_v59 = vld [vmem:[#allocation8] sm:$0xff]  ;;  %v639_v5 = vld [vmem:[#allocation8 + $0x150] sm:$0xff] }
  0xaa   :  { %5498 = vmatpush3.bf16.msra.mxu0 %v5497_v4  ;;  %v304_v54 = vrot.slane %v7259_v48, %v7599_v30  ;;  %v610_v60 = vld [vmem:[#allocation8 + $0x68] sm:$0xff]  ;;  %v612_v0 = vld [vmem:[#allocation8 + $0x78] sm:$0xff]  ;;  %v637_v3 = vld [vmem:[#allocation8 + $0x140] sm:$0xff] }
  0xab   :  { %5500 = vmatprep.subr.bf16.mxu0 %v5499_v7  ;;  %v5508_v62 = vpack.c.bf16 %v610_v60, %v597_v59  ;;  %v624_v1 = vld [vmem:[#allocation8 + $0xd8] sm:$0xff]  ;;  %v5540_v2 = vpack.c.bf16 %v612_v0, %v599_v63  ;;  %v626_v4 = vld [vmem:[#allocation8 + $0xe8] sm:$0xff]  ;;  %v623_v8 = vld [vmem:[#allocation8 + $0xd0] sm:$0xff] }
  0xac   :  { %5446 = vmatpush3.bf16.msra.mxu1 %v5445_v56  ;;  %v307_v55 = vcombine.low %v290_v53, %v304_v54  ;;  %v600_v56 = vld [vmem:[#allocation8 + $0x18] sm:$0xff]  ;;  %v5542_v7 = vpack.c.bf16 %v639_v5, %v626_v4  ;;  %v638_v12 = vld [vmem:[#allocation8 + $0x148] sm:$0xff]  ;;  %v663_v14 = vld [vmem:[#allocation8 + $0x210] sm:$0xff] }
  0xad   :  { %5448 = vmatprep.subr.bf16.mxu1 %v5447_v61  ;;  %v5538_v61 = vpack.c.bf16 %v613_v58, %v600_v56  ;;  %v636_v9 = vld [vmem:[#allocation8 + $0x138] sm:$0xff]  ;;  %v650_v13 = vld [vmem:[#allocation8 + $0x1a8] sm:$0xff]  ;;  %v649_v19 = vld [vmem:[#allocation8 + $0x1a0] sm:$0xff] }
  0xae   :  { %5502 = vmatpush3.bf16.msra.mxu0 %v5501_v16  ;;  %v5512_v11 = vpack.c.bf16 %v636_v9, %v623_v8  ;;  %v5514_v16 = vpack.c.bf16 %v663_v14, %v650_v13  ;;  %v662_v21 = vld [vmem:[#allocation8 + $0x208] sm:$0xff]  ;;  %v651_v22 = vld [vmem:[#allocation8 + $0x1b0] sm:$0xff]  ;;  %v689_v27 = vld [vmem:[#allocation8 + $0x2e0] sm:$0xff] }
  0xaf   :  { %5539 = vmatprep.subr.bf16.mxu0 %v5538_v61  ;;  %v678_v28 = vld [vmem:[#allocation8 + $0x288] sm:$0xff]  ;;  %v688_v37 = vld [vmem:[#allocation8 + $0x2d8] sm:$0xff]  ;;  %v677_v41 = vld [vmem:[#allocation8 + $0x280] sm:$0xff] }
  0xb0   :  { %5450 = vmatpush3.bf16.msra.mxu1 %v5449_v6  ;;  %v5510_v6 = vpack.c.bf16 %v637_v3, %v624_v1  ;;  %v690_v42 = vld [vmem:[#allocation8 + $0x2e8] sm:$0xff]  ;;  %v704_v45 = vld [vmem:[#allocation8 + $0x358] sm:$0xff]  ;;  %v717_v46 = vld [vmem:[#allocation8 + $0x3c0] sm:$0xff] }
  0xb1   :  { %5452 = vmatprep.subr.bf16.mxu1 %v5451_v10  ;;  %522 = vmatmul.mubr.f32.vlgmr.msra.gmra.mrb[0].mxu0 %v305_v24  ;;  %v625_v10 = vld [vmem:[#allocation8 + $0xe0] sm:$0xff]  ;;  %v664_v24 = vld [vmem:[#allocation8 + $0x218] sm:$0xff]  ;;  %v5552_v48 = vpack.c.bf16 %v690_v42, %v677_v41  ;;  %v714_v51 = vld [vmem:[#allocation8 + $0x3a8] sm:$0xff]  ;;  %v5554_v53 = vpack.c.bf16 %v717_v46, %v704_v45 }
  0xb2   :  { %1009 = vmatprep.mubr.f32.mxu0 %v7465_v32  ;;  %5541 = vmatpush1.bf16.msra.mxu0 %v5540_v2  ;;  %v5544_v15 = vpack.c.bf16 %v638_v12, %v625_v10  ;;  %v5548_v29 = vpack.c.bf16 %v664_v24, %v651_v22  ;;  %v701_v50 = vld [vmem:[#allocation8 + $0x340] sm:$0xff]  ;;  %v716_v54 = vld [vmem:[#allocation8 + $0x3b8] sm:$0xff]  ;;  %v730_v35 = vld [vmem:[#allocation8 + $0x428] sm:$0xff] }
  0xb3   :  { %5543 = vmatprep.subr.bf16.mxu0 %v5542_v7  ;;  %v743_v36 = vld [vmem:[#allocation8 + $0x490] sm:$0xff]  ;;  %v5524_v56 = vpack.c.bf16 %v714_v51, %v701_v50  ;;  %v740_v60 = vld [vmem:[#allocation8 + $0x478] sm:$0xff]  ;;  %v742_v63 = vld [vmem:[#allocation8 + $0x488] sm:$0xff] }
  0xb4   :  { %5454 = vmatpush3.bf16.msra.mxu1 %v5453_v17  ;;  %v652_v17 = vld [vmem:[#allocation8 + $0x1b8] sm:$0xff]  ;;  %v727_v59 = vld [vmem:[#allocation8 + $0x410] sm:$0xff]  ;;  %v5558_v61 = vpack.c.bf16 %v743_v36, %v730_v35  ;;  %v754_v2 = vld [vmem:[#allocation8 + $0x4e8] sm:$0xff] }
  0xb5   :  { %5456 = vmatprep.subr.bf16.mxu1 %v5455_v18  ;;  %v665_v18 = vld [vmem:[#allocation8 + $0x220] sm:$0xff]  ;;  %v5528_v0 = vpack.c.bf16 %v740_v60, %v727_v59  ;;  %v767_v3 = vld [vmem:[#allocation8 + $0x550] sm:$0xff]  ;;  %v756_v4 = vld [vmem:[#allocation8 + $0x4f8] sm:$0xff] }
  0xb6   :  { %v5546_v20 = vpack.c.bf16 %v665_v18, %v652_v17  ;;  %5545 = vmatpush1.bf16.msra.mxu0 %v5544_v15  ;;  %v5530_v5 = vpack.c.bf16 %v767_v3, %v754_v2  ;;  %v753_v7 = vld [vmem:[#allocation8 + $0x4e0] sm:$0xff]  ;;  %v766_v8 = vld [vmem:[#allocation8 + $0x548] sm:$0xff]  ;;  %v768_v12 = vld [vmem:[#allocation8 + $0x558] sm:$0xff] }
  0xb7   :  { %v5532_v10 = vpack.c.bf16 %v766_v8, %v753_v7  ;;  %v780_v14 = vld [vmem:[#allocation8 + $0x5b8] sm:$0xff]  ;;  %v793_v15 = vld [vmem:[#allocation8 + $0x620] sm:$0xff]  ;;  %v795_v18 = vld [vmem:[#allocation8 + $0x630] sm:$0xff] }
  0xb8   :  { %5458 = vmatpush3.bf16.msra.mxu1 %v5457_v25  ;;  %v5516_v25 = vpack.c.bf16 %v662_v21, %v649_v19  ;;  %5547 = vmatprep.subr.bf16.mxu0 %v5546_v20  ;;  %v5534_v17 = vpack.c.bf16 %v793_v15, %v780_v14  ;;  %v779_v19 = vld [vmem:[#allocation8 + $0x5b0] sm:$0xff]  ;;  %v792_v20 = vld [vmem:[#allocation8 + $0x618] sm:$0xff]  ;;  %v781_v24 = vld [vmem:[#allocation8 + $0x5c0] sm:$0xff] }
  0xb9   :  { %5460 = vmatprep.subr.bf16.mxu1 %v5459_v26  ;;  %v676_v26 = vld [vmem:[#allocation8 + $0x278] sm:$0xff]  ;;  %v5536_v22 = vpack.c.bf16 %v792_v20, %v779_v19  ;;  %v601_v50 = vld [vmem:[#allocation8 + $0x20] sm:$0xff]  ;;  %v614_v51 = vld [vmem:[#allocation8 + $0x88] sm:$0xff] }
  0xba   :  { %v5518_v31 = vpack.c.bf16 %v689_v27, %v676_v26  ;;  %5549 = vmatpush1.bf16.msra.mxu0 %v5548_v29  ;;  %v602_v27 = vld [vmem:[#allocation8 + $0x28] sm:$0xff]  ;;  %v604_v29 = vld [vmem:[#allocation8 + $0x38] sm:$0xff]  ;;  %v641_v36 = vld [vmem:[#allocation8 + $0x160] sm:$0xff]  ;;  %v5572_v59 = vpack.c.bf16 %v614_v51, %v601_v50 }
  0xbb   :  { %v4976_v45 = vld [vmem:[#allocation7] ss:$0 sm:$0xff]  ;;  %v629_v2 = vld [vmem:[#allocation8 + $0x100] sm:$0xff]  ;;  %v642_v3 = vld [vmem:[#allocation8 + $0x168] sm:$0xff] }
  0xbc   :  { %5462 = vmatpush3.bf16.msra.mxu1 %v5461_v33  ;;  %v691_v33 = vld [vmem:[#allocation8 + $0x2f0] sm:$0xff]  ;;  %v669_v7 = vld [vmem:[#allocation8 + $0x240] sm:$0xff]  ;;  %v668_v15 = vld [vmem:[#allocation8 + $0x238] sm:$0xff] }
  0xbd   :  { %5464 = vmatprep.subr.bf16.mxu1 %v5463_v34  ;;  %v675_v34 = vld [vmem:[#allocation8 + $0x270] sm:$0xff]  ;;  %v5550_v38 = vpack.c.bf16 %v691_v33, %v678_v28  ;;  %v617_v33 = vld [vmem:[#allocation8 + $0xa0] sm:$0xff]  ;;  %vm4948_vm6 = vmor %vm4947_vm5, %vm4946_vm4 }
  0xbe   :  { %v5520_v47 = vpack.c.bf16 %v688_v37, %v675_v34  ;;  %v615_v28 = vld [vmem:[#allocation8 + $0x90] sm:$0xff]  ;;  %v5602_v34 = vpack.c.bf16 %v617_v33, %v604_v29  ;;  %v706_v29 = vld [vmem:[#allocation8 + $0x368] sm:$0xff]  ;;  %v708_v33 = vld [vmem:[#allocation8 + $0x378] sm:$0xff] }
  0xbf   :  { %5551 = vmatprep.subr.bf16.mxu0 %v5550_v38  ;;  %v655_v14 = vld [vmem:[#allocation8 + $0x1d0] sm:$0xff] }
  0xc0   :  { %5466 = vmatpush3.bf16.msra.mxu1 %v5465_v43  ;;  %v702_v43 = vld [vmem:[#allocation8 + $0x348] sm:$0xff]  ;;  %5553 = vmatpush1.bf16.msra.mxu0 %v5552_v48  ;;  %v695_v19 = vld [vmem:[#allocation8 + $0x310] sm:$0xff] }
  0xc1   :  { %5468 = vmatprep.subr.bf16.mxu1 %v5467_v44  ;;  %v715_v44 = vld [vmem:[#allocation8 + $0x3b0] sm:$0xff]  ;;  %5555 = vmatprep.subr.bf16.mxu0 %v5554_v53 }
  0xc2   :  { %v747_v50 = vld [vmem:[#allocation8 + $0x4b0] sm:$0xff] }
  0xc4   :  { %5470 = vmatpush3.bf16.msra.mxu1 %v5469_v49  ;;  %v5522_v49 = vpack.c.bf16 %v715_v44, %v702_v43 }
  0xc5   :  { %5503 = vmatprep.subr.bf16.mxu1 %v7466_v40 }
  0xc7   :  { %452 = vmatmul.mubr.f32.vlgmr.msra.gmra.mrb[2].mxu1 %v271_v52  ;;  %v703_v52 = vld [vmem:[#allocation8 + $0x350] sm:$0xff] }
  0xc8   :  { %5505 = vmatpush3.bf16.msra.mxu1 %v5504_v39  ;;  %5334 = vmatprep.mubr.msk.f32.mxu1 %vm7467_vm0, %v7465_v32  ;;  %v728_v39 = vld [vmem:[#allocation8 + $0x418] sm:$0xff] }
  0xc9   :  { %5507 = vmatprep.subr.bf16.mxu1 %v5506_v57  ;;  %v5556_v57 = vpack.c.bf16 %v716_v54, %v703_v52  ;;  %v603_v54 = vld [vmem:[#allocation8 + $0x30] sm:$0xff] }
  0xcb   :  { %5335 = vmatmul.mubr.msk.f32.vlgmr.msra.gmra.mrb[4].mxu1 %vm314_vm1, %v307_v55  ;;  %v741_v55 = vld [vmem:[#allocation8 + $0x480] sm:$0xff]  ;;  %5557 = vmatpush1.bf16.msra.mxu0 %v5556_v57  ;;  %v643_v57 = vld [vmem:[#allocation8 + $0x170] sm:$0xff] }
  0xcc   :  { %938 = vmatprep.mubr.f32.mxu1 %v7465_v32  ;;  %5509 = vmatpush1.bf16.msra.mxu1 %v5508_v62  ;;  %v5526_v58 = vpack.c.bf16 %v741_v55, %v728_v39  ;;  %v729_v62 = vld [vmem:[#allocation8 + $0x420] sm:$0xff]  ;;  %v616_v39 = vld [vmem:[#allocation8 + $0x98] sm:$0xff] }
  0xcd   :  { %5511 = vmatprep.subr.bf16.mxu1 %v5510_v6  ;;  %v5560_v1 = vpack.c.bf16 %v742_v63, %v729_v62  ;;  %5559 = vmatprep.subr.bf16.mxu0 %v5558_v61  ;;  %v769_v6 = vld [vmem:[#allocation8 + $0x560] sm:$0xff]  ;;  %v628_v55 = vld [vmem:[#allocation8 + $0xf8] sm:$0xff]  ;;  %v5604_v60 = vpack.c.bf16 %v616_v39, %v603_v54  ;;  %v627_v61 = vld [vmem:[#allocation8 + $0xf0] sm:$0xff] }
  0xce   :  { %v5562_v9 = vpack.c.bf16 %v769_v6, %v756_v4  ;;  %v640_v62 = vld [vmem:[#allocation8 + $0x158] sm:$0xff]  ;;  %v654_v4 = vld [vmem:[#allocation8 + $0x1c8] sm:$0xff] }
  0xcf   :  { %5561 = vmatpush1.bf16.msra.mxu0 %v5560_v1  ;;  %v656_v6 = vld [vmem:[#allocation8 + $0x1d8] sm:$0xff]  ;;  %v5576_v8 = vpack.c.bf16 %v640_v62, %v627_v61  ;;  %v757_v62 = vld [vmem:[#allocation8 + $0x500] sm:$0xff] }
  0xd0   :  { %5513 = vmatpush1.bf16.msra.mxu1 %v5512_v11  ;;  %v755_v11 = vld [vmem:[#allocation8 + $0x4f0] sm:$0xff]  ;;  %5563 = vmatprep.subr.bf16.mxu0 %v5562_v9  ;;  %v5608_v9 = vpack.c.bf16 %v642_v3, %v629_v2  ;;  %v744_v54 = vld [vmem:[#allocation8 + $0x498] sm:$0xff] }
  0xd1   :  { %5515 = vmatprep.subr.bf16.mxu1 %v5514_v16  ;;  %v5564_v13 = vpack.c.bf16 %v768_v12, %v755_v11  ;;  %v782_v16 = vld [vmem:[#allocation8 + $0x5c8] sm:$0xff]  ;;  %v759_v3 = vld [vmem:[#allocation8 + $0x510] sm:$0xff] }
  0xd2   :  { %v5566_v21 = vpack.c.bf16 %v795_v18, %v782_v16  ;;  %v666_v11 = vld [vmem:[#allocation8 + $0x228] sm:$0xff]  ;;  %v680_v16 = vld [vmem:[#allocation8 + $0x298] sm:$0xff] }
  0xd3   :  { %5565 = vmatpush1.bf16.msra.mxu0 %v5564_v13  ;;  %v5610_v13 = vpack.c.bf16 %v669_v7, %v656_v6  ;;  %v682_v18 = vld [vmem:[#allocation8 + $0x2a8] sm:$0xff]  ;;  %v797_v6 = vld [vmem:[#allocation8 + $0x640] sm:$0xff] }
  0xd4   :  { %5517 = vmatpush1.bf16.msra.mxu1 %v5516_v25  ;;  %v794_v25 = vld [vmem:[#allocation8 + $0x628] sm:$0xff]  ;;  %5567 = vmatprep.subr.bf16.mxu0 %v5566_v21  ;;  %v5612_v21 = vpack.c.bf16 %v668_v15, %v655_v14  ;;  %v785_v15 = vld [vmem:[#allocation8 + $0x5e0] sm:$0xff] }
  0xd5   :  { %5519 = vmatprep.subr.bf16.mxu1 %v5518_v31  ;;  %v5568_v26 = vpack.c.bf16 %v794_v25, %v781_v24  ;;  %v5570_v31 = vpack.c.bf16 %v615_v28, %v602_v27  ;;  %v692_v24 = vld [vmem:[#allocation8 + $0x2f8] sm:$0xff]  ;;  %v681_v27 = vld [vmem:[#allocation8 + $0x2a0] sm:$0xff]  ;;  %v694_v28 = vld [vmem:[#allocation8 + $0x308] sm:$0xff] }
  0xd6   :  { %v786_v7 = vld [vmem:[#allocation8 + $0x5e8] sm:$0xff] }
  0xd7   :  { %5569 = vmatpush1.bf16.msra.mxu0 %v5568_v26  ;;  %v5614_v26 = vpack.c.bf16 %v695_v19, %v682_v18  ;;  %v619_v18 = vld [vmem:[#allocation8 + $0xb0] sm:$0xff]  ;;  %v608_v19 = vld [vmem:[#allocation8 + $0x58] sm:$0xff] }
  0xd8   :  { %5521 = vmatpush1.bf16.msra.mxu1 %v5520_v47  ;;  %5603 = vmatprep.subr.bf16.mxu0 %v5602_v34  ;;  %v721_v34 = vld [vmem:[#allocation8 + $0x3e0] sm:$0xff] }
  0xd9   :  { %5523 = vmatprep.subr.bf16.mxu1 %v5522_v49 }
  0xdc   :  { %5525 = vmatpush1.bf16.msra.mxu1 %v5524_v56  ;;  %v630_v56 = vld [vmem:[#allocation8 + $0x108] sm:$0xff] }
  0xdd   :  { %5527 = vmatprep.subr.bf16.mxu1 %v5526_v58  ;;  %v5606_v1 = vpack.c.bf16 %v643_v57, %v630_v56  ;;  %v758_v56 = vld [vmem:[#allocation8 + $0x508] sm:$0xff]  ;;  %v771_v57 = vld [vmem:[#allocation8 + $0x570] sm:$0xff] }
  0xe0   :  { %5529 = vmatpush1.bf16.msra.mxu1 %v5528_v0  ;;  %v5574_v0 = vpack.c.bf16 %v641_v36, %v628_v55  ;;  %v746_v36 = vld [vmem:[#allocation8 + $0x4a8] sm:$0xff] }
  0xe1   :  { %5531 = vmatprep.subr.bf16.mxu1 %v5530_v5  ;;  %v667_v5 = vld [vmem:[#allocation8 + $0x230] sm:$0xff] }
  0xe2   :  { %v5578_v12 = vpack.c.bf16 %v667_v5, %v654_v4  ;;  %v772_v4 = vld [vmem:[#allocation8 + $0x578] sm:$0xff] }
  0xe3   :  { %v784_v5 = vld [vmem:[#allocation8 + $0x5d8] sm:$0xff] }
  0xe4   :  { %5533 = vmatpush1.bf16.msra.mxu1 %v5532_v10  ;;  %v653_v10 = vld [vmem:[#allocation8 + $0x1c0] sm:$0xff] }
  0xe5   :  { %5535 = vmatprep.subr.bf16.mxu1 %v5534_v17  ;;  %v693_v17 = vld [vmem:[#allocation8 + $0x300] sm:$0xff]  ;;  %v5580_v20 = vpack.c.bf16 %v666_v11, %v653_v10  ;;  %v5628_v10 = vpack.c.bf16 %v772_v4, %v759_v3  ;;  %v783_v11 = vld [vmem:[#allocation8 + $0x5d0] sm:$0xff] }
  0xe6   :  { %v5582_v25 = vpack.c.bf16 %v693_v17, %v680_v16  ;;  %v798_v16 = vld [vmem:[#allocation8 + $0x648] sm:$0xff]  ;;  %v685_v4 = vld [vmem:[#allocation8 + $0x2c0] sm:$0xff] }
  0xe7   :  { %v606_v17 = vld [vmem:[#allocation8 + $0x48] sm:$0xff] }
  0xe8   :  { %5537 = vmatpush1.bf16.msra.mxu1 %v5536_v22  ;;  %v679_v22 = vld [vmem:[#allocation8 + $0x290] sm:$0xff] }
  0xe9   :  { %5571 = vmatprep.subr.bf16.mxu1 %v5570_v31  ;;  %v719_v31 = vld [vmem:[#allocation8 + $0x3d0] sm:$0xff] }
 0x17a   :  { %v5010_v37 = vpop.f32.mrb[0].mxu1 }
 0x17b   :  { %v5011_v38 = vpop.f32.mrb[1].mxu1 }
 0x17c   :  { %v5012_v41 = vadd.f32 %v5011_v38, %v5010_v37  ;;  %v5584_v37 = vpack.c.bf16 %v692_v24, %v679_v22  ;;  %v5616_v38 = vpack.c.bf16 %v694_v28, %v681_v27  ;;  %v5632_v22 = vpack.c.bf16 %v798_v16, %v785_v15  ;;  %v605_v24 = vld [vmem:[#allocation8 + $0x40] sm:$0xff]  ;;  %v607_v28 = vld [vmem:[#allocation8 + $0x50] sm:$0xff] }
 0x17d   :  { %v711_v16 = vld [vmem:[#allocation8 + $0x390] sm:$0xff] }
 0x17e   :  { %v384_v48 = vadd.f32 %v5012_v41, %v4976_v45  ;;  %v705_v41 = vld [vmem:[#allocation8 + $0x360] sm:$0xff]  ;;  %v707_v45 = vld [vmem:[#allocation8 + $0x370] sm:$0xff] }
 0x184   :  { %v5080_v42 = vpop.f32.mrb[0].mxu0 }
 0x185   :  { %v5081_v43 = vpop.f32.mrb[1].mxu0 }
 0x186   :  { %v5082_v44 = vadd.f32 %v5081_v43, %v5080_v42  ;;  %v718_v42 = vld [vmem:[#allocation8 + $0x3c8] sm:$0xff]  ;;  %v5586_v43 = vpack.c.bf16 %v719_v31, %v706_v29  ;;  %v620_v29 = vld [vmem:[#allocation8 + $0xb8] sm:$0xff] }
 0x187   :  { %v5588_v51 = vpack.c.bf16 %v718_v42, %v705_v41  ;;  %v632_v31 = vld [vmem:[#allocation8 + $0x118] sm:$0xff]  ;;  %v5668_v41 = vpack.c.bf16 %v620_v29, %v607_v28  ;;  %v631_v42 = vld [vmem:[#allocation8 + $0x110] sm:$0xff]  ;;  %v737_v29 = vld [vmem:[#allocation8 + $0x460] sm:$0xff] }
 0x19a   :  { %v5045_v46 = vpop.f32.mrb[2].mxu1 }
 0x19b   :  { %v5046_v47 = vpop.f32.mrb[3].mxu1 }
 0x19c   :  { %v5047_v49 = vadd.f32 %v5046_v47, %v5045_v46  ;;  %v720_v46 = vld [vmem:[#allocation8 + $0x3d8] sm:$0xff] }
 0x19d   :  { %v732_v47 = vld [vmem:[#allocation8 + $0x438] sm:$0xff] }
 0x19e   :  { %v454_v52 = vadd.f32 %v5047_v49, %v384_v48  ;;  %v593_v53 = vpop.f32.mrb[4].mxu1  ;;  %v745_v48 = vld [vmem:[#allocation8 + $0x4a0] sm:$0xff]  ;;  %v734_v49 = vld [vmem:[#allocation8 + $0x448] sm:$0xff] }
 0x19f   :  { %v5336_v35 = vpop.f32.mrb[5].mxu1  ;;  %v5590_v39 = vpack.c.bf16 %v745_v48, %v732_v47  ;;  %v5622_v55 = vpack.c.bf16 %v747_v50, %v734_v49  ;;  %v646_v47 = vld [vmem:[#allocation8 + $0x188] sm:$0xff]  ;;  %v671_v49 = vld [vmem:[#allocation8 + $0x250] sm:$0xff]  ;;  %v660_v50 = vld [vmem:[#allocation8 + $0x1f8] sm:$0xff] }
 0x1a0   :  { %v524_v58 = vadd.f32 %v5082_v44, %v454_v52  ;;  %v5618_v44 = vpack.c.bf16 %v721_v34, %v708_v33  ;;  %v5620_v52 = vpack.c.bf16 %v720_v46, %v707_v45  ;;  %v733_v35 = vld [vmem:[#allocation8 + $0x440] sm:$0xff]  ;;  %v634_v34 = vld [vmem:[#allocation8 + $0x128] sm:$0xff] }
 0x1a1   :  { %v5624_v61 = vpack.c.bf16 %v746_v36, %v733_v35  ;;  %v645_v33 = vld [vmem:[#allocation8 + $0x180] sm:$0xff]  ;;  %v658_v48 = vld [vmem:[#allocation8 + $0x1e8] sm:$0xff]  ;;  %v659_v36 = vld [vmem:[#allocation8 + $0x1f0] sm:$0xff] }
 0x1a2   :  { %v7630_v63 = vadd.f32 %v593_v53, %v524_v58  ;;  %v731_v53 = vld [vmem:[#allocation8 + $0x430] sm:$0xff]  ;;  %v760_v58 = vld [vmem:[#allocation8 + $0x518] sm:$0xff]  ;;  %v633_v46 = vld [vmem:[#allocation8 + $0x120] sm:$0xff] }
 0x1a4   :  { %939 = vmatmul.mubr.f32.vlgmr.msra.gmra.mrb[6].mxu1 %v7630_v63  ;;  %1010 = vmatmul.mubr.f32.vlgmr.msra.gmra.mrb[2].mxu0 %v7630_v63 }
 0x1a5   :  { %5573 = vmatpush1.bf16.msra.mxu1 %v5572_v59  ;;  %5605 = vmatpush1.bf16.msra.mxu0 %v5604_v60  ;;  %v773_v59 = vld [vmem:[#allocation8 + $0x580] sm:$0xff]  ;;  %v5592_v60 = vpack.c.bf16 %v744_v54, %v731_v53  ;;  %v5672_v53 = vpack.c.bf16 %v646_v47, %v633_v46  ;;  %v763_v47 = vld [vmem:[#allocation8 + $0x530] sm:$0xff] }
 0x1a6   :  { %5575 = vmatprep.subr.bf16.mxu1 %v5574_v0  ;;  %5607 = vmatprep.subr.bf16.mxu0 %v5606_v1  ;;  %v770_v0 = vld [vmem:[#allocation8 + $0x568] sm:$0xff]  ;;  %v5594_v1 = vpack.c.bf16 %v771_v57, %v758_v56  ;;  %v5626_v2 = vpack.c.bf16 %v773_v59, %v760_v58  ;;  %v657_v54 = vld [vmem:[#allocation8 + $0x1e0] sm:$0xff]  ;;  %v672_v56 = vld [vmem:[#allocation8 + $0x258] sm:$0xff] }
 0x1a7   :  { %1080 = vmatprep.mubr.f32.mxu1 %v7465_v32  ;;  %1151 = vmatprep.mubr.f32.mxu0 %v7465_v32  ;;  %v684_v57 = vld [vmem:[#allocation8 + $0x2b8] sm:$0xff]  ;;  %v697_v58 = vld [vmem:[#allocation8 + $0x320] sm:$0xff]  ;;  %v686_v59 = vld [vmem:[#allocation8 + $0x2c8] sm:$0xff] }
 0x1a9   :  { %5577 = vmatpush1.bf16.msra.mxu1 %v5576_v8  ;;  %5609 = vmatpush1.bf16.msra.mxu0 %v5608_v9  ;;  %v799_v8 = vld [vmem:[#allocation8 + $0x650] sm:$0xff]  ;;  %v5596_v9 = vpack.c.bf16 %v770_v0, %v757_v62  ;;  %v5676_v62 = vpack.c.bf16 %v672_v56, %v659_v36  ;;  %v800_v36 = vld [vmem:[#allocation8 + $0x658] sm:$0xff]  ;;  %v789_v56 = vld [vmem:[#allocation8 + $0x600] sm:$0xff] }
 0x1aa   :  { %5579 = vmatprep.subr.bf16.mxu1 %v5578_v12  ;;  %5611 = vmatprep.subr.bf16.mxu0 %v5610_v13  ;;  %v796_v12 = vld [vmem:[#allocation8 + $0x638] sm:$0xff]  ;;  %v5598_v13 = vpack.c.bf16 %v797_v6, %v784_v5  ;;  %v5630_v14 = vpack.c.bf16 %v799_v8, %v786_v7  ;;  %v683_v0 = vld [vmem:[#allocation8 + $0x2b0] sm:$0xff]  ;;  %v698_v5 = vld [vmem:[#allocation8 + $0x328] sm:$0xff] }
 0x1ab   :  { %v710_v6 = vld [vmem:[#allocation8 + $0x388] sm:$0xff]  ;;  %v723_v7 = vld [vmem:[#allocation8 + $0x3f0] sm:$0xff]  ;;  %v712_v8 = vld [vmem:[#allocation8 + $0x398] sm:$0xff] }
 0x1ad   :  { %5581 = vmatpush1.bf16.msra.mxu1 %v5580_v20  ;;  %5613 = vmatpush1.bf16.msra.mxu0 %v5612_v21  ;;  %v621_v20 = vld [vmem:[#allocation8 + $0xc0] sm:$0xff]  ;;  %v5600_v21 = vpack.c.bf16 %v796_v12, %v783_v11  ;;  %v5680_v11 = vpack.c.bf16 %v698_v5, %v685_v4 }
 0x1ae   :  { %5583 = vmatprep.subr.bf16.mxu1 %v5582_v25  ;;  %5615 = vmatprep.subr.bf16.mxu0 %v5614_v26  ;;  %v618_v25 = vld [vmem:[#allocation8 + $0xa8] sm:$0xff]  ;;  %v5634_v26 = vpack.c.bf16 %v619_v18, %v606_v17  ;;  %v5666_v27 = vpack.c.bf16 %v621_v20, %v608_v19  ;;  %v709_v12 = vld [vmem:[#allocation8 + $0x380] sm:$0xff]  ;;  %v724_v17 = vld [vmem:[#allocation8 + $0x3f8] sm:$0xff] }
 0x1af   :  { %v736_v18 = vld [vmem:[#allocation8 + $0x458] sm:$0xff]  ;;  %v749_v19 = vld [vmem:[#allocation8 + $0x4c0] sm:$0xff]  ;;  %v738_v20 = vld [vmem:[#allocation8 + $0x468] sm:$0xff] }
 0x1b0   :  { %v1622_v4 = vld [vmem:[#allocation11 + $0x778] sm:$0xff]  ;;  %v1629_v5 = vld [vmem:[#allocation11 + $0x7b0] sm:$0xff] }
 0x1b1   :  { %5585 = vmatpush1.bf16.msra.mxu1 %v5584_v37  ;;  %5617 = vmatpush1.bf16.msra.mxu0 %v5616_v38  ;;  %v647_v37 = vld [vmem:[#allocation8 + $0x190] sm:$0xff]  ;;  %v5636_v38 = vpack.c.bf16 %v618_v25, %v605_v24  ;;  %v5684_v24 = vpack.c.bf16 %v724_v17, %v711_v16  ;;  %v661_v16 = vld [vmem:[#allocation8 + $0x200] sm:$0xff]  ;;  %v674_v17 = vld [vmem:[#allocation8 + $0x268] sm:$0xff] }
 0x1b2   :  { %5587 = vmatprep.subr.bf16.mxu1 %v5586_v43  ;;  %5619 = vmatprep.subr.bf16.mxu0 %v5618_v44  ;;  %v644_v43 = vld [vmem:[#allocation8 + $0x178] sm:$0xff]  ;;  %v5638_v44 = vpack.c.bf16 %v645_v33, %v632_v31  ;;  %v5670_v45 = vpack.c.bf16 %v647_v37, %v634_v34  ;;  %v735_v25 = vld [vmem:[#allocation8 + $0x450] sm:$0xff]  ;;  %v750_v31 = vld [vmem:[#allocation8 + $0x4c8] sm:$0xff] }
 0x1b3   :  { %v762_v33 = vld [vmem:[#allocation8 + $0x528] sm:$0xff]  ;;  %v775_v34 = vld [vmem:[#allocation8 + $0x590] sm:$0xff]  ;;  %v764_v37 = vld [vmem:[#allocation8 + $0x538] sm:$0xff] }
 0x1b5   :  { %5589 = vmatpush1.bf16.msra.mxu1 %v5588_v51  ;;  %5621 = vmatpush1.bf16.msra.mxu0 %v5620_v52  ;;  %v673_v51 = vld [vmem:[#allocation8 + $0x260] sm:$0xff]  ;;  %v5640_v52 = vpack.c.bf16 %v644_v43, %v631_v42  ;;  %v5688_v42 = vpack.c.bf16 %v750_v31, %v737_v29 }
 0x1b6   :  { %5591 = vmatprep.subr.bf16.mxu1 %v5590_v39  ;;  %5623 = vmatprep.subr.bf16.mxu0 %v5622_v55  ;;  %v670_v39 = vld [vmem:[#allocation8 + $0x248] sm:$0xff]  ;;  %v5642_v55 = vpack.c.bf16 %v671_v49, %v658_v48  ;;  %v5674_v35 = vpack.c.bf16 %v673_v51, %v660_v50  ;;  %v761_v43 = vld [vmem:[#allocation8 + $0x520] sm:$0xff]  ;;  %v776_v48 = vld [vmem:[#allocation8 + $0x598] sm:$0xff] }
 0x1b7   :  { %v788_v49 = vld [vmem:[#allocation8 + $0x5f8] sm:$0xff]  ;;  %v801_v50 = vld [vmem:[#allocation8 + $0x660] sm:$0xff]  ;;  %v790_v51 = vld [vmem:[#allocation8 + $0x608] sm:$0xff] }
 0x1b8   :  { %v1649_v31 = vld [vmem:[#allocation11 + $0x850] sm:$0xff] }
 0x1b9   :  { %5593 = vmatpush1.bf16.msra.mxu1 %v5592_v60  ;;  %5625 = vmatpush1.bf16.msra.mxu0 %v5624_v61  ;;  %v699_v60 = vld [vmem:[#allocation8 + $0x330] sm:$0xff]  ;;  %v5644_v61 = vpack.c.bf16 %v670_v39, %v657_v54  ;;  %v5692_v54 = vpack.c.bf16 %v776_v48, %v763_v47  ;;  %v1678_v47 = vld [vmem:[#allocation11 + $0x938] sm:$0xff]  ;;  %v1685_v48 = vld [vmem:[#allocation11 + $0x970] sm:$0xff] }
 0x1ba   :  { %5595 = vmatprep.subr.bf16.mxu1 %v5594_v1  ;;  %5627 = vmatprep.subr.bf16.mxu0 %v5626_v2  ;;  %v696_v1 = vld [vmem:[#allocation8 + $0x318] sm:$0xff]  ;;  %v5646_v2 = vpack.c.bf16 %v697_v58, %v684_v57  ;;  %v5678_v3 = vpack.c.bf16 %v699_v60, %v686_v59  ;;  %v787_v39 = vld [vmem:[#allocation8 + $0x5f0] sm:$0xff]  ;;  %v802_v57 = vld [vmem:[#allocation8 + $0x668] sm:$0xff] }
 0x1bb   :  { %v1608_v58 = vld [vmem:[#allocation11 + $0x708] sm:$0xff]  ;;  %v1615_v59 = vld [vmem:[#allocation11 + $0x740] sm:$0xff]  ;;  %v5664_v60 = vpack.c.bf16 %v800_v36, %v787_v39 }
 0x1bc   :  { %v1684_v39 = vld [vmem:[#allocation11 + $0x968] sm:$0xff] }
 0x1bd   :  { %5597 = vmatpush1.bf16.msra.mxu1 %v5596_v9  ;;  %5629 = vmatpush1.bf16.msra.mxu0 %v5628_v10  ;;  %v725_v9 = vld [vmem:[#allocation8 + $0x400] sm:$0xff]  ;;  %v5648_v10 = vpack.c.bf16 %v696_v1, %v683_v0  ;;  %v622_v0 = vld [vmem:[#allocation8 + $0xc8] sm:$0xff]  ;;  %v5786_v1 = vpack.c.bf16 %v1615_v59, %v1608_v58 }
 0x1be   :  { %5599 = vmatprep.subr.bf16.mxu1 %v5598_v13  ;;  %5631 = vmatprep.subr.bf16.mxu0 %v5630_v14  ;;  %v722_v13 = vld [vmem:[#allocation8 + $0x3e8] sm:$0xff]  ;;  %v5650_v14 = vpack.c.bf16 %v723_v7, %v710_v6  ;;  %v5682_v15 = vpack.c.bf16 %v725_v9, %v712_v8  ;;  %v635_v7 = vld [vmem:[#allocation8 + $0x130] sm:$0xff]  ;;  %v648_v8 = vld [vmem:[#allocation8 + $0x198] sm:$0xff] }
 0x1c1   :  { %5601 = vmatpush1.bf16.msra.mxu1 %v5600_v21  ;;  %5633 = vmatpush1.bf16.msra.mxu0 %v5632_v22  ;;  %v751_v21 = vld [vmem:[#allocation8 + $0x4d0] sm:$0xff]  ;;  %v5652_v22 = vpack.c.bf16 %v722_v13, %v709_v12 }
 0x1c2   :  { %5635 = vmatprep.subr.bf16.mxu1 %v5634_v26  ;;  %5667 = vmatprep.subr.bf16.mxu0 %v5666_v27  ;;  %v748_v26 = vld [vmem:[#allocation8 + $0x4b8] sm:$0xff]  ;;  %v5654_v27 = vpack.c.bf16 %v749_v19, %v736_v18  ;;  %v5686_v28 = vpack.c.bf16 %v751_v21, %v738_v20  ;;  %v1635_v20 = vld [vmem:[#allocation11 + $0x7e0] sm:$0xff]  ;;  %v1642_v21 = vld [vmem:[#allocation11 + $0x818] sm:$0xff] }
 0x1c3   :  { %v1628_v12 = vld [vmem:[#allocation11 + $0x7a8] sm:$0xff] }
 0x1c4   :  { %1081 = vmatmul.mubr.f32.vlgmr.msra.gmra.mrb[8].mxu1 %v7630_v63  ;;  %1152 = vmatmul.mubr.f32.vlgmr.msra.gmra.mrb[4].mxu0 %v7630_v63  ;;  %v1636_v13 = vld [vmem:[#allocation11 + $0x7e8] sm:$0xff] }
 0x1c5   :  { %5637 = vmatpush1.bf16.msra.mxu1 %v5636_v38  ;;  %5669 = vmatpush1.bf16.msra.mxu0 %v5668_v41  ;;  %v777_v38 = vld [vmem:[#allocation8 + $0x5a0] sm:$0xff]  ;;  %v5656_v41 = vpack.c.bf16 %v748_v26, %v735_v25  ;;  %v5705_v25 = vpack.c.bf16 %v674_v17, %v661_v16  ;;  %v687_v26 = vld [vmem:[#allocation8 + $0x2d0] sm:$0xff] }
 0x1c6   :  { %5639 = vmatprep.subr.bf16.mxu1 %v5638_v44  ;;  %5671 = vmatprep.subr.bf16.mxu0 %v5670_v45  ;;  %v774_v44 = vld [vmem:[#allocation8 + $0x588] sm:$0xff]  ;;  %v5658_v45 = vpack.c.bf16 %v775_v34, %v762_v33  ;;  %v5690_v46 = vpack.c.bf16 %v777_v38, %v764_v37  ;;  %v1656_v33 = vld [vmem:[#allocation11 + $0x888] sm:$0xff] }
 0x1c7   :  { %1222 = vmatprep.mubr.f32.mxu1 %v7465_v32  ;;  %1293 = vmatprep.mubr.f32.mxu0 %v7465_v32  ;;  %v1664_v34 = vld [vmem:[#allocation11 + $0x8c8] sm:$0xff]  ;;  %v1671_v37 = vld [vmem:[#allocation11 + $0x900] sm:$0xff]  ;;  %v1398_v16 = vld [vmem:[#allocation11 + $0x78] sm:$0xff] }
 0x1c9   :  { %5641 = vmatpush1.bf16.msra.mxu1 %v5640_v52  ;;  %5673 = vmatpush1.bf16.msra.mxu0 %v5672_v53  ;;  %v803_v52 = vld [vmem:[#allocation8 + $0x670] sm:$0xff]  ;;  %v5660_v53 = vpack.c.bf16 %v774_v44, %v761_v43  ;;  %v5800_v43 = vpack.c.bf16 %v1656_v33, %v1649_v31  ;;  %v5802_v44 = vpack.c.bf16 %v1671_v37, %v1664_v34  ;;  %v1733_v37 = vld [vmem:[#allocation11 + $0xaf0] sm:$0xff] }
 0x1ca   :  { %5643 = vmatprep.subr.bf16.mxu1 %v5642_v55  ;;  %5675 = vmatprep.subr.bf16.mxu0 %v5674_v35  ;;  %v5662_v55 = vpack.c.bf16 %v801_v50, %v788_v49  ;;  %v5694_v35 = vpack.c.bf16 %v803_v52, %v790_v51  ;;  %v739_v50 = vld [vmem:[#allocation8 + $0x470] sm:$0xff]  ;;  %v752_v51 = vld [vmem:[#allocation8 + $0x4d8] sm:$0xff] }
 0x1cb   :  { %v5714_v36 = vpack.c.bf16 %v752_v51, %v739_v50  ;;  %v1419_v33 = vld [vmem:[#allocation11 + $0x120] sm:$0xff] }
 0x1cc   :  { %v1747_v51 = vld [vmem:[#allocation11 + $0xb60] sm:$0xff] }
 0x1cd   :  { %5645 = vmatpush1.bf16.msra.mxu1 %v5644_v61  ;;  %5677 = vmatpush1.bf16.msra.mxu0 %v5676_v62  ;;  %v5696_v61 = vpack.c.bf16 %v802_v57, %v789_v56  ;;  %v609_v62 = vld [vmem:[#allocation8 + $0x60] sm:$0xff]  ;;  %v778_v57 = vld [vmem:[#allocation8 + $0x5a8] sm:$0xff] }
 0x1ce   :  { %5647 = vmatprep.subr.bf16.mxu1 %v5646_v2  ;;  %5679 = vmatprep.subr.bf16.mxu0 %v5678_v3  ;;  %v1607_v2 = vld [vmem:[#allocation11 + $0x700] sm:$0xff]  ;;  %v1614_v3 = vld [vmem:[#allocation11 + $0x738] sm:$0xff]  ;;  %v5699_v6 = vpack.c.bf16 %v622_v0, %v609_v62  ;;  %v1713_v0 = vld [vmem:[#allocation11 + $0xa50] sm:$0xff] }
 0x1cf   :  { %v5788_v9 = vpack.c.bf16 %v1614_v3, %v1607_v2  ;;  %v765_v56 = vld [vmem:[#allocation8 + $0x540] sm:$0xff]  ;;  %v791_v2 = vld [vmem:[#allocation8 + $0x610] sm:$0xff]  ;;  %v804_v3 = vld [vmem:[#allocation8 + $0x678] sm:$0xff] }
 0x1d0   :  { %v1706_v62 = vld [vmem:[#allocation11 + $0xa18] sm:$0xff] }
 0x1d1   :  { %5649 = vmatpush1.bf16.msra.mxu1 %v5648_v10  ;;  %5681 = vmatpush1.bf16.msra.mxu0 %v5680_v11  ;;  %v5790_v10 = vpack.c.bf16 %v1629_v5, %v1622_v4  ;;  %v1621_v11 = vld [vmem:[#allocation11 + $0x770] sm:$0xff]  ;;  %v1384_v4 = vld [vmem:[#allocation11 + $0x8] sm:$0xff] }
 0x1d2   :  { %5651 = vmatprep.subr.bf16.mxu1 %v5650_v14  ;;  %5683 = vmatprep.subr.bf16.mxu0 %v5682_v15  ;;  %v1643_v14 = vld [vmem:[#allocation11 + $0x820] sm:$0xff]  ;;  %v5702_v15 = vpack.c.bf16 %v648_v8, %v635_v7  ;;  %v5792_v18 = vpack.c.bf16 %v1628_v12, %v1621_v11  ;;  %v5814_v7 = vpack.c.bf16 %v1713_v0, %v1706_v62  ;;  %v1705_v8 = vld [vmem:[#allocation11 + $0xa10] sm:$0xff] }
 0x1d3   :  { %v5794_v19 = vpack.c.bf16 %v1643_v14, %v1636_v13  ;;  %v1727_v11 = vld [vmem:[#allocation11 + $0xac0] sm:$0xff]  ;;  %v5720_v12 = vpack.c.bf16 %v804_v3, %v791_v2  ;;  %v1446_v3 = vld [vmem:[#allocation11 + $0x1f8] sm:$0xff] }
 0x1d4   :  { %v1383_v14 = vld [vmem:[#allocation11] sm:$0xff] }
 0x1d5   :  { %5653 = vmatpush1.bf16.msra.mxu1 %v5652_v22  ;;  %5685 = vmatpush1.bf16.msra.mxu0 %v5684_v24  ;;  %v1650_v22 = vld [vmem:[#allocation11 + $0x858] sm:$0xff]  ;;  %v1657_v24 = vld [vmem:[#allocation11 + $0x890] sm:$0xff]  ;;  %v1783_v62 = vld [vmem:[#allocation11 + $0xc80] sm:$0xff] }
 0x1d6   :  { %5655 = vmatprep.subr.bf16.mxu1 %v5654_v27  ;;  %5687 = vmatprep.subr.bf16.mxu0 %v5686_v28  ;;  %v700_v27 = vld [vmem:[#allocation8 + $0x338] sm:$0xff]  ;;  %v5796_v28 = vpack.c.bf16 %v1642_v21, %v1635_v20  ;;  %v5798_v29 = vpack.c.bf16 %v1657_v24, %v1650_v22  ;;  %v1719_v20 = vld [vmem:[#allocation11 + $0xa80] sm:$0xff]  ;;  %v1726_v21 = vld [vmem:[#allocation11 + $0xab8] sm:$0xff] }
 0x1d7   :  { %v5708_v38 = vpack.c.bf16 %v700_v27, %v687_v26  ;;  %v1734_v22 = vld [vmem:[#allocation11 + $0xaf8] sm:$0xff]  ;;  %v1741_v24 = vld [vmem:[#allocation11 + $0xb30] sm:$0xff]  ;;  %v5820_v31 = vpack.c.bf16 %v1726_v21, %v1719_v20  ;;  %v1439_v2 = vld [vmem:[#allocation11 + $0x1c0] sm:$0xff] }
 0x1d8   :  { %v1397_v27 = vld [vmem:[#allocation11 + $0x70] sm:$0xff]  ;;  %v5822_v34 = vpack.c.bf16 %v1741_v24, %v1734_v22  ;;  %v1796_v21 = vld [vmem:[#allocation11 + $0xce8] sm:$0xff]  ;;  %v1811_v24 = vld [vmem:[#allocation11 + $0xd60] sm:$0xff] }
 0x1d9   :  { %5657 = vmatpush1.bf16.msra.mxu1 %v5656_v41  ;;  %5689 = vmatpush1.bf16.msra.mxu0 %v5688_v42  ;;  %v713_v41 = vld [vmem:[#allocation8 + $0x3a0] sm:$0xff]  ;;  %v726_v42 = vld [vmem:[#allocation8 + $0x408] sm:$0xff]  ;;  %v1804_v22 = vld [vmem:[#allocation11 + $0xd28] sm:$0xff] }
 0x1da   :  { %5659 = vmatprep.subr.bf16.mxu1 %v5658_v45  ;;  %5691 = vmatprep.subr.bf16.mxu0 %v5690_v46  ;;  %v1663_v45 = vld [vmem:[#allocation11 + $0x8c0] sm:$0xff]  ;;  %v1670_v46 = vld [vmem:[#allocation11 + $0x8f8] sm:$0xff]  ;;  %v5711_v49 = vpack.c.bf16 %v726_v42, %v713_v41  ;;  %v1748_v41 = vld [vmem:[#allocation11 + $0xb68] sm:$0xff] }
 0x1db   :  { %v5804_v52 = vpack.c.bf16 %v1670_v46, %v1663_v45  ;;  %v1755_v42 = vld [vmem:[#allocation11 + $0xba0] sm:$0xff]  ;;  %v1418_v46 = vld [vmem:[#allocation11 + $0x118] sm:$0xff]  ;;  %v1789_v20 = vld [vmem:[#allocation11 + $0xcb0] sm:$0xff] }
 0x1dc   :  { %v1411_v45 = vld [vmem:[#allocation11 + $0xe0] sm:$0xff]  ;;  %v5826_v50 = vpack.c.bf16 %v1755_v42, %v1748_v41  ;;  %v1818_v41 = vld [vmem:[#allocation11 + $0xd98] sm:$0xff]  ;;  %v1825_v42 = vld [vmem:[#allocation11 + $0xdd0] sm:$0xff] }
 0x1dd   :  { %5661 = vmatpush1.bf16.msra.mxu1 %v5660_v53  ;;  %5693 = vmatpush1.bf16.msra.mxu0 %v5692_v54  ;;  %v5806_v53 = vpack.c.bf16 %v1685_v48, %v1678_v47  ;;  %v1677_v54 = vld [vmem:[#allocation11 + $0x930] sm:$0xff]  ;;  %v1426_v47 = vld [vmem:[#allocation11 + $0x158] sm:$0xff] }
 0x1de   :  { %5663 = vmatprep.subr.bf16.mxu1 %v5662_v55  ;;  %5695 = vmatprep.subr.bf16.mxu0 %v5694_v35  ;;  %v1692_v55 = vld [vmem:[#allocation11 + $0x9a8] sm:$0xff]  ;;  %v1699_v35 = vld [vmem:[#allocation11 + $0x9e0] sm:$0xff]  ;;  %v5808_v58 = vpack.c.bf16 %v1684_v39, %v1677_v54  ;;  %v1769_v54 = vld [vmem:[#allocation11 + $0xc10] sm:$0xff] }
 0x1df   :  { %v5810_v59 = vpack.c.bf16 %v1699_v35, %v1692_v55  ;;  %v1425_v55 = vld [vmem:[#allocation11 + $0x150] sm:$0xff]  ;;  %v1432_v35 = vld [vmem:[#allocation11 + $0x188] sm:$0xff] }
 0x1e0   :  { %v5736_v0 = vpack.c.bf16 %v1432_v35, %v1425_v55  ;;  %v1495_v55 = vld [vmem:[#allocation11 + $0x380] sm:$0xff]  ;;  %v1502_v35 = vld [vmem:[#allocation11 + $0x3b8] sm:$0xff] }
 0x1e1   :  { %5665 = vmatpush1.bf16.msra.mxu1 %v5664_v60  ;;  %5697 = vmatpush1.bf16.msra.mxu0 %v5696_v61  ;;  %v1691_v60 = vld [vmem:[#allocation11 + $0x9a0] sm:$0xff]  ;;  %v1698_v61 = vld [vmem:[#allocation11 + $0x9d8] sm:$0xff] }
 0x1e2   :  { %5698 = vmatprep.subr.bf16.mxu1 %v7466_v40  ;;  %5787 = vmatprep.subr.bf16.mxu0 %v5786_v1  ;;  %v5717_v1 = vpack.c.bf16 %v778_v57, %v765_v56  ;;  %v5812_v5 = vpack.c.bf16 %v1698_v61, %v1691_v60  ;;  %v1447_v57 = vld [vmem:[#allocation11 + $0x200] sm:$0xff]  ;;  %v1768_v60 = vld [vmem:[#allocation11 + $0xc08] sm:$0xff] }
 0x1e3   :  { %v1776_v61 = vld [vmem:[#allocation11 + $0xc48] sm:$0xff] }
 0x1e4   :  { %1223 = vmatmul.mubr.f32.vlgmr.msra.gmra.mrb[10].mxu1 %v7630_v63  ;;  %1294 = vmatmul.mubr.f32.vlgmr.msra.gmra.mrb[6].mxu0 %v7630_v63 }
 0x1e5   :  { %5700 = vmatpush3.bf16.msra.mxu1 %v5699_v6  ;;  %5369 = vmatprep.mubr.msk.f32.mxu1 %vm7467_vm0, %v7465_v32  ;;  %v1391_v6 = vld [vmem:[#allocation11 + $0x40] sm:$0xff] }
 0x1e6   :  { %5701 = vmatprep.subr.bf16.mxu1 %v7466_v40  ;;  %5789 = vmatpush1.bf16.msra.mxu0 %v5788_v9  ;;  %v1712_v9 = vld [vmem:[#allocation11 + $0xa48] sm:$0xff]  ;;  %v5722_v13 = vpack.c.bf16 %v1391_v6, %v1384_v4  ;;  %v1454_v4 = vld [vmem:[#allocation11 + $0x238] sm:$0xff]  ;;  %v1461_v6 = vld [vmem:[#allocation11 + $0x270] sm:$0xff] }
 0x1e7   :  { %5791 = vmatprep.subr.bf16.mxu0 %v5790_v10  ;;  %v1720_v10 = vld [vmem:[#allocation11 + $0xa88] sm:$0xff]  ;;  %v5816_v17 = vpack.c.bf16 %v1712_v9, %v1705_v8  ;;  %v1775_v8 = vld [vmem:[#allocation11 + $0xc40] sm:$0xff]  ;;  %v1782_v9 = vld [vmem:[#allocation11 + $0xc78] sm:$0xff] }
 0x1e9   :  { %5703 = vmatpush3.bf16.msra.mxu1 %v5702_v15  ;;  %v1390_v15 = vld [vmem:[#allocation11 + $0x38] sm:$0xff] }
 0x1ea   :  { %5704 = vmatprep.subr.bf16.mxu1 %v7466_v40  ;;  %5793 = vmatpush1.bf16.msra.mxu0 %v5792_v18  ;;  %v1405_v18 = vld [vmem:[#allocation11 + $0xb0] sm:$0xff] }
 0x1eb   :  { %5795 = vmatprep.subr.bf16.mxu0 %v5794_v19  ;;  %v5818_v19 = vpack.c.bf16 %v1727_v11, %v1720_v10  ;;  %v5726_v26 = vpack.c.bf16 %v1405_v18, %v1398_v16  ;;  %v1790_v10 = vld [vmem:[#allocation11 + $0xcb8] sm:$0xff]  ;;  %v1797_v11 = vld [vmem:[#allocation11 + $0xcf0] sm:$0xff]  ;;  %v1468_v16 = vld [vmem:[#allocation11 + $0x2a8] sm:$0xff] }
 0x1ec   :  { %v1475_v18 = vld [vmem:[#allocation11 + $0x2e0] sm:$0xff] }
 0x1ed   :  { %5706 = vmatpush3.bf16.msra.mxu1 %v5705_v25  ;;  %v5724_v25 = vpack.c.bf16 %v1390_v15, %v1383_v14  ;;  %v1453_v14 = vld [vmem:[#allocation11 + $0x230] sm:$0xff]  ;;  %v1460_v15 = vld [vmem:[#allocation11 + $0x268] sm:$0xff] }
 0x1ee   :  { %5707 = vmatprep.subr.bf16.mxu1 %v7466_v40  ;;  %5797 = vmatpush1.bf16.msra.mxu0 %v5796_v28  ;;  %v1404_v28 = vld [vmem:[#allocation11 + $0xa8] sm:$0xff] }
 0x1ef   :  { %5799 = vmatprep.subr.bf16.mxu0 %v5798_v29  ;;  %v1412_v29 = vld [vmem:[#allocation11 + $0xe8] sm:$0xff] }
 0x1f1   :  { %5709 = vmatpush3.bf16.msra.mxu1 %v5708_v38  ;;  %v1740_v38 = vld [vmem:[#allocation11 + $0xb28] sm:$0xff] }
 0x1f2   :  { %5710 = vmatprep.subr.bf16.mxu1 %v7466_v40  ;;  %5801 = vmatpush1.bf16.msra.mxu0 %v5800_v43  ;;  %v5728_v43 = vpack.c.bf16 %v1404_v28, %v1397_v27  ;;  %v5824_v48 = vpack.c.bf16 %v1740_v38, %v1733_v37  ;;  %v1467_v27 = vld [vmem:[#allocation11 + $0x2a0] sm:$0xff]  ;;  %v1474_v28 = vld [vmem:[#allocation11 + $0x2d8] sm:$0xff] }
 0x1f3   :  { %5803 = vmatprep.subr.bf16.mxu0 %v5802_v44  ;;  %v5730_v44 = vpack.c.bf16 %v1419_v33, %v1412_v29  ;;  %v1482_v29 = vld [vmem:[#allocation11 + $0x318] sm:$0xff]  ;;  %v1489_v33 = vld [vmem:[#allocation11 + $0x350] sm:$0xff]  ;;  %v1803_v37 = vld [vmem:[#allocation11 + $0xd20] sm:$0xff] }
 0x1f4   :  { %v1810_v38 = vld [vmem:[#allocation11 + $0xd58] sm:$0xff] }
 0x1f5   :  { %5712 = vmatpush3.bf16.msra.mxu1 %v5711_v49  ;;  %v1433_v49 = vld [vmem:[#allocation11 + $0x190] sm:$0xff] }
 0x1f6   :  { %5713 = vmatprep.subr.bf16.mxu1 %v7466_v40  ;;  %5805 = vmatpush1.bf16.msra.mxu0 %v5804_v52  ;;  %v1754_v52 = vld [vmem:[#allocation11 + $0xb98] sm:$0xff]  ;;  %v5734_v39 = vpack.c.bf16 %v1433_v49, %v1426_v47  ;;  %v1496_v47 = vld [vmem:[#allocation11 + $0x388] sm:$0xff]  ;;  %v1503_v49 = vld [vmem:[#allocation11 + $0x3c0] sm:$0xff] }
 0x1f7   :  { %5807 = vmatprep.subr.bf16.mxu0 %v5806_v53  ;;  %v1762_v53 = vld [vmem:[#allocation11 + $0xbd8] sm:$0xff]  ;;  %v5828_v56 = vpack.c.bf16 %v1754_v52, %v1747_v51  ;;  %v1817_v51 = vld [vmem:[#allocation11 + $0xd90] sm:$0xff]  ;;  %v1824_v52 = vld [vmem:[#allocation11 + $0xdc8] sm:$0xff] }
 0x1f9   :  { %5715 = vmatpush3.bf16.msra.mxu1 %v5714_v36  ;;  %v1440_v36 = vld [vmem:[#allocation11 + $0x1c8] sm:$0xff] }
 0x1fa   :  { %5716 = vmatprep.subr.bf16.mxu1 %v7466_v40  ;;  %5809 = vmatpush1.bf16.msra.mxu0 %v5808_v58  ;;  %v5830_v58 = vpack.c.bf16 %v1769_v54, %v1762_v53  ;;  %v1832_v53 = vld [vmem:[#allocation11 + $0xe08] sm:$0xff]  ;;  %v1839_v54 = vld [vmem:[#allocation11 + $0xe40] sm:$0xff] }
 0x1fb   :  { %5811 = vmatprep.subr.bf16.mxu0 %v5810_v59  ;;  %v1761_v59 = vld [vmem:[#allocation11 + $0xbd0] sm:$0xff] }
 0x1fd   :  { %5718 = vmatpush3.bf16.msra.mxu1 %v5717_v1  ;;  %v5738_v1 = vpack.c.bf16 %v1447_v57, %v1440_v36  ;;  %v5848_v36 = vpack.c.bf16 %v1824_v52, %v1817_v51  ;;  %v1517_v57 = vld [vmem:[#allocation11 + $0x430] sm:$0xff]  ;;  %v7665_v51 = vsub.s32 3, %v7596_v23 }
 0x1fe   :  { %5719 = vmatprep.subr.bf16.mxu1 %v7466_v40  ;;  %5813 = vmatpush1.bf16.msra.mxu0 %v5812_v5  ;;  %v5832_v5 = vpack.c.bf16 %v1768_v60, %v1761_v59  ;;  %v5756_v59 = vpack.c.bf16 %v1502_v35, %v1495_v55  ;;  %v1831_v35 = vld [vmem:[#allocation11 + $0xe00] sm:$0xff] }
 0x1ff   :  { %5815 = vmatprep.subr.bf16.mxu0 %v5814_v7  ;;  %v5834_v7 = vpack.c.bf16 %v1783_v62, %v1776_v61  ;;  %v1509_v61 = vld [vmem:[#allocation11 + $0x3f0] sm:$0xff]  ;;  %v1516_v62 = vld [vmem:[#allocation11 + $0x428] sm:$0xff] }
 0x201   :  { %5721 = vmatpush3.bf16.msra.mxu1 %v5720_v12  ;;  %v5740_v12 = vpack.c.bf16 %v1446_v3, %v1439_v2  ;;  %v5760_v2 = vpack.c.bf16 %v1516_v62, %v1509_v61  ;;  %v1392_v61 = vld [vmem:[#allocation11 + $0x48] sm:$0xff] }
 0x202   :  { %5723 = vmatprep.subr.bf16.mxu1 %v5722_v13  ;;  %5817 = vmatpush1.bf16.msra.mxu0 %v5816_v17  ;;  %v5742_v13 = vpack.c.bf16 %v1461_v6, %v1454_v4  ;;  %v5836_v17 = vpack.c.bf16 %v1782_v9, %v1775_v8  ;;  %v1523_v4 = vld [vmem:[#allocation11 + $0x460] sm:$0xff]  ;;  %v1538_v6 = vld [vmem:[#allocation11 + $0x4d8] sm:$0xff] }
 0x203   :  { %5819 = vmatprep.subr.bf16.mxu0 %v5818_v19  ;;  %v5838_v19 = vpack.c.bf16 %v1797_v11, %v1790_v10  ;;  %v1537_v10 = vld [vmem:[#allocation11 + $0x4d0] sm:$0xff]  ;;  %v1544_v11 = vld [vmem:[#allocation11 + $0x508] sm:$0xff] }
 0x204   :  { %5370 = vmatmul.mubr.f32.vlgmr.msra.gmra.mrb[12].mxu1 %v7630_v63  ;;  %v5732_v63 = vpack.c.bf16 %v1418_v46, %v1411_v45  ;;  %v1481_v45 = vld [vmem:[#allocation11 + $0x310] sm:$0xff]  ;;  %v1488_v46 = vld [vmem:[#allocation11 + $0x348] sm:$0xff] }
 0x205   :  { %5725 = vmatpush1.bf16.msra.mxu1 %v5724_v25  ;;  %v5744_v25 = vpack.c.bf16 %v1460_v15, %v1453_v14  ;;  %v5768_v14 = vpack.c.bf16 %v1544_v11, %v1537_v10  ;;  %v1852_v10 = vld [vmem:[#allocation11 + $0xea8] sm:$0xff] }
 0x206   :  { %5727 = vmatprep.subr.bf16.mxu1 %v5726_v26  ;;  %5821 = vmatpush1.bf16.msra.mxu0 %v5820_v31  ;;  %v5746_v26 = vpack.c.bf16 %v1475_v18, %v1468_v16  ;;  %v5840_v31 = vpack.c.bf16 %v1796_v21, %v1789_v20  ;;  %v1551_v16 = vld [vmem:[#allocation11 + $0x540] sm:$0xff]  ;;  %v1566_v18 = vld [vmem:[#allocation11 + $0x5b8] sm:$0xff] }
 0x207   :  { %5823 = vmatprep.subr.bf16.mxu0 %v5822_v34  ;;  %v5842_v34 = vpack.c.bf16 %v1811_v24, %v1804_v22  ;;  %v1565_v22 = vld [vmem:[#allocation11 + $0x5b0] sm:$0xff]  ;;  %v1572_v24 = vld [vmem:[#allocation11 + $0x5e8] sm:$0xff] }
 0x209   :  { %5729 = vmatpush1.bf16.msra.mxu1 %v5728_v43  ;;  %v5748_v43 = vpack.c.bf16 %v1474_v28, %v1467_v27  ;;  %v5776_v27 = vpack.c.bf16 %v1572_v24, %v1565_v22  ;;  %v1859_v24 = vld [vmem:[#allocation11 + $0xee0] sm:$0xff] }
 0x20a   :  { %5731 = vmatprep.subr.bf16.mxu1 %v5730_v44  ;;  %5825 = vmatpush1.bf16.msra.mxu0 %v5824_v48  ;;  %v5750_v44 = vpack.c.bf16 %v1489_v33, %v1482_v29  ;;  %v5844_v48 = vpack.c.bf16 %v1810_v38, %v1803_v37  ;;  %v1579_v29 = vld [vmem:[#allocation11 + $0x620] sm:$0xff]  ;;  %v1594_v33 = vld [vmem:[#allocation11 + $0x698] sm:$0xff] }
 0x20b   :  { %5827 = vmatprep.subr.bf16.mxu0 %v5826_v50  ;;  %v5846_v50 = vpack.c.bf16 %v1825_v42, %v1818_v41  ;;  %v1593_v41 = vld [vmem:[#allocation11 + $0x690] sm:$0xff]  ;;  %v1600_v42 = vld [vmem:[#allocation11 + $0x6c8] sm:$0xff] }
 0x20d   :  { %5733 = vmatpush1.bf16.msra.mxu1 %v5732_v63  ;;  %v5752_v63 = vpack.c.bf16 %v1488_v46, %v1481_v45  ;;  %v5784_v45 = vpack.c.bf16 %v1600_v42, %v1593_v41  ;;  %v1873_v42 = vld [vmem:[#allocation11 + $0xf50] sm:$0xff] }
 0x20e   :  { %5735 = vmatprep.subr.bf16.mxu1 %v5734_v39  ;;  %5829 = vmatpush1.bf16.msra.mxu0 %v5828_v56  ;;  %v5754_v39 = vpack.c.bf16 %v1503_v49, %v1496_v47  ;;  %v1510_v56 = vld [vmem:[#allocation11 + $0x3f8] sm:$0xff]  ;;  %v7654_v47 = vsub.s32 0, %v7596_v23 }
 0x20f   :  { %5831 = vmatprep.subr.bf16.mxu0 %v5830_v58  ;;  %v5850_v58 = vpack.c.bf16 %v1839_v54, %v1832_v53  ;;  %v5758_v60 = vpack.c.bf16 %v1517_v57, %v1510_v56  ;;  %v7659_v49 = vld [vmem:[#allocation10] sm:$0xff] }
 0x210   :  { %v812_v52 = vrot.slane %v7659_v49, %v7654_v47 }
 0x211   :  { %5737 = vmatpush1.bf16.msra.mxu1 %v5736_v0  ;;  %v1524_v0 = vld [vmem:[#allocation11 + $0x468] sm:$0xff] }
 0x212   :  { %5739 = vmatprep.subr.bf16.mxu1 %v5738_v1  ;;  %5833 = vmatpush1.bf16.msra.mxu0 %v5832_v5  ;;  %v1531_v1 = vld [vmem:[#allocation11 + $0x4a0] sm:$0xff]  ;;  %v1530_v5 = vld [vmem:[#allocation11 + $0x498] sm:$0xff] }
 0x213   :  { %5835 = vmatprep.subr.bf16.mxu0 %v5834_v7  ;;  %v5762_v3 = vpack.c.bf16 %v1531_v1, %v1524_v0  ;;  %v1545_v7 = vld [vmem:[#allocation11 + $0x510] sm:$0xff]  ;;  %v5764_v8 = vpack.c.bf16 %v1530_v5, %v1523_v4  ;;  %v1846_v1 = vld [vmem:[#allocation11 + $0xe78] sm:$0xff]  ;;  %v1407_v4 = vld [vmem:[#allocation11 + $0xc0] sm:$0xff] }
 0x214   :  { %v5766_v9 = vpack.c.bf16 %v1545_v7, %v1538_v6 }
 0x215   :  { %5741 = vmatpush1.bf16.msra.mxu1 %v5740_v12  ;;  %v1552_v12 = vld [vmem:[#allocation11 + $0x548] sm:$0xff] }
 0x216   :  { %5743 = vmatprep.subr.bf16.mxu1 %v5742_v13  ;;  %5837 = vmatpush1.bf16.msra.mxu0 %v5836_v17  ;;  %v1559_v13 = vld [vmem:[#allocation11 + $0x580] sm:$0xff]  ;;  %v1558_v17 = vld [vmem:[#allocation11 + $0x578] sm:$0xff] }
 0x217   :  { %5839 = vmatprep.subr.bf16.mxu0 %v5838_v19  ;;  %v5770_v15 = vpack.c.bf16 %v1559_v13, %v1552_v12  ;;  %v1573_v19 = vld [vmem:[#allocation11 + $0x5f0] sm:$0xff]  ;;  %v5772_v20 = vpack.c.bf16 %v1558_v17, %v1551_v16  ;;  %v1860_v16 = vld [vmem:[#allocation11 + $0xee8] sm:$0xff] }
 0x218   :  { %v5774_v21 = vpack.c.bf16 %v1573_v19, %v1566_v18  ;;  %v1867_v18 = vld [vmem:[#allocation11 + $0xf20] sm:$0xff]  ;;  %v1414_v19 = vld [vmem:[#allocation11 + $0xf8] sm:$0xff] }
 0x219   :  { %5745 = vmatpush1.bf16.msra.mxu1 %v5744_v25  ;;  %v1580_v25 = vld [vmem:[#allocation11 + $0x628] sm:$0xff] }
 0x21a   :  { %5747 = vmatprep.subr.bf16.mxu1 %v5746_v26  ;;  %5841 = vmatpush1.bf16.msra.mxu0 %v5840_v31  ;;  %v1587_v26 = vld [vmem:[#allocation11 + $0x660] sm:$0xff]  ;;  %v1586_v31 = vld [vmem:[#allocation11 + $0x658] sm:$0xff] }
 0x21b   :  { %5843 = vmatprep.subr.bf16.mxu0 %v5842_v34  ;;  %v5778_v28 = vpack.c.bf16 %v1587_v26, %v1580_v25  ;;  %v1601_v34 = vld [vmem:[#allocation11 + $0x6d0] sm:$0xff]  ;;  %v5780_v37 = vpack.c.bf16 %v1586_v31, %v1579_v29  ;;  %v1866_v25 = vld [vmem:[#allocation11 + $0xf18] sm:$0xff]  ;;  %v5858_v26 = vpack.c.bf16 %v1867_v18, %v1860_v16  ;;  %v1420_v29 = vld [vmem:[#allocation11 + $0x128] sm:$0xff] }
 0x21c   :  { %v5782_v38 = vpack.c.bf16 %v1601_v34, %v1594_v33  ;;  %v1874_v31 = vld [vmem:[#allocation11 + $0xf58] sm:$0xff]  ;;  %v1881_v33 = vld [vmem:[#allocation11 + $0xf90] sm:$0xff]  ;;  %v1428_v34 = vld [vmem:[#allocation11 + $0x168] sm:$0xff] }
 0x21d   :  { %5749 = vmatpush1.bf16.msra.mxu1 %v5748_v43  ;;  %v1386_v43 = vld [vmem:[#allocation11 + $0x18] sm:$0xff] }
 0x21e   :  { %5751 = vmatprep.subr.bf16.mxu1 %v5750_v44  ;;  %5845 = vmatpush1.bf16.msra.mxu0 %v5844_v48  ;;  %v1393_v44 = vld [vmem:[#allocation11 + $0x50] sm:$0xff]  ;;  %v7657_v48 = vsub.s32 2, %v7596_v23  ;;  %v1470_v16 = vld [vmem:[#allocation11 + $0x2b8] sm:$0xff] }
 0x21f   :  { %5847 = vmatprep.subr.bf16.mxu0 %v5846_v50  ;;  %v6138_v46 = vpack.c.bf16 %v1393_v44, %v1386_v43  ;;  %v7662_v50 = vsub.s32 1, %v7596_v23  ;;  %v1880_v43 = vld [vmem:[#allocation11 + $0xf88] sm:$0xff]  ;;  %v5862_v44 = vpack.c.bf16 %v1881_v33, %v1874_v31  ;;  %v1491_v33 = vld [vmem:[#allocation11 + $0x360] sm:$0xff] }
 0x220   :  { %v820_v53 = vrot.slane %v7659_v49, %v7657_v48  ;;  %v1484_v31 = vld [vmem:[#allocation11 + $0x328] sm:$0xff] }
 0x221   :  { %5753 = vmatpush1.bf16.msra.mxu1 %v5752_v63  ;;  %v816_v54 = vrot.slane %v7659_v49, %v7662_v50  ;;  %v824_v63 = vrot.slane %v7659_v49, %v7665_v51 }
 0x222   :  { %5755 = vmatprep.subr.bf16.mxu1 %v5754_v39  ;;  %5849 = vmatpush1.bf16.msra.mxu0 %v5848_v36 }
 0x223   :  { %5851 = vmatprep.subr.bf16.mxu0 %v5850_v58 }
 0x225   :  { %5757 = vmatpush1.bf16.msra.mxu1 %v5756_v59  ;;  %v1838_v59 = vld [vmem:[#allocation11 + $0xe38] sm:$0xff] }
 0x226   :  { %5759 = vmatprep.subr.bf16.mxu1 %v5758_v60  ;;  %v1385_v60 = vld [vmem:[#allocation11 + $0x10] sm:$0xff]  ;;  %v5852_v7 = vpack.c.bf16 %v1838_v59, %v1831_v35 }
 0x227   :  { %v1441_v59 = vld [vmem:[#allocation11 + $0x1d0] sm:$0xff] }
 0x229   :  { %5761 = vmatpush1.bf16.msra.mxu1 %v5760_v2  ;;  %v1853_v2 = vld [vmem:[#allocation11 + $0xeb0] sm:$0xff] }
 0x22a   :  { %5763 = vmatprep.subr.bf16.mxu1 %v5762_v3  ;;  %v1400_v3 = vld [vmem:[#allocation11 + $0x88] sm:$0xff]  ;;  %v5854_v13 = vpack.c.bf16 %v1853_v2, %v1846_v1  ;;  %v1463_v1 = vld [vmem:[#allocation11 + $0x280] sm:$0xff] }
 0x22b   :  { %v6142_v17 = vpack.c.bf16 %v1407_v4, %v1400_v3  ;;  %v1901_v4 = vld [vmem:[#allocation11 + $0x1030] sm:$0xff] }
 0x22d   :  { %5765 = vmatpush1.bf16.msra.mxu1 %v5764_v8  ;;  %v6140_v8 = vpack.c.bf16 %v1392_v61, %v1385_v60  ;;  %v1448_v60 = vld [vmem:[#allocation11 + $0x208] sm:$0xff]  ;;  %v1902_v61 = vld [vmem:[#allocation11 + $0x1038] sm:$0xff] }
 0x22e   :  { %5767 = vmatprep.subr.bf16.mxu1 %v5766_v9  ;;  %v1845_v9 = vld [vmem:[#allocation11 + $0xe70] sm:$0xff]  ;;  %v6156_v3 = vpack.c.bf16 %v1448_v60, %v1441_v59 }
 0x231   :  { %5769 = vmatpush1.bf16.msra.mxu1 %v5768_v14  ;;  %v1399_v14 = vld [vmem:[#allocation11 + $0x80] sm:$0xff] }
 0x232   :  { %5771 = vmatprep.subr.bf16.mxu1 %v5770_v15  ;;  %v1406_v15 = vld [vmem:[#allocation11 + $0xb8] sm:$0xff] }
 0x233   :  { %v6144_v22 = vpack.c.bf16 %v1406_v15, %v1399_v14  ;;  %v1916_v14 = vld [vmem:[#allocation11 + $0x10a8] sm:$0xff]  ;;  %v1923_v15 = vld [vmem:[#allocation11 + $0x10e0] sm:$0xff] }
 0x235   :  { %5773 = vmatpush1.bf16.msra.mxu1 %v5772_v20  ;;  %v1421_v20 = vld [vmem:[#allocation11 + $0x130] sm:$0xff] }
 0x236   :  { %5775 = vmatprep.subr.bf16.mxu1 %v5774_v21  ;;  %v5856_v21 = vpack.c.bf16 %v1852_v10, %v1845_v9  ;;  %v1455_v10 = vld [vmem:[#allocation11 + $0x240] sm:$0xff] }
 0x239   :  { %5777 = vmatpush1.bf16.msra.mxu1 %v5776_v27  ;;  %v6146_v27 = vpack.c.bf16 %v1421_v20, %v1414_v19  ;;  %v1915_v20 = vld [vmem:[#allocation11 + $0x10a0] sm:$0xff] }
 0x23a   :  { %5779 = vmatprep.subr.bf16.mxu1 %v5778_v28  ;;  %v1413_v28 = vld [vmem:[#allocation11 + $0xf0] sm:$0xff] }
 0x23b   :  { %v6148_v41 = vpack.c.bf16 %v1420_v29, %v1413_v28  ;;  %v831_v28 = vsub.s32 5, %v7596_v23  ;;  %v1937_v29 = vld [vmem:[#allocation11 + $0x1150] sm:$0xff] }
 0x23d   :  { %5781 = vmatpush1.bf16.msra.mxu1 %v5780_v37  ;;  %v1435_v37 = vld [vmem:[#allocation11 + $0x1a0] sm:$0xff] }
 0x23e   :  { %5783 = vmatprep.subr.bf16.mxu1 %v5782_v38  ;;  %v5860_v38 = vpack.c.bf16 %v1866_v25, %v1859_v24  ;;  %v1469_v25 = vld [vmem:[#allocation11 + $0x2b0] sm:$0xff] }
 0x241   :  { %5785 = vmatpush1.bf16.msra.mxu1 %v5784_v45  ;;  %v6150_v45 = vpack.c.bf16 %v1435_v37, %v1428_v34 }
 0x242   :  { %6139 = vmatprep.subr.bf16.mxu1 %v6138_v46  ;;  %v1427_v46 = vld [vmem:[#allocation11 + $0x160] sm:$0xff] }
 0x277   :  { %v940_v39 = vpop.f32.mrb[6].mxu1  ;;  %v1011_v55 = vpop.f32.mrb[2].mxu0 }
 0x278   :  { %v941_v36 = vadd.f32 %v940_v39, %v812_v52  ;;  %v1012_v56 = vadd.f32 %v1011_v55, %v820_v53  ;;  %v942_v57 = vpop.f32.mrb[7].mxu1  ;;  %v1013_v58 = vpop.f32.mrb[3].mxu0  ;;  %v1434_v52 = vld [vmem:[#allocation11 + $0x198] sm:$0xff]  ;;  %v1888_v53 = vld [vmem:[#allocation11 + $0xfc8] sm:$0xff]  ;;  %v1449_v39 = vld [vmem:[#allocation11 + $0x210] sm:$0xff]  ;;  %v5864_v55 = vpack.c.bf16 %v1880_v43, %v1873_v42  ;;  %v6166_v43 = vpack.c.bf16 %v1491_v33, %v1484_v31 }
 0x279   :  { %v943_v62 = vadd.f32 %v942_v57, %v816_v54  ;;  %v1014_v0 = vadd.f32 %v1013_v58, %v824_v63  ;;  %v1895_v54 = vld [vmem:[#allocation11 + $0x1000] sm:$0xff]  ;;  %v1442_v63 = vld [vmem:[#allocation11 + $0x1d8] sm:$0xff]  ;;  %v6152_v35 = vpack.c.bf16 %v1434_v52, %v1427_v46  ;;  %v1944_v46 = vld [vmem:[#allocation11 + $0x1188] sm:$0xff]  ;;  %v832_v52 = vrot.slane %v7659_v49, %v831_v28 }
 0x27a   :  { %v7679_v11 = vmax.f32 %v941_v36, 0.0  ;;  %v7681_v12 = vmax.f32 %v1012_v56, 0.0  ;;  %v1887_v36 = vld [vmem:[#allocation11 + $0xfc0] sm:$0xff]  ;;  %v1894_v56 = vld [vmem:[#allocation11 + $0xff8] sm:$0xff]  ;;  %v5866_v57 = vpack.c.bf16 %v1895_v54, %v1888_v53  ;;  %v6154_v58 = vpack.c.bf16 %v1449_v39, %v1442_v63  ;;  %v1505_v63 = vld [vmem:[#allocation11 + $0x3d0] sm:$0xff] }
 0x27b   :  { %v7675_v5 = vmax.f32 %v943_v62, 0.0  ;;  %v7677_v6 = vmax.f32 %v1014_v0, 0.0  ;;  %v1909_v62 = vld [vmem:[#allocation11 + $0x1070] sm:$0xff]  ;;  %v1456_v0 = vld [vmem:[#allocation11 + $0x248] sm:$0xff]  ;;  %v5868_v2 = vpack.c.bf16 %v1894_v56, %v1887_v36  ;;  %v1951_v53 = vld [vmem:[#allocation11 + $0x11c0] sm:$0xff] }
 0x27c   :  { %v6158_v9 = vpack.c.bf16 %v1463_v1, %v1456_v0  ;;  %v1498_v54 = vld [vmem:[#allocation11 + $0x398] sm:$0xff]  ;;  %v1943_v56 = vld [vmem:[#allocation11 + $0x1180] sm:$0xff]  ;;  %v5882_v60 = vpack.c.bf16 %v1951_v53, %v1944_v46  ;;  %v1504_v0 = vld [vmem:[#allocation11 + $0x3c8] sm:$0xff] }
 0x27d   :  { %2940 = vmatprep.mubr.f32.mxu1 %v7675_v5  ;;  %3011 = vmatprep.mubr.f32.mxu0 %v7677_v6  ;;  %v1958_v1 = vld [vmem:[#allocation11 + $0x11f8] sm:$0xff]  ;;  %v1525_v33 = vld [vmem:[#allocation11 + $0x470] sm:$0xff]  ;;  %v1992_v46 = vld [vmem:[#allocation11 + $0x1308] sm:$0xff] }
 0x27e   :  { %2941 = vmatmul.mubr.f32.vlgmr.msra.gmra.mrb[14].mxu1 %v7679_v11  ;;  %3012 = vmatmul.mubr.f32.vlgmr.msra.gmra.mrb[8].mxu0 %v7681_v12 }
 0x27f   :  { %5853 = vmatpush1.bf16.msra.mxu0 %v5852_v7  ;;  %6141 = vmatpush1.bf16.msra.mxu1 %v6140_v8  ;;  %v1908_v7 = vld [vmem:[#allocation11 + $0x1068] sm:$0xff]  ;;  %v5870_v8 = vpack.c.bf16 %v1909_v62, %v1902_v61  ;;  %v6170_v61 = vpack.c.bf16 %v1505_v63, %v1498_v54  ;;  %v1497_v62 = vld [vmem:[#allocation11 + $0x390] sm:$0xff]  ;;  %v1539_v54 = vld [vmem:[#allocation11 + $0x4e0] sm:$0xff] }
 0x280   :  { %3437 = vmatprep.mubr.f32.mxu1 %v7675_v5  ;;  %5855 = vmatprep.subr.bf16.mxu0 %v5854_v13  ;;  %v1462_v13 = vld [vmem:[#allocation11 + $0x278] sm:$0xff]  ;;  %v5872_v18 = vpack.c.bf16 %v1908_v7, %v1901_v4  ;;  %v1512_v4 = vld [vmem:[#allocation11 + $0x408] sm:$0xff]  ;;  %v1519_v7 = vld [vmem:[#allocation11 + $0x440] sm:$0xff] }
 0x281   :  { %6143 = vmatprep.subr.bf16.mxu1 %v6142_v17  ;;  %v1477_v17 = vld [vmem:[#allocation11 + $0x2f0] sm:$0xff]  ;;  %v6160_v19 = vpack.c.bf16 %v1462_v13, %v1455_v10  ;;  %v6172_v10 = vpack.c.bf16 %v1504_v0, %v1497_v62  ;;  %v1546_v63 = vld [vmem:[#allocation11 + $0x518] sm:$0xff] }
 0x282   :  { %v6162_v24 = vpack.c.bf16 %v1477_v17, %v1470_v16  ;;  %v1957_v13 = vld [vmem:[#allocation11 + $0x11f0] sm:$0xff]  ;;  %v6174_v16 = vpack.c.bf16 %v1519_v7, %v1512_v4  ;;  %v1511_v17 = vld [vmem:[#allocation11 + $0x400] sm:$0xff]  ;;  %v2006_v62 = vld [vmem:[#allocation11 + $0x1378] sm:$0xff] }
 0x283   :  { %5857 = vmatpush1.bf16.msra.mxu0 %v5856_v21  ;;  %6145 = vmatpush1.bf16.msra.mxu1 %v6144_v22  ;;  %v1922_v21 = vld [vmem:[#allocation11 + $0x10d8] sm:$0xff]  ;;  %v5874_v22 = vpack.c.bf16 %v1923_v15, %v1916_v14  ;;  %v1964_v14 = vld [vmem:[#allocation11 + $0x1228] sm:$0xff]  ;;  %v2021_v7 = vld [vmem:[#allocation11 + $0x13f0] sm:$0xff] }
 0x284   :  { %5859 = vmatprep.subr.bf16.mxu0 %v5858_v26  ;;  %6147 = vmatprep.subr.bf16.mxu1 %v6146_v27  ;;  %v1476_v26 = vld [vmem:[#allocation11 + $0x2e8] sm:$0xff]  ;;  %v1930_v27 = vld [vmem:[#allocation11 + $0x1118] sm:$0xff]  ;;  %v5876_v34 = vpack.c.bf16 %v1922_v21, %v1915_v20  ;;  %v1979_v20 = vld [vmem:[#allocation11 + $0x12a0] sm:$0xff] }
 0x285   :  { %v6164_v37 = vpack.c.bf16 %v1476_v26, %v1469_v25  ;;  %v5878_v42 = vpack.c.bf16 %v1937_v29, %v1930_v27  ;;  %v1526_v21 = vld [vmem:[#allocation11 + $0x478] sm:$0xff]  ;;  %v1971_v26 = vld [vmem:[#allocation11 + $0x1260] sm:$0xff] }
 0x286   :  { %v1978_v27 = vld [vmem:[#allocation11 + $0x1298] sm:$0xff] }
 0x287   :  { %5861 = vmatpush1.bf16.msra.mxu0 %v5860_v38  ;;  %6149 = vmatpush1.bf16.msra.mxu1 %v6148_v41  ;;  %v1929_v38 = vld [vmem:[#allocation11 + $0x1110] sm:$0xff]  ;;  %v1936_v41 = vld [vmem:[#allocation11 + $0x1148] sm:$0xff]  ;;  %v2014_v4 = vld [vmem:[#allocation11 + $0x13b8] sm:$0xff] }
 0x288   :  { %5863 = vmatprep.subr.bf16.mxu0 %v5862_v44  ;;  %6151 = vmatprep.subr.bf16.mxu1 %v6150_v45  ;;  %v1483_v44 = vld [vmem:[#allocation11 + $0x320] sm:$0xff]  ;;  %v1490_v45 = vld [vmem:[#allocation11 + $0x358] sm:$0xff] }
 0x289   :  { %v6168_v36 = vpack.c.bf16 %v1490_v45, %v1483_v44  ;;  %v1985_v45 = vld [vmem:[#allocation11 + $0x12d0] sm:$0xff] }
 0x28b   :  { %5865 = vmatpush1.bf16.msra.mxu0 %v5864_v55  ;;  %6153 = vmatpush1.bf16.msra.mxu1 %v6152_v35  ;;  %v5880_v35 = vpack.c.bf16 %v1936_v41, %v1929_v38  ;;  %v1993_v38 = vld [vmem:[#allocation11 + $0x1310] sm:$0xff]  ;;  %v1540_v41 = vld [vmem:[#allocation11 + $0x4e8] sm:$0xff] }
 0x28c   :  { %5867 = vmatprep.subr.bf16.mxu0 %v5866_v57  ;;  %6155 = vmatprep.subr.bf16.mxu1 %v6154_v58  ;;  %v1950_v57 = vld [vmem:[#allocation11 + $0x11b8] sm:$0xff] }
 0x28f   :  { %5869 = vmatpush1.bf16.msra.mxu0 %v5868_v2  ;;  %6157 = vmatpush1.bf16.msra.mxu1 %v6156_v3  ;;  %v1965_v3 = vld [vmem:[#allocation11 + $0x1230] sm:$0xff] }
 0x290   :  { %5871 = vmatprep.subr.bf16.mxu0 %v5870_v8  ;;  %6159 = vmatprep.subr.bf16.mxu1 %v6158_v9  ;;  %v5884_v9 = vpack.c.bf16 %v1950_v57, %v1943_v56  ;;  %v5886_v15 = vpack.c.bf16 %v1965_v3, %v1958_v1  ;;  %v1554_v56 = vld [vmem:[#allocation11 + $0x558] sm:$0xff]  ;;  %v1561_v57 = vld [vmem:[#allocation11 + $0x590] sm:$0xff]  ;;  %v1560_v3 = vld [vmem:[#allocation11 + $0x588] sm:$0xff] }
 0x291   :  { %v6186_v1 = vpack.c.bf16 %v1561_v57, %v1554_v56  ;;  %v1595_v56 = vld [vmem:[#allocation11 + $0x6a0] sm:$0xff] }
 0x293   :  { %5873 = vmatpush1.bf16.msra.mxu0 %v5872_v18  ;;  %6161 = vmatpush1.bf16.msra.mxu1 %v6160_v19  ;;  %v1518_v18 = vld [vmem:[#allocation11 + $0x438] sm:$0xff]  ;;  %v1972_v19 = vld [vmem:[#allocation11 + $0x1268] sm:$0xff] }
 0x294   :  { %5875 = vmatprep.subr.bf16.mxu0 %v5874_v22  ;;  %6163 = vmatprep.subr.bf16.mxu1 %v6162_v24  ;;  %v1533_v22 = vld [vmem:[#allocation11 + $0x4b0] sm:$0xff]  ;;  %v5888_v24 = vpack.c.bf16 %v1964_v14, %v1957_v13  ;;  %v6176_v25 = vpack.c.bf16 %v1518_v18, %v1511_v17  ;;  %v5890_v29 = vpack.c.bf16 %v1979_v20, %v1972_v19  ;;  %v1567_v19 = vld [vmem:[#allocation11 + $0x5c0] sm:$0xff]  ;;  %v1574_v20 = vld [vmem:[#allocation11 + $0x5f8] sm:$0xff] }
 0x295   :  { %v6178_v31 = vpack.c.bf16 %v1533_v22, %v1526_v21  ;;  %v5902_v17 = vpack.c.bf16 %v2021_v7, %v2014_v4  ;;  %v2028_v21 = vld [vmem:[#allocation11 + $0x1428] sm:$0xff]  ;;  %v2035_v22 = vld [vmem:[#allocation11 + $0x1460] sm:$0xff]  ;;  %v1617_v4 = vld [vmem:[#allocation11 + $0x750] sm:$0xff] }
 0x297   :  { %v7692_v39 = vpop.f32.mrb[8].mxu1  ;;  %v7694_v55 = vpop.f32.mrb[4].mxu0  ;;  %5877 = vmatpush1.bf16.msra.mxu0 %v5876_v34  ;;  %6165 = vmatpush1.bf16.msra.mxu1 %v6164_v37  ;;  %v1532_v34 = vld [vmem:[#allocation11 + $0x4a8] sm:$0xff]  ;;  %v1986_v37 = vld [vmem:[#allocation11 + $0x12d8] sm:$0xff] }
 0x298   :  { %v1084_v58 = vpop.f32.mrb[9].mxu1  ;;  %v7696_v59 = vpop.f32.mrb[5].mxu0  ;;  %5879 = vmatprep.subr.bf16.mxu0 %v5878_v42  ;;  %6167 = vmatprep.subr.bf16.mxu1 %v6166_v43  ;;  %v1547_v42 = vld [vmem:[#allocation11 + $0x520] sm:$0xff]  ;;  %v5892_v43 = vpack.c.bf16 %v1978_v27, %v1971_v26  ;;  %v6180_v44 = vpack.c.bf16 %v1532_v34, %v1525_v33  ;;  %v7702_v26 = vsub.s32 4, %v7596_v23  ;;  %v2034_v34 = vld [vmem:[#allocation11 + $0x1458] sm:$0xff] }
 0x299   :  { %v1085_v2 = vadd.f32 %v1084_v58, %v832_v52  ;;  %v5894_v52 = vpack.c.bf16 %v1993_v38, %v1986_v37  ;;  %v6182_v53 = vpack.c.bf16 %v1547_v42, %v1540_v41  ;;  %v5896_v58 = vpack.c.bf16 %v1992_v46, %v1985_v45  ;;  %v2027_v33 = vld [vmem:[#allocation11 + $0x1420] sm:$0xff]  ;;  %v1581_v41 = vld [vmem:[#allocation11 + $0x630] sm:$0xff]  ;;  %v1588_v42 = vld [vmem:[#allocation11 + $0x668] sm:$0xff] }
 0x29a   :  { %v5906_v37 = vpack.c.bf16 %v2035_v22, %v2028_v21  ;;  %v2049_v45 = vld [vmem:[#allocation11 + $0x14d0] sm:$0xff]  ;;  %v1596_v46 = vld [vmem:[#allocation11 + $0x6a8] sm:$0xff] }
 0x29b   :  { %v7698_v8 = vmax.f32 %v1085_v2, 0.0  ;;  %5881 = vmatpush1.bf16.msra.mxu0 %v5880_v35  ;;  %6169 = vmatpush1.bf16.msra.mxu1 %v6168_v36  ;;  %v2000_v35 = vld [vmem:[#allocation11 + $0x1348] sm:$0xff]  ;;  %v2007_v36 = vld [vmem:[#allocation11 + $0x1380] sm:$0xff]  ;;  %v1553_v2 = vld [vmem:[#allocation11 + $0x550] sm:$0xff] }
 0x29c   :  { %5883 = vmatprep.subr.bf16.mxu0 %v5882_v60  ;;  %6171 = vmatprep.subr.bf16.mxu1 %v6170_v61  ;;  %v6184_v60 = vpack.c.bf16 %v1546_v63, %v1539_v54  ;;  %v1999_v61 = vld [vmem:[#allocation11 + $0x1340] sm:$0xff]  ;;  %v5898_v0 = vpack.c.bf16 %v2007_v36, %v2000_v35  ;;  %v6188_v14 = vpack.c.bf16 %v1560_v3, %v1553_v2  ;;  %v2041_v35 = vld [vmem:[#allocation11 + $0x1490] sm:$0xff]  ;;  %v2048_v36 = vld [vmem:[#allocation11 + $0x14c8] sm:$0xff] }
 0x29d   :  { %3082 = vmatprep.mubr.f32.mxu0 %v7698_v8  ;;  %v5900_v13 = vpack.c.bf16 %v2006_v62, %v1999_v61  ;;  %v5908_v54 = vpack.c.bf16 %v2034_v34, %v2027_v33  ;;  %v6196_v63 = vpack.c.bf16 %v1588_v42, %v1581_v41  ;;  %v1602_v61 = vld [vmem:[#allocation11 + $0x6d8] sm:$0xff]  ;;  %v2056_v62 = vld [vmem:[#allocation11 + $0x1508] sm:$0xff]  ;;  %v2069_v41 = vld [vmem:[#allocation11 + $0x1570] sm:$0xff] }
 0x29e   :  { %v1610_v3 = vld [vmem:[#allocation11 + $0x718] sm:$0xff]  ;;  %v1624_v33 = vld [vmem:[#allocation11 + $0x788] sm:$0xff] }
 0x29f   :  { %5885 = vmatpush1.bf16.msra.mxu0 %v5884_v9  ;;  %6173 = vmatpush1.bf16.msra.mxu1 %v6172_v10  ;;  %v1568_v9 = vld [vmem:[#allocation11 + $0x5c8] sm:$0xff]  ;;  %v1575_v10 = vld [vmem:[#allocation11 + $0x600] sm:$0xff] }
 0x2a0   :  { %5887 = vmatprep.subr.bf16.mxu0 %v5886_v15  ;;  %6175 = vmatprep.subr.bf16.mxu1 %v6174_v16  ;;  %v2013_v15 = vld [vmem:[#allocation11 + $0x13b0] sm:$0xff]  ;;  %v2020_v16 = vld [vmem:[#allocation11 + $0x13e8] sm:$0xff]  ;;  %v6190_v18 = vpack.c.bf16 %v1575_v10, %v1568_v9  ;;  %v5912_v10 = vpack.c.bf16 %v2048_v36, %v2041_v35 }
 0x2a1   :  { %v5904_v27 = vpack.c.bf16 %v2020_v16, %v2013_v15  ;;  %v2076_v42 = vld [vmem:[#allocation11 + $0x15a8] sm:$0xff] }
 0x2a2   :  { %v5920_v35 = vpack.c.bf16 %v2076_v42, %v2069_v41  ;;  %v1672_v41 = vld [vmem:[#allocation11 + $0x908] sm:$0xff]  ;;  %v2126_v42 = vld [vmem:[#allocation11 + $0x1738] sm:$0xff] }
 0x2a3   :  { %5889 = vmatpush1.bf16.msra.mxu0 %v5888_v24  ;;  %6177 = vmatpush1.bf16.msra.mxu1 %v6176_v25  ;;  %v1582_v24 = vld [vmem:[#allocation11 + $0x638] sm:$0xff]  ;;  %v1589_v25 = vld [vmem:[#allocation11 + $0x670] sm:$0xff] }
 0x2a4   :  { %5891 = vmatprep.subr.bf16.mxu0 %v5890_v29  ;;  %6179 = vmatprep.subr.bf16.mxu1 %v6178_v31  ;;  %v6192_v29 = vpack.c.bf16 %v1574_v20, %v1567_v19  ;;  %v7704_v31 = vld [vmem:[#allocation10 + $0x8] sm:$0x1f]  ;;  %v6194_v38 = vpack.c.bf16 %v1589_v25, %v1582_v24  ;;  %v2055_v19 = vld [vmem:[#allocation11 + $0x1500] sm:$0xff]  ;;  %v1609_v24 = vld [vmem:[#allocation11 + $0x710] sm:$0xff] }
 0x2a5   :  { %v852_v57 = vrot.slane %v7704_v31, %v7657_v48  ;;  %v856_v2 = vrot.slane %v7704_v31, %v7665_v51  ;;  %v2062_v20 = vld [vmem:[#allocation11 + $0x1538] sm:$0xff]  ;;  %v1616_v25 = vld [vmem:[#allocation11 + $0x748] sm:$0xff] }
 0x2a6   :  { %v5916_v34 = vpack.c.bf16 %v2062_v20, %v2055_v19  ;;  %v2112_v19 = vld [vmem:[#allocation11 + $0x16c8] sm:$0xff]  ;;  %v2119_v20 = vld [vmem:[#allocation11 + $0x1700] sm:$0xff] }
 0x2a7   :  { %5893 = vmatpush1.bf16.msra.mxu0 %v5892_v43  ;;  %6181 = vmatpush1.bf16.msra.mxu1 %v6180_v44  ;;  %v2042_v43 = vld [vmem:[#allocation11 + $0x1498] sm:$0xff]  ;;  %v839_v44 = vsub.s32 7, %v7596_v23 }
 0x2a8   :  { %5895 = vmatprep.subr.bf16.mxu0 %v5894_v52  ;;  %6183 = vmatprep.subr.bf16.mxu1 %v6182_v53  ;;  %v1603_v52 = vld [vmem:[#allocation11 + $0x6e0] sm:$0xff]  ;;  %v828_v53 = vrot.slane %v7659_v49, %v7702_v26 }
 0x2aa   :  { %v1083_v15 = vadd.f32 %v7692_v39, %v828_v53  ;;  %v1631_v39 = vld [vmem:[#allocation11 + $0x7c0] sm:$0xff] }
 0x2ab   :  { %5897 = vmatpush1.bf16.msra.mxu0 %v5896_v58  ;;  %6185 = vmatpush1.bf16.msra.mxu1 %v6184_v60  ;;  %v5910_v58 = vpack.c.bf16 %v2049_v45, %v2042_v43  ;;  %v6198_v60 = vpack.c.bf16 %v1603_v52, %v1596_v46  ;;  %v1623_v43 = vld [vmem:[#allocation11 + $0x780] sm:$0xff]  ;;  %v6206_v45 = vpack.c.bf16 %v1631_v39, %v1624_v33  ;;  %v1630_v46 = vld [vmem:[#allocation11 + $0x7b8] sm:$0xff]  ;;  %v2084_v52 = vld [vmem:[#allocation11 + $0x15e8] sm:$0xff] }
 0x2ac   :  { %5899 = vmatprep.subr.bf16.mxu0 %v5898_v0  ;;  %6187 = vmatprep.subr.bf16.mxu1 %v6186_v1  ;;  %v2063_v0 = vld [vmem:[#allocation11 + $0x1540] sm:$0xff]  ;;  %v840_v1 = vrot.slane %v7659_v49, %v839_v44  ;;  %v6208_v36 = vpack.c.bf16 %v1630_v46, %v1623_v43  ;;  %v2118_v39 = vld [vmem:[#allocation11 + $0x16f8] sm:$0xff]  ;;  %v2133_v43 = vld [vmem:[#allocation11 + $0x1770] sm:$0xff] }
 0x2ad   :  { %v2091_v53 = vld [vmem:[#allocation11 + $0x1620] sm:$0xff] }
 0x2ae   :  { %v1156_v21 = vadd.f32 %v7696_v59, %v840_v1  ;;  %v2105_v1 = vld [vmem:[#allocation11 + $0x1690] sm:$0xff]  ;;  %v2111_v33 = vld [vmem:[#allocation11 + $0x16c0] sm:$0xff] }
 0x2af   :  { %5901 = vmatpush1.bf16.msra.mxu0 %v5900_v13  ;;  %6189 = vmatpush1.bf16.msra.mxu1 %v6188_v14  ;;  %v6200_v13 = vpack.c.bf16 %v1602_v61, %v1595_v56  ;;  %v5914_v14 = vpack.c.bf16 %v2063_v0, %v2056_v62  ;;  %v5922_v56 = vpack.c.bf16 %v2091_v53, %v2084_v52  ;;  %v1644_v62 = vld [vmem:[#allocation11 + $0x828] sm:$0xff]  ;;  %v2098_v0 = vld [vmem:[#allocation11 + $0x1658] sm:$0xff] }
 0x2b0   :  { %5903 = vmatprep.subr.bf16.mxu0 %v5902_v17  ;;  %6191 = vmatprep.subr.bf16.mxu1 %v6190_v18  ;;  %v6202_v18 = vpack.c.bf16 %v1617_v4, %v1610_v3  ;;  %v7726_v59 = vmax.f32 %v1156_v21, 0.0  ;;  %v1659_v3 = vld [vmem:[#allocation11 + $0x8a0] sm:$0xff]  ;;  %v1666_v21 = vld [vmem:[#allocation11 + $0x8d8] sm:$0xff]  ;;  %v5932_v46 = vpack.c.bf16 %v2118_v39, %v2111_v33  ;;  %v5934_v53 = vpack.c.bf16 %v2133_v43, %v2126_v42  ;;  %v2168_v39 = vld [vmem:[#allocation11 + $0x1888] sm:$0xff] }
 0x2b1   :  { %v1714_v33 = vld [vmem:[#allocation11 + $0xa58] sm:$0xff] }
 0x2b3   :  { %5905 = vmatpush1.bf16.msra.mxu0 %v5904_v27  ;;  %6193 = vmatpush1.bf16.msra.mxu1 %v6192_v29  ;;  %v2070_v27 = vld [vmem:[#allocation11 + $0x1578] sm:$0xff]  ;;  %v2077_v29 = vld [vmem:[#allocation11 + $0x15b0] sm:$0xff] }
 0x2b4   :  { %5907 = vmatprep.subr.bf16.mxu0 %v5906_v37  ;;  %6195 = vmatprep.subr.bf16.mxu1 %v6194_v38  ;;  %v7724_v37 = vmax.f32 %v1083_v15, 0.0  ;;  %v6204_v38 = vpack.c.bf16 %v1616_v25, %v1609_v24  ;;  %v5918_v44 = vpack.c.bf16 %v2077_v29, %v2070_v27  ;;  %v1651_v15 = vld [vmem:[#allocation11 + $0x860] sm:$0xff]  ;;  %v1673_v24 = vld [vmem:[#allocation11 + $0x910] sm:$0xff]  ;;  %v5930_v29 = vpack.c.bf16 %v2119_v20, %v2112_v19 }
 0x2b5   :  { %v860_v19 = vrot.slane %v7704_v31, %v7702_v26 }
 0x2b7   :  { %v7714_v7 = vpop.f32.mrb[10].mxu1  ;;  %v1295_v9 = vpop.f32.mrb[6].mxu0  ;;  %5909 = vmatpush1.bf16.msra.mxu0 %v5908_v54  ;;  %6197 = vmatpush1.bf16.msra.mxu1 %v6196_v63  ;;  %v1638_v54 = vld [vmem:[#allocation11 + $0x7f8] sm:$0xff]  ;;  %v1645_v63 = vld [vmem:[#allocation11 + $0x830] sm:$0xff] }
 0x2b8   :  { %v7717_v16 = vadd.f32 %v1295_v9, %v852_v57  ;;  %v7719_v17 = vpop.f32.mrb[11].mxu1  ;;  %v1297_v49 = vpop.f32.mrb[7].mxu0  ;;  %5911 = vmatprep.subr.bf16.mxu0 %v5910_v58  ;;  %6199 = vmatprep.subr.bf16.mxu1 %v6198_v60  ;;  %v2083_v57 = vld [vmem:[#allocation11 + $0x15e0] sm:$0xff]  ;;  %v2090_v58 = vld [vmem:[#allocation11 + $0x1618] sm:$0xff]  ;;  %v1637_v60 = vld [vmem:[#allocation11 + $0x7f0] sm:$0xff]  ;;  %v6210_v61 = vpack.c.bf16 %v1645_v63, %v1638_v54 }
 0x2b9   :  { %v7722_v22 = vadd.f32 %v1297_v49, %v856_v2  ;;  %v1652_v2 = vld [vmem:[#allocation11 + $0x868] sm:$0xff]  ;;  %v5924_v4 = vpack.c.bf16 %v2090_v58, %v2083_v57  ;;  %v6212_v9 = vpack.c.bf16 %v1644_v62, %v1637_v60  ;;  %v2125_v54 = vld [vmem:[#allocation11 + $0x1730] sm:$0xff]  ;;  %v2147_v58 = vld [vmem:[#allocation11 + $0x17e0] sm:$0xff] }
 0x2ba   :  { %v6214_v49 = vpack.c.bf16 %v1659_v3, %v1652_v2  ;;  %v2132_v63 = vld [vmem:[#allocation11 + $0x1768] sm:$0xff]  ;;  %v1694_v60 = vld [vmem:[#allocation11 + $0x9b8] sm:$0xff]  ;;  %v2139_v2 = vld [vmem:[#allocation11 + $0x17a0] sm:$0xff] }
 0x2bb   :  { %5913 = vmatpush1.bf16.msra.mxu0 %v5912_v10  ;;  %6201 = vmatpush1.bf16.msra.mxu1 %v6200_v13  ;;  %v5926_v10 = vpack.c.bf16 %v2105_v1, %v2098_v0  ;;  %v2097_v13 = vld [vmem:[#allocation11 + $0x1650] sm:$0xff]  ;;  %v2140_v57 = vld [vmem:[#allocation11 + $0x17a8] sm:$0xff]  ;;  %v5936_v62 = vpack.c.bf16 %v2132_v63, %v2125_v54  ;;  %v2146_v3 = vld [vmem:[#allocation11 + $0x17d8] sm:$0xff] }
 0x2bc   :  { %5915 = vmatprep.subr.bf16.mxu0 %v5914_v14  ;;  %6203 = vmatprep.subr.bf16.mxu1 %v6202_v18  ;;  %v2104_v14 = vld [vmem:[#allocation11 + $0x1688] sm:$0xff]  ;;  %v1658_v18 = vld [vmem:[#allocation11 + $0x898] sm:$0xff]  ;;  %v5938_v1 = vpack.c.bf16 %v2147_v58, %v2140_v57  ;;  %v1721_v63 = vld [vmem:[#allocation11 + $0xa90] sm:$0xff] }
 0x2bd   :  { %v5928_v25 = vpack.c.bf16 %v2104_v14, %v2097_v13  ;;  %v6216_v27 = vpack.c.bf16 %v1658_v18, %v1651_v15  ;;  %v2154_v13 = vld [vmem:[#allocation11 + $0x1818] sm:$0xff]  ;;  %v2161_v14 = vld [vmem:[#allocation11 + $0x1850] sm:$0xff]  ;;  %v1708_v15 = vld [vmem:[#allocation11 + $0xa28] sm:$0xff]  ;;  %v5940_v18 = vpack.c.bf16 %v2146_v3, %v2139_v2 }
 0x2be   :  { %3083 = vmatmul.mubr.f32.vlgmr.msra.gmra.mrb[8].mxu0 %v7724_v37  ;;  %3438 = vmatmul.mubr.f32.vlgmr.msra.gmra.mrb[16].mxu1 %v7679_v11  ;;  %v2174_v54 = vld [vmem:[#allocation11 + $0x18b8] sm:$0xff]  ;;  %v2189_v57 = vld [vmem:[#allocation11 + $0x1930] sm:$0xff]  ;;  %v1736_v58 = vld [vmem:[#allocation11 + $0xb08] sm:$0xff] }
 0x2bf   :  { %5917 = vmatpush1.bf16.msra.mxu0 %v5916_v34  ;;  %3153 = vmatprep.mubr.f32.mxu0 %v7726_v59  ;;  %v1665_v34 = vld [vmem:[#allocation11 + $0x8d0] sm:$0xff]  ;;  %v2188_v2 = vld [vmem:[#allocation11 + $0x1928] sm:$0xff]  ;;  %v1735_v3 = vld [vmem:[#allocation11 + $0xb00] sm:$0xff] }
 0x2c0   :  { %6205 = vmatpush1.bf16.msra.mxu1 %v6204_v38  ;;  %3508 = vmatprep.mubr.f32.mxu1 %v7677_v6  ;;  %v6218_v38 = vpack.c.bf16 %v1673_v24, %v1666_v21  ;;  %v6220_v52 = vpack.c.bf16 %v1672_v41, %v1665_v34  ;;  %v5942_v21 = vpack.c.bf16 %v2161_v14, %v2154_v13  ;;  %v2153_v24 = vld [vmem:[#allocation11 + $0x1810] sm:$0xff]  ;;  %v2175_v34 = vld [vmem:[#allocation11 + $0x18c0] sm:$0xff]  ;;  %v1750_v14 = vld [vmem:[#allocation11 + $0xb78] sm:$0xff] }
 0x2c1   :  { %5919 = vmatprep.subr.bf16.mxu0 %v5918_v44  ;;  %6207 = vmatprep.subr.bf16.mxu1 %v6206_v45  ;;  %v1680_v44 = vld [vmem:[#allocation11 + $0x948] sm:$0xff]  ;;  %v1687_v45 = vld [vmem:[#allocation11 + $0x980] sm:$0xff]  ;;  %v1729_v41 = vld [vmem:[#allocation11 + $0xad0] sm:$0xff] }
 0x2c2   :  { %v2203_v13 = vld [vmem:[#allocation11 + $0x19a0] sm:$0xff] }
 0x2c3   :  { %5921 = vmatpush1.bf16.msra.mxu0 %v5920_v35  ;;  %v1679_v35 = vld [vmem:[#allocation11 + $0x940] sm:$0xff] }
 0x2c4   :  { %6209 = vmatpush1.bf16.msra.mxu1 %v6208_v36  ;;  %5923 = vmatprep.subr.bf16.mxu0 %v5922_v56  ;;  %v6222_v36 = vpack.c.bf16 %v1687_v45, %v1680_v44  ;;  %v1686_v56 = vld [vmem:[#allocation11 + $0x978] sm:$0xff] }
 0x2c5   :  { %6211 = vmatprep.subr.bf16.mxu1 %v6210_v61  ;;  %v1701_v61 = vld [vmem:[#allocation11 + $0x9f0] sm:$0xff]  ;;  %v6224_v0 = vpack.c.bf16 %v1686_v56, %v1679_v35  ;;  %v2182_v56 = vld [vmem:[#allocation11 + $0x18f8] sm:$0xff] }
 0x2c7   :  { %5925 = vmatpush1.bf16.msra.mxu0 %v5924_v4  ;;  %v1693_v4 = vld [vmem:[#allocation11 + $0x9b0] sm:$0xff] }
 0x2c8   :  { %6213 = vmatpush1.bf16.msra.mxu1 %v6212_v9  ;;  %5927 = vmatprep.subr.bf16.mxu0 %v5926_v10  ;;  %v6226_v9 = vpack.c.bf16 %v1701_v61, %v1694_v60  ;;  %v1700_v10 = vld [vmem:[#allocation11 + $0x9e8] sm:$0xff]  ;;  %v1743_v60 = vld [vmem:[#allocation11 + $0xb40] sm:$0xff] }
 0x2c9   :  { %6215 = vmatprep.subr.bf16.mxu1 %v6214_v49  ;;  %v1715_v49 = vld [vmem:[#allocation11 + $0xa60] sm:$0xff]  ;;  %v6228_v20 = vpack.c.bf16 %v1700_v10, %v1693_v4  ;;  %v6238_v4 = vpack.c.bf16 %v1743_v60, %v1736_v58  ;;  %v2196_v10 = vld [vmem:[#allocation11 + $0x1968] sm:$0xff] }
 0x2ca   :  { %v2223_v60 = vld [vmem:[#allocation11 + $0x1a40] sm:$0xff] }
 0x2cb   :  { %5929 = vmatpush1.bf16.msra.mxu0 %v5928_v25  ;;  %v2160_v25 = vld [vmem:[#allocation11 + $0x1848] sm:$0xff] }
 0x2cc   :  { %6217 = vmatpush1.bf16.msra.mxu1 %v6216_v27  ;;  %5931 = vmatprep.subr.bf16.mxu0 %v5930_v29  ;;  %v1707_v27 = vld [vmem:[#allocation11 + $0xa20] sm:$0xff]  ;;  %v6230_v29 = vpack.c.bf16 %v1715_v49, %v1708_v15  ;;  %v5944_v43 = vpack.c.bf16 %v2160_v25, %v2153_v24  ;;  %v1757_v15 = vld [vmem:[#allocation11 + $0xbb0] sm:$0xff] }
 0x2cd   :  { %6219 = vmatprep.subr.bf16.mxu1 %v6218_v38  ;;  %v1722_v38 = vld [vmem:[#allocation11 + $0xa98] sm:$0xff]  ;;  %v1749_v24 = vld [vmem:[#allocation11 + $0xb70] sm:$0xff]  ;;  %v6242_v25 = vpack.c.bf16 %v1757_v15, %v1750_v14 }
 0x2ce   :  { %v6234_v35 = vpack.c.bf16 %v1729_v41, %v1722_v38  ;;  %v2237_v15 = vld [vmem:[#allocation11 + $0x1ab0] sm:$0xff] }
 0x2cf   :  { %5933 = vmatpush1.bf16.msra.mxu0 %v5932_v46  ;;  %v6232_v46 = vpack.c.bf16 %v1714_v33, %v1707_v27  ;;  %v1756_v27 = vld [vmem:[#allocation11 + $0xba8] sm:$0xff]  ;;  %v2217_v33 = vld [vmem:[#allocation11 + $0x1a10] sm:$0xff] }
 0x2d0   :  { %6221 = vmatpush1.bf16.msra.mxu1 %v6220_v52  ;;  %5935 = vmatprep.subr.bf16.mxu0 %v5934_v53  ;;  %v5946_v52 = vpack.c.bf16 %v2175_v34, %v2168_v39  ;;  %v2167_v53 = vld [vmem:[#allocation11 + $0x1880] sm:$0xff]  ;;  %v1764_v39 = vld [vmem:[#allocation11 + $0xbe8] sm:$0xff]  ;;  %v6244_v41 = vpack.c.bf16 %v1756_v27, %v1749_v24  ;;  %v1813_v27 = vld [vmem:[#allocation11 + $0xd70] sm:$0xff] }
 0x2d1   :  { %6223 = vmatprep.subr.bf16.mxu1 %v6222_v36  ;;  %v1728_v36 = vld [vmem:[#allocation11 + $0xac8] sm:$0xff]  ;;  %v5948_v61 = vpack.c.bf16 %v2174_v54, %v2167_v53  ;;  %v1771_v34 = vld [vmem:[#allocation11 + $0xc20] sm:$0xff]  ;;  %v1770_v53 = vld [vmem:[#allocation11 + $0xc18] sm:$0xff] }
 0x2d2   :  { %v2224_v54 = vld [vmem:[#allocation11 + $0x1a48] sm:$0xff]  ;;  %v2259_v24 = vld [vmem:[#allocation11 + $0x1b60] sm:$0xff] }
 0x2d3   :  { %5937 = vmatpush1.bf16.msra.mxu0 %v5936_v62  ;;  %v6236_v62 = vpack.c.bf16 %v1728_v36, %v1721_v63  ;;  %v2231_v63 = vld [vmem:[#allocation11 + $0x1a80] sm:$0xff]  ;;  %v1785_v36 = vld [vmem:[#allocation11 + $0xc90] sm:$0xff] }
 0x2d4   :  { %6225 = vmatpush1.bf16.msra.mxu1 %v6224_v0  ;;  %5939 = vmatprep.subr.bf16.mxu0 %v5938_v1  ;;  %v5950_v0 = vpack.c.bf16 %v2189_v57, %v2182_v56  ;;  %v2181_v1 = vld [vmem:[#allocation11 + $0x18f0] sm:$0xff]  ;;  %v5962_v58 = vpack.c.bf16 %v2231_v63, %v2224_v54  ;;  %v1827_v54 = vld [vmem:[#allocation11 + $0xde0] sm:$0xff] }
 0x2d5   :  { %6227 = vmatprep.subr.bf16.mxu1 %v6226_v9  ;;  %v1742_v9 = vld [vmem:[#allocation11 + $0xb38] sm:$0xff]  ;;  %v5952_v49 = vpack.c.bf16 %v2188_v2, %v2181_v1  ;;  %v1784_v1 = vld [vmem:[#allocation11 + $0xc88] sm:$0xff] }
 0x2d6   :  { %v2238_v2 = vld [vmem:[#allocation11 + $0x1ab8] sm:$0xff] }
 0x2d7   :  { %v1366_v42 = vpop.f32.mrb[12].mxu1  ;;  %5941 = vmatpush1.bf16.msra.mxu0 %v5940_v18  ;;  %v6240_v18 = vpack.c.bf16 %v1742_v9, %v1735_v3  ;;  %v2245_v3 = vld [vmem:[#allocation11 + $0x1af0] sm:$0xff]  ;;  %v1799_v9 = vld [vmem:[#allocation11 + $0xd00] sm:$0xff] }
 0x2d8   :  { %v7734_v44 = vadd.f32 %v1366_v42, %v860_v19  ;;  %6229 = vmatpush1.bf16.msra.mxu1 %v6228_v20  ;;  %v5371_v45 = vpop.f32.mrb[13].mxu1  ;;  %5943 = vmatprep.subr.bf16.mxu0 %v5942_v21  ;;  %v5954_v19 = vpack.c.bf16 %v2203_v13, %v2196_v10  ;;  %v2195_v20 = vld [vmem:[#allocation11 + $0x1960] sm:$0xff]  ;;  %v2202_v21 = vld [vmem:[#allocation11 + $0x1998] sm:$0xff]  ;;  %v5966_v14 = vpack.c.bf16 %v2245_v3, %v2238_v2 }
 0x2d9   :  { %6231 = vmatprep.subr.bf16.mxu1 %v6230_v29  ;;  %v2210_v29 = vld [vmem:[#allocation11 + $0x19d8] sm:$0xff]  ;;  %v5956_v38 = vpack.c.bf16 %v2202_v21, %v2195_v20  ;;  %v2216_v45 = vld [vmem:[#allocation11 + $0x1a08] sm:$0xff]  ;;  %v2287_v2 = vld [vmem:[#allocation11 + $0x1c40] sm:$0xff]  ;;  %v848_v3 = vrot.slane %v7704_v31, %v7662_v50 }
 0x2da   :  { %v5958_v42 = vpack.c.bf16 %v2217_v33, %v2210_v29  ;;  %v1798_v20 = vld [vmem:[#allocation11 + $0xcf8] sm:$0xff]  ;;  %v2252_v21 = vld [vmem:[#allocation11 + $0x1b28] sm:$0xff]  ;;  %v835_v33 = vsub.s32 6, %v7596_v23  ;;  %v2301_v31 = vld [vmem:[#allocation11 + $0x1cb0] sm:$0xff] }
 0x2db   :  { %5945 = vmatpush1.bf16.msra.mxu0 %v5944_v43  ;;  %v2209_v43 = vld [vmem:[#allocation11 + $0x19d0] sm:$0xff] }
 0x2dc   :  { %6233 = vmatpush1.bf16.msra.mxu1 %v6232_v46  ;;  %5947 = vmatprep.subr.bf16.mxu0 %v5946_v52  ;;  %v1763_v46 = vld [vmem:[#allocation11 + $0xbe0] sm:$0xff]  ;;  %v6246_v52 = vpack.c.bf16 %v1771_v34, %v1764_v39  ;;  %v5960_v56 = vpack.c.bf16 %v2216_v45, %v2209_v43  ;;  %v5970_v34 = vpack.c.bf16 %v2259_v24, %v2252_v21  ;;  %v1812_v45 = vld [vmem:[#allocation11 + $0xd68] sm:$0xff] }
 0x2dd   :  { %6235 = vmatprep.subr.bf16.mxu1 %v6234_v35  ;;  %v1778_v35 = vld [vmem:[#allocation11 + $0xc58] sm:$0xff]  ;;  %v6248_v57 = vpack.c.bf16 %v1770_v53, %v1763_v46  ;;  %v1820_v53 = vld [vmem:[#allocation11 + $0xda8] sm:$0xff]  ;;  %v1227_v24 = vadd.f32 %v7719_v17, %v848_v3  ;;  %v1883_v3 = vld [vmem:[#allocation11 + $0xfa0] sm:$0xff] }
 0x2de   :  { %v2266_v46 = vld [vmem:[#allocation11 + $0x1b98] sm:$0xff]  ;;  %v1840_v21 = vld [vmem:[#allocation11 + $0xe48] sm:$0xff] }
 0x2df   :  { %5949 = vmatpush1.bf16.msra.mxu0 %v5948_v61  ;;  %v2230_v61 = vld [vmem:[#allocation11 + $0x1a78] sm:$0xff]  ;;  %v7745_v17 = vmax.f32 %v1227_v24, 0.0  ;;  %v1897_v24 = vld [vmem:[#allocation11 + $0x1010] sm:$0xff] }
 0x2e0   :  { %6237 = vmatpush1.bf16.msra.mxu1 %v6236_v62  ;;  %5951 = vmatprep.subr.bf16.mxu0 %v5950_v0  ;;  %v1777_v62 = vld [vmem:[#allocation11 + $0xc50] sm:$0xff]  ;;  %v6250_v0 = vpack.c.bf16 %v1785_v36, %v1778_v35  ;;  %v5964_v10 = vpack.c.bf16 %v2230_v61, %v2223_v60  ;;  %v2272_v60 = vld [vmem:[#allocation11 + $0x1bc8] sm:$0xff]  ;;  %v1819_v61 = vld [vmem:[#allocation11 + $0xda0] sm:$0xff] }
 0x2e1   :  { %6239 = vmatprep.subr.bf16.mxu1 %v6238_v4  ;;  %v1792_v4 = vld [vmem:[#allocation11 + $0xcc8] sm:$0xff]  ;;  %v6252_v13 = vpack.c.bf16 %v1784_v1, %v1777_v62  ;;  %v7260_v35 = vld [vmem:[#allocation10] sm:$0xff]  ;;  %v6262_v62 = vpack.c.bf16 %v1827_v54, %v1820_v53 }
 0x2e2   :  { %v836_v36 = vrot.slane %v7260_v35, %v835_v33  ;;  %v2280_v1 = vld [vmem:[#allocation11 + $0x1c08] sm:$0xff]  ;;  %v1862_v54 = vld [vmem:[#allocation11 + $0xef8] sm:$0xff] }
 0x2e3   :  { %5953 = vmatpush1.bf16.msra.mxu0 %v5952_v49  ;;  %v2244_v49 = vld [vmem:[#allocation11 + $0x1ae8] sm:$0xff] }
 0x2e4   :  { %6241 = vmatpush1.bf16.msra.mxu1 %v6240_v18  ;;  %5955 = vmatprep.subr.bf16.mxu0 %v5954_v19  ;;  %v1791_v18 = vld [vmem:[#allocation11 + $0xcc0] sm:$0xff]  ;;  %v6254_v19 = vpack.c.bf16 %v1799_v9, %v1792_v4  ;;  %v5968_v29 = vpack.c.bf16 %v2244_v49, %v2237_v15  ;;  %v1834_v4 = vld [vmem:[#allocation11 + $0xe18] sm:$0xff]  ;;  %v1841_v9 = vld [vmem:[#allocation11 + $0xe50] sm:$0xff]  ;;  %v5978_v15 = vpack.c.bf16 %v2287_v2, %v2280_v1 }
 0x2e5   :  { %6243 = vmatprep.subr.bf16.mxu1 %v6242_v25  ;;  %v1806_v25 = vld [vmem:[#allocation11 + $0xd38] sm:$0xff]  ;;  %v6256_v39 = vpack.c.bf16 %v1798_v20, %v1791_v18  ;;  %v2279_v49 = vld [vmem:[#allocation11 + $0x1c00] sm:$0xff]  ;;  %v1833_v20 = vld [vmem:[#allocation11 + $0xe10] sm:$0xff] }
 0x2e6   :  { %v6258_v43 = vpack.c.bf16 %v1813_v27, %v1806_v25  ;;  %v2286_v18 = vld [vmem:[#allocation11 + $0x1c38] sm:$0xff]  ;;  %v2329_v1 = vld [vmem:[#allocation11 + $0x1d90] sm:$0xff]  ;;  %v1876_v2 = vld [vmem:[#allocation11 + $0xf68] sm:$0xff] }
 0x2e7   :  { %5957 = vmatpush1.bf16.msra.mxu0 %v5956_v38  ;;  %v2251_v38 = vld [vmem:[#allocation11 + $0x1b20] sm:$0xff]  ;;  %v2294_v25 = vld [vmem:[#allocation11 + $0x1c78] sm:$0xff]  ;;  %v5980_v27 = vpack.c.bf16 %v2286_v18, %v2279_v49  ;;  %v6278_v49 = vpack.c.bf16 %v1883_v3, %v1876_v2 }
 0x2e8   :  { %6245 = vmatpush1.bf16.msra.mxu1 %v6244_v41  ;;  %5959 = vmatprep.subr.bf16.mxu0 %v5958_v42  ;;  %v2258_v41 = vld [vmem:[#allocation11 + $0x1b58] sm:$0xff]  ;;  %v1805_v42 = vld [vmem:[#allocation11 + $0xd30] sm:$0xff]  ;;  %v2363_v3 = vld [vmem:[#allocation11 + $0x1ea0] sm:$0xff] }
 0x2e9   :  { %6247 = vmatprep.subr.bf16.mxu1 %v6246_v52  ;;  %v2273_v52 = vld [vmem:[#allocation11 + $0x1bd0] sm:$0xff]  ;;  %v5972_v63 = vpack.c.bf16 %v2258_v41, %v2251_v38  ;;  %v2300_v41 = vld [vmem:[#allocation11 + $0x1ca8] sm:$0xff]  ;;  %v1882_v18 = vld [vmem:[#allocation11 + $0xf98] sm:$0xff] }
 0x2ea   :  { %v2293_v38 = vld [vmem:[#allocation11 + $0x1c70] sm:$0xff] }
 0x2eb   :  { %5961 = vmatpush1.bf16.msra.mxu0 %v5960_v56  ;;  %v6260_v56 = vpack.c.bf16 %v1812_v45, %v1805_v42  ;;  %v1847_v42 = vld [vmem:[#allocation11 + $0xe80] sm:$0xff]  ;;  %v1854_v45 = vld [vmem:[#allocation11 + $0xeb8] sm:$0xff]  ;;  %v5984_v35 = vpack.c.bf16 %v2300_v41, %v2293_v38  ;;  %v1896_v41 = vld [vmem:[#allocation11 + $0x1008] sm:$0xff] }
 0x2ec   :  { %6249 = vmatpush1.bf16.msra.mxu1 %v6248_v57  ;;  %5963 = vmatprep.subr.bf16.mxu0 %v5962_v58  ;;  %v5974_v57 = vpack.c.bf16 %v2273_v52, %v2266_v46  ;;  %v2265_v58 = vld [vmem:[#allocation11 + $0x1b90] sm:$0xff]  ;;  %v2308_v46 = vld [vmem:[#allocation11 + $0x1ce8] sm:$0xff]  ;;  %v2315_v52 = vld [vmem:[#allocation11 + $0x1d20] sm:$0xff] }
 0x2ed   :  { %6251 = vmatprep.subr.bf16.mxu1 %v6250_v0  ;;  %v1826_v0 = vld [vmem:[#allocation11 + $0xdd8] sm:$0xff] }
 0x2ef   :  { %5965 = vmatpush1.bf16.msra.mxu0 %v5964_v10  ;;  %v5976_v10 = vpack.c.bf16 %v2272_v60, %v2265_v58  ;;  %v2314_v58 = vld [vmem:[#allocation11 + $0x1d18] sm:$0xff]  ;;  %v1861_v60 = vld [vmem:[#allocation11 + $0xef0] sm:$0xff] }
 0x2f0   :  { %6253 = vmatpush1.bf16.msra.mxu1 %v6252_v13  ;;  %5967 = vmatprep.subr.bf16.mxu0 %v5966_v14  ;;  %v1154_v13 = vadd.f32 %v7694_v55, %v836_v36  ;;  %v6264_v14 = vpack.c.bf16 %v1826_v0, %v1819_v61  ;;  %v6268_v55 = vpack.c.bf16 %v1840_v21, %v1833_v20  ;;  %v2322_v0 = vld [vmem:[#allocation11 + $0x1d58] sm:$0xff]  ;;  %v2343_v20 = vld [vmem:[#allocation11 + $0x1e00] sm:$0xff] }
 0x2f1   :  { %6255 = vmatprep.subr.bf16.mxu1 %v6254_v19  ;;  %v6266_v19 = vpack.c.bf16 %v1841_v9, %v1834_v4  ;;  %v6272_v36 = vpack.c.bf16 %v1854_v45, %v1847_v42  ;;  %v1890_v21 = vld [vmem:[#allocation11 + $0xfd8] sm:$0xff]  ;;  %v1904_v45 = vld [vmem:[#allocation11 + $0x1048] sm:$0xff] }
 0x2f2   :  { %v6282_v38 = vpack.c.bf16 %v1897_v24, %v1890_v21  ;;  %v2350_v42 = vld [vmem:[#allocation11 + $0x1e38] sm:$0xff]  ;;  %v2377_v24 = vld [vmem:[#allocation11 + $0x1f10] sm:$0xff] }
 0x2f3   :  { %5969 = vmatpush1.bf16.msra.mxu0 %v5968_v29  ;;  %v1848_v29 = vld [vmem:[#allocation11 + $0xe88] sm:$0xff] }
 0x2f4   :  { %6257 = vmatpush1.bf16.msra.mxu1 %v6256_v39  ;;  %5971 = vmatprep.subr.bf16.mxu0 %v5970_v34  ;;  %v1855_v39 = vld [vmem:[#allocation11 + $0xec0] sm:$0xff]  ;;  %v7743_v34 = vmax.f32 %v1154_v13, 0.0  ;;  %v2321_v13 = vld [vmem:[#allocation11 + $0x1d50] sm:$0xff] }
 0x2f5   :  { %6259 = vmatprep.subr.bf16.mxu1 %v6258_v43  ;;  %v5982_v43 = vpack.c.bf16 %v2301_v31, %v2294_v25  ;;  %v6270_v53 = vpack.c.bf16 %v1855_v39, %v1848_v29  ;;  %v2335_v29 = vld [vmem:[#allocation11 + $0x1dc0] sm:$0xff]  ;;  %v2342_v39 = vld [vmem:[#allocation11 + $0x1df8] sm:$0xff] }
 0x2f7   :  { %5973 = vmatpush1.bf16.msra.mxu0 %v5972_v63  ;;  %v1869_v63 = vld [vmem:[#allocation11 + $0xf30] sm:$0xff] }
 0x2f8   :  { %6261 = vmatpush1.bf16.msra.mxu1 %v6260_v56  ;;  %5975 = vmatprep.subr.bf16.mxu0 %v5974_v57  ;;  %v5986_v56 = vpack.c.bf16 %v2315_v52, %v2308_v46  ;;  %v2307_v57 = vld [vmem:[#allocation11 + $0x1ce0] sm:$0xff]  ;;  %v6274_v61 = vpack.c.bf16 %v1869_v63, %v1862_v54  ;;  %v5996_v52 = vpack.c.bf16 %v2342_v39, %v2335_v29  ;;  %v2349_v63 = vld [vmem:[#allocation11 + $0x1e30] sm:$0xff]  ;;  %v1938_v29 = vld [vmem:[#allocation11 + $0x1158] sm:$0xff] }
 0x2f9   :  { %6263 = vmatprep.subr.bf16.mxu1 %v6262_v62  ;;  %v1868_v62 = vld [vmem:[#allocation11 + $0xf28] sm:$0xff]  ;;  %v5988_v4 = vpack.c.bf16 %v2314_v58, %v2307_v57  ;;  %v1911_v46 = vld [vmem:[#allocation11 + $0x1080] sm:$0xff]  ;;  %v1910_v57 = vld [vmem:[#allocation11 + $0x1078] sm:$0xff] }
 0x2fa   :  { %v6276_v9 = vpack.c.bf16 %v1868_v62, %v1861_v60  ;;  %v2364_v58 = vld [vmem:[#allocation11 + $0x1ea8] sm:$0xff]  ;;  %v2371_v60 = vld [vmem:[#allocation11 + $0x1ee0] sm:$0xff]  ;;  %v1925_v62 = vld [vmem:[#allocation11 + $0x10f0] sm:$0xff] }
 0x2fb   :  { %5977 = vmatpush1.bf16.msra.mxu0 %v5976_v10  ;;  %v5990_v10 = vpack.c.bf16 %v2329_v1, %v2322_v0  ;;  %v6002_v2 = vpack.c.bf16 %v2371_v60, %v2364_v58  ;;  %v2392_v39 = vld [vmem:[#allocation11 + $0x1f88] sm:$0xff] }
 0x2fc   :  { %6265 = vmatpush1.bf16.msra.mxu1 %v6264_v14  ;;  %5979 = vmatprep.subr.bf16.mxu0 %v5978_v15  ;;  %v2328_v14 = vld [vmem:[#allocation11 + $0x1d88] sm:$0xff]  ;;  %v1875_v15 = vld [vmem:[#allocation11 + $0xf60] sm:$0xff] }
 0x2fd   :  { %6267 = vmatprep.subr.bf16.mxu1 %v6266_v19  ;;  %v2336_v19 = vld [vmem:[#allocation11 + $0x1dc8] sm:$0xff]  ;;  %v5992_v25 = vpack.c.bf16 %v2328_v14, %v2321_v13  ;;  %v6280_v31 = vpack.c.bf16 %v1882_v18, %v1875_v15  ;;  %v2378_v14 = vld [vmem:[#allocation11 + $0x1f18] sm:$0xff]  ;;  %v2385_v15 = vld [vmem:[#allocation11 + $0x1f50] sm:$0xff] }
 0x2fe   :  { %3154 = vmatmul.mubr.f32.vlgmr.msra.gmra.mrb[8].mxu0 %v7743_v34  ;;  %v1924_v13 = vld [vmem:[#allocation11 + $0x10e8] sm:$0xff]  ;;  %v1939_v18 = vld [vmem:[#allocation11 + $0x1160] sm:$0xff]  ;;  %v6006_v21 = vpack.c.bf16 %v2385_v15, %v2378_v14 }
 0x2ff   :  { %3509 = vmatmul.mubr.f32.vlgmr.msra.gmra.mrb[16].mxu1 %v7681_v12  ;;  %5981 = vmatpush1.bf16.msra.mxu0 %v5980_v27  ;;  %v5994_v27 = vpack.c.bf16 %v2343_v20, %v2336_v19 }
 0x300   :  { %3224 = vmatprep.mubr.f32.mxu0 %v7745_v17  ;;  %6269 = vmatpush1.bf16.msra.mxu1 %v6268_v55  ;;  %v1889_v55 = vld [vmem:[#allocation11 + $0xfd0] sm:$0xff] }
 0x301   :  { %3579 = vmatprep.mubr.f32.mxu1 %v7698_v8  ;;  %5983 = vmatprep.subr.bf16.mxu0 %v5982_v43  ;;  %v2357_v43 = vld [vmem:[#allocation11 + $0x1e70] sm:$0xff] }
 0x302   :  { %6271 = vmatprep.subr.bf16.mxu1 %v6270_v53  ;;  %v6284_v53 = vpack.c.bf16 %v1896_v41, %v1889_v55  ;;  %v5998_v54 = vpack.c.bf16 %v2357_v43, %v2350_v42  ;;  %v2399_v55 = vld [vmem:[#allocation11 + $0x1fc0] sm:$0xff]  ;;  %v1953_v41 = vld [vmem:[#allocation11 + $0x11d0] sm:$0xff] }
 0x303   :  { %5985 = vmatpush1.bf16.msra.mxu0 %v5984_v35  ;;  %v2356_v35 = vld [vmem:[#allocation11 + $0x1e68] sm:$0xff] }
 0x304   :  { %6273 = vmatpush1.bf16.msra.mxu1 %v6272_v36  ;;  %5987 = vmatprep.subr.bf16.mxu0 %v5986_v56  ;;  %v1903_v36 = vld [vmem:[#allocation11 + $0x1040] sm:$0xff]  ;;  %v6286_v56 = vpack.c.bf16 %v1911_v46, %v1904_v45  ;;  %v6000_v0 = vpack.c.bf16 %v2356_v35, %v2349_v63  ;;  %v6010_v45 = vpack.c.bf16 %v2399_v55, %v2392_v39  ;;  %v1952_v63 = vld [vmem:[#allocation11 + $0x11c8] sm:$0xff]  ;;  %v2406_v35 = vld [vmem:[#allocation11 + $0x1ff8] sm:$0xff] }
 0x305   :  { %6275 = vmatprep.subr.bf16.mxu1 %v6274_v61  ;;  %v1918_v61 = vld [vmem:[#allocation11 + $0x10b8] sm:$0xff]  ;;  %v6288_v1 = vpack.c.bf16 %v1910_v57, %v1903_v36  ;;  %v2391_v46 = vld [vmem:[#allocation11 + $0x1f80] sm:$0xff]  ;;  %v2413_v36 = vld [vmem:[#allocation11 + $0x2030] sm:$0xff] }
 0x306   :  { %v1967_v57 = vld [vmem:[#allocation11 + $0x1240] sm:$0xff] }
 0x307   :  { %5989 = vmatpush1.bf16.msra.mxu0 %v5988_v4  ;;  %v2370_v4 = vld [vmem:[#allocation11 + $0x1ed8] sm:$0xff] }
 0x308   :  { %6277 = vmatpush1.bf16.msra.mxu1 %v6276_v9  ;;  %5991 = vmatprep.subr.bf16.mxu0 %v5990_v10  ;;  %v1917_v9 = vld [vmem:[#allocation11 + $0x10b0] sm:$0xff]  ;;  %v6290_v10 = vpack.c.bf16 %v1925_v62, %v1918_v61  ;;  %v6004_v19 = vpack.c.bf16 %v2370_v4, %v2363_v3  ;;  %v6014_v61 = vpack.c.bf16 %v2413_v36, %v2406_v35  ;;  %v1966_v3 = vld [vmem:[#allocation11 + $0x1238] sm:$0xff]  ;;  %v2420_v4 = vld [vmem:[#allocation11 + $0x2068] sm:$0xff] }
 0x309   :  { %6279 = vmatprep.subr.bf16.mxu1 %v6278_v49  ;;  %v1932_v49 = vld [vmem:[#allocation11 + $0x1128] sm:$0xff]  ;;  %v6292_v20 = vpack.c.bf16 %v1924_v13, %v1917_v9  ;;  %v2405_v62 = vld [vmem:[#allocation11 + $0x1ff0] sm:$0xff]  ;;  %v2427_v9 = vld [vmem:[#allocation11 + $0x20a0] sm:$0xff] }
 0x30a   :  { %v1981_v13 = vld [vmem:[#allocation11 + $0x12b0] sm:$0xff] }
 0x30b   :  { %5993 = vmatpush1.bf16.msra.mxu0 %v5992_v25  ;;  %v2384_v25 = vld [vmem:[#allocation11 + $0x1f48] sm:$0xff] }
 0x30c   :  { %6281 = vmatpush1.bf16.msra.mxu1 %v6280_v31  ;;  %5995 = vmatprep.subr.bf16.mxu0 %v5994_v27  ;;  %v1931_v31 = vld [vmem:[#allocation11 + $0x1120] sm:$0xff]  ;;  %v6294_v27 = vpack.c.bf16 %v1939_v18, %v1932_v49  ;;  %v6008_v42 = vpack.c.bf16 %v2384_v25, %v2377_v24  ;;  %v6018_v49 = vpack.c.bf16 %v2427_v9, %v2420_v4  ;;  %v1980_v24 = vld [vmem:[#allocation11 + $0x12a8] sm:$0xff]  ;;  %v2434_v25 = vld [vmem:[#allocation11 + $0x20d8] sm:$0xff] }
 0x30d   :  { %6283 = vmatprep.subr.bf16.mxu1 %v6282_v38  ;;  %v1946_v38 = vld [vmem:[#allocation11 + $0x1198] sm:$0xff]  ;;  %v6296_v43 = vpack.c.bf16 %v1938_v29, %v1931_v31  ;;  %v2419_v18 = vld [vmem:[#allocation11 + $0x2060] sm:$0xff]  ;;  %v2441_v31 = vld [vmem:[#allocation11 + $0x2110] sm:$0xff] }
 0x30e   :  { %v1995_v29 = vld [vmem:[#allocation11 + $0x1320] sm:$0xff] }
 0x30f   :  { %5997 = vmatpush1.bf16.msra.mxu0 %v5996_v52  ;;  %v2398_v52 = vld [vmem:[#allocation11 + $0x1fb8] sm:$0xff] }
 0x310   :  { %6285 = vmatpush1.bf16.msra.mxu1 %v6284_v53  ;;  %5999 = vmatprep.subr.bf16.mxu0 %v5998_v54  ;;  %v1945_v53 = vld [vmem:[#allocation11 + $0x1190] sm:$0xff]  ;;  %v6298_v54 = vpack.c.bf16 %v1953_v41, %v1946_v38  ;;  %v6012_v58 = vpack.c.bf16 %v2398_v52, %v2391_v46  ;;  %v6022_v38 = vpack.c.bf16 %v2441_v31, %v2434_v25  ;;  %v1994_v46 = vld [vmem:[#allocation11 + $0x1318] sm:$0xff]  ;;  %v2448_v52 = vld [vmem:[#allocation11 + $0x2148] sm:$0xff] }
 0x311   :  { %6287 = vmatprep.subr.bf16.mxu1 %v6286_v56  ;;  %v1960_v56 = vld [vmem:[#allocation11 + $0x1208] sm:$0xff]  ;;  %v6300_v60 = vpack.c.bf16 %v1952_v63, %v1945_v53  ;;  %v2433_v41 = vld [vmem:[#allocation11 + $0x20d0] sm:$0xff]  ;;  %v2455_v53 = vld [vmem:[#allocation11 + $0x2180] sm:$0xff] }
 0x312   :  { %v2009_v63 = vld [vmem:[#allocation11 + $0x1390] sm:$0xff] }
 0x313   :  { %6001 = vmatpush1.bf16.msra.mxu0 %v6000_v0  ;;  %v2412_v0 = vld [vmem:[#allocation11 + $0x2028] sm:$0xff] }
 0x314   :  { %6289 = vmatpush1.bf16.msra.mxu1 %v6288_v1  ;;  %6003 = vmatprep.subr.bf16.mxu0 %v6002_v2  ;;  %v1959_v1 = vld [vmem:[#allocation11 + $0x1200] sm:$0xff]  ;;  %v6302_v2 = vpack.c.bf16 %v1967_v57, %v1960_v56  ;;  %v6016_v14 = vpack.c.bf16 %v2412_v0, %v2405_v62  ;;  %v6026_v56 = vpack.c.bf16 %v2455_v53, %v2448_v52  ;;  %v2008_v62 = vld [vmem:[#allocation11 + $0x1388] sm:$0xff]  ;;  %v2462_v0 = vld [vmem:[#allocation11 + $0x21b8] sm:$0xff] }
 0x315   :  { %6291 = vmatprep.subr.bf16.mxu1 %v6290_v10  ;;  %v1974_v10 = vld [vmem:[#allocation11 + $0x1278] sm:$0xff]  ;;  %v6304_v15 = vpack.c.bf16 %v1966_v3, %v1959_v1  ;;  %v2447_v57 = vld [vmem:[#allocation11 + $0x2140] sm:$0xff]  ;;  %v2469_v1 = vld [vmem:[#allocation11 + $0x21f0] sm:$0xff] }
 0x316   :  { %v2023_v3 = vld [vmem:[#allocation11 + $0x1400] sm:$0xff]  ;;  %v7261_v53 = vld [vmem:[#allocation10 + $0x8] sm:$0x1f] }
 0x317   :  { %6005 = vmatpush1.bf16.msra.mxu0 %v6004_v19  ;;  %v2426_v19 = vld [vmem:[#allocation11 + $0x2098] sm:$0xff] }
 0x318   :  { %6293 = vmatpush1.bf16.msra.mxu1 %v6292_v20  ;;  %6007 = vmatprep.subr.bf16.mxu0 %v6006_v21  ;;  %v1973_v20 = vld [vmem:[#allocation11 + $0x1270] sm:$0xff]  ;;  %v6306_v21 = vpack.c.bf16 %v1981_v13, %v1974_v10  ;;  %v6020_v39 = vpack.c.bf16 %v2426_v19, %v2419_v18  ;;  %v6030_v10 = vpack.c.bf16 %v2469_v1, %v2462_v0  ;;  %v2022_v18 = vld [vmem:[#allocation11 + $0x13f8] sm:$0xff]  ;;  %v2476_v19 = vld [vmem:[#allocation11 + $0x2228] sm:$0xff] }
 0x319   :  { %6295 = vmatprep.subr.bf16.mxu1 %v6294_v27  ;;  %v1988_v27 = vld [vmem:[#allocation11 + $0x12e8] sm:$0xff]  ;;  %v6308_v55 = vpack.c.bf16 %v1980_v24, %v1973_v20  ;;  %v2461_v13 = vld [vmem:[#allocation11 + $0x21b0] sm:$0xff]  ;;  %v2483_v20 = vld [vmem:[#allocation11 + $0x2260] sm:$0xff] }
 0x31a   :  { %v2037_v24 = vld [vmem:[#allocation11 + $0x1470] sm:$0xff]  ;;  %v2058_v0 = vld [vmem:[#allocation11 + $0x1518] sm:$0xff] }
 0x31b   :  { %6009 = vmatpush1.bf16.msra.mxu0 %v6008_v42  ;;  %v2440_v42 = vld [vmem:[#allocation11 + $0x2108] sm:$0xff]  ;;  %v2065_v1 = vld [vmem:[#allocation11 + $0x1550] sm:$0xff] }
 0x31c   :  { %6297 = vmatpush1.bf16.msra.mxu1 %v6296_v43  ;;  %6011 = vmatprep.subr.bf16.mxu0 %v6010_v45  ;;  %v1987_v43 = vld [vmem:[#allocation11 + $0x12e0] sm:$0xff]  ;;  %v6310_v45 = vpack.c.bf16 %v1995_v29, %v1988_v27  ;;  %v6024_v35 = vpack.c.bf16 %v2440_v42, %v2433_v41  ;;  %v6034_v27 = vpack.c.bf16 %v2483_v20, %v2476_v19  ;;  %v2036_v41 = vld [vmem:[#allocation11 + $0x1468] sm:$0xff]  ;;  %v2490_v42 = vld [vmem:[#allocation11 + $0x2298] sm:$0xff] }
 0x31d   :  { %6299 = vmatprep.subr.bf16.mxu1 %v6298_v54  ;;  %v2002_v54 = vld [vmem:[#allocation11 + $0x1358] sm:$0xff]  ;;  %v6312_v36 = vpack.c.bf16 %v1994_v46, %v1987_v43  ;;  %v2475_v29 = vld [vmem:[#allocation11 + $0x2220] sm:$0xff]  ;;  %v2497_v43 = vld [vmem:[#allocation11 + $0x22d0] sm:$0xff] }
 0x31e   :  { %v2051_v46 = vld [vmem:[#allocation11 + $0x14e0] sm:$0xff]  ;;  %v2525_v19 = vld [vmem:[#allocation11 + $0x23b0] sm:$0xff] }
 0x31f   :  { %6013 = vmatpush1.bf16.msra.mxu0 %v6012_v58  ;;  %v2454_v58 = vld [vmem:[#allocation11 + $0x2178] sm:$0xff] }
 0x320   :  { %6301 = vmatpush1.bf16.msra.mxu1 %v6300_v60  ;;  %6015 = vmatprep.subr.bf16.mxu0 %v6014_v61  ;;  %v2001_v60 = vld [vmem:[#allocation11 + $0x1350] sm:$0xff]  ;;  %v6314_v61 = vpack.c.bf16 %v2009_v63, %v2002_v54  ;;  %v6028_v4 = vpack.c.bf16 %v2454_v58, %v2447_v57  ;;  %v844_v54 = vrot.slane %v7261_v53, %v7654_v47  ;;  %v2043_v57 = vld [vmem:[#allocation11 + $0x14a0] sm:$0xff] }
 0x321   :  { %6303 = vmatprep.subr.bf16.mxu1 %v6302_v2  ;;  %v2016_v2 = vld [vmem:[#allocation11 + $0x13c8] sm:$0xff]  ;;  %v6316_v9 = vpack.c.bf16 %v2008_v62, %v2001_v60  ;;  %v2050_v60 = vld [vmem:[#allocation11 + $0x14d8] sm:$0xff]  ;;  %v2511_v62 = vld [vmem:[#allocation11 + $0x2340] sm:$0xff] }
 0x323   :  { %6017 = vmatpush1.bf16.msra.mxu0 %v6016_v14  ;;  %v2468_v14 = vld [vmem:[#allocation11 + $0x21e8] sm:$0xff] }
 0x324   :  { %6305 = vmatpush1.bf16.msra.mxu1 %v6304_v15  ;;  %6019 = vmatprep.subr.bf16.mxu0 %v6018_v49  ;;  %v2015_v15 = vld [vmem:[#allocation11 + $0x13c0] sm:$0xff]  ;;  %v6318_v49 = vpack.c.bf16 %v2023_v3, %v2016_v2  ;;  %v6032_v25 = vpack.c.bf16 %v2468_v14, %v2461_v13  ;;  %v1225_v3 = vadd.f32 %v7714_v7, %v844_v54  ;;  %v2510_v13 = vld [vmem:[#allocation11 + $0x2338] sm:$0xff] }
 0x325   :  { %6307 = vmatprep.subr.bf16.mxu1 %v6306_v21  ;;  %v2030_v21 = vld [vmem:[#allocation11 + $0x1438] sm:$0xff]  ;;  %v6320_v31 = vpack.c.bf16 %v2022_v18, %v2015_v15  ;;  %v6330_v14 = vpack.c.bf16 %v2065_v1, %v2058_v0  ;;  %v2057_v15 = vld [vmem:[#allocation11 + $0x1510] sm:$0xff] }
 0x326   :  { %v2518_v18 = vld [vmem:[#allocation11 + $0x2378] sm:$0xff] }
 0x327   :  { %6021 = vmatpush1.bf16.msra.mxu0 %v6020_v39  ;;  %v2482_v39 = vld [vmem:[#allocation11 + $0x2258] sm:$0xff] }
 0x328   :  { %6309 = vmatpush1.bf16.msra.mxu1 %v6308_v55  ;;  %6023 = vmatprep.subr.bf16.mxu0 %v6022_v38  ;;  %v2029_v55 = vld [vmem:[#allocation11 + $0x1430] sm:$0xff]  ;;  %v6322_v38 = vpack.c.bf16 %v2037_v24, %v2030_v21  ;;  %v6036_v52 = vpack.c.bf16 %v2482_v39, %v2475_v29  ;;  %v2072_v21 = vld [vmem:[#allocation11 + $0x1588] sm:$0xff]  ;;  %v2079_v24 = vld [vmem:[#allocation11 + $0x15c0] sm:$0xff]  ;;  %v6046_v39 = vpack.c.bf16 %v2525_v19, %v2518_v18 }
 0x329   :  { %6311 = vmatprep.subr.bf16.mxu1 %v6310_v45  ;;  %v2044_v45 = vld [vmem:[#allocation11 + $0x14a8] sm:$0xff]  ;;  %v6324_v63 = vpack.c.bf16 %v2036_v41, %v2029_v55  ;;  %v2071_v29 = vld [vmem:[#allocation11 + $0x1580] sm:$0xff]  ;;  %v2078_v55 = vld [vmem:[#allocation11 + $0x15b8] sm:$0xff] }
 0x32a   :  { %v6326_v58 = vpack.c.bf16 %v2051_v46, %v2044_v45  ;;  %v2539_v41 = vld [vmem:[#allocation11 + $0x2420] sm:$0xff]  ;;  %v2086_v45 = vld [vmem:[#allocation11 + $0x15f8] sm:$0xff]  ;;  %v2093_v46 = vld [vmem:[#allocation11 + $0x1630] sm:$0xff]  ;;  %v6336_v53 = vpack.c.bf16 %v2078_v55, %v2071_v29 }
 0x32b   :  { %6025 = vmatpush1.bf16.msra.mxu0 %v6024_v35  ;;  %v6038_v35 = vpack.c.bf16 %v2497_v43, %v2490_v42  ;;  %v7756_v42 = vmax.f32 %v7722_v22, 0.0  ;;  %v6334_v43 = vpack.c.bf16 %v2079_v24, %v2072_v21  ;;  %v6338_v22 = vpack.c.bf16 %v2093_v46, %v2086_v45  ;;  %v2559_v21 = vld [vmem:[#allocation11 + $0x24c0] sm:$0xff]  ;;  %v2566_v24 = vld [vmem:[#allocation11 + $0x24f8] sm:$0xff]  ;;  %v2128_v55 = vld [vmem:[#allocation11 + $0x1748] sm:$0xff] }
 0x32c   :  { %6313 = vmatpush1.bf16.msra.mxu1 %v6312_v36  ;;  %6027 = vmatprep.subr.bf16.mxu0 %v6026_v56  ;;  %v2489_v36 = vld [vmem:[#allocation11 + $0x2290] sm:$0xff]  ;;  %v2496_v56 = vld [vmem:[#allocation11 + $0x22c8] sm:$0xff]  ;;  %v2574_v29 = vld [vmem:[#allocation11 + $0x2538] sm:$0xff] }
 0x32d   :  { %6315 = vmatprep.subr.bf16.mxu1 %v6314_v61  ;;  %v2504_v61 = vld [vmem:[#allocation11 + $0x2308] sm:$0xff]  ;;  %v6040_v2 = vpack.c.bf16 %v2496_v56, %v2489_v36  ;;  %v2085_v36 = vld [vmem:[#allocation11 + $0x15f0] sm:$0xff] }
 0x32e   :  { %v2092_v56 = vld [vmem:[#allocation11 + $0x1628] sm:$0xff]  ;;  %v2573_v46 = vld [vmem:[#allocation11 + $0x2530] sm:$0xff] }
 0x32f   :  { %6029 = vmatpush1.bf16.msra.mxu0 %v6028_v4  ;;  %v6328_v4 = vpack.c.bf16 %v2050_v60, %v2043_v57  ;;  %v2546_v57 = vld [vmem:[#allocation11 + $0x2458] sm:$0xff]  ;;  %v2100_v60 = vld [vmem:[#allocation11 + $0x1668] sm:$0xff]  ;;  %v6340_v0 = vpack.c.bf16 %v2092_v56, %v2085_v36  ;;  %v2595_v36 = vld [vmem:[#allocation11 + $0x25e0] sm:$0xff] }
 0x330   :  { %6317 = vmatpush1.bf16.msra.mxu1 %v6316_v9  ;;  %6031 = vmatprep.subr.bf16.mxu0 %v6030_v10  ;;  %v6042_v9 = vpack.c.bf16 %v2511_v62, %v2504_v61  ;;  %v2503_v10 = vld [vmem:[#allocation11 + $0x2300] sm:$0xff]  ;;  %v2149_v56 = vld [vmem:[#allocation11 + $0x17f0] sm:$0xff] }
 0x331   :  { %6319 = vmatprep.subr.bf16.mxu1 %v6318_v49  ;;  %v2064_v49 = vld [vmem:[#allocation11 + $0x1548] sm:$0xff]  ;;  %v6044_v20 = vpack.c.bf16 %v2510_v13, %v2503_v10  ;;  %v2107_v61 = vld [vmem:[#allocation11 + $0x16a0] sm:$0xff]  ;;  %v2106_v10 = vld [vmem:[#allocation11 + $0x1698] sm:$0xff] }
 0x332   :  { %v6332_v7 = vpack.c.bf16 %v2064_v49, %v2057_v15  ;;  %v2560_v13 = vld [vmem:[#allocation11 + $0x24c8] sm:$0xff]  ;;  %v2114_v15 = vld [vmem:[#allocation11 + $0x16d8] sm:$0xff]  ;;  %v2121_v49 = vld [vmem:[#allocation11 + $0x1710] sm:$0xff] }
 0x333   :  { %6033 = vmatpush1.bf16.msra.mxu0 %v6032_v25  ;;  %v7753_v25 = vmax.f32 %v1225_v3, 0.0  ;;  %v2552_v3 = vld [vmem:[#allocation11 + $0x2488] sm:$0xff] }
 0x334   :  { %6321 = vmatpush1.bf16.msra.mxu1 %v6320_v31  ;;  %6035 = vmatprep.subr.bf16.mxu0 %v6034_v27  ;;  %v2517_v31 = vld [vmem:[#allocation11 + $0x2370] sm:$0xff]  ;;  %v2524_v27 = vld [vmem:[#allocation11 + $0x23a8] sm:$0xff] }
 0x335   :  { %6323 = vmatprep.subr.bf16.mxu1 %v6322_v38  ;;  %v2532_v38 = vld [vmem:[#allocation11 + $0x23e8] sm:$0xff] }
 0x336   :  { %v6050_v54 = vpack.c.bf16 %v2539_v41, %v2532_v38  ;;  %v2135_v38 = vld [vmem:[#allocation11 + $0x1780] sm:$0xff]  ;;  %v6060_v41 = vpack.c.bf16 %v2566_v24, %v2559_v21 }
 0x337   :  { %6037 = vmatpush1.bf16.msra.mxu0 %v6036_v52  ;;  %v6048_v52 = vpack.c.bf16 %v2524_v27, %v2517_v31  ;;  %v6346_v31 = vpack.c.bf16 %v2121_v49, %v2114_v15  ;;  %v2120_v27 = vld [vmem:[#allocation11 + $0x1708] sm:$0xff]  ;;  %v2155_v21 = vld [vmem:[#allocation11 + $0x1820] sm:$0xff] }
 0x338   :  { %6325 = vmatpush1.bf16.msra.mxu1 %v6324_v63  ;;  %6039 = vmatprep.subr.bf16.mxu0 %v6038_v35  ;;  %v2531_v63 = vld [vmem:[#allocation11 + $0x23e0] sm:$0xff]  ;;  %v2538_v35 = vld [vmem:[#allocation11 + $0x2418] sm:$0xff] }
 0x339   :  { %6327 = vmatprep.subr.bf16.mxu1 %v6326_v58  ;;  %v2553_v58 = vld [vmem:[#allocation11 + $0x2490] sm:$0xff]  ;;  %v6052_v62 = vpack.c.bf16 %v2538_v35, %v2531_v63  ;;  %v2134_v63 = vld [vmem:[#allocation11 + $0x1778] sm:$0xff]  ;;  %v2588_v35 = vld [vmem:[#allocation11 + $0x25a8] sm:$0xff] }
 0x33a   :  { %v6054_v1 = vpack.c.bf16 %v2553_v58, %v2546_v57 }
 0x33b   :  { %6041 = vmatpush1.bf16.msra.mxu0 %v6040_v2  ;;  %v2545_v2 = vld [vmem:[#allocation11 + $0x2450] sm:$0xff] }
 0x33c   :  { %6329 = vmatpush1.bf16.msra.mxu1 %v6328_v4  ;;  %6043 = vmatprep.subr.bf16.mxu0 %v6042_v9  ;;  %v2099_v4 = vld [vmem:[#allocation11 + $0x1660] sm:$0xff]  ;;  %v6342_v9 = vpack.c.bf16 %v2107_v61, %v2100_v60  ;;  %v6056_v18 = vpack.c.bf16 %v2552_v3, %v2545_v2  ;;  %v6066_v60 = vpack.c.bf16 %v2595_v36, %v2588_v35  ;;  %v2148_v3 = vld [vmem:[#allocation11 + $0x17e8] sm:$0xff] }
 0x33d   :  { %6331 = vmatprep.subr.bf16.mxu1 %v6330_v14  ;;  %v2567_v14 = vld [vmem:[#allocation11 + $0x2500] sm:$0xff]  ;;  %v6344_v19 = vpack.c.bf16 %v2106_v10, %v2099_v4  ;;  %v2602_v4 = vld [vmem:[#allocation11 + $0x2618] sm:$0xff]  ;;  %v2184_v35 = vld [vmem:[#allocation11 + $0x1908] sm:$0xff] }
 0x33e   :  { %3225 = vmatmul.mubr.f32.vlgmr.msra.gmra.mrb[8].mxu0 %v7753_v25  ;;  %v2587_v61 = vld [vmem:[#allocation11 + $0x25a0] sm:$0xff] }
 0x33f   :  { %3580 = vmatmul.mubr.f32.vlgmr.msra.gmra.mrb[16].mxu1 %v7724_v37  ;;  %6045 = vmatpush1.bf16.msra.mxu0 %v6044_v20  ;;  %v6058_v20 = vpack.c.bf16 %v2567_v14, %v2560_v13  ;;  %v2156_v13 = vld [vmem:[#allocation11 + $0x1828] sm:$0xff]  ;;  %v2163_v14 = vld [vmem:[#allocation11 + $0x1860] sm:$0xff] }
 0x340   :  { %3295 = vmatprep.mubr.f32.mxu0 %v7756_v42  ;;  %6333 = vmatpush1.bf16.msra.mxu1 %v6332_v7  ;;  %v2113_v7 = vld [vmem:[#allocation11 + $0x16d0] sm:$0xff]  ;;  %v6358_v24 = vpack.c.bf16 %v2163_v14, %v2156_v13  ;;  %v2191_v36 = vld [vmem:[#allocation11 + $0x1940] sm:$0xff] }
 0x341   :  { %3650 = vmatprep.mubr.f32.mxu1 %v7726_v59  ;;  %6047 = vmatprep.subr.bf16.mxu0 %v6046_v39  ;;  %v2581_v39 = vld [vmem:[#allocation11 + $0x2570] sm:$0xff] }
 0x342   :  { %6335 = vmatprep.subr.bf16.mxu1 %v6334_v43  ;;  %v6348_v43 = vpack.c.bf16 %v2120_v27, %v2113_v7  ;;  %v6062_v45 = vpack.c.bf16 %v2581_v39, %v2574_v29  ;;  %v2162_v7 = vld [vmem:[#allocation11 + $0x1858] sm:$0xff]  ;;  %v2623_v27 = vld [vmem:[#allocation11 + $0x26c0] sm:$0xff]  ;;  %v2177_v39 = vld [vmem:[#allocation11 + $0x18d0] sm:$0xff] }
 0x343   :  { %6049 = vmatpush1.bf16.msra.mxu0 %v6048_v52  ;;  %v2580_v52 = vld [vmem:[#allocation11 + $0x2568] sm:$0xff]  ;;  %v2170_v29 = vld [vmem:[#allocation11 + $0x1898] sm:$0xff] }
 0x344   :  { %6337 = vmatpush1.bf16.msra.mxu1 %v6336_v53  ;;  %6051 = vmatprep.subr.bf16.mxu0 %v6050_v54  ;;  %v2127_v53 = vld [vmem:[#allocation11 + $0x1740] sm:$0xff]  ;;  %v6350_v54 = vpack.c.bf16 %v2135_v38, %v2128_v55  ;;  %v6064_v57 = vpack.c.bf16 %v2580_v52, %v2573_v46  ;;  %v6360_v38 = vpack.c.bf16 %v2162_v7, %v2155_v21  ;;  %v2169_v46 = vld [vmem:[#allocation11 + $0x1890] sm:$0xff]  ;;  %v2204_v21 = vld [vmem:[#allocation11 + $0x19a8] sm:$0xff] }
 0x345   :  { %6339 = vmatprep.subr.bf16.mxu1 %v6338_v22  ;;  %v2142_v22 = vld [vmem:[#allocation11 + $0x17b8] sm:$0xff]  ;;  %v6352_v58 = vpack.c.bf16 %v2134_v63, %v2127_v53  ;;  %v6362_v52 = vpack.c.bf16 %v2177_v39, %v2170_v29  ;;  %v2176_v53 = vld [vmem:[#allocation11 + $0x18c8] sm:$0xff]  ;;  %v2637_v63 = vld [vmem:[#allocation11 + $0x2730] sm:$0xff] }
 0x346   :  { %v6354_v2 = vpack.c.bf16 %v2149_v56, %v2142_v22  ;;  %v6364_v56 = vpack.c.bf16 %v2176_v53, %v2169_v46  ;;  %v2665_v7 = vld [vmem:[#allocation11 + $0x2810] sm:$0xff]  ;;  %v2218_v46 = vld [vmem:[#allocation11 + $0x1a18] sm:$0xff]  ;;  %v2679_v53 = vld [vmem:[#allocation11 + $0x2880] sm:$0xff] }
 0x347   :  { %6053 = vmatpush1.bf16.msra.mxu0 %v6052_v62  ;;  %v2594_v62 = vld [vmem:[#allocation11 + $0x25d8] sm:$0xff] }
 0x348   :  { %6341 = vmatpush1.bf16.msra.mxu1 %v6340_v0  ;;  %6055 = vmatprep.subr.bf16.mxu0 %v6054_v1  ;;  %v2141_v0 = vld [vmem:[#allocation11 + $0x17b0] sm:$0xff]  ;;  %v6068_v15 = vpack.c.bf16 %v2594_v62, %v2587_v61  ;;  %v2183_v61 = vld [vmem:[#allocation11 + $0x1900] sm:$0xff]  ;;  %v6366_v62 = vpack.c.bf16 %v2191_v36, %v2184_v35 }
 0x349   :  { %6343 = vmatprep.subr.bf16.mxu1 %v6342_v9  ;;  %v2609_v9 = vld [vmem:[#allocation11 + $0x2650] sm:$0xff]  ;;  %v6356_v49 = vpack.c.bf16 %v2148_v3, %v2141_v0  ;;  %v2190_v0 = vld [vmem:[#allocation11 + $0x1938] sm:$0xff]  ;;  %v2651_v3 = vld [vmem:[#allocation11 + $0x27a0] sm:$0xff] }
 0x34a   :  { %v6368_v14 = vpack.c.bf16 %v2190_v0, %v2183_v61  ;;  %v2232_v61 = vld [vmem:[#allocation11 + $0x1a88] sm:$0xff]  ;;  %v2693_v0 = vld [vmem:[#allocation11 + $0x28f0] sm:$0xff] }
 0x34b   :  { %6057 = vmatpush1.bf16.msra.mxu0 %v6056_v18  ;;  %v6070_v18 = vpack.c.bf16 %v2609_v9, %v2602_v4  ;;  %v2198_v4 = vld [vmem:[#allocation11 + $0x1978] sm:$0xff]  ;;  %v2205_v9 = vld [vmem:[#allocation11 + $0x19b0] sm:$0xff] }
 0x34c   :  { %6345 = vmatpush1.bf16.msra.mxu1 %v6344_v19  ;;  %6059 = vmatprep.subr.bf16.mxu0 %v6058_v20  ;;  %v2601_v19 = vld [vmem:[#allocation11 + $0x2610] sm:$0xff]  ;;  %v2608_v20 = vld [vmem:[#allocation11 + $0x2648] sm:$0xff] }
 0x34d   :  { %6347 = vmatprep.subr.bf16.mxu1 %v6346_v31  ;;  %v2616_v31 = vld [vmem:[#allocation11 + $0x2688] sm:$0xff]  ;;  %v6072_v55 = vpack.c.bf16 %v2608_v20, %v2601_v19  ;;  %v2197_v19 = vld [vmem:[#allocation11 + $0x1970] sm:$0xff]  ;;  %v6370_v20 = vpack.c.bf16 %v2205_v9, %v2198_v4 }
 0x34e   :  { %v6372_v39 = vpack.c.bf16 %v2204_v21, %v2197_v19  ;;  %v2246_v19 = vld [vmem:[#allocation11 + $0x1af8] sm:$0xff]  ;;  %v2707_v21 = vld [vmem:[#allocation11 + $0x2960] sm:$0xff] }
 0x34f   :  { %6061 = vmatpush1.bf16.msra.mxu0 %v6060_v41  ;;  %v6074_v41 = vpack.c.bf16 %v2623_v27, %v2616_v31  ;;  %v2212_v31 = vld [vmem:[#allocation11 + $0x19e8] sm:$0xff]  ;;  %v2219_v27 = vld [vmem:[#allocation11 + $0x1a20] sm:$0xff] }
 0x350   :  { %6349 = vmatpush1.bf16.msra.mxu1 %v6348_v43  ;;  %6063 = vmatprep.subr.bf16.mxu0 %v6062_v45  ;;  %v2615_v43 = vld [vmem:[#allocation11 + $0x2680] sm:$0xff]  ;;  %v2622_v45 = vld [vmem:[#allocation11 + $0x26b8] sm:$0xff] }
 0x351   :  { %v7762_v1 = vpop.f32.mrb[14].mxu1  ;;  %6351 = vmatprep.subr.bf16.mxu1 %v6350_v54  ;;  %v2630_v54 = vld [vmem:[#allocation11 + $0x26f8] sm:$0xff]  ;;  %v6076_v22 = vpack.c.bf16 %v2622_v45, %v2615_v43  ;;  %v2211_v43 = vld [vmem:[#allocation11 + $0x19e0] sm:$0xff]  ;;  %v6374_v45 = vpack.c.bf16 %v2219_v27, %v2212_v31 }
 0x352   :  { %v7764_v10 = vpop.f32.mrb[15].mxu1  ;;  %v6376_v36 = vpack.c.bf16 %v2218_v46, %v2211_v43  ;;  %v2260_v43 = vld [vmem:[#allocation11 + $0x1b68] sm:$0xff]  ;;  %v2721_v46 = vld [vmem:[#allocation11 + $0x29d0] sm:$0xff] }
 0x353   :  { %6065 = vmatpush1.bf16.msra.mxu0 %v6064_v57  ;;  %v6078_v57 = vpack.c.bf16 %v2637_v63, %v2630_v54  ;;  %v2226_v54 = vld [vmem:[#allocation11 + $0x1a58] sm:$0xff]  ;;  %v2233_v63 = vld [vmem:[#allocation11 + $0x1a90] sm:$0xff] }
 0x354   :  { %6353 = vmatpush1.bf16.msra.mxu1 %v6352_v58  ;;  %6067 = vmatprep.subr.bf16.mxu0 %v6066_v60  ;;  %v2629_v58 = vld [vmem:[#allocation11 + $0x26f0] sm:$0xff]  ;;  %v2636_v60 = vld [vmem:[#allocation11 + $0x2728] sm:$0xff] }
 0x355   :  { %6355 = vmatprep.subr.bf16.mxu1 %v6354_v2  ;;  %v2644_v2 = vld [vmem:[#allocation11 + $0x2768] sm:$0xff]  ;;  %v6080_v13 = vpack.c.bf16 %v2636_v60, %v2629_v58  ;;  %v2225_v58 = vld [vmem:[#allocation11 + $0x1a50] sm:$0xff]  ;;  %v6378_v60 = vpack.c.bf16 %v2233_v63, %v2226_v54 }
 0x356   :  { %v6380_v9 = vpack.c.bf16 %v2232_v61, %v2225_v58  ;;  %v2274_v58 = vld [vmem:[#allocation11 + $0x1bd8] sm:$0xff]  ;;  %v2735_v61 = vld [vmem:[#allocation11 + $0x2a40] sm:$0xff] }
 0x357   :  { %6069 = vmatpush1.bf16.msra.mxu0 %v6068_v15  ;;  %v6082_v15 = vpack.c.bf16 %v2651_v3, %v2644_v2  ;;  %v2240_v2 = vld [vmem:[#allocation11 + $0x1ac8] sm:$0xff]  ;;  %v2247_v3 = vld [vmem:[#allocation11 + $0x1b00] sm:$0xff] }
 0x358   :  { %6357 = vmatpush1.bf16.msra.mxu1 %v6356_v49  ;;  %6071 = vmatprep.subr.bf16.mxu0 %v6070_v18  ;;  %v2643_v49 = vld [vmem:[#allocation11 + $0x2760] sm:$0xff]  ;;  %v2650_v18 = vld [vmem:[#allocation11 + $0x2798] sm:$0xff] }
 0x359   :  { %6359 = vmatprep.subr.bf16.mxu1 %v6358_v24  ;;  %v2658_v24 = vld [vmem:[#allocation11 + $0x27d8] sm:$0xff]  ;;  %v6084_v29 = vpack.c.bf16 %v2650_v18, %v2643_v49  ;;  %v2239_v49 = vld [vmem:[#allocation11 + $0x1ac0] sm:$0xff]  ;;  %v6382_v18 = vpack.c.bf16 %v2247_v3, %v2240_v2 }
 0x35a   :  { %v6384_v27 = vpack.c.bf16 %v2246_v19, %v2239_v49  ;;  %v2288_v49 = vld [vmem:[#allocation11 + $0x1c48] sm:$0xff]  ;;  %v2749_v19 = vld [vmem:[#allocation11 + $0x2ab0] sm:$0xff] }
 0x35b   :  { %6073 = vmatpush1.bf16.msra.mxu0 %v6072_v55  ;;  %v6086_v55 = vpack.c.bf16 %v2665_v7, %v2658_v24  ;;  %v2254_v24 = vld [vmem:[#allocation11 + $0x1b38] sm:$0xff]  ;;  %v2261_v7 = vld [vmem:[#allocation11 + $0x1b70] sm:$0xff] }
 0x35c   :  { %6361 = vmatpush1.bf16.msra.mxu1 %v6360_v38  ;;  %6075 = vmatprep.subr.bf16.mxu0 %v6074_v41  ;;  %v2657_v38 = vld [vmem:[#allocation11 + $0x27d0] sm:$0xff]  ;;  %v2664_v41 = vld [vmem:[#allocation11 + $0x2808] sm:$0xff] }
 0x35d   :  { %6363 = vmatprep.subr.bf16.mxu1 %v6362_v52  ;;  %v2672_v52 = vld [vmem:[#allocation11 + $0x2848] sm:$0xff]  ;;  %v6088_v35 = vpack.c.bf16 %v2664_v41, %v2657_v38  ;;  %v2253_v38 = vld [vmem:[#allocation11 + $0x1b30] sm:$0xff]  ;;  %v6386_v41 = vpack.c.bf16 %v2261_v7, %v2254_v24  ;;  %v7767_v7 = vmax.f32 %v7717_v16, 0.0 }
 0x35e   :  { %v6388_v63 = vpack.c.bf16 %v2260_v43, %v2253_v38  ;;  %v2756_v43 = vld [vmem:[#allocation11 + $0x2ae8] sm:$0xff] }
 0x35f   :  { %6077 = vmatpush1.bf16.msra.mxu0 %v6076_v22  ;;  %v6090_v22 = vpack.c.bf16 %v2679_v53, %v2672_v52  ;;  %v2268_v52 = vld [vmem:[#allocation11 + $0x1ba8] sm:$0xff]  ;;  %v2275_v53 = vld [vmem:[#allocation11 + $0x1be0] sm:$0xff] }
 0x360   :  { %6365 = vmatpush1.bf16.msra.mxu1 %v6364_v56  ;;  %6079 = vmatprep.subr.bf16.mxu0 %v6078_v57  ;;  %v2671_v56 = vld [vmem:[#allocation11 + $0x2840] sm:$0xff]  ;;  %v2678_v57 = vld [vmem:[#allocation11 + $0x2878] sm:$0xff] }
 0x361   :  { %6367 = vmatprep.subr.bf16.mxu1 %v6366_v62  ;;  %v2686_v62 = vld [vmem:[#allocation11 + $0x28b8] sm:$0xff]  ;;  %v6092_v4 = vpack.c.bf16 %v2678_v57, %v2671_v56  ;;  %v2267_v56 = vld [vmem:[#allocation11 + $0x1ba0] sm:$0xff]  ;;  %v6390_v57 = vpack.c.bf16 %v2275_v53, %v2268_v52  ;;  %v2317_v52 = vld [vmem:[#allocation11 + $0x1d30] sm:$0xff] }
 0x362   :  { %v6392_v3 = vpack.c.bf16 %v2274_v58, %v2267_v56  ;;  %v2316_v56 = vld [vmem:[#allocation11 + $0x1d28] sm:$0xff]  ;;  %v2777_v58 = vld [vmem:[#allocation11 + $0x2b90] sm:$0xff] }
 0x363   :  { %6081 = vmatpush1.bf16.msra.mxu0 %v6080_v13  ;;  %v6094_v13 = vpack.c.bf16 %v2693_v0, %v2686_v62  ;;  %v2282_v62 = vld [vmem:[#allocation11 + $0x1c18] sm:$0xff]  ;;  %v2289_v0 = vld [vmem:[#allocation11 + $0x1c50] sm:$0xff] }
 0x364   :  { %6369 = vmatpush1.bf16.msra.mxu1 %v6368_v14  ;;  %6083 = vmatprep.subr.bf16.mxu0 %v6082_v15  ;;  %v2685_v14 = vld [vmem:[#allocation11 + $0x28b0] sm:$0xff]  ;;  %v2692_v15 = vld [vmem:[#allocation11 + $0x28e8] sm:$0xff] }
 0x365   :  { %6371 = vmatprep.subr.bf16.mxu1 %v6370_v20  ;;  %v2700_v20 = vld [vmem:[#allocation11 + $0x2928] sm:$0xff]  ;;  %v6096_v31 = vpack.c.bf16 %v2692_v15, %v2685_v14  ;;  %v6394_v14 = vpack.c.bf16 %v2289_v0, %v2282_v62  ;;  %v2281_v15 = vld [vmem:[#allocation11 + $0x1c10] sm:$0xff] }
 0x367   :  { %6085 = vmatpush1.bf16.msra.mxu0 %v6084_v29  ;;  %v6098_v29 = vpack.c.bf16 %v2707_v21, %v2700_v20  ;;  %v2296_v20 = vld [vmem:[#allocation11 + $0x1c88] sm:$0xff]  ;;  %v2303_v21 = vld [vmem:[#allocation11 + $0x1cc0] sm:$0xff] }
 0x368   :  { %6373 = vmatpush1.bf16.msra.mxu1 %v6372_v39  ;;  %6087 = vmatprep.subr.bf16.mxu0 %v6086_v55  ;;  %v2699_v39 = vld [vmem:[#allocation11 + $0x2920] sm:$0xff]  ;;  %v2706_v55 = vld [vmem:[#allocation11 + $0x2958] sm:$0xff]  ;;  %v6398_v38 = vpack.c.bf16 %v2303_v21, %v2296_v20 }
 0x369   :  { %6375 = vmatprep.subr.bf16.mxu1 %v6374_v45  ;;  %v2714_v45 = vld [vmem:[#allocation11 + $0x2998] sm:$0xff]  ;;  %v6100_v54 = vpack.c.bf16 %v2706_v55, %v2699_v39  ;;  %v2295_v39 = vld [vmem:[#allocation11 + $0x1c80] sm:$0xff] }
 0x36b   :  { %6089 = vmatpush1.bf16.msra.mxu0 %v6088_v35  ;;  %v6102_v35 = vpack.c.bf16 %v2721_v46, %v2714_v45  ;;  %v2763_v45 = vld [vmem:[#allocation11 + $0x2b20] sm:$0xff]  ;;  %v2310_v46 = vld [vmem:[#allocation11 + $0x1cf8] sm:$0xff] }
 0x36c   :  { %6377 = vmatpush1.bf16.msra.mxu1 %v6376_v36  ;;  %6091 = vmatprep.subr.bf16.mxu0 %v6090_v22  ;;  %v2713_v36 = vld [vmem:[#allocation11 + $0x2990] sm:$0xff]  ;;  %v2720_v22 = vld [vmem:[#allocation11 + $0x29c8] sm:$0xff] }
 0x36d   :  { %6379 = vmatprep.subr.bf16.mxu1 %v6378_v60  ;;  %v2728_v60 = vld [vmem:[#allocation11 + $0x2a08] sm:$0xff]  ;;  %v6104_v2 = vpack.c.bf16 %v2720_v22, %v2713_v36  ;;  %v2309_v36 = vld [vmem:[#allocation11 + $0x1cf0] sm:$0xff]  ;;  %v6402_v22 = vpack.c.bf16 %v2317_v52, %v2310_v46 }
 0x36e   :  { %v6404_v0 = vpack.c.bf16 %v2316_v56, %v2309_v36  ;;  %v2358_v36 = vld [vmem:[#allocation11 + $0x1e78] sm:$0xff]  ;;  %v2819_v56 = vld [vmem:[#allocation11 + $0x2ce0] sm:$0xff] }
 0x36f   :  { %6093 = vmatpush1.bf16.msra.mxu0 %v6092_v4  ;;  %v6106_v4 = vpack.c.bf16 %v2735_v61, %v2728_v60  ;;  %v2324_v60 = vld [vmem:[#allocation11 + $0x1d68] sm:$0xff]  ;;  %v2331_v61 = vld [vmem:[#allocation11 + $0x1da0] sm:$0xff] }
 0x370   :  { %6381 = vmatpush1.bf16.msra.mxu1 %v6380_v9  ;;  %6095 = vmatprep.subr.bf16.mxu0 %v6094_v13  ;;  %v2727_v9 = vld [vmem:[#allocation11 + $0x2a00] sm:$0xff]  ;;  %v2734_v13 = vld [vmem:[#allocation11 + $0x2a38] sm:$0xff] }
 0x371   :  { %6383 = vmatprep.subr.bf16.mxu1 %v6382_v18  ;;  %v2742_v18 = vld [vmem:[#allocation11 + $0x2a78] sm:$0xff]  ;;  %v6108_v24 = vpack.c.bf16 %v2734_v13, %v2727_v9  ;;  %v2323_v9 = vld [vmem:[#allocation11 + $0x1d60] sm:$0xff]  ;;  %v6406_v13 = vpack.c.bf16 %v2331_v61, %v2324_v60 }
 0x372   :  { %v6110_v55 = vpack.c.bf16 %v2749_v19, %v2742_v18  ;;  %v2338_v18 = vld [vmem:[#allocation11 + $0x1dd8] sm:$0xff]  ;;  %v2345_v19 = vld [vmem:[#allocation11 + $0x1e10] sm:$0xff] }
 0x373   :  { %6097 = vmatpush1.bf16.msra.mxu0 %v6096_v31  ;;  %v6396_v31 = vpack.c.bf16 %v2288_v49, %v2281_v15  ;;  %v2784_v15 = vld [vmem:[#allocation11 + $0x2bc8] sm:$0xff]  ;;  %v2791_v49 = vld [vmem:[#allocation11 + $0x2c00] sm:$0xff] }
 0x374   :  { %6385 = vmatpush1.bf16.msra.mxu1 %v6384_v27  ;;  %6099 = vmatprep.subr.bf16.mxu0 %v6098_v29  ;;  %v2741_v27 = vld [vmem:[#allocation11 + $0x2a70] sm:$0xff]  ;;  %v2748_v29 = vld [vmem:[#allocation11 + $0x2aa8] sm:$0xff] }
 0x375   :  { %6387 = vmatprep.subr.bf16.mxu1 %v6386_v41  ;;  %v2302_v41 = vld [vmem:[#allocation11 + $0x1cb8] sm:$0xff]  ;;  %v6112_v16 = vpack.c.bf16 %v2748_v29, %v2741_v27  ;;  %v2337_v29 = vld [vmem:[#allocation11 + $0x1dd0] sm:$0xff] }
 0x376   :  { %v6400_v53 = vpack.c.bf16 %v2302_v41, %v2295_v39  ;;  %v2790_v27 = vld [vmem:[#allocation11 + $0x2bf8] sm:$0xff]  ;;  %v6410_v39 = vpack.c.bf16 %v2345_v19, %v2338_v18  ;;  %v2805_v41 = vld [vmem:[#allocation11 + $0x2c70] sm:$0xff] }
 0x377   :  { %6101 = vmatpush1.bf16.msra.mxu0 %v6100_v54  ;;  %v6114_v54 = vpack.c.bf16 %v2763_v45, %v2756_v43  ;;  %v2352_v43 = vld [vmem:[#allocation11 + $0x1e48] sm:$0xff]  ;;  %v2359_v45 = vld [vmem:[#allocation11 + $0x1e80] sm:$0xff] }
 0x378   :  { %6389 = vmatpush1.bf16.msra.mxu1 %v6388_v63  ;;  %6103 = vmatprep.subr.bf16.mxu0 %v6102_v35  ;;  %v2755_v63 = vld [vmem:[#allocation11 + $0x2ae0] sm:$0xff]  ;;  %v2762_v35 = vld [vmem:[#allocation11 + $0x2b18] sm:$0xff] }
 0x379   :  { %6391 = vmatprep.subr.bf16.mxu1 %v6390_v57  ;;  %v2770_v57 = vld [vmem:[#allocation11 + $0x2b58] sm:$0xff]  ;;  %v6116_v62 = vpack.c.bf16 %v2762_v35, %v2755_v63  ;;  %v2351_v63 = vld [vmem:[#allocation11 + $0x1e40] sm:$0xff]  ;;  %v6414_v35 = vpack.c.bf16 %v2359_v45, %v2352_v43 }
 0x37a   :  { %v6416_v61 = vpack.c.bf16 %v2358_v36, %v2351_v63  ;;  %v2400_v63 = vld [vmem:[#allocation11 + $0x1fc8] sm:$0xff]  ;;  %v1409_v36 = vld [vmem:[#allocation11 + $0xd0] sm:$0xff] }
 0x37b   :  { %6105 = vmatpush1.bf16.msra.mxu0 %v6104_v2  ;;  %v6118_v2 = vpack.c.bf16 %v2777_v58, %v2770_v57  ;;  %v2366_v57 = vld [vmem:[#allocation11 + $0x1eb8] sm:$0xff]  ;;  %v2373_v58 = vld [vmem:[#allocation11 + $0x1ef0] sm:$0xff] }
 0x37c   :  { %6393 = vmatpush1.bf16.msra.mxu1 %v6392_v3  ;;  %6107 = vmatprep.subr.bf16.mxu0 %v6106_v4  ;;  %v2769_v3 = vld [vmem:[#allocation11 + $0x2b50] sm:$0xff]  ;;  %v2776_v4 = vld [vmem:[#allocation11 + $0x2b88] sm:$0xff] }
 0x37d   :  { %6395 = vmatprep.subr.bf16.mxu1 %v6394_v14  ;;  %v2330_v14 = vld [vmem:[#allocation11 + $0x1d98] sm:$0xff]  ;;  %v6120_v20 = vpack.c.bf16 %v2776_v4, %v2769_v3  ;;  %v2365_v3 = vld [vmem:[#allocation11 + $0x1eb0] sm:$0xff]  ;;  %v6418_v4 = vpack.c.bf16 %v2373_v58, %v2366_v57  ;;  %v7774_v58 = vmax.f32 %v7734_v44, 0.0 }
 0x37e   :  { %3296 = vmatmul.mubr.f32.vlgmr.msra.gmra.mrb[8].mxu0 %v7767_v7  ;;  %v6408_v21 = vpack.c.bf16 %v2330_v14, %v2323_v9  ;;  %v2372_v9 = vld [vmem:[#allocation11 + $0x1ee8] sm:$0xff]  ;;  %v2833_v14 = vld [vmem:[#allocation11 + $0x2d50] sm:$0xff] }
 0x37f   :  { %3651 = vmatmul.mubr.f32.vlgmr.msra.gmra.mrb[16].mxu1 %v7743_v34  ;;  %6109 = vmatpush1.bf16.msra.mxu0 %v6108_v24  ;;  %v6122_v24 = vpack.c.bf16 %v2791_v49, %v2784_v15  ;;  %v2380_v15 = vld [vmem:[#allocation11 + $0x1f28] sm:$0xff]  ;;  %v2387_v49 = vld [vmem:[#allocation11 + $0x1f60] sm:$0xff]  ;;  %v6420_v19 = vpack.c.bf16 %v2372_v9, %v2365_v3 }
 0x380   :  { %6397 = vmatpush1.bf16.msra.mxu1 %v6396_v31  ;;  %3721 = vmatprep.mubr.f32.mxu1 %v7745_v17  ;;  %v2783_v31 = vld [vmem:[#allocation11 + $0x2bc0] sm:$0xff]  ;;  %v1416_v9 = vld [vmem:[#allocation11 + $0x108] sm:$0xff] }
 0x381   :  { %6111 = vmatprep.subr.bf16.mxu0 %v6110_v55  ;;  %6399 = vmatprep.subr.bf16.mxu1 %v6398_v38  ;;  %v2344_v55 = vld [vmem:[#allocation11 + $0x1e08] sm:$0xff]  ;;  %v2798_v38 = vld [vmem:[#allocation11 + $0x2c38] sm:$0xff]  ;;  %v6124_v46 = vpack.c.bf16 %v2790_v27, %v2783_v31  ;;  %v2379_v31 = vld [vmem:[#allocation11 + $0x1f20] sm:$0xff]  ;;  %v6422_v27 = vpack.c.bf16 %v2387_v49, %v2380_v15 }
 0x382   :  { %3366 = vmatprep.mubr.f32.mxu0 %v7465_v32  ;;  %v6412_v52 = vpack.c.bf16 %v2344_v55, %v2337_v29  ;;  %v2386_v29 = vld [vmem:[#allocation11 + $0x1f58] sm:$0xff]  ;;  %v1395_v55 = vld [vmem:[#allocation11 + $0x60] sm:$0xff]  ;;  %v2429_v15 = vld [vmem:[#allocation11 + $0x20b0] sm:$0xff] }
 0x383   :  { %6113 = vmatpush1.bf16.msra.mxu0 %v6112_v16  ;;  %v6126_v16 = vpack.c.bf16 %v2805_v41, %v2798_v38  ;;  %v2394_v38 = vld [vmem:[#allocation11 + $0x1f98] sm:$0xff]  ;;  %v2401_v41 = vld [vmem:[#allocation11 + $0x1fd0] sm:$0xff]  ;;  %v6424_v45 = vpack.c.bf16 %v2386_v29, %v2379_v31  ;;  %v2428_v31 = vld [vmem:[#allocation11 + $0x20a8] sm:$0xff] }
 0x384   :  { %6401 = vmatpush1.bf16.msra.mxu1 %v6400_v53  ;;  %6115 = vmatprep.subr.bf16.mxu0 %v6114_v54  ;;  %v2797_v53 = vld [vmem:[#allocation11 + $0x2c30] sm:$0xff]  ;;  %v2804_v54 = vld [vmem:[#allocation11 + $0x2c68] sm:$0xff] }
 0x385   :  { %6403 = vmatprep.subr.bf16.mxu1 %v6402_v22  ;;  %v2812_v22 = vld [vmem:[#allocation11 + $0x2ca8] sm:$0xff]  ;;  %v6128_v60 = vpack.c.bf16 %v2804_v54, %v2797_v53  ;;  %v1394_v53 = vld [vmem:[#allocation11 + $0x58] sm:$0xff]  ;;  %v6426_v54 = vpack.c.bf16 %v2401_v41, %v2394_v38  ;;  %v1437_v29 = vld [vmem:[#allocation11 + $0x1b0] sm:$0xff] }
 0x387   :  { %6117 = vmatpush1.bf16.msra.mxu0 %v6116_v62  ;;  %v6130_v62 = vpack.c.bf16 %v2819_v56, %v2812_v22  ;;  %v2408_v22 = vld [vmem:[#allocation11 + $0x2008] sm:$0xff]  ;;  %v2415_v56 = vld [vmem:[#allocation11 + $0x2040] sm:$0xff] }
 0x388   :  { %6405 = vmatpush1.bf16.msra.mxu1 %v6404_v0  ;;  %6119 = vmatprep.subr.bf16.mxu0 %v6118_v2  ;;  %v2811_v0 = vld [vmem:[#allocation11 + $0x2ca0] sm:$0xff]  ;;  %v2818_v2 = vld [vmem:[#allocation11 + $0x2cd8] sm:$0xff]  ;;  %v6430_v3 = vpack.c.bf16 %v2415_v56, %v2408_v22 }
 0x389   :  { %6407 = vmatprep.subr.bf16.mxu1 %v6406_v13  ;;  %v2826_v13 = vld [vmem:[#allocation11 + $0x2d18] sm:$0xff]  ;;  %v6132_v18 = vpack.c.bf16 %v2818_v2, %v2811_v0  ;;  %v1401_v0 = vld [vmem:[#allocation11 + $0x90] sm:$0xff]  ;;  %v1408_v2 = vld [vmem:[#allocation11 + $0xc8] sm:$0xff] }
 0x38a   :  { %v6560_v44 = vpack.c.bf16 %v1408_v2, %v1401_v0  ;;  %v2456_v2 = vld [vmem:[#allocation11 + $0x2188] sm:$0xff] }
 0x38b   :  { %6121 = vmatpush1.bf16.msra.mxu0 %v6120_v20  ;;  %v6134_v20 = vpack.c.bf16 %v2833_v14, %v2826_v13  ;;  %v1423_v13 = vld [vmem:[#allocation11 + $0x140] sm:$0xff]  ;;  %v2422_v14 = vld [vmem:[#allocation11 + $0x2078] sm:$0xff] }
 0x38c   :  { %6409 = vmatpush1.bf16.msra.mxu1 %v6408_v21  ;;  %6123 = vmatprep.subr.bf16.mxu0 %v6122_v24  ;;  %v2825_v21 = vld [vmem:[#allocation11 + $0x2d10] sm:$0xff]  ;;  %v2832_v24 = vld [vmem:[#allocation11 + $0x2d48] sm:$0xff] }
 0x38d   :  { %6411 = vmatprep.subr.bf16.mxu1 %v6410_v39  ;;  %v1388_v39 = vld [vmem:[#allocation11 + $0x28] sm:$0xff]  ;;  %v6136_v43 = vpack.c.bf16 %v2832_v24, %v2825_v21  ;;  %v1422_v21 = vld [vmem:[#allocation11 + $0x138] sm:$0xff]  ;;  %v6434_v24 = vpack.c.bf16 %v2429_v15, %v2422_v14 }
 0x38f   :  { %6125 = vmatpush1.bf16.msra.mxu0 %v6124_v46  ;;  %v6554_v46 = vpack.c.bf16 %v1395_v55, %v1388_v39  ;;  %v2436_v39 = vld [vmem:[#allocation11 + $0x20e8] sm:$0xff]  ;;  %v2443_v55 = vld [vmem:[#allocation11 + $0x2120] sm:$0xff] }
 0x390   :  { %6413 = vmatpush1.bf16.msra.mxu1 %v6412_v52  ;;  %6127 = vmatprep.subr.bf16.mxu0 %v6126_v16  ;;  %v2393_v52 = vld [vmem:[#allocation11 + $0x1f90] sm:$0xff]  ;;  %v1387_v16 = vld [vmem:[#allocation11 + $0x20] sm:$0xff] }
 0x391   :  { %6415 = vmatprep.subr.bf16.mxu1 %v6414_v35  ;;  %v1402_v35 = vld [vmem:[#allocation11 + $0x98] sm:$0xff]  ;;  %v6556_v57 = vpack.c.bf16 %v1394_v53, %v1387_v16  ;;  %v6438_v16 = vpack.c.bf16 %v2443_v55, %v2436_v39 }
 0x392   :  { %v2442_v53 = vld [vmem:[#allocation11 + $0x2118] sm:$0xff] }
 0x393   :  { %6129 = vmatpush1.bf16.msra.mxu0 %v6128_v60  ;;  %v6428_v60 = vpack.c.bf16 %v2400_v63, %v2393_v52  ;;  %v1436_v52 = vld [vmem:[#allocation11 + $0x1a8] sm:$0xff]  ;;  %v1451_v63 = vld [vmem:[#allocation11 + $0x220] sm:$0xff] }
 0x394   :  { %6417 = vmatpush1.bf16.msra.mxu1 %v6416_v61  ;;  %6131 = vmatprep.subr.bf16.mxu0 %v6130_v62  ;;  %v6558_v61 = vpack.c.bf16 %v1409_v36, %v1402_v35  ;;  %v2407_v62 = vld [vmem:[#allocation11 + $0x2000] sm:$0xff]  ;;  %v2450_v35 = vld [vmem:[#allocation11 + $0x2158] sm:$0xff]  ;;  %v2457_v36 = vld [vmem:[#allocation11 + $0x2190] sm:$0xff] }
 0x395   :  { %6419 = vmatprep.subr.bf16.mxu1 %v6418_v4  ;;  %v2414_v4 = vld [vmem:[#allocation11 + $0x2038] sm:$0xff]  ;;  %v6442_v0 = vpack.c.bf16 %v2457_v36, %v2450_v35 }
 0x396   :  { %v6432_v49 = vpack.c.bf16 %v2414_v4, %v2407_v62  ;;  %v1450_v62 = vld [vmem:[#allocation11 + $0x218] sm:$0xff]  ;;  %v1465_v4 = vld [vmem:[#allocation11 + $0x290] sm:$0xff] }
 0x397   :  { %6133 = vmatpush1.bf16.msra.mxu0 %v6132_v18  ;;  %v6562_v18 = vpack.c.bf16 %v1423_v13, %v1416_v9  ;;  %v2464_v9 = vld [vmem:[#allocation11 + $0x21c8] sm:$0xff]  ;;  %v2471_v13 = vld [vmem:[#allocation11 + $0x2200] sm:$0xff] }
 0x398   :  { %6421 = vmatpush1.bf16.msra.mxu1 %v6420_v19  ;;  %6135 = vmatprep.subr.bf16.mxu0 %v6134_v20  ;;  %v2421_v19 = vld [vmem:[#allocation11 + $0x2070] sm:$0xff]  ;;  %v1415_v20 = vld [vmem:[#allocation11 + $0x100] sm:$0xff] }
 0x399   :  { %6423 = vmatprep.subr.bf16.mxu1 %v6422_v27  ;;  %v1430_v27 = vld [vmem:[#allocation11 + $0x178] sm:$0xff]  ;;  %v6564_v38 = vpack.c.bf16 %v1422_v21, %v1415_v20  ;;  %v6436_v41 = vpack.c.bf16 %v2428_v31, %v2421_v19  ;;  %v1464_v19 = vld [vmem:[#allocation11 + $0x288] sm:$0xff]  ;;  %v6446_v20 = vpack.c.bf16 %v2471_v13, %v2464_v9  ;;  %v1479_v31 = vld [vmem:[#allocation11 + $0x300] sm:$0xff] }
 0x39a   :  { %v2470_v21 = vld [vmem:[#allocation11 + $0x21f8] sm:$0xff] }
 0x39b   :  { %6137 = vmatpush1.bf16.msra.mxu0 %v6136_v43  ;;  %v6566_v43 = vpack.c.bf16 %v1437_v29, %v1430_v27  ;;  %v2478_v27 = vld [vmem:[#allocation11 + $0x2238] sm:$0xff]  ;;  %v2485_v29 = vld [vmem:[#allocation11 + $0x2270] sm:$0xff] }
 0x39c   :  { %6425 = vmatpush1.bf16.msra.mxu1 %v6424_v45  ;;  %6555 = vmatprep.subr.bf16.mxu0 %v6554_v46  ;;  %v2435_v45 = vld [vmem:[#allocation11 + $0x20e0] sm:$0xff]  ;;  %v1429_v46 = vld [vmem:[#allocation11 + $0x170] sm:$0xff] }
 0x39d   :  { %6427 = vmatprep.subr.bf16.mxu1 %v6426_v54  ;;  %v1444_v54 = vld [vmem:[#allocation11 + $0x1e8] sm:$0xff]  ;;  %v6568_v22 = vpack.c.bf16 %v1436_v52, %v1429_v46  ;;  %v6440_v56 = vpack.c.bf16 %v2442_v53, %v2435_v45  ;;  %v1478_v45 = vld [vmem:[#allocation11 + $0x2f8] sm:$0xff]  ;;  %v6450_v46 = vpack.c.bf16 %v2485_v29, %v2478_v27  ;;  %v1493_v53 = vld [vmem:[#allocation11 + $0x370] sm:$0xff] }
 0x39e   :  { %3367 = vmatmul.mubr.f32.vlgmr.msra.gmra.mrb[8].mxu0 %v7774_v58  ;;  %v2484_v52 = vld [vmem:[#allocation11 + $0x2268] sm:$0xff] }
 0x39f   :  { %6557 = vmatpush1.bf16.msra.mxu0 %v6556_v57  ;;  %3934 = vmatprep.mubr.f32.mxu0 %v7675_v5  ;;  %v6570_v57 = vpack.c.bf16 %v1451_v63, %v1444_v54  ;;  %v2492_v54 = vld [vmem:[#allocation11 + $0x22a8] sm:$0xff]  ;;  %v2499_v63 = vld [vmem:[#allocation11 + $0x22e0] sm:$0xff] }
 0x3a0   :  { %6429 = vmatpush1.bf16.msra.mxu1 %v6428_v60  ;;  %6559 = vmatprep.subr.bf16.mxu0 %v6558_v61  ;;  %v2449_v60 = vld [vmem:[#allocation11 + $0x2150] sm:$0xff]  ;;  %v1443_v61 = vld [vmem:[#allocation11 + $0x1e0] sm:$0xff] }
 0x3a1   :  { %6431 = vmatprep.subr.bf16.mxu1 %v6430_v3  ;;  %v1458_v3 = vld [vmem:[#allocation11 + $0x258] sm:$0xff]  ;;  %v6572_v14 = vpack.c.bf16 %v1450_v62, %v1443_v61  ;;  %v6444_v15 = vpack.c.bf16 %v2456_v2, %v2449_v60  ;;  %v1492_v60 = vld [vmem:[#allocation11 + $0x368] sm:$0xff]  ;;  %v6454_v61 = vpack.c.bf16 %v2499_v63, %v2492_v54  ;;  %v1507_v2 = vld [vmem:[#allocation11 + $0x3e0] sm:$0xff] }
 0x3a2   :  { %v2498_v62 = vld [vmem:[#allocation11 + $0x22d8] sm:$0xff] }
 0x3a3   :  { %6561 = vmatpush1.bf16.msra.mxu0 %v6560_v44  ;;  %v6574_v44 = vpack.c.bf16 %v1465_v4, %v1458_v3  ;;  %v2506_v3 = vld [vmem:[#allocation11 + $0x2318] sm:$0xff]  ;;  %v2513_v4 = vld [vmem:[#allocation11 + $0x2350] sm:$0xff] }
 0x3a4   :  { %6433 = vmatpush1.bf16.msra.mxu1 %v6432_v49  ;;  %6563 = vmatprep.subr.bf16.mxu0 %v6562_v18  ;;  %v2463_v49 = vld [vmem:[#allocation11 + $0x21c0] sm:$0xff]  ;;  %v1457_v18 = vld [vmem:[#allocation11 + $0x250] sm:$0xff] }
 0x3a5   :  { %6435 = vmatprep.subr.bf16.mxu1 %v6434_v24  ;;  %v1472_v24 = vld [vmem:[#allocation11 + $0x2c8] sm:$0xff]  ;;  %v6576_v39 = vpack.c.bf16 %v1464_v19, %v1457_v18  ;;  %v6448_v55 = vpack.c.bf16 %v2470_v21, %v2463_v49  ;;  %v6458_v49 = vpack.c.bf16 %v2513_v4, %v2506_v3  ;;  %v2505_v18 = vld [vmem:[#allocation11 + $0x2310] sm:$0xff]  ;;  %v2527_v21 = vld [vmem:[#allocation11 + $0x23c0] sm:$0xff] }
 0x3a6   :  { %v2512_v19 = vld [vmem:[#allocation11 + $0x2348] sm:$0xff] }
 0x3a7   :  { %6565 = vmatpush1.bf16.msra.mxu0 %v6564_v38  ;;  %v6578_v38 = vpack.c.bf16 %v1479_v31, %v1472_v24  ;;  %v1514_v24 = vld [vmem:[#allocation11 + $0x418] sm:$0xff]  ;;  %v1521_v31 = vld [vmem:[#allocation11 + $0x450] sm:$0xff]  ;;  %v6460_v29 = vpack.c.bf16 %v2512_v19, %v2505_v18  ;;  %v1556_v18 = vld [vmem:[#allocation11 + $0x568] sm:$0xff] }
 0x3a8   :  { %6437 = vmatpush1.bf16.msra.mxu1 %v6436_v41  ;;  %6567 = vmatprep.subr.bf16.mxu0 %v6566_v43  ;;  %v2477_v41 = vld [vmem:[#allocation11 + $0x2230] sm:$0xff]  ;;  %v1471_v43 = vld [vmem:[#allocation11 + $0x2c0] sm:$0xff] }
 0x3a9   :  { %6439 = vmatprep.subr.bf16.mxu1 %v6438_v16  ;;  %v1486_v16 = vld [vmem:[#allocation11 + $0x338] sm:$0xff]  ;;  %v6580_v35 = vpack.c.bf16 %v1478_v45, %v1471_v43  ;;  %v6452_v36 = vpack.c.bf16 %v2484_v52, %v2477_v41  ;;  %v6590_v43 = vpack.c.bf16 %v1521_v31, %v1514_v24  ;;  %v1535_v52 = vld [vmem:[#allocation11 + $0x4c0] sm:$0xff] }
 0x3aa   :  { %v2526_v45 = vld [vmem:[#allocation11 + $0x23b8] sm:$0xff]  ;;  %v1563_v19 = vld [vmem:[#allocation11 + $0x5a0] sm:$0xff] }
 0x3ab   :  { %6569 = vmatpush1.bf16.msra.mxu0 %v6568_v22  ;;  %v6582_v22 = vpack.c.bf16 %v1493_v53, %v1486_v16  ;;  %v2534_v16 = vld [vmem:[#allocation11 + $0x23f8] sm:$0xff]  ;;  %v2541_v53 = vld [vmem:[#allocation11 + $0x2430] sm:$0xff] }
 0x3ac   :  { %6441 = vmatpush1.bf16.msra.mxu1 %v6440_v56  ;;  %6571 = vmatprep.subr.bf16.mxu0 %v6570_v57  ;;  %v2491_v56 = vld [vmem:[#allocation11 + $0x22a0] sm:$0xff]  ;;  %v1485_v57 = vld [vmem:[#allocation11 + $0x330] sm:$0xff] }
 0x3ad   :  { %6443 = vmatprep.subr.bf16.mxu1 %v6442_v0  ;;  %v1500_v0 = vld [vmem:[#allocation11 + $0x3a8] sm:$0xff]  ;;  %v6584_v9 = vpack.c.bf16 %v1492_v60, %v1485_v57  ;;  %v6456_v13 = vpack.c.bf16 %v2498_v62, %v2491_v56  ;;  %v1534_v56 = vld [vmem:[#allocation11 + $0x4b8] sm:$0xff]  ;;  %v6466_v57 = vpack.c.bf16 %v2541_v53, %v2534_v16  ;;  %v1549_v62 = vld [vmem:[#allocation11 + $0x530] sm:$0xff] }
 0x3ae   :  { %v2540_v60 = vld [vmem:[#allocation11 + $0x2428] sm:$0xff] }
 0x3af   :  { %6573 = vmatpush1.bf16.msra.mxu0 %v6572_v14  ;;  %v6586_v14 = vpack.c.bf16 %v1507_v2, %v1500_v0  ;;  %v2548_v0 = vld [vmem:[#allocation11 + $0x2468] sm:$0xff]  ;;  %v2555_v2 = vld [vmem:[#allocation11 + $0x24a0] sm:$0xff] }
 0x3b0   :  { %6445 = vmatpush1.bf16.msra.mxu1 %v6444_v15  ;;  %6575 = vmatprep.subr.bf16.mxu0 %v6574_v44  ;;  %v1499_v15 = vld [vmem:[#allocation11 + $0x3a0] sm:$0xff]  ;;  %v1506_v44 = vld [vmem:[#allocation11 + $0x3d8] sm:$0xff] }
 0x3b1   :  { %6447 = vmatprep.subr.bf16.mxu1 %v6446_v20  ;;  %v2520_v20 = vld [vmem:[#allocation11 + $0x2388] sm:$0xff]  ;;  %v6588_v27 = vpack.c.bf16 %v1506_v44, %v1499_v15  ;;  %v6470_v44 = vpack.c.bf16 %v2555_v2, %v2548_v0 }
 0x3b2   :  { %v6462_v41 = vpack.c.bf16 %v2527_v21, %v2520_v20  ;;  %v1548_v15 = vld [vmem:[#allocation11 + $0x528] sm:$0xff]  ;;  %v2562_v20 = vld [vmem:[#allocation11 + $0x24d8] sm:$0xff]  ;;  %v2569_v21 = vld [vmem:[#allocation11 + $0x2510] sm:$0xff] }
 0x3b3   :  { %6577 = vmatpush1.bf16.msra.mxu0 %v6576_v39  ;;  %v2519_v39 = vld [vmem:[#allocation11 + $0x2380] sm:$0xff] }
 0x3b4   :  { %6449 = vmatpush1.bf16.msra.mxu1 %v6448_v55  ;;  %6579 = vmatprep.subr.bf16.mxu0 %v6578_v38  ;;  %v1513_v55 = vld [vmem:[#allocation11 + $0x410] sm:$0xff]  ;;  %v1520_v38 = vld [vmem:[#allocation11 + $0x448] sm:$0xff]  ;;  %v6464_v63 = vpack.c.bf16 %v2526_v45, %v2519_v39  ;;  %v1555_v39 = vld [vmem:[#allocation11 + $0x560] sm:$0xff] }
 0x3b5   :  { %6451 = vmatprep.subr.bf16.mxu1 %v6450_v46  ;;  %v1528_v46 = vld [vmem:[#allocation11 + $0x488] sm:$0xff]  ;;  %v6592_v54 = vpack.c.bf16 %v1520_v38, %v1513_v55  ;;  %v1562_v55 = vld [vmem:[#allocation11 + $0x598] sm:$0xff]  ;;  %v6474_v38 = vpack.c.bf16 %v2569_v21, %v2562_v20  ;;  %v1577_v45 = vld [vmem:[#allocation11 + $0x610] sm:$0xff] }
 0x3b6   :  { %v6604_v16 = vpack.c.bf16 %v1562_v55, %v1555_v39  ;;  %v2610_v55 = vld [vmem:[#allocation11 + $0x2658] sm:$0xff] }
 0x3b7   :  { %6581 = vmatpush1.bf16.msra.mxu0 %v6580_v35  ;;  %v6594_v35 = vpack.c.bf16 %v1535_v52, %v1528_v46  ;;  %v2576_v46 = vld [vmem:[#allocation11 + $0x2548] sm:$0xff]  ;;  %v2583_v52 = vld [vmem:[#allocation11 + $0x2580] sm:$0xff] }
 0x3b8   :  { %6453 = vmatpush1.bf16.msra.mxu1 %v6452_v36  ;;  %6583 = vmatprep.subr.bf16.mxu0 %v6582_v22  ;;  %v2533_v36 = vld [vmem:[#allocation11 + $0x23f0] sm:$0xff]  ;;  %v1527_v22 = vld [vmem:[#allocation11 + $0x480] sm:$0xff] }
 0x3b9   :  { %6455 = vmatprep.subr.bf16.mxu1 %v6454_v61  ;;  %v1542_v61 = vld [vmem:[#allocation11 + $0x4f8] sm:$0xff]  ;;  %v6596_v3 = vpack.c.bf16 %v1534_v56, %v1527_v22  ;;  %v6468_v4 = vpack.c.bf16 %v2540_v60, %v2533_v36  ;;  %v1576_v36 = vld [vmem:[#allocation11 + $0x608] sm:$0xff]  ;;  %v6478_v22 = vpack.c.bf16 %v2583_v52, %v2576_v46  ;;  %v1591_v60 = vld [vmem:[#allocation11 + $0x680] sm:$0xff] }
 0x3ba   :  { %v2582_v56 = vld [vmem:[#allocation11 + $0x2578] sm:$0xff] }
 0x3bb   :  { %6585 = vmatpush1.bf16.msra.mxu0 %v6584_v9  ;;  %v6598_v9 = vpack.c.bf16 %v1549_v62, %v1542_v61  ;;  %v2590_v61 = vld [vmem:[#allocation11 + $0x25b8] sm:$0xff]  ;;  %v2597_v62 = vld [vmem:[#allocation11 + $0x25f0] sm:$0xff] }
 0x3bc   :  { %6457 = vmatpush1.bf16.msra.mxu1 %v6456_v13  ;;  %6587 = vmatprep.subr.bf16.mxu0 %v6586_v14  ;;  %v2547_v13 = vld [vmem:[#allocation11 + $0x2460] sm:$0xff]  ;;  %v1541_v14 = vld [vmem:[#allocation11 + $0x4f0] sm:$0xff] }
 0x3bd   :  { %6459 = vmatprep.subr.bf16.mxu1 %v6458_v49  ;;  %v2554_v49 = vld [vmem:[#allocation11 + $0x2498] sm:$0xff]  ;;  %v6600_v24 = vpack.c.bf16 %v1548_v15, %v1541_v14  ;;  %v6482_v14 = vpack.c.bf16 %v2597_v62, %v2590_v61  ;;  %v2596_v15 = vld [vmem:[#allocation11 + $0x25e8] sm:$0xff] }
 0x3be   :  { %v6472_v31 = vpack.c.bf16 %v2554_v49, %v2547_v13  ;;  %v1590_v13 = vld [vmem:[#allocation11 + $0x678] sm:$0xff]  ;;  %v1605_v49 = vld [vmem:[#allocation11 + $0x6f0] sm:$0xff] }
 0x3bf   :  { %3722 = vmatmul.mubr.f32.vlgmr.msra.gmra.mrb[16].mxu1 %v7753_v25  ;;  %6589 = vmatpush1.bf16.msra.mxu0 %v6588_v27  ;;  %v6602_v27 = vpack.c.bf16 %v1563_v19, %v1556_v18  ;;  %v2604_v18 = vld [vmem:[#allocation11 + $0x2628] sm:$0xff]  ;;  %v2611_v19 = vld [vmem:[#allocation11 + $0x2660] sm:$0xff] }
 0x3c0   :  { %6461 = vmatpush1.bf16.msra.mxu1 %v6460_v29  ;;  %3792 = vmatprep.mubr.f32.mxu1 %v7756_v42  ;;  %v2561_v29 = vld [vmem:[#allocation11 + $0x24d0] sm:$0xff]  ;;  %v6486_v39 = vpack.c.bf16 %v2611_v19, %v2604_v18 }
 0x3c1   :  { %6463 = vmatprep.subr.bf16.mxu1 %v6462_v41  ;;  %6591 = vmatprep.subr.bf16.mxu0 %v6590_v43  ;;  %v2568_v41 = vld [vmem:[#allocation11 + $0x2508] sm:$0xff]  ;;  %v1570_v43 = vld [vmem:[#allocation11 + $0x5d8] sm:$0xff] }
 0x3c2   :  { %v6476_v53 = vpack.c.bf16 %v2568_v41, %v2561_v29  ;;  %v1604_v29 = vld [vmem:[#allocation11 + $0x6e8] sm:$0xff]  ;;  %v1619_v41 = vld [vmem:[#allocation11 + $0x760] sm:$0xff] }
 0x3c3   :  { %6593 = vmatpush1.bf16.msra.mxu0 %v6592_v54  ;;  %v6606_v54 = vpack.c.bf16 %v1577_v45, %v1570_v43  ;;  %v2618_v43 = vld [vmem:[#allocation11 + $0x2698] sm:$0xff]  ;;  %v2625_v45 = vld [vmem:[#allocation11 + $0x26d0] sm:$0xff] }
 0x3c4   :  { %6465 = vmatpush1.bf16.msra.mxu1 %v6464_v63  ;;  %6595 = vmatprep.subr.bf16.mxu0 %v6594_v35  ;;  %v2575_v63 = vld [vmem:[#allocation11 + $0x2540] sm:$0xff]  ;;  %v1569_v35 = vld [vmem:[#allocation11 + $0x5d0] sm:$0xff] }
 0x3c5   :  { %6467 = vmatprep.subr.bf16.mxu1 %v6466_v57  ;;  %v1584_v57 = vld [vmem:[#allocation11 + $0x648] sm:$0xff]  ;;  %v6608_v0 = vpack.c.bf16 %v1576_v36, %v1569_v35  ;;  %v6480_v2 = vpack.c.bf16 %v2582_v56, %v2575_v63  ;;  %v1618_v63 = vld [vmem:[#allocation11 + $0x758] sm:$0xff]  ;;  %v6490_v35 = vpack.c.bf16 %v2625_v45, %v2618_v43  ;;  %v1633_v56 = vld [vmem:[#allocation11 + $0x7d0] sm:$0xff] }
 0x3c6   :  { %v2624_v36 = vld [vmem:[#allocation11 + $0x26c8] sm:$0xff] }
 0x3c7   :  { %6597 = vmatpush1.bf16.msra.mxu0 %v6596_v3  ;;  %v6610_v3 = vpack.c.bf16 %v1591_v60, %v1584_v57  ;;  %v2632_v57 = vld [vmem:[#allocation11 + $0x2708] sm:$0xff]  ;;  %v2639_v60 = vld [vmem:[#allocation11 + $0x2740] sm:$0xff] }
 0x3c8   :  { %6469 = vmatpush1.bf16.msra.mxu1 %v6468_v4  ;;  %6599 = vmatprep.subr.bf16.mxu0 %v6598_v9  ;;  %v2589_v4 = vld [vmem:[#allocation11 + $0x25b0] sm:$0xff]  ;;  %v1583_v9 = vld [vmem:[#allocation11 + $0x640] sm:$0xff] }
 0x3c9   :  { %6471 = vmatprep.subr.bf16.mxu1 %v6470_v44  ;;  %v1598_v44 = vld [vmem:[#allocation11 + $0x6b8] sm:$0xff]  ;;  %v6612_v20 = vpack.c.bf16 %v1590_v13, %v1583_v9  ;;  %v6484_v21 = vpack.c.bf16 %v2596_v15, %v2589_v4  ;;  %v1632_v4 = vld [vmem:[#allocation11 + $0x7c8] sm:$0xff]  ;;  %v6494_v9 = vpack.c.bf16 %v2639_v60, %v2632_v57  ;;  %v1647_v15 = vld [vmem:[#allocation11 + $0x840] sm:$0xff] }
 0x3ca   :  { %v2638_v13 = vld [vmem:[#allocation11 + $0x2738] sm:$0xff] }
 0x3cb   :  { %6601 = vmatpush1.bf16.msra.mxu0 %v6600_v24  ;;  %v6614_v24 = vpack.c.bf16 %v1605_v49, %v1598_v44  ;;  %v2646_v44 = vld [vmem:[#allocation11 + $0x2778] sm:$0xff]  ;;  %v2653_v49 = vld [vmem:[#allocation11 + $0x27b0] sm:$0xff] }
 0x3cc   :  { %6473 = vmatpush1.bf16.msra.mxu1 %v6472_v31  ;;  %6603 = vmatprep.subr.bf16.mxu0 %v6602_v27  ;;  %v2603_v31 = vld [vmem:[#allocation11 + $0x2620] sm:$0xff]  ;;  %v1597_v27 = vld [vmem:[#allocation11 + $0x6b0] sm:$0xff] }
 0x3cd   :  { %6475 = vmatprep.subr.bf16.mxu1 %v6474_v38  ;;  %v1612_v38 = vld [vmem:[#allocation11 + $0x728] sm:$0xff]  ;;  %v6616_v46 = vpack.c.bf16 %v1604_v29, %v1597_v27  ;;  %v6488_v52 = vpack.c.bf16 %v2610_v55, %v2603_v31  ;;  %v1646_v31 = vld [vmem:[#allocation11 + $0x838] sm:$0xff]  ;;  %v6498_v27 = vpack.c.bf16 %v2653_v49, %v2646_v44  ;;  %v1661_v55 = vld [vmem:[#allocation11 + $0x8b0] sm:$0xff] }
 0x3ce   :  { %v2652_v29 = vld [vmem:[#allocation11 + $0x27a8] sm:$0xff] }
 0x3cf   :  { %6605 = vmatpush1.bf16.msra.mxu0 %v6604_v16  ;;  %v6618_v16 = vpack.c.bf16 %v1619_v41, %v1612_v38  ;;  %v2660_v38 = vld [vmem:[#allocation11 + $0x27e8] sm:$0xff]  ;;  %v2667_v41 = vld [vmem:[#allocation11 + $0x2820] sm:$0xff] }
 0x3d0   :  { %6477 = vmatpush1.bf16.msra.mxu1 %v6476_v53  ;;  %6607 = vmatprep.subr.bf16.mxu0 %v6606_v54  ;;  %v2617_v53 = vld [vmem:[#allocation11 + $0x2690] sm:$0xff]  ;;  %v1611_v54 = vld [vmem:[#allocation11 + $0x720] sm:$0xff] }
 0x3d1   :  { %6479 = vmatprep.subr.bf16.mxu1 %v6478_v22  ;;  %v1626_v22 = vld [vmem:[#allocation11 + $0x798] sm:$0xff]  ;;  %v6620_v61 = vpack.c.bf16 %v1618_v63, %v1611_v54  ;;  %v6492_v62 = vpack.c.bf16 %v2624_v36, %v2617_v53  ;;  %v1660_v53 = vld [vmem:[#allocation11 + $0x8a8] sm:$0xff]  ;;  %v6502_v54 = vpack.c.bf16 %v2667_v41, %v2660_v38  ;;  %v1675_v36 = vld [vmem:[#allocation11 + $0x920] sm:$0xff] }
 0x3d2   :  { %v2666_v63 = vld [vmem:[#allocation11 + $0x2818] sm:$0xff] }
 0x3d3   :  { %6609 = vmatpush1.bf16.msra.mxu0 %v6608_v0  ;;  %v6622_v0 = vpack.c.bf16 %v1633_v56, %v1626_v22  ;;  %v2674_v22 = vld [vmem:[#allocation11 + $0x2858] sm:$0xff]  ;;  %v2681_v56 = vld [vmem:[#allocation11 + $0x2890] sm:$0xff] }
 0x3d4   :  { %6481 = vmatpush1.bf16.msra.mxu1 %v6480_v2  ;;  %6611 = vmatprep.subr.bf16.mxu0 %v6610_v3  ;;  %v2631_v2 = vld [vmem:[#allocation11 + $0x2700] sm:$0xff]  ;;  %v1625_v3 = vld [vmem:[#allocation11 + $0x790] sm:$0xff] }
 0x3d5   :  { %6483 = vmatprep.subr.bf16.mxu1 %v6482_v14  ;;  %v1640_v14 = vld [vmem:[#allocation11 + $0x808] sm:$0xff]  ;;  %v6624_v18 = vpack.c.bf16 %v1632_v4, %v1625_v3  ;;  %v6496_v19 = vpack.c.bf16 %v2638_v13, %v2631_v2  ;;  %v1674_v2 = vld [vmem:[#allocation11 + $0x918] sm:$0xff]  ;;  %v6506_v3 = vpack.c.bf16 %v2681_v56, %v2674_v22  ;;  %v1689_v13 = vld [vmem:[#allocation11 + $0x990] sm:$0xff] }
 0x3d6   :  { %v2680_v4 = vld [vmem:[#allocation11 + $0x2888] sm:$0xff] }
 0x3d7   :  { %6613 = vmatpush1.bf16.msra.mxu0 %v6612_v20  ;;  %v6626_v20 = vpack.c.bf16 %v1647_v15, %v1640_v14  ;;  %v2688_v14 = vld [vmem:[#allocation11 + $0x28c8] sm:$0xff]  ;;  %v2695_v15 = vld [vmem:[#allocation11 + $0x2900] sm:$0xff] }
 0x3d8   :  { %6485 = vmatpush1.bf16.msra.mxu1 %v6484_v21  ;;  %6615 = vmatprep.subr.bf16.mxu0 %v6614_v24  ;;  %v2645_v21 = vld [vmem:[#allocation11 + $0x2770] sm:$0xff]  ;;  %v1639_v24 = vld [vmem:[#allocation11 + $0x800] sm:$0xff] }
 0x3d9   :  { %6487 = vmatprep.subr.bf16.mxu1 %v6486_v39  ;;  %v1654_v39 = vld [vmem:[#allocation11 + $0x878] sm:$0xff]  ;;  %v6628_v43 = vpack.c.bf16 %v1646_v31, %v1639_v24  ;;  %v6500_v45 = vpack.c.bf16 %v2652_v29, %v2645_v21  ;;  %v1688_v21 = vld [vmem:[#allocation11 + $0x988] sm:$0xff]  ;;  %v6510_v24 = vpack.c.bf16 %v2695_v15, %v2688_v14  ;;  %v1703_v29 = vld [vmem:[#allocation11 + $0xa00] sm:$0xff] }
 0x3da   :  { %v2694_v31 = vld [vmem:[#allocation11 + $0x28f8] sm:$0xff] }
 0x3db   :  { %6617 = vmatpush1.bf16.msra.mxu0 %v6616_v46  ;;  %v6630_v46 = vpack.c.bf16 %v1661_v55, %v1654_v39  ;;  %v2702_v39 = vld [vmem:[#allocation11 + $0x2938] sm:$0xff]  ;;  %v2709_v55 = vld [vmem:[#allocation11 + $0x2970] sm:$0xff] }
 0x3dc   :  { %6489 = vmatpush1.bf16.msra.mxu1 %v6488_v52  ;;  %6619 = vmatprep.subr.bf16.mxu0 %v6618_v16  ;;  %v2659_v52 = vld [vmem:[#allocation11 + $0x27e0] sm:$0xff]  ;;  %v1653_v16 = vld [vmem:[#allocation11 + $0x870] sm:$0xff] }
 0x3dd   :  { %6491 = vmatprep.subr.bf16.mxu1 %v6490_v35  ;;  %v1668_v35 = vld [vmem:[#allocation11 + $0x8e8] sm:$0xff]  ;;  %v6632_v57 = vpack.c.bf16 %v1660_v53, %v1653_v16  ;;  %v6504_v60 = vpack.c.bf16 %v2666_v63, %v2659_v52  ;;  %v1702_v52 = vld [vmem:[#allocation11 + $0x9f8] sm:$0xff]  ;;  %v6514_v16 = vpack.c.bf16 %v2709_v55, %v2702_v39  ;;  %v1717_v63 = vld [vmem:[#allocation11 + $0xa70] sm:$0xff] }
 0x3de   :  { %3935 = vmatmul.mubr.f32.vlgmr.msra.gmra.mrb[10].mxu0 %v7679_v11  ;;  %v2708_v53 = vld [vmem:[#allocation11 + $0x2968] sm:$0xff] }
 0x3df   :  { %6621 = vmatpush1.bf16.msra.mxu0 %v6620_v61  ;;  %4005 = vmatprep.mubr.f32.mxu0 %v7677_v6  ;;  %v6634_v61 = vpack.c.bf16 %v1675_v36, %v1668_v35  ;;  %v2716_v35 = vld [vmem:[#allocation11 + $0x29a8] sm:$0xff]  ;;  %v2723_v36 = vld [vmem:[#allocation11 + $0x29e0] sm:$0xff] }
 0x3e0   :  { %6493 = vmatpush1.bf16.msra.mxu1 %v6492_v62  ;;  %6623 = vmatprep.subr.bf16.mxu0 %v6622_v0  ;;  %v2673_v62 = vld [vmem:[#allocation11 + $0x2850] sm:$0xff]  ;;  %v1667_v0 = vld [vmem:[#allocation11 + $0x8e0] sm:$0xff] }
 0x3e1   :  { %6495 = vmatprep.subr.bf16.mxu1 %v6494_v9  ;;  %v1682_v9 = vld [vmem:[#allocation11 + $0x958] sm:$0xff]  ;;  %v6636_v44 = vpack.c.bf16 %v1674_v2, %v1667_v0  ;;  %v6508_v49 = vpack.c.bf16 %v2680_v4, %v2673_v62  ;;  %v1716_v62 = vld [vmem:[#allocation11 + $0xa68] sm:$0xff]  ;;  %v6518_v0 = vpack.c.bf16 %v2723_v36, %v2716_v35  ;;  %v1731_v4 = vld [vmem:[#allocation11 + $0xae0] sm:$0xff] }
 0x3e2   :  { %v2722_v2 = vld [vmem:[#allocation11 + $0x29d8] sm:$0xff] }
 0x3e3   :  { %6625 = vmatpush1.bf16.msra.mxu0 %v6624_v18  ;;  %v6638_v18 = vpack.c.bf16 %v1689_v13, %v1682_v9  ;;  %v2730_v9 = vld [vmem:[#allocation11 + $0x2a18] sm:$0xff]  ;;  %v2737_v13 = vld [vmem:[#allocation11 + $0x2a50] sm:$0xff] }
 0x3e4   :  { %6497 = vmatpush1.bf16.msra.mxu1 %v6496_v19  ;;  %6627 = vmatprep.subr.bf16.mxu0 %v6626_v20  ;;  %v2687_v19 = vld [vmem:[#allocation11 + $0x28c0] sm:$0xff]  ;;  %v1681_v20 = vld [vmem:[#allocation11 + $0x950] sm:$0xff] }
 0x3e5   :  { %6499 = vmatprep.subr.bf16.mxu1 %v6498_v27  ;;  %v1696_v27 = vld [vmem:[#allocation11 + $0x9c8] sm:$0xff]  ;;  %v6640_v38 = vpack.c.bf16 %v1688_v21, %v1681_v20  ;;  %v6512_v41 = vpack.c.bf16 %v2694_v31, %v2687_v19  ;;  %v1730_v19 = vld [vmem:[#allocation11 + $0xad8] sm:$0xff]  ;;  %v6522_v20 = vpack.c.bf16 %v2737_v13, %v2730_v9  ;;  %v1745_v31 = vld [vmem:[#allocation11 + $0xb50] sm:$0xff] }
 0x3e6   :  { %v2736_v21 = vld [vmem:[#allocation11 + $0x2a48] sm:$0xff] }
 0x3e7   :  { %6629 = vmatpush1.bf16.msra.mxu0 %v6628_v43  ;;  %v6642_v43 = vpack.c.bf16 %v1703_v29, %v1696_v27  ;;  %v2744_v27 = vld [vmem:[#allocation11 + $0x2a88] sm:$0xff]  ;;  %v2751_v29 = vld [vmem:[#allocation11 + $0x2ac0] sm:$0xff] }
 0x3e8   :  { %6501 = vmatpush1.bf16.msra.mxu1 %v6500_v45  ;;  %6631 = vmatprep.subr.bf16.mxu0 %v6630_v46  ;;  %v2701_v45 = vld [vmem:[#allocation11 + $0x2930] sm:$0xff]  ;;  %v1695_v46 = vld [vmem:[#allocation11 + $0x9c0] sm:$0xff] }
 0x3e9   :  { %6503 = vmatprep.subr.bf16.mxu1 %v6502_v54  ;;  %v1710_v54 = vld [vmem:[#allocation11 + $0xa38] sm:$0xff]  ;;  %v6644_v22 = vpack.c.bf16 %v1702_v52, %v1695_v46  ;;  %v6516_v56 = vpack.c.bf16 %v2708_v53, %v2701_v45  ;;  %v1744_v45 = vld [vmem:[#allocation11 + $0xb48] sm:$0xff]  ;;  %v6526_v46 = vpack.c.bf16 %v2751_v29, %v2744_v27  ;;  %v1759_v53 = vld [vmem:[#allocation11 + $0xbc0] sm:$0xff] }
 0x3ea   :  { %v2750_v52 = vld [vmem:[#allocation11 + $0x2ab8] sm:$0xff] }
 0x3eb   :  { %6633 = vmatpush1.bf16.msra.mxu0 %v6632_v57  ;;  %v6646_v57 = vpack.c.bf16 %v1717_v63, %v1710_v54  ;;  %v2758_v54 = vld [vmem:[#allocation11 + $0x2af8] sm:$0xff]  ;;  %v2765_v63 = vld [vmem:[#allocation11 + $0x2b30] sm:$0xff] }
 0x3ec   :  { %6505 = vmatpush1.bf16.msra.mxu1 %v6504_v60  ;;  %6635 = vmatprep.subr.bf16.mxu0 %v6634_v61  ;;  %v2715_v60 = vld [vmem:[#allocation11 + $0x29a0] sm:$0xff]  ;;  %v1709_v61 = vld [vmem:[#allocation11 + $0xa30] sm:$0xff] }
 0x3ed   :  { %6507 = vmatprep.subr.bf16.mxu1 %v6506_v3  ;;  %v1724_v3 = vld [vmem:[#allocation11 + $0xaa8] sm:$0xff]  ;;  %v6648_v14 = vpack.c.bf16 %v1716_v62, %v1709_v61  ;;  %v6520_v15 = vpack.c.bf16 %v2722_v2, %v2715_v60  ;;  %v1758_v60 = vld [vmem:[#allocation11 + $0xbb8] sm:$0xff]  ;;  %v6530_v61 = vpack.c.bf16 %v2765_v63, %v2758_v54  ;;  %v1773_v2 = vld [vmem:[#allocation11 + $0xc30] sm:$0xff] }
 0x3ee   :  { %v2764_v62 = vld [vmem:[#allocation11 + $0x2b28] sm:$0xff] }
 0x3ef   :  { %6637 = vmatpush1.bf16.msra.mxu0 %v6636_v44  ;;  %v6650_v44 = vpack.c.bf16 %v1731_v4, %v1724_v3  ;;  %v2772_v3 = vld [vmem:[#allocation11 + $0x2b68] sm:$0xff]  ;;  %v2779_v4 = vld [vmem:[#allocation11 + $0x2ba0] sm:$0xff] }
 0x3f0   :  { %6509 = vmatpush1.bf16.msra.mxu1 %v6508_v49  ;;  %6639 = vmatprep.subr.bf16.mxu0 %v6638_v18  ;;  %v2729_v49 = vld [vmem:[#allocation11 + $0x2a10] sm:$0xff]  ;;  %v1723_v18 = vld [vmem:[#allocation11 + $0xaa0] sm:$0xff] }
 0x3f1   :  { %6511 = vmatprep.subr.bf16.mxu1 %v6510_v24  ;;  %v1738_v24 = vld [vmem:[#allocation11 + $0xb18] sm:$0xff]  ;;  %v6652_v39 = vpack.c.bf16 %v1730_v19, %v1723_v18  ;;  %v6524_v55 = vpack.c.bf16 %v2736_v21, %v2729_v49  ;;  %v1772_v49 = vld [vmem:[#allocation11 + $0xc28] sm:$0xff]  ;;  %v6534_v18 = vpack.c.bf16 %v2779_v4, %v2772_v3  ;;  %v1787_v21 = vld [vmem:[#allocation11 + $0xca0] sm:$0xff] }
 0x3f2   :  { %v2778_v19 = vld [vmem:[#allocation11 + $0x2b98] sm:$0xff] }
 0x3f3   :  { %6641 = vmatpush1.bf16.msra.mxu0 %v6640_v38  ;;  %v6654_v38 = vpack.c.bf16 %v1745_v31, %v1738_v24  ;;  %v2786_v24 = vld [vmem:[#allocation11 + $0x2bd8] sm:$0xff]  ;;  %v2793_v31 = vld [vmem:[#allocation11 + $0x2c10] sm:$0xff] }
 0x3f4   :  { %6513 = vmatpush1.bf16.msra.mxu1 %v6512_v41  ;;  %6643 = vmatprep.subr.bf16.mxu0 %v6642_v43  ;;  %v2743_v41 = vld [vmem:[#allocation11 + $0x2a80] sm:$0xff]  ;;  %v1737_v43 = vld [vmem:[#allocation11 + $0xb10] sm:$0xff] }
 0x3f5   :  { %6515 = vmatprep.subr.bf16.mxu1 %v6514_v16  ;;  %v1752_v16 = vld [vmem:[#allocation11 + $0xb88] sm:$0xff]  ;;  %v6656_v35 = vpack.c.bf16 %v1744_v45, %v1737_v43  ;;  %v6528_v36 = vpack.c.bf16 %v2750_v52, %v2743_v41  ;;  %v1786_v41 = vld [vmem:[#allocation11 + $0xc98] sm:$0xff]  ;;  %v6538_v43 = vpack.c.bf16 %v2793_v31, %v2786_v24  ;;  %v1801_v52 = vld [vmem:[#allocation11 + $0xd10] sm:$0xff] }
 0x3f6   :  { %v2792_v45 = vld [vmem:[#allocation11 + $0x2c08] sm:$0xff] }
 0x3f7   :  { %6645 = vmatpush1.bf16.msra.mxu0 %v6644_v22  ;;  %v6658_v22 = vpack.c.bf16 %v1759_v53, %v1752_v16  ;;  %v2800_v16 = vld [vmem:[#allocation11 + $0x2c48] sm:$0xff]  ;;  %v2807_v53 = vld [vmem:[#allocation11 + $0x2c80] sm:$0xff] }
 0x3f8   :  { %6517 = vmatpush1.bf16.msra.mxu1 %v6516_v56  ;;  %6647 = vmatprep.subr.bf16.mxu0 %v6646_v57  ;;  %v2757_v56 = vld [vmem:[#allocation11 + $0x2af0] sm:$0xff]  ;;  %v1751_v57 = vld [vmem:[#allocation11 + $0xb80] sm:$0xff] }
 0x3f9   :  { %6519 = vmatprep.subr.bf16.mxu1 %v6518_v0  ;;  %v1766_v0 = vld [vmem:[#allocation11 + $0xbf8] sm:$0xff]  ;;  %v6660_v9 = vpack.c.bf16 %v1758_v60, %v1751_v57  ;;  %v6532_v13 = vpack.c.bf16 %v2764_v62, %v2757_v56  ;;  %v1800_v56 = vld [vmem:[#allocation11 + $0xd08] sm:$0xff]  ;;  %v6542_v57 = vpack.c.bf16 %v2807_v53, %v2800_v16  ;;  %v1815_v62 = vld [vmem:[#allocation11 + $0xd80] sm:$0xff] }
 0x3fa   :  { %v2806_v60 = vld [vmem:[#allocation11 + $0x2c78] sm:$0xff] }
 0x3fb   :  { %6649 = vmatpush1.bf16.msra.mxu0 %v6648_v14  ;;  %v6662_v14 = vpack.c.bf16 %v1773_v2, %v1766_v0  ;;  %v2814_v0 = vld [vmem:[#allocation11 + $0x2cb8] sm:$0xff]  ;;  %v2821_v2 = vld [vmem:[#allocation11 + $0x2cf0] sm:$0xff] }
 0x3fc   :  { %6521 = vmatpush1.bf16.msra.mxu1 %v6520_v15  ;;  %6651 = vmatprep.subr.bf16.mxu0 %v6650_v44  ;;  %v2771_v15 = vld [vmem:[#allocation11 + $0x2b60] sm:$0xff]  ;;  %v1765_v44 = vld [vmem:[#allocation11 + $0xbf0] sm:$0xff] }
 0x3fd   :  { %6523 = vmatprep.subr.bf16.mxu1 %v6522_v20  ;;  %v1780_v20 = vld [vmem:[#allocation11 + $0xc68] sm:$0xff]  ;;  %v6664_v27 = vpack.c.bf16 %v1772_v49, %v1765_v44  ;;  %v6536_v29 = vpack.c.bf16 %v2778_v19, %v2771_v15  ;;  %v1814_v15 = vld [vmem:[#allocation11 + $0xd78] sm:$0xff]  ;;  %v6546_v44 = vpack.c.bf16 %v2821_v2, %v2814_v0  ;;  %v1829_v19 = vld [vmem:[#allocation11 + $0xdf0] sm:$0xff] }
 0x3fe   :  { %v2820_v49 = vld [vmem:[#allocation11 + $0x2ce8] sm:$0xff]  ;;  %v1522_v0 = vld [vmem:[#allocation11 + $0x458] sm:$0xff] }
 0x3ff   :  { %3793 = vmatmul.mubr.f32.vlgmr.msra.gmra.mrb[16].mxu1 %v7767_v7  ;;  %6653 = vmatpush1.bf16.msra.mxu0 %v6652_v39  ;;  %v6666_v39 = vpack.c.bf16 %v1787_v21, %v1780_v20  ;;  %v2828_v20 = vld [vmem:[#allocation11 + $0x2d28] sm:$0xff]  ;;  %v2835_v21 = vld [vmem:[#allocation11 + $0x2d60] sm:$0xff] }
 0x400   :  { %6525 = vmatpush1.bf16.msra.mxu1 %v6524_v55  ;;  %6655 = vmatprep.subr.bf16.mxu0 %v6654_v38  ;;  %v2785_v55 = vld [vmem:[#allocation11 + $0x2bd0] sm:$0xff]  ;;  %v1779_v38 = vld [vmem:[#allocation11 + $0xc60] sm:$0xff] }
 0x401   :  { %6527 = vmatprep.subr.bf16.mxu1 %v6526_v46  ;;  %3863 = vmatprep.mubr.f32.mxu1 %v7465_v32  ;;  %v1794_v46 = vld [vmem:[#allocation11 + $0xcd8] sm:$0xff]  ;;  %v6668_v54 = vpack.c.bf16 %v1786_v41, %v1779_v38  ;;  %v6540_v63 = vpack.c.bf16 %v2792_v45, %v2785_v55  ;;  %v1828_v55 = vld [vmem:[#allocation11 + $0xde8] sm:$0xff]  ;;  %v6550_v38 = vpack.c.bf16 %v2835_v21, %v2828_v20  ;;  %v1843_v45 = vld [vmem:[#allocation11 + $0xe60] sm:$0xff] }
 0x402   :  { %v2834_v41 = vld [vmem:[#allocation11 + $0x2d58] sm:$0xff] }
 0x403   :  { %6657 = vmatpush1.bf16.msra.mxu0 %v6656_v35  ;;  %v6670_v35 = vpack.c.bf16 %v1801_v52, %v1794_v46  ;;  %v1501_v46 = vld [vmem:[#allocation11 + $0x3b0] sm:$0xff]  ;;  %v1508_v52 = vld [vmem:[#allocation11 + $0x3e8] sm:$0xff] }
 0x404   :  { %6529 = vmatpush1.bf16.msra.mxu1 %v6528_v36  ;;  %6659 = vmatprep.subr.bf16.mxu0 %v6658_v22  ;;  %v2799_v36 = vld [vmem:[#allocation11 + $0x2c40] sm:$0xff]  ;;  %v1793_v22 = vld [vmem:[#allocation11 + $0xcd0] sm:$0xff] }
 0x405   :  { %6531 = vmatprep.subr.bf16.mxu1 %v6530_v61  ;;  %v1808_v61 = vld [vmem:[#allocation11 + $0xd48] sm:$0xff]  ;;  %v6672_v3 = vpack.c.bf16 %v1800_v56, %v1793_v22  ;;  %v6544_v4 = vpack.c.bf16 %v2806_v60, %v2799_v36  ;;  %v6970_v36 = vpack.c.bf16 %v1508_v52, %v1501_v46  ;;  %v1389_v22 = vld [vmem:[#allocation11 + $0x30] sm:$0xff] }
 0x406   :  { %v1396_v56 = vld [vmem:[#allocation11 + $0x68] sm:$0xff]  ;;  %v1857_v60 = vld [vmem:[#allocation11 + $0xed0] sm:$0xff] }
 0x407   :  { %6661 = vmatpush1.bf16.msra.mxu0 %v6660_v9  ;;  %v6674_v9 = vpack.c.bf16 %v1815_v62, %v1808_v61  ;;  %v1515_v62 = vld [vmem:[#allocation11 + $0x420] sm:$0xff]  ;;  %v6972_v2 = vpack.c.bf16 %v1396_v56, %v1389_v22  ;;  %v1557_v56 = vld [vmem:[#allocation11 + $0x570] sm:$0xff] }
 0x408   :  { %6533 = vmatpush1.bf16.msra.mxu1 %v6532_v13  ;;  %6663 = vmatprep.subr.bf16.mxu0 %v6662_v14  ;;  %v2813_v13 = vld [vmem:[#allocation11 + $0x2cb0] sm:$0xff]  ;;  %v1807_v14 = vld [vmem:[#allocation11 + $0xd40] sm:$0xff] }
 0x409   :  { %6535 = vmatprep.subr.bf16.mxu1 %v6534_v18  ;;  %v1822_v18 = vld [vmem:[#allocation11 + $0xdb8] sm:$0xff]  ;;  %v6676_v24 = vpack.c.bf16 %v1814_v15, %v1807_v14  ;;  %v6548_v31 = vpack.c.bf16 %v2820_v49, %v2813_v13  ;;  %v1864_v15 = vld [vmem:[#allocation11 + $0xf08] sm:$0xff]  ;;  %v6974_v49 = vpack.c.bf16 %v1522_v0, %v1515_v62  ;;  %v1899_v22 = vld [vmem:[#allocation11 + $0x1020] sm:$0xff] }
 0x40a   :  { %v1410_v14 = vld [vmem:[#allocation11 + $0xd8] sm:$0xff]  ;;  %v1891_v0 = vld [vmem:[#allocation11 + $0xfe0] sm:$0xff] }
 0x40b   :  { %6665 = vmatpush1.bf16.msra.mxu0 %v6664_v27  ;;  %v6678_v27 = vpack.c.bf16 %v1829_v19, %v1822_v18  ;;  %v1529_v18 = vld [vmem:[#allocation11 + $0x490] sm:$0xff]  ;;  %v1536_v19 = vld [vmem:[#allocation11 + $0x4c8] sm:$0xff] }
 0x40c   :  { %6537 = vmatpush1.bf16.msra.mxu1 %v6536_v29  ;;  %6667 = vmatprep.subr.bf16.mxu0 %v6666_v39  ;;  %v2827_v29 = vld [vmem:[#allocation11 + $0x2d20] sm:$0xff]  ;;  %v1821_v39 = vld [vmem:[#allocation11 + $0xdb0] sm:$0xff] }
 0x40d   :  { %6539 = vmatprep.subr.bf16.mxu1 %v6538_v43  ;;  %v1836_v43 = vld [vmem:[#allocation11 + $0xe28] sm:$0xff]  ;;  %v6680_v16 = vpack.c.bf16 %v1828_v55, %v1821_v39  ;;  %v6552_v53 = vpack.c.bf16 %v2834_v41, %v2827_v29  ;;  %v1417_v29 = vld [vmem:[#allocation11 + $0x110] sm:$0xff]  ;;  %v6978_v39 = vpack.c.bf16 %v1536_v19, %v1529_v18 }
 0x40e   :  { %v1424_v55 = vld [vmem:[#allocation11 + $0x148] sm:$0xff]  ;;  %v1885_v41 = vld [vmem:[#allocation11 + $0xfb0] sm:$0xff] }
 0x40f   :  { %6669 = vmatpush1.bf16.msra.mxu0 %v6668_v54  ;;  %v6682_v54 = vpack.c.bf16 %v1843_v45, %v1836_v43  ;;  %v1543_v43 = vld [vmem:[#allocation11 + $0x500] sm:$0xff]  ;;  %v1550_v45 = vld [vmem:[#allocation11 + $0x538] sm:$0xff]  ;;  %v6980_v52 = vpack.c.bf16 %v1424_v55, %v1417_v29  ;;  %v1920_v29 = vld [vmem:[#allocation11 + $0x10c8] sm:$0xff] }
 0x410   :  { %6541 = vmatpush1.bf16.msra.mxu1 %v6540_v63  ;;  %6671 = vmatprep.subr.bf16.mxu0 %v6670_v35  ;;  %v1835_v63 = vld [vmem:[#allocation11 + $0xe20] sm:$0xff]  ;;  %v1842_v35 = vld [vmem:[#allocation11 + $0xe58] sm:$0xff]  ;;  %v1585_v55 = vld [vmem:[#allocation11 + $0x650] sm:$0xff] }
 0x411   :  { %6543 = vmatprep.subr.bf16.mxu1 %v6542_v57  ;;  %v1850_v57 = vld [vmem:[#allocation11 + $0xe98] sm:$0xff]  ;;  %v6684_v61 = vpack.c.bf16 %v1842_v35, %v1835_v63  ;;  %v1431_v63 = vld [vmem:[#allocation11 + $0x180] sm:$0xff]  ;;  %v6982_v35 = vpack.c.bf16 %v1550_v45, %v1543_v43 }
 0x412   :  { %v6686_v13 = vpack.c.bf16 %v1857_v60, %v1850_v57  ;;  %v1564_v57 = vld [vmem:[#allocation11 + $0x5a8] sm:$0xff] }
 0x413   :  { %6673 = vmatpush1.bf16.msra.mxu0 %v6672_v3  ;;  %v1849_v3 = vld [vmem:[#allocation11 + $0xe90] sm:$0xff] }
 0x414   :  { %6545 = vmatpush1.bf16.msra.mxu1 %v6544_v4  ;;  %6675 = vmatprep.subr.bf16.mxu0 %v6674_v9  ;;  %v1856_v4 = vld [vmem:[#allocation11 + $0xec8] sm:$0xff]  ;;  %v1403_v9 = vld [vmem:[#allocation11 + $0xa0] sm:$0xff] }
 0x415   :  { %6547 = vmatprep.subr.bf16.mxu1 %v6546_v44  ;;  %v1871_v44 = vld [vmem:[#allocation11 + $0xf40] sm:$0xff]  ;;  %v6688_v20 = vpack.c.bf16 %v1856_v4, %v1849_v3  ;;  %v6976_v21 = vpack.c.bf16 %v1410_v14, %v1403_v9  ;;  %v1445_v3 = vld [vmem:[#allocation11 + $0x1f0] sm:$0xff]  ;;  %v6986_v4 = vpack.c.bf16 %v1564_v57, %v1557_v56  ;;  %v1452_v9 = vld [vmem:[#allocation11 + $0x228] sm:$0xff] }
 0x416   :  { %v1913_v14 = vld [vmem:[#allocation11 + $0x1090] sm:$0xff]  ;;  %v6988_v18 = vpack.c.bf16 %v1452_v9, %v1445_v3  ;;  %v1948_v3 = vld [vmem:[#allocation11 + $0x11a8] sm:$0xff] }
 0x417   :  { %6677 = vmatpush1.bf16.msra.mxu0 %v6676_v24  ;;  %v6690_v24 = vpack.c.bf16 %v1871_v44, %v1864_v15  ;;  %v1571_v15 = vld [vmem:[#allocation11 + $0x5e0] sm:$0xff]  ;;  %v1578_v44 = vld [vmem:[#allocation11 + $0x618] sm:$0xff]  ;;  %v1725_v9 = vld [vmem:[#allocation11 + $0xab0] sm:$0xff] }
 0x418   :  { %6549 = vmatpush1.bf16.msra.mxu1 %v6548_v31  ;;  %6679 = vmatprep.subr.bf16.mxu0 %v6678_v27  ;;  %v1863_v31 = vld [vmem:[#allocation11 + $0xf00] sm:$0xff]  ;;  %v1870_v27 = vld [vmem:[#allocation11 + $0xf38] sm:$0xff] }
 0x419   :  { %6551 = vmatprep.subr.bf16.mxu1 %v6550_v38  ;;  %v1878_v38 = vld [vmem:[#allocation11 + $0xf78] sm:$0xff]  ;;  %v6692_v46 = vpack.c.bf16 %v1870_v27, %v1863_v31  ;;  %v6990_v31 = vpack.c.bf16 %v1578_v44, %v1571_v15 }
 0x41a   :  { %v1466_v27 = vld [vmem:[#allocation11 + $0x298] sm:$0xff] }
 0x41b   :  { %6681 = vmatpush1.bf16.msra.mxu0 %v6680_v16  ;;  %v6694_v16 = vpack.c.bf16 %v1885_v41, %v1878_v38  ;;  %v1592_v38 = vld [vmem:[#allocation11 + $0x688] sm:$0xff] }
 0x41c   :  { %6553 = vmatpush1.bf16.msra.mxu1 %v6552_v53  ;;  %6683 = vmatprep.subr.bf16.mxu0 %v6682_v54  ;;  %v1877_v53 = vld [vmem:[#allocation11 + $0xf70] sm:$0xff]  ;;  %v1884_v54 = vld [vmem:[#allocation11 + $0xfa8] sm:$0xff] }
 0x41d   :  { %6971 = vmatprep.subr.bf16.mxu1 %v6970_v36  ;;  %v1892_v36 = vld [vmem:[#allocation11 + $0xfe8] sm:$0xff]  ;;  %v6696_v60 = vpack.c.bf16 %v1884_v54, %v1877_v53  ;;  %v6994_v53 = vpack.c.bf16 %v1592_v38, %v1585_v55  ;;  %v1961_v38 = vld [vmem:[#allocation11 + $0x1210] sm:$0xff] }
 0x41e   :  { %4006 = vmatmul.mubr.f32.vlgmr.msra.gmra.mrb[10].mxu0 %v7681_v12  ;;  %v6698_v62 = vpack.c.bf16 %v1899_v22, %v1892_v36  ;;  %v1480_v54 = vld [vmem:[#allocation11 + $0x308] sm:$0xff]  ;;  %v1606_v36 = vld [vmem:[#allocation11 + $0x6f8] sm:$0xff] }
 0x41f   :  { %3864 = vmatmul.mubr.f32.vlgmr.msra.gmra.mrb[16].mxu1 %v7774_v58  ;;  %6685 = vmatpush1.bf16.msra.mxu0 %v6684_v61 }
 0x420   :  { %4076 = vmatprep.mubr.f32.mxu0 %v7698_v8  ;;  %6973 = vmatpush3.bf16.msra.mxu1 %v6972_v2  ;;  %v1898_v2 = vld [vmem:[#allocation11 + $0x1018] sm:$0xff] }
 0x421   :  { %4431 = vmatprep.mubr.f32.mxu1 %v7675_v5  ;;  %6687 = vmatprep.subr.bf16.mxu0 %v6686_v13  ;;  %v1438_v5 = vld [vmem:[#allocation11 + $0x1b8] sm:$0xff] }
 0x422   :  { %6975 = vmatprep.subr.bf16.mxu1 %v6974_v49  ;;  %v6984_v61 = vpack.c.bf16 %v1438_v5, %v1431_v63  ;;  %v1906_v13 = vld [vmem:[#allocation11 + $0x1058] sm:$0xff]  ;;  %v6700_v49 = vpack.c.bf16 %v1898_v2, %v1891_v0  ;;  %v1599_v5 = vld [vmem:[#allocation11 + $0x6c0] sm:$0xff] }
 0x423   :  { %6689 = vmatpush1.bf16.msra.mxu0 %v6688_v20  ;;  %v6702_v19 = vpack.c.bf16 %v1913_v14, %v1906_v13  ;;  %v1905_v20 = vld [vmem:[#allocation11 + $0x1050] sm:$0xff]  ;;  %v1934_v63 = vld [vmem:[#allocation11 + $0x1138] sm:$0xff]  ;;  %v6998_v0 = vpack.c.bf16 %v1606_v36, %v1599_v5  ;;  %v1732_v13 = vld [vmem:[#allocation11 + $0xae8] sm:$0xff] }
 0x424   :  { %6977 = vmatpush3.bf16.msra.mxu1 %v6976_v21  ;;  %6691 = vmatprep.subr.bf16.mxu0 %v6690_v24  ;;  %v1912_v21 = vld [vmem:[#allocation11 + $0x1088] sm:$0xff]  ;;  %v1459_v24 = vld [vmem:[#allocation11 + $0x260] sm:$0xff]  ;;  %v1494_v2 = vld [vmem:[#allocation11 + $0x378] sm:$0xff] }
 0x425   :  { %6979 = vmatprep.subr.bf16.mxu1 %v6978_v39  ;;  %v1927_v39 = vld [vmem:[#allocation11 + $0x1100] sm:$0xff]  ;;  %v6704_v41 = vpack.c.bf16 %v1912_v21, %v1905_v20  ;;  %v6992_v43 = vpack.c.bf16 %v1466_v27, %v1459_v24  ;;  %v1613_v20 = vld [vmem:[#allocation11 + $0x730] sm:$0xff]  ;;  %v1620_v21 = vld [vmem:[#allocation11 + $0x768] sm:$0xff] }
 0x426   :  { %v6706_v45 = vpack.c.bf16 %v1927_v39, %v1920_v29  ;;  %v1962_v24 = vld [vmem:[#allocation11 + $0x1218] sm:$0xff]  ;;  %v1739_v27 = vld [vmem:[#allocation11 + $0xb20] sm:$0xff]  ;;  %v7004_v55 = vpack.c.bf16 %v1620_v21, %v1613_v20  ;;  %v1788_v20 = vld [vmem:[#allocation11 + $0xca8] sm:$0xff] }
 0x427   :  { %6693 = vmatpush1.bf16.msra.mxu0 %v6692_v46  ;;  %v1919_v46 = vld [vmem:[#allocation11 + $0x10c0] sm:$0xff]  ;;  %v1746_v29 = vld [vmem:[#allocation11 + $0xb58] sm:$0xff] }
 0x428   :  { %6981 = vmatpush3.bf16.msra.mxu1 %v6980_v52  ;;  %6695 = vmatprep.subr.bf16.mxu0 %v6694_v16  ;;  %v1926_v52 = vld [vmem:[#allocation11 + $0x10f8] sm:$0xff]  ;;  %v1473_v16 = vld [vmem:[#allocation11 + $0x2d0] sm:$0xff] }
 0x429   :  { %6983 = vmatprep.subr.bf16.mxu1 %v6982_v35  ;;  %v1941_v35 = vld [vmem:[#allocation11 + $0x1170] sm:$0xff]  ;;  %v6708_v22 = vpack.c.bf16 %v1926_v52, %v1919_v46  ;;  %v6996_v56 = vpack.c.bf16 %v1480_v54, %v1473_v16  ;;  %v7006_v46 = vpack.c.bf16 %v1746_v29, %v1739_v27  ;;  %v1634_v52 = vld [vmem:[#allocation11 + $0x7d8] sm:$0xff]  ;;  %v1976_v16 = vld [vmem:[#allocation11 + $0x1288] sm:$0xff] }
 0x42a   :  { %v6710_v57 = vpack.c.bf16 %v1941_v35, %v1934_v63  ;;  %v1753_v54 = vld [vmem:[#allocation11 + $0xb90] sm:$0xff]  ;;  %v1760_v63 = vld [vmem:[#allocation11 + $0xbc8] sm:$0xff]  ;;  %v2003_v27 = vld [vmem:[#allocation11 + $0x1360] sm:$0xff] }
 0x42b   :  { %6697 = vmatpush1.bf16.msra.mxu0 %v6696_v60  ;;  %v1933_v60 = vld [vmem:[#allocation11 + $0x1130] sm:$0xff]  ;;  %v2010_v29 = vld [vmem:[#allocation11 + $0x1398] sm:$0xff] }
 0x42c   :  { %6985 = vmatpush3.bf16.msra.mxu1 %v6984_v61  ;;  %6699 = vmatprep.subr.bf16.mxu0 %v6698_v62  ;;  %v1940_v61 = vld [vmem:[#allocation11 + $0x1168] sm:$0xff]  ;;  %v1487_v62 = vld [vmem:[#allocation11 + $0x340] sm:$0xff] }
 0x42d   :  { %6987 = vmatprep.subr.bf16.mxu1 %v6986_v4  ;;  %v1955_v4 = vld [vmem:[#allocation11 + $0x11e0] sm:$0xff]  ;;  %v6712_v14 = vpack.c.bf16 %v1940_v61, %v1933_v60  ;;  %v7000_v15 = vpack.c.bf16 %v1494_v2, %v1487_v62  ;;  %v7010_v60 = vpack.c.bf16 %v1760_v63, %v1753_v54  ;;  %v1648_v61 = vld [vmem:[#allocation11 + $0x848] sm:$0xff]  ;;  %v1990_v62 = vld [vmem:[#allocation11 + $0x12f8] sm:$0xff] }
 0x42e   :  { %v6714_v44 = vpack.c.bf16 %v1955_v4, %v1948_v3  ;;  %v1767_v2 = vld [vmem:[#allocation11 + $0xc00] sm:$0xff]  ;;  %v1774_v3 = vld [vmem:[#allocation11 + $0xc38] sm:$0xff]  ;;  %v2017_v54 = vld [vmem:[#allocation11 + $0x13d0] sm:$0xff] }
 0x42f   :  { %6701 = vmatpush1.bf16.msra.mxu0 %v6700_v49  ;;  %v1947_v49 = vld [vmem:[#allocation11 + $0x11a0] sm:$0xff]  ;;  %v2024_v63 = vld [vmem:[#allocation11 + $0x1408] sm:$0xff] }
 0x430   :  { %6989 = vmatpush3.bf16.msra.mxu1 %v6988_v18  ;;  %6703 = vmatprep.subr.bf16.mxu0 %v6702_v19  ;;  %v1954_v18 = vld [vmem:[#allocation11 + $0x11d8] sm:$0xff]  ;;  %v7002_v19 = vpack.c.bf16 %v1732_v13, %v1725_v9  ;;  %v1996_v13 = vld [vmem:[#allocation11 + $0x1328] sm:$0xff] }
 0x431   :  { %6991 = vmatprep.subr.bf16.mxu1 %v6990_v31  ;;  %v1969_v31 = vld [vmem:[#allocation11 + $0x1250] sm:$0xff]  ;;  %v6716_v39 = vpack.c.bf16 %v1954_v18, %v1947_v49  ;;  %v2004_v49 = vld [vmem:[#allocation11 + $0x1368] sm:$0xff]  ;;  %v2011_v18 = vld [vmem:[#allocation11 + $0x13a0] sm:$0xff] }
 0x433   :  { %6705 = vmatpush1.bf16.msra.mxu0 %v6704_v41  ;;  %v1968_v41 = vld [vmem:[#allocation11 + $0x1248] sm:$0xff] }
 0x434   :  { %6993 = vmatpush3.bf16.msra.mxu1 %v6992_v43  ;;  %6707 = vmatprep.subr.bf16.mxu0 %v6706_v45  ;;  %v1627_v43 = vld [vmem:[#allocation11 + $0x7a0] sm:$0xff]  ;;  %v6718_v45 = vpack.c.bf16 %v1969_v31, %v1962_v24  ;;  %v6720_v35 = vpack.c.bf16 %v1968_v41, %v1961_v38  ;;  %v6730_v31 = vpack.c.bf16 %v2011_v18, %v2004_v49  ;;  %v1676_v38 = vld [vmem:[#allocation11 + $0x928] sm:$0xff]  ;;  %v2018_v41 = vld [vmem:[#allocation11 + $0x13d8] sm:$0xff] }
 0x435   :  { %6995 = vmatprep.subr.bf16.mxu1 %v6994_v53  ;;  %v1983_v53 = vld [vmem:[#allocation11 + $0x12c0] sm:$0xff]  ;;  %v7008_v5 = vpack.c.bf16 %v1634_v52, %v1627_v43  ;;  %v2025_v43 = vld [vmem:[#allocation11 + $0x1410] sm:$0xff]  ;;  %v6732_v52 = vpack.c.bf16 %v2010_v29, %v2003_v27  ;;  %v2060_v27 = vld [vmem:[#allocation11 + $0x1528] sm:$0xff] }
 0x436   :  { %v6722_v36 = vpack.c.bf16 %v1983_v53, %v1976_v16  ;;  %v6734_v53 = vpack.c.bf16 %v2025_v43, %v2018_v41  ;;  %v2067_v29 = vld [vmem:[#allocation11 + $0x1560] sm:$0xff] }
 0x437   :  { %6709 = vmatpush1.bf16.msra.mxu0 %v6708_v22  ;;  %v1975_v22 = vld [vmem:[#allocation11 + $0x1280] sm:$0xff]  ;;  %v6746_v43 = vpack.c.bf16 %v2067_v29, %v2060_v27  ;;  %v2101_v29 = vld [vmem:[#allocation11 + $0x1670] sm:$0xff] }
 0x438   :  { %6997 = vmatpush3.bf16.msra.mxu1 %v6996_v56  ;;  %6711 = vmatprep.subr.bf16.mxu0 %v6710_v57  ;;  %v1982_v56 = vld [vmem:[#allocation11 + $0x12b8] sm:$0xff]  ;;  %v1641_v57 = vld [vmem:[#allocation11 + $0x810] sm:$0xff] }
 0x439   :  { %6999 = vmatprep.subr.bf16.mxu1 %v6998_v0  ;;  %v1997_v0 = vld [vmem:[#allocation11 + $0x1330] sm:$0xff]  ;;  %v7012_v4 = vpack.c.bf16 %v1648_v61, %v1641_v57  ;;  %v6736_v61 = vpack.c.bf16 %v2024_v63, %v2017_v54  ;;  %v2074_v54 = vld [vmem:[#allocation11 + $0x1598] sm:$0xff] }
 0x43a   :  { %v6726_v9 = vpack.c.bf16 %v1997_v0, %v1990_v62  ;;  %v1809_v57 = vld [vmem:[#allocation11 + $0xd50] sm:$0xff] }
 0x43b   :  { %6713 = vmatpush1.bf16.msra.mxu0 %v6712_v14  ;;  %v1655_v14 = vld [vmem:[#allocation11 + $0x880] sm:$0xff]  ;;  %v2081_v63 = vld [vmem:[#allocation11 + $0x15d0] sm:$0xff] }
 0x43c   :  { %7001 = vmatpush3.bf16.msra.mxu1 %v7000_v15  ;;  %6715 = vmatprep.subr.bf16.mxu0 %v6714_v44  ;;  %v7014_v15 = vpack.c.bf16 %v1774_v3, %v1767_v2  ;;  %v1662_v44 = vld [vmem:[#allocation11 + $0x8b8] sm:$0xff]  ;;  %v2031_v2 = vld [vmem:[#allocation11 + $0x1440] sm:$0xff] }
 0x43d   :  { %7003 = vmatprep.subr.bf16.mxu1 %v7002_v19  ;;  %v1781_v19 = vld [vmem:[#allocation11 + $0xc70] sm:$0xff]  ;;  %v7016_v24 = vpack.c.bf16 %v1662_v44, %v1655_v14  ;;  %v2038_v3 = vld [vmem:[#allocation11 + $0x1478] sm:$0xff]  ;;  %v1823_v14 = vld [vmem:[#allocation11 + $0xdc0] sm:$0xff] }
 0x43e   :  { %v6740_v44 = vpack.c.bf16 %v2038_v3, %v2031_v2  ;;  %v2095_v2 = vld [vmem:[#allocation11 + $0x1640] sm:$0xff] }
 0x43f   :  { %4432 = vmatmul.mubr.f32.vlgmr.msra.gmra.mrb[18].mxu1 %v7679_v11  ;;  %6717 = vmatpush1.bf16.msra.mxu0 %v6716_v39  ;;  %v6724_v11 = vpack.c.bf16 %v1982_v56, %v1975_v22  ;;  %v1669_v39 = vld [vmem:[#allocation11 + $0x8f0] sm:$0xff]  ;;  %v2032_v22 = vld [vmem:[#allocation11 + $0x1448] sm:$0xff]  ;;  %v2039_v56 = vld [vmem:[#allocation11 + $0x1480] sm:$0xff] }
 0x440   :  { %7005 = vmatpush3.bf16.msra.mxu1 %v7004_v55  ;;  %4501 = vmatprep.mubr.f32.mxu1 %v7677_v6  ;;  %v1989_v6 = vld [vmem:[#allocation11 + $0x12f0] sm:$0xff]  ;;  %v7018_v55 = vpack.c.bf16 %v1788_v20, %v1781_v19  ;;  %v7020_v16 = vpack.c.bf16 %v1676_v38, %v1669_v39  ;;  %v6738_v0 = vpack.c.bf16 %v2039_v56, %v2032_v22  ;;  %v2052_v20 = vld [vmem:[#allocation11 + $0x14e8] sm:$0xff] }
 0x441   :  { %6719 = vmatprep.subr.bf16.mxu0 %v6718_v45  ;;  %7007 = vmatprep.subr.bf16.mxu1 %v7006_v46  ;;  %v6728_v21 = vpack.c.bf16 %v1996_v13, %v1989_v6  ;;  %v1795_v45 = vld [vmem:[#allocation11 + $0xce0] sm:$0xff]  ;;  %v1802_v46 = vld [vmem:[#allocation11 + $0xd18] sm:$0xff]  ;;  %v2053_v13 = vld [vmem:[#allocation11 + $0x14f0] sm:$0xff] }
 0x442   :  { %v2046_v6 = vld [vmem:[#allocation11 + $0x14b8] sm:$0xff]  ;;  %v2045_v19 = vld [vmem:[#allocation11 + $0x14b0] sm:$0xff] }
 0x443   :  { %6721 = vmatpush1.bf16.msra.mxu0 %v6720_v35  ;;  %v1683_v35 = vld [vmem:[#allocation11 + $0x960] sm:$0xff]  ;;  %v6742_v18 = vpack.c.bf16 %v2053_v13, %v2046_v6  ;;  %v1949_v39 = vld [vmem:[#allocation11 + $0x11b0] sm:$0xff]  ;;  %v6744_v38 = vpack.c.bf16 %v2052_v20, %v2045_v19  ;;  %v2102_v19 = vld [vmem:[#allocation11 + $0x1678] sm:$0xff] }
 0x444   :  { %7009 = vmatpush3.bf16.msra.mxu1 %v7008_v5  ;;  %6723 = vmatprep.subr.bf16.mxu0 %v6722_v36  ;;  %v7022_v5 = vpack.c.bf16 %v1802_v46, %v1795_v45  ;;  %v1690_v36 = vld [vmem:[#allocation11 + $0x998] sm:$0xff]  ;;  %v2059_v45 = vld [vmem:[#allocation11 + $0x1520] sm:$0xff]  ;;  %v2073_v56 = vld [vmem:[#allocation11 + $0x1590] sm:$0xff] }
 0x445   :  { %7011 = vmatprep.subr.bf16.mxu1 %v7010_v60  ;;  %v1816_v60 = vld [vmem:[#allocation11 + $0xd88] sm:$0xff]  ;;  %v7024_v62 = vpack.c.bf16 %v1690_v36, %v1683_v35  ;;  %v2066_v46 = vld [vmem:[#allocation11 + $0x1558] sm:$0xff]  ;;  %v2109_v20 = vld [vmem:[#allocation11 + $0x16b0] sm:$0xff] }
 0x446   :  { %v6748_v35 = vpack.c.bf16 %v2066_v46, %v2059_v45  ;;  %v1970_v36 = vld [vmem:[#allocation11 + $0x1258] sm:$0xff]  ;;  %v6758_v27 = vpack.c.bf16 %v2109_v20, %v2102_v19  ;;  %v2005_v45 = vld [vmem:[#allocation11 + $0x1370] sm:$0xff]  ;;  %v2012_v46 = vld [vmem:[#allocation11 + $0x13a8] sm:$0xff] }
 0x447   :  { %6725 = vmatpush1.bf16.msra.mxu0 %v6724_v11  ;;  %v1697_v11 = vld [vmem:[#allocation11 + $0x9d0] sm:$0xff] }
 0x448   :  { %7013 = vmatpush3.bf16.msra.mxu1 %v7012_v4  ;;  %6727 = vmatprep.subr.bf16.mxu0 %v6726_v9  ;;  %v7026_v4 = vpack.c.bf16 %v1816_v60, %v1809_v57  ;;  %v1704_v9 = vld [vmem:[#allocation11 + $0xa08] sm:$0xff]  ;;  %v1851_v60 = vld [vmem:[#allocation11 + $0xea0] sm:$0xff] }
 0x449   :  { %7015 = vmatprep.subr.bf16.mxu1 %v7014_v15  ;;  %v1830_v15 = vld [vmem:[#allocation11 + $0xdf8] sm:$0xff]  ;;  %v7028_v49 = vpack.c.bf16 %v1704_v9, %v1697_v11  ;;  %v2080_v57 = vld [vmem:[#allocation11 + $0x15c8] sm:$0xff]  ;;  %v1977_v11 = vld [vmem:[#allocation11 + $0x1290] sm:$0xff] }
 0x44a   :  { %v6752_v9 = vpack.c.bf16 %v2080_v57, %v2073_v56  ;;  %v2130_v56 = vld [vmem:[#allocation11 + $0x1758] sm:$0xff]  ;;  %v2137_v57 = vld [vmem:[#allocation11 + $0x1790] sm:$0xff] }
 0x44b   :  { %6729 = vmatpush1.bf16.msra.mxu0 %v6728_v21  ;;  %v1711_v21 = vld [vmem:[#allocation11 + $0xa40] sm:$0xff] }
 0x44c   :  { %7017 = vmatpush3.bf16.msra.mxu1 %v7016_v24  ;;  %6731 = vmatprep.subr.bf16.mxu0 %v6730_v31  ;;  %v7030_v24 = vpack.c.bf16 %v1830_v15, %v1823_v14  ;;  %v1718_v31 = vld [vmem:[#allocation11 + $0xa78] sm:$0xff]  ;;  %v2087_v14 = vld [vmem:[#allocation11 + $0x1600] sm:$0xff] }
 0x44d   :  { %7019 = vmatprep.subr.bf16.mxu1 %v7018_v55  ;;  %v1956_v55 = vld [vmem:[#allocation11 + $0x11e8] sm:$0xff]  ;;  %v7032_v41 = vpack.c.bf16 %v1718_v31, %v1711_v21  ;;  %v2094_v15 = vld [vmem:[#allocation11 + $0x1638] sm:$0xff]  ;;  %v1991_v21 = vld [vmem:[#allocation11 + $0x1300] sm:$0xff] }
 0x44f   :  { %6733 = vmatpush1.bf16.msra.mxu0 %v6732_v52  ;;  %v7034_v52 = vpack.c.bf16 %v1956_v55, %v1949_v39  ;;  %v2108_v39 = vld [vmem:[#allocation11 + $0x16a8] sm:$0xff]  ;;  %v1879_v55 = vld [vmem:[#allocation11 + $0xf80] sm:$0xff] }
 0x450   :  { %7021 = vmatpush3.bf16.msra.mxu1 %v7020_v16  ;;  %6735 = vmatprep.subr.bf16.mxu0 %v6734_v53  ;;  %v1837_v16 = vld [vmem:[#allocation11 + $0xe30] sm:$0xff]  ;;  %v1844_v53 = vld [vmem:[#allocation11 + $0xe68] sm:$0xff] }
 0x451   :  { %7023 = vmatprep.subr.bf16.mxu1 %v7022_v5  ;;  %v1963_v5 = vld [vmem:[#allocation11 + $0x1220] sm:$0xff]  ;;  %v7036_v22 = vpack.c.bf16 %v1844_v53, %v1837_v16  ;;  %v6760_v16 = vpack.c.bf16 %v2108_v39, %v2101_v29  ;;  %v1928_v39 = vld [vmem:[#allocation11 + $0x1108] sm:$0xff] }
 0x452   :  { %v7038_v3 = vpack.c.bf16 %v1970_v36, %v1963_v5  ;;  %v1893_v5 = vld [vmem:[#allocation11 + $0xff0] sm:$0xff]  ;;  %v7050_v36 = vpack.c.bf16 %v2012_v46, %v2005_v45 }
 0x453   :  { %6737 = vmatpush1.bf16.msra.mxu0 %v6736_v61  ;;  %v6750_v61 = vpack.c.bf16 %v2081_v63, %v2074_v54  ;;  %v2115_v63 = vld [vmem:[#allocation11 + $0x16e0] sm:$0xff] }
 0x454   :  { %7025 = vmatpush3.bf16.msra.mxu1 %v7024_v62  ;;  %6739 = vmatprep.subr.bf16.mxu0 %v6738_v0  ;;  %v1858_v62 = vld [vmem:[#allocation11 + $0xed8] sm:$0xff]  ;;  %v2088_v0 = vld [vmem:[#allocation11 + $0x1608] sm:$0xff] }
 0x455   :  { %7027 = vmatprep.subr.bf16.mxu1 %v7026_v4  ;;  %v1984_v4 = vld [vmem:[#allocation11 + $0x12c8] sm:$0xff]  ;;  %v7040_v6 = vpack.c.bf16 %v1858_v62, %v1851_v60  ;;  %v6754_v13 = vpack.c.bf16 %v2095_v2, %v2088_v0  ;;  %v2019_v60 = vld [vmem:[#allocation11 + $0x13e0] sm:$0xff] }
 0x457   :  { %6741 = vmatpush1.bf16.msra.mxu0 %v6740_v44  ;;  %v1865_v44 = vld [vmem:[#allocation11 + $0xf10] sm:$0xff] }
 0x458   :  { %7029 = vmatpush3.bf16.msra.mxu1 %v7028_v49  ;;  %6743 = vmatprep.subr.bf16.mxu0 %v6742_v18  ;;  %v7042_v49 = vpack.c.bf16 %v1984_v4, %v1977_v11  ;;  %v1872_v18 = vld [vmem:[#allocation11 + $0xf48] sm:$0xff]  ;;  %v2129_v11 = vld [vmem:[#allocation11 + $0x1750] sm:$0xff] }
 0x459   :  { %7031 = vmatprep.subr.bf16.mxu1 %v7030_v24  ;;  %v6756_v24 = vpack.c.bf16 %v2094_v15, %v2087_v14  ;;  %v7044_v31 = vpack.c.bf16 %v1872_v18, %v1865_v44  ;;  %v2136_v4 = vld [vmem:[#allocation11 + $0x1788] sm:$0xff]  ;;  %v1914_v14 = vld [vmem:[#allocation11 + $0x1098] sm:$0xff]  ;;  %v2151_v44 = vld [vmem:[#allocation11 + $0x1800] sm:$0xff] }
 0x45a   :  { %v2144_v15 = vld [vmem:[#allocation11 + $0x17c8] sm:$0xff]  ;;  %v6768_v19 = vpack.c.bf16 %v2136_v4, %v2129_v11  ;;  %v2061_v4 = vld [vmem:[#allocation11 + $0x1530] sm:$0xff] }
 0x45b   :  { %6745 = vmatpush1.bf16.msra.mxu0 %v6744_v38  ;;  %v2040_v18 = vld [vmem:[#allocation11 + $0x1488] sm:$0xff] }
 0x45c   :  { %7033 = vmatpush3.bf16.msra.mxu1 %v7032_v41  ;;  %6747 = vmatprep.subr.bf16.mxu0 %v6746_v43  ;;  %v2116_v41 = vld [vmem:[#allocation11 + $0x16e8] sm:$0xff]  ;;  %v2123_v43 = vld [vmem:[#allocation11 + $0x1720] sm:$0xff] }
 0x45d   :  { %7035 = vmatprep.subr.bf16.mxu1 %v7034_v52  ;;  %v2839_v52 = vld [vmem:[#allocation13] sm:$0x7f]  ;;  %v6762_v54 = vpack.c.bf16 %v2123_v43, %v2116_v41 }
 0x45e   :  { %4077 = vmatmul.mubr.f32.vlgmr.msra.gmra.mrb[10].mxu0 %v7724_v37  ;;  %v2844_v0 = vrot.slane %v2839_v52, %v7654_v47  ;;  %v2047_v43 = vld [vmem:[#allocation11 + $0x14c0] sm:$0xff] }
 0x45f   :  { %4502 = vmatmul.mubr.f32.vlgmr.msra.gmra.mrb[20].mxu1 %v7681_v12  ;;  %6749 = vmatpush1.bf16.msra.mxu0 %v6748_v35  ;;  %v1998_v12 = vld [vmem:[#allocation11 + $0x1338] sm:$0xff] }
 0x460   :  { %4147 = vmatprep.mubr.f32.mxu0 %v7726_v59  ;;  %7037 = vmatpush3.bf16.msra.mxu1 %v7036_v22  ;;  %v7046_v38 = vpack.c.bf16 %v1998_v12, %v1991_v21  ;;  %v2122_v35 = vld [vmem:[#allocation11 + $0x1718] sm:$0xff]  ;;  %v1900_v22 = vld [vmem:[#allocation11 + $0x1028] sm:$0xff]  ;;  %v2943_v47 = vadd.f32 %v7762_v1, %v2844_v0  ;;  %v6770_v21 = vpack.c.bf16 %v2151_v44, %v2144_v15  ;;  %v2143_v12 = vld [vmem:[#allocation11 + $0x17c0] sm:$0xff] }
 0x461   :  { %4571 = vmatprep.mubr.f32.mxu1 %v7698_v8  ;;  %6751 = vmatprep.subr.bf16.mxu0 %v6750_v61  ;;  %v1886_v8 = vld [vmem:[#allocation11 + $0xfb8] sm:$0xff]  ;;  %v6764_v62 = vpack.c.bf16 %v2122_v35, %v2115_v63  ;;  %v7052_v2 = vpack.c.bf16 %v1900_v22, %v1893_v5  ;;  %v2172_v22 = vld [vmem:[#allocation11 + $0x18a8] sm:$0xff] }
 0x462   :  { %7039 = vmatprep.subr.bf16.mxu1 %v7038_v3  ;;  %v7048_v53 = vpack.c.bf16 %v1886_v8, %v1879_v55  ;;  %v2026_v61 = vld [vmem:[#allocation11 + $0x1418] sm:$0xff]  ;;  %v6766_v3 = vpack.c.bf16 %v2137_v57, %v2130_v56  ;;  %v2179_v56 = vld [vmem:[#allocation11 + $0x18e0] sm:$0xff]  ;;  %v2173_v57 = vld [vmem:[#allocation11 + $0x18b0] sm:$0xff] }
 0x463   :  { %6753 = vmatpush1.bf16.msra.mxu0 %v6752_v9  ;;  %v1907_v9 = vld [vmem:[#allocation11 + $0x1060] sm:$0xff]  ;;  %v2158_v55 = vld [vmem:[#allocation11 + $0x1838] sm:$0xff]  ;;  %v6778_v0 = vpack.c.bf16 %v2179_v56, %v2172_v22 }
 0x464   :  { %7041 = vmatpush3.bf16.msra.mxu1 %v7040_v6  ;;  %6755 = vmatprep.subr.bf16.mxu0 %v6754_v13  ;;  %v2848_v6 = vrot.slane %v2839_v52, %v7662_v50  ;;  %v7054_v13 = vpack.c.bf16 %v2026_v61, %v2019_v60  ;;  %v7056_v20 = vpack.c.bf16 %v1914_v14, %v1907_v9  ;;  %v2054_v1 = vld [vmem:[#allocation11 + $0x14f8] sm:$0xff]  ;;  %v2180_v60 = vld [vmem:[#allocation11 + $0x18e8] sm:$0xff]  ;;  %v2187_v14 = vld [vmem:[#allocation11 + $0x1920] sm:$0xff] }
 0x465   :  { %7043 = vmatprep.subr.bf16.mxu1 %v7042_v49  ;;  %v2033_v49 = vld [vmem:[#allocation11 + $0x1450] sm:$0xff]  ;;  %v7062_v5 = vpack.c.bf16 %v2054_v1, %v2047_v43  ;;  %v7066_v11 = vpack.c.bf16 %v2180_v60, %v2173_v57  ;;  %v2068_v9 = vld [vmem:[#allocation11 + $0x1568] sm:$0xff]  ;;  %v2194_v15 = vld [vmem:[#allocation11 + $0x1958] sm:$0xff] }
 0x466   :  { %v2945_v50 = vadd.f32 %v7764_v10, %v2848_v6  ;;  %v7058_v29 = vpack.c.bf16 %v2040_v18, %v2033_v49  ;;  %v2157_v10 = vld [vmem:[#allocation11 + $0x1830] sm:$0xff]  ;;  %v2186_v6 = vld [vmem:[#allocation11 + $0x1918] sm:$0xff]  ;;  %v7068_v49 = vpack.c.bf16 %v2068_v9, %v2061_v4  ;;  %v2103_v22 = vld [vmem:[#allocation11 + $0x1680] sm:$0xff] }
 0x467   :  { %6757 = vmatpush1.bf16.msra.mxu0 %v6756_v24  ;;  %v2150_v24 = vld [vmem:[#allocation11 + $0x17f8] sm:$0xff]  ;;  %v2185_v18 = vld [vmem:[#allocation11 + $0x1910] sm:$0xff]  ;;  %v2228_v60 = vld [vmem:[#allocation11 + $0x1a68] sm:$0xff] }
 0x468   :  { %7045 = vmatpush3.bf16.msra.mxu1 %v7044_v31  ;;  %6759 = vmatprep.subr.bf16.mxu0 %v6758_v27  ;;  %v1921_v31 = vld [vmem:[#allocation11 + $0x10d0] sm:$0xff]  ;;  %v6772_v46 = vpack.c.bf16 %v2150_v24, %v2143_v12  ;;  %v2082_v12 = vld [vmem:[#allocation11 + $0x15d8] sm:$0xff]  ;;  %v2200_v24 = vld [vmem:[#allocation11 + $0x1988] sm:$0xff] }
 0x469   :  { %7047 = vmatprep.subr.bf16.mxu1 %v7046_v38  ;;  %v2165_v38 = vld [vmem:[#allocation11 + $0x1870] sm:$0xff]  ;;  %v7060_v52 = vpack.c.bf16 %v1928_v39, %v1921_v31  ;;  %v2207_v31 = vld [vmem:[#allocation11 + $0x19c0] sm:$0xff]  ;;  %v2110_v57 = vld [vmem:[#allocation11 + $0x16b8] sm:$0xff] }
 0x46a   :  { %v2089_v43 = vld [vmem:[#allocation11 + $0x1610] sm:$0xff]  ;;  %v2227_v4 = vld [vmem:[#allocation11 + $0x1a60] sm:$0xff]  ;;  %v2234_v9 = vld [vmem:[#allocation11 + $0x1a98] sm:$0xff] }
 0x46b   :  { %6761 = vmatpush1.bf16.msra.mxu0 %v6760_v16  ;;  %v6774_v16 = vpack.c.bf16 %v2165_v38, %v2158_v55  ;;  %v6786_v55 = vpack.c.bf16 %v2207_v31, %v2200_v24  ;;  %v2199_v38 = vld [vmem:[#allocation11 + $0x1980] sm:$0xff] }
 0x46c   :  { %7049 = vmatpush3.bf16.msra.mxu1 %v7048_v53  ;;  %6763 = vmatprep.subr.bf16.mxu0 %v6762_v54  ;;  %v2164_v53 = vld [vmem:[#allocation11 + $0x1868] sm:$0xff]  ;;  %v1935_v54 = vld [vmem:[#allocation11 + $0x1140] sm:$0xff] }
 0x46d   :  { %7051 = vmatprep.subr.bf16.mxu1 %v7050_v36  ;;  %v1942_v36 = vld [vmem:[#allocation11 + $0x1178] sm:$0xff]  ;;  %v6776_v61 = vpack.c.bf16 %v2164_v53, %v2157_v10  ;;  %v2215_v10 = vld [vmem:[#allocation11 + $0x1a00] sm:$0xff] }
 0x46e   :  { %v2222_v53 = vld [vmem:[#allocation11 + $0x1a38] sm:$0xff]  ;;  %v2131_v24 = vld [vmem:[#allocation11 + $0x1760] sm:$0xff] }
 0x46f   :  { %6765 = vmatpush1.bf16.msra.mxu0 %v6764_v62  ;;  %v7064_v62 = vpack.c.bf16 %v1942_v36, %v1935_v54  ;;  %v2220_v36 = vld [vmem:[#allocation11 + $0x1a28] sm:$0xff]  ;;  %v7078_v56 = vpack.c.bf16 %v2222_v53, %v2215_v10  ;;  %v2270_v53 = vld [vmem:[#allocation11 + $0x1bb8] sm:$0xff] }
 0x470   :  { %7053 = vmatpush3.bf16.msra.mxu1 %v7052_v2  ;;  %6767 = vmatprep.subr.bf16.mxu0 %v6766_v3  ;;  %v2171_v2 = vld [vmem:[#allocation11 + $0x18a0] sm:$0xff]  ;;  %v2178_v3 = vld [vmem:[#allocation11 + $0x18d8] sm:$0xff]  ;;  %v2152_v10 = vld [vmem:[#allocation11 + $0x1808] sm:$0xff] }
 0x471   :  { %v3368_v27 = vpop.f32.mrb[8].mxu0  ;;  %7055 = vmatprep.subr.bf16.mxu1 %v7054_v13  ;;  %v2193_v13 = vld [vmem:[#allocation11 + $0x1950] sm:$0xff]  ;;  %v6780_v44 = vpack.c.bf16 %v2178_v3, %v2171_v2  ;;  %v7080_v3 = vpack.c.bf16 %v2110_v57, %v2103_v22  ;;  %v2276_v57 = vld [vmem:[#allocation11 + $0x1be8] sm:$0xff] }
 0x472   :  { %v7798_v8 = vadd.f32 %v3368_v27, %v2943_v47  ;;  %v3370_v41 = vpop.f32.mrb[9].mxu0  ;;  %v2075_v47 = vld [vmem:[#allocation11 + $0x15a0] sm:$0xff]  ;;  %v2208_v27 = vld [vmem:[#allocation11 + $0x19c8] sm:$0xff] }
 0x473   :  { %v7800_v45 = vadd.f32 %v3370_v41, %v2945_v50  ;;  %6769 = vmatpush1.bf16.msra.mxu0 %v6768_v19  ;;  %v2192_v19 = vld [vmem:[#allocation11 + $0x1948] sm:$0xff]  ;;  %v2201_v50 = vld [vmem:[#allocation11 + $0x1990] sm:$0xff]  ;;  %v7072_v39 = vpack.c.bf16 %v2082_v12, %v2075_v47  ;;  %v2206_v41 = vld [vmem:[#allocation11 + $0x19b8] sm:$0xff] }
 0x474   :  { %7057 = vmatpush3.bf16.msra.mxu1 %v7056_v20  ;;  %6771 = vmatprep.subr.bf16.mxu0 %v6770_v21  ;;  %v6782_v20 = vpack.c.bf16 %v2193_v13, %v2186_v6  ;;  %v7070_v21 = vpack.c.bf16 %v2194_v15, %v2187_v14  ;;  %v7074_v1 = vpack.c.bf16 %v2208_v27, %v2201_v50  ;;  %v2117_v6 = vld [vmem:[#allocation11 + $0x16f0] sm:$0xff]  ;;  %v2124_v14 = vld [vmem:[#allocation11 + $0x1728] sm:$0xff]  ;;  %v2242_v15 = vld [vmem:[#allocation11 + $0x1ad8] sm:$0xff] }
 0x475   :  { %v4864_v63 = vcombine.low %v7798_v8, %v7800_v45  ;;  %v4865_v35 = vcombine.high %v7798_v8, %v7800_v45  ;;  %7059 = vmatprep.subr.bf16.mxu1 %v7058_v29  ;;  %v6784_v29 = vpack.c.bf16 %v2192_v19, %v2185_v18  ;;  %v2250_v18 = vld [vmem:[#allocation11 + $0x1b18] sm:$0xff]  ;;  %v6796_v19 = vpack.c.bf16 %v2234_v9, %v2227_v4  ;;  %v2248_v12 = vld [vmem:[#allocation11 + $0x1b08] sm:$0xff] }
 0x476   :  { %v7084_v47 = vpack.c.bf16 %v2124_v14, %v2117_v6  ;;  %v2138_v50 = vld [vmem:[#allocation11 + $0x1798] sm:$0xff]  ;;  %v2256_v27 = vld [vmem:[#allocation11 + $0x1b48] sm:$0xff] }
 0x477   :  { %6773 = vmatpush1.bf16.msra.mxu0 %v6772_v46  ;;  %v2096_v46 = vld [vmem:[#allocation11 + $0x1648] sm:$0xff]  ;;  %v2290_v14 = vld [vmem:[#allocation11 + $0x1c58] sm:$0xff] }
 0x478   :  { %7061 = vmatpush3.bf16.msra.mxu1 %v7060_v52  ;;  %6775 = vmatprep.subr.bf16.mxu0 %v6774_v16  ;;  %v2214_v52 = vld [vmem:[#allocation11 + $0x19f8] sm:$0xff]  ;;  %v2221_v16 = vld [vmem:[#allocation11 + $0x1a30] sm:$0xff]  ;;  %v7076_v54 = vpack.c.bf16 %v2096_v46, %v2089_v43 }
 0x479   :  { %7063 = vmatprep.subr.bf16.mxu1 %v7062_v5  ;;  %v6790_v5 = vpack.c.bf16 %v2221_v16, %v2214_v52  ;;  %v2262_v46 = vld [vmem:[#allocation11 + $0x1b78] sm:$0xff]  ;;  %v2145_v52 = vld [vmem:[#allocation11 + $0x17d0] sm:$0xff] }
 0x47b   :  { %6777 = vmatpush1.bf16.msra.mxu0 %v6776_v61  ;;  %v2235_v61 = vld [vmem:[#allocation11 + $0x1aa0] sm:$0xff] }
 0x47c   :  { %7065 = vmatpush3.bf16.msra.mxu1 %v7064_v62  ;;  %6779 = vmatprep.subr.bf16.mxu0 %v6778_v0  ;;  %v2229_v62 = vld [vmem:[#allocation11 + $0x1a70] sm:$0xff]  ;;  %v2236_v0 = vld [vmem:[#allocation11 + $0x1aa8] sm:$0xff] }
 0x47d   :  { %7067 = vmatprep.subr.bf16.mxu1 %v7066_v11  ;;  %v6794_v11 = vpack.c.bf16 %v2235_v61, %v2228_v60  ;;  %v7082_v13 = vpack.c.bf16 %v2236_v0, %v2229_v62  ;;  %v2159_v60 = vld [vmem:[#allocation11 + $0x1840] sm:$0xff]  ;;  %v2166_v62 = vld [vmem:[#allocation11 + $0x1878] sm:$0xff]  ;;  %v2284_v0 = vld [vmem:[#allocation11 + $0x1c28] sm:$0xff] }
 0x47e   :  { %v7096_v9 = vpack.c.bf16 %v2166_v62, %v2159_v60  ;;  %v2325_v60 = vld [vmem:[#allocation11 + $0x1d70] sm:$0xff]  ;;  %v2327_v62 = vld [vmem:[#allocation11 + $0x1d80] sm:$0xff] }
 0x47f   :  { %4572 = vmatmul.mubr.f32.vlgmr.msra.gmra.mrb[22].mxu1 %v7724_v37  ;;  %6781 = vmatpush1.bf16.msra.mxu0 %v6780_v44  ;;  %v6788_v37 = vpack.c.bf16 %v2206_v41, %v2199_v38  ;;  %v2249_v44 = vld [vmem:[#allocation11 + $0x1b10] sm:$0xff]  ;;  %v7088_v41 = vpack.c.bf16 %v2138_v50, %v2131_v24  ;;  %v2299_v50 = vld [vmem:[#allocation11 + $0x1ca0] sm:$0xff] }
 0x480   :  { %7069 = vmatpush3.bf16.msra.mxu1 %v7068_v49  ;;  %4641 = vmatprep.mubr.f32.mxu1 %v7726_v59  ;;  %v2213_v59 = vld [vmem:[#allocation11 + $0x19f0] sm:$0xff]  ;;  %v2243_v49 = vld [vmem:[#allocation11 + $0x1ae0] sm:$0xff] }
 0x481   :  { %6783 = vmatprep.subr.bf16.mxu0 %v6782_v20  ;;  %7071 = vmatprep.subr.bf16.mxu1 %v7070_v21  ;;  %v6792_v2 = vpack.c.bf16 %v2220_v36, %v2213_v59  ;;  %v6798_v20 = vpack.c.bf16 %v2249_v44, %v2242_v15  ;;  %v2241_v21 = vld [vmem:[#allocation11 + $0x1ad0] sm:$0xff]  ;;  %v7086_v31 = vpack.c.bf16 %v2250_v18, %v2243_v49  ;;  %v2292_v49 = vld [vmem:[#allocation11 + $0x1c68] sm:$0xff]  ;;  %v2298_v18 = vld [vmem:[#allocation11 + $0x1c98] sm:$0xff] }
 0x482   :  { %v6800_v38 = vpack.c.bf16 %v2248_v12, %v2241_v21  ;;  %v7092_v36 = vpack.c.bf16 %v2152_v10, %v2145_v52  ;;  %v2285_v44 = vld [vmem:[#allocation11 + $0x1c30] sm:$0xff]  ;;  %v2418_v21 = vld [vmem:[#allocation11 + $0x2058] sm:$0xff] }
 0x483   :  { %6785 = vmatpush1.bf16.msra.mxu0 %v6784_v29  ;;  %v2263_v29 = vld [vmem:[#allocation11 + $0x1b80] sm:$0xff]  ;;  %v7100_v12 = vpack.c.bf16 %v2292_v49, %v2285_v44  ;;  %v2297_v24 = vld [vmem:[#allocation11 + $0x1c90] sm:$0xff]  ;;  %v2318_v10 = vld [vmem:[#allocation11 + $0x1d38] sm:$0xff] }
 0x484   :  { %7073 = vmatpush3.bf16.msra.mxu1 %v7072_v39  ;;  %6787 = vmatprep.subr.bf16.mxu0 %v6786_v55  ;;  %v2257_v39 = vld [vmem:[#allocation11 + $0x1b50] sm:$0xff]  ;;  %v2264_v55 = vld [vmem:[#allocation11 + $0x1b88] sm:$0xff]  ;;  %v6802_v43 = vpack.c.bf16 %v2263_v29, %v2256_v27  ;;  %v2306_v29 = vld [vmem:[#allocation11 + $0x1cd8] sm:$0xff] }
 0x485   :  { %7075 = vmatprep.subr.bf16.mxu1 %v7074_v1  ;;  %v2255_v1 = vld [vmem:[#allocation11 + $0x1b40] sm:$0xff]  ;;  %v7090_v16 = vpack.c.bf16 %v2264_v55, %v2257_v39  ;;  %v2312_v39 = vld [vmem:[#allocation11 + $0x1d08] sm:$0xff]  ;;  %v2341_v44 = vld [vmem:[#allocation11 + $0x1df0] sm:$0xff] }
 0x486   :  { %v6804_v59 = vpack.c.bf16 %v2262_v46, %v2255_v1  ;;  %v2319_v55 = vld [vmem:[#allocation11 + $0x1d40] sm:$0xff]  ;;  %v7104_v46 = vpack.c.bf16 %v2306_v29, %v2299_v50  ;;  %v2353_v50 = vld [vmem:[#allocation11 + $0x1e50] sm:$0xff] }
 0x487   :  { %6789 = vmatpush1.bf16.msra.mxu0 %v6788_v37  ;;  %v2277_v37 = vld [vmem:[#allocation11 + $0x1bf0] sm:$0xff]  ;;  %v6818_v52 = vpack.c.bf16 %v2319_v55, %v2312_v39  ;;  %v2355_v29 = vld [vmem:[#allocation11 + $0x1e60] sm:$0xff]  ;;  %v2362_v55 = vld [vmem:[#allocation11 + $0x1e98] sm:$0xff] }
 0x488   :  { %7077 = vmatpush3.bf16.msra.mxu1 %v7076_v54  ;;  %6791 = vmatprep.subr.bf16.mxu0 %v6790_v5  ;;  %v2271_v54 = vld [vmem:[#allocation11 + $0x1bc0] sm:$0xff]  ;;  %v2278_v5 = vld [vmem:[#allocation11 + $0x1bf8] sm:$0xff]  ;;  %v6806_v22 = vpack.c.bf16 %v2277_v37, %v2270_v53  ;;  %v2313_v53 = vld [vmem:[#allocation11 + $0x1d10] sm:$0xff] }
 0x489   :  { %7079 = vmatprep.subr.bf16.mxu1 %v7078_v56  ;;  %v2269_v56 = vld [vmem:[#allocation11 + $0x1bb0] sm:$0xff]  ;;  %v7094_v61 = vpack.c.bf16 %v2278_v5, %v2271_v54  ;;  %v2320_v54 = vld [vmem:[#allocation11 + $0x1d48] sm:$0xff]  ;;  %v2326_v5 = vld [vmem:[#allocation11 + $0x1d78] sm:$0xff] }
 0x48a   :  { %v6808_v4 = vpack.c.bf16 %v2276_v57, %v2269_v56  ;;  %v7108_v56 = vpack.c.bf16 %v2320_v54, %v2313_v53  ;;  %v2374_v53 = vld [vmem:[#allocation11 + $0x1ef8] sm:$0xff] }
 0x48b   :  { %6793 = vmatpush1.bf16.msra.mxu0 %v6792_v2  ;;  %v2291_v2 = vld [vmem:[#allocation11 + $0x1c60] sm:$0xff] }
 0x48c   :  { %7081 = vmatpush3.bf16.msra.mxu1 %v7080_v3  ;;  %6795 = vmatprep.subr.bf16.mxu0 %v6794_v11  ;;  %v2397_v3 = vld [vmem:[#allocation11 + $0x1fb0] sm:$0xff]  ;;  %v2404_v11 = vld [vmem:[#allocation11 + $0x1fe8] sm:$0xff]  ;;  %v6810_v6 = vpack.c.bf16 %v2291_v2, %v2284_v0 }
 0x48d   :  { %7083 = vmatprep.subr.bf16.mxu1 %v7082_v13  ;;  %v2283_v13 = vld [vmem:[#allocation11 + $0x1c20] sm:$0xff]  ;;  %v7098_v15 = vpack.c.bf16 %v2404_v11, %v2397_v3  ;;  %v2340_v2 = vld [vmem:[#allocation11 + $0x1de8] sm:$0xff]  ;;  %v2453_v11 = vld [vmem:[#allocation11 + $0x2170] sm:$0xff] }
 0x48e   :  { %v2347_v3 = vld [vmem:[#allocation11 + $0x1e20] sm:$0xff] }
 0x48f   :  { %6797 = vmatpush1.bf16.msra.mxu0 %v6796_v19  ;;  %v2305_v19 = vld [vmem:[#allocation11 + $0x1cd0] sm:$0xff] }
 0x490   :  { %7085 = vmatpush3.bf16.msra.mxu1 %v7084_v47  ;;  %6799 = vmatprep.subr.bf16.mxu0 %v6798_v20  ;;  %v6812_v47 = vpack.c.bf16 %v2290_v14, %v2283_v13  ;;  %v2411_v20 = vld [vmem:[#allocation11 + $0x2020] sm:$0xff]  ;;  %v6814_v27 = vpack.c.bf16 %v2305_v19, %v2298_v18  ;;  %v6826_v13 = vpack.c.bf16 %v2347_v3, %v2340_v2  ;;  %v2348_v18 = vld [vmem:[#allocation11 + $0x1e28] sm:$0xff]  ;;  %v2354_v19 = vld [vmem:[#allocation11 + $0x1e58] sm:$0xff] }
 0x491   :  { %7087 = vmatprep.subr.bf16.mxu1 %v7086_v31  ;;  %v2304_v31 = vld [vmem:[#allocation11 + $0x1cc8] sm:$0xff]  ;;  %v2339_v14 = vld [vmem:[#allocation11 + $0x1de0] sm:$0xff]  ;;  %v2390_v2 = vld [vmem:[#allocation11 + $0x1f78] sm:$0xff] }
 0x492   :  { %v6816_v1 = vpack.c.bf16 %v2304_v31, %v2297_v24  ;;  %v7116_v24 = vpack.c.bf16 %v2348_v18, %v2341_v44  ;;  %v2396_v3 = vld [vmem:[#allocation11 + $0x1fa8] sm:$0xff]  ;;  %v2402_v44 = vld [vmem:[#allocation11 + $0x1fd8] sm:$0xff]  ;;  %v2509_v18 = vld [vmem:[#allocation11 + $0x2330] sm:$0xff] }
 0x493   :  { %6801 = vmatpush1.bf16.msra.mxu0 %v6800_v38  ;;  %v7102_v38 = vpack.c.bf16 %v2418_v21, %v2411_v20  ;;  %v2467_v20 = vld [vmem:[#allocation11 + $0x21e0] sm:$0xff]  ;;  %v2474_v21 = vld [vmem:[#allocation11 + $0x2218] sm:$0xff] }
 0x494   :  { %7089 = vmatpush3.bf16.msra.mxu1 %v7088_v41  ;;  %6803 = vmatprep.subr.bf16.mxu0 %v6802_v43  ;;  %v2425_v41 = vld [vmem:[#allocation11 + $0x2090] sm:$0xff]  ;;  %v2432_v43 = vld [vmem:[#allocation11 + $0x20c8] sm:$0xff]  ;;  %v7118_v39 = vpack.c.bf16 %v2474_v21, %v2467_v20  ;;  %v2635_v21 = vld [vmem:[#allocation11 + $0x2720] sm:$0xff] }
 0x495   :  { %7091 = vmatprep.subr.bf16.mxu1 %v7090_v16  ;;  %v2311_v16 = vld [vmem:[#allocation11 + $0x1d00] sm:$0xff]  ;;  %v7106_v37 = vpack.c.bf16 %v2432_v43, %v2425_v41  ;;  %v2481_v43 = vld [vmem:[#allocation11 + $0x2250] sm:$0xff] }
 0x496   :  { %v2375_v41 = vld [vmem:[#allocation11 + $0x1f00] sm:$0xff]  ;;  %v2417_v20 = vld [vmem:[#allocation11 + $0x2050] sm:$0xff] }
 0x497   :  { %6805 = vmatpush1.bf16.msra.mxu0 %v6804_v59  ;;  %v2333_v59 = vld [vmem:[#allocation11 + $0x1db0] sm:$0xff] }
 0x498   :  { %7093 = vmatpush3.bf16.msra.mxu1 %v7092_v36  ;;  %6807 = vmatprep.subr.bf16.mxu0 %v6806_v22  ;;  %v2439_v36 = vld [vmem:[#allocation11 + $0x2100] sm:$0xff]  ;;  %v6820_v22 = vpack.c.bf16 %v2318_v10, %v2311_v16  ;;  %v6822_v57 = vpack.c.bf16 %v2333_v59, %v2326_v5  ;;  %v2376_v5 = vld [vmem:[#allocation11 + $0x1f08] sm:$0xff]  ;;  %v2382_v59 = vld [vmem:[#allocation11 + $0x1f38] sm:$0xff] }
 0x499   :  { %7095 = vmatprep.subr.bf16.mxu1 %v7094_v61  ;;  %v2332_v61 = vld [vmem:[#allocation11 + $0x1da8] sm:$0xff]  ;;  %v2367_v10 = vld [vmem:[#allocation11 + $0x1ec0] sm:$0xff] }
 0x49b   :  { %6809 = vmatpush1.bf16.msra.mxu0 %v6808_v4  ;;  %v2460_v4 = vld [vmem:[#allocation11 + $0x21a8] sm:$0xff] }
 0x49c   :  { %7097 = vmatpush3.bf16.msra.mxu1 %v7096_v9  ;;  %6811 = vmatprep.subr.bf16.mxu0 %v6810_v6  ;;  %v6824_v9 = vpack.c.bf16 %v2332_v61, %v2325_v60  ;;  %v7114_v49 = vpack.c.bf16 %v2460_v4, %v2453_v11  ;;  %v2381_v61 = vld [vmem:[#allocation11 + $0x1f30] sm:$0xff]  ;;  %v2403_v11 = vld [vmem:[#allocation11 + $0x1fe0] sm:$0xff] }
 0x49d   :  { %7099 = vmatprep.subr.bf16.mxu1 %v7098_v15  ;;  %v2346_v15 = vld [vmem:[#allocation11 + $0x1e18] sm:$0xff]  ;;  %v2621_v4 = vld [vmem:[#allocation11 + $0x26b0] sm:$0xff] }
 0x49e   :  { %4148 = vmatmul.mubr.f32.vlgmr.msra.gmra.mrb[10].mxu0 %v7743_v34 }
 0x49f   :  { %4642 = vmatmul.mubr.f32.vlgmr.msra.gmra.mrb[24].mxu1 %v7743_v34  ;;  %6813 = vmatpush1.bf16.msra.mxu0 %v6812_v47  ;;  %v2446_v34 = vld [vmem:[#allocation11 + $0x2138] sm:$0xff]  ;;  %v2361_v47 = vld [vmem:[#allocation11 + $0x1e90] sm:$0xff] }
 0x4a0   :  { %4218 = vmatprep.mubr.f32.mxu0 %v7745_v17  ;;  %7101 = vmatpush3.bf16.msra.mxu1 %v7100_v12  ;;  %v7110_v0 = vpack.c.bf16 %v2446_v34, %v2439_v36  ;;  %v6828_v12 = vpack.c.bf16 %v2346_v15, %v2339_v14  ;;  %v6830_v31 = vpack.c.bf16 %v2361_v47, %v2354_v19  ;;  %v2389_v36 = vld [vmem:[#allocation11 + $0x1f70] sm:$0xff]  ;;  %v2495_v34 = vld [vmem:[#allocation11 + $0x22c0] sm:$0xff]  ;;  %v2516_v19 = vld [vmem:[#allocation11 + $0x2368] sm:$0xff] }
 0x4a1   :  { %4711 = vmatprep.mubr.f32.mxu1 %v7745_v17  ;;  %6815 = vmatprep.subr.bf16.mxu0 %v6814_v27  ;;  %v2334_v17 = vld [vmem:[#allocation11 + $0x1db8] sm:$0xff]  ;;  %v2360_v27 = vld [vmem:[#allocation11 + $0x1e88] sm:$0xff]  ;;  %v6838_v60 = vpack.c.bf16 %v2389_v36, %v2382_v59  ;;  %v6842_v14 = vpack.c.bf16 %v2403_v11, %v2396_v3  ;;  %v2395_v15 = vld [vmem:[#allocation11 + $0x1fa0] sm:$0xff] }
 0x4a2   :  { %7103 = vmatprep.subr.bf16.mxu1 %v7102_v38  ;;  %v7112_v6 = vpack.c.bf16 %v2334_v17, %v2327_v62  ;;  %v2368_v38 = vld [vmem:[#allocation11 + $0x1ec8] sm:$0xff]  ;;  %v2410_v47 = vld [vmem:[#allocation11 + $0x2018] sm:$0xff] }
 0x4a3   :  { %6817 = vmatpush1.bf16.msra.mxu0 %v6816_v1  ;;  %v2488_v1 = vld [vmem:[#allocation11 + $0x2288] sm:$0xff]  ;;  %v6834_v16 = vpack.c.bf16 %v2375_v41, %v2368_v38  ;;  %v2530_v38 = vld [vmem:[#allocation11 + $0x23d8] sm:$0xff] }
 0x4a4   :  { %7105 = vmatpush3.bf16.msra.mxu1 %v7104_v46  ;;  %6819 = vmatprep.subr.bf16.mxu0 %v6818_v52  ;;  %v6832_v46 = vpack.c.bf16 %v2360_v27, %v2353_v50  ;;  %v7120_v52 = vpack.c.bf16 %v2362_v55, %v2355_v29  ;;  %v7122_v54 = vpack.c.bf16 %v2488_v1, %v2481_v43  ;;  %v2388_v62 = vld [vmem:[#allocation11 + $0x1f68] sm:$0xff]  ;;  %v2409_v50 = vld [vmem:[#allocation11 + $0x2010] sm:$0xff]  ;;  %v2523_v29 = vld [vmem:[#allocation11 + $0x23a0] sm:$0xff] }
 0x4a5   :  { %7107 = vmatprep.subr.bf16.mxu1 %v7106_v37  ;;  %v2369_v37 = vld [vmem:[#allocation11 + $0x1ed0] sm:$0xff]  ;;  %v2416_v27 = vld [vmem:[#allocation11 + $0x2048] sm:$0xff]  ;;  %v2431_v43 = vld [vmem:[#allocation11 + $0x20c0] sm:$0xff] }
 0x4a6   :  { %v2424_v41 = vld [vmem:[#allocation11 + $0x2088] sm:$0xff]  ;;  %v2649_v1 = vld [vmem:[#allocation11 + $0x2790] sm:$0xff]  ;;  %v2438_v36 = vld [vmem:[#allocation11 + $0x20f8] sm:$0xff] }
 0x4a7   :  { %6821 = vmatpush1.bf16.msra.mxu0 %v6820_v22  ;;  %v2502_v22 = vld [vmem:[#allocation11 + $0x22f8] sm:$0xff]  ;;  %v2544_v59 = vld [vmem:[#allocation11 + $0x2448] sm:$0xff] }
 0x4a8   :  { %7109 = vmatpush3.bf16.msra.mxu1 %v7108_v56  ;;  %6823 = vmatprep.subr.bf16.mxu0 %v6822_v57  ;;  %v6836_v56 = vpack.c.bf16 %v2374_v53, %v2367_v10  ;;  %v7124_v57 = vpack.c.bf16 %v2376_v5, %v2369_v37  ;;  %v7126_v17 = vpack.c.bf16 %v2502_v22, %v2495_v34  ;;  %v2423_v53 = vld [vmem:[#allocation11 + $0x2080] sm:$0xff]  ;;  %v2430_v37 = vld [vmem:[#allocation11 + $0x20b8] sm:$0xff]  ;;  %v2445_v34 = vld [vmem:[#allocation11 + $0x2130] sm:$0xff] }
 0x4a9   :  { %7111 = vmatprep.subr.bf16.mxu1 %v7110_v0  ;;  %v2383_v0 = vld [vmem:[#allocation11 + $0x1f40] sm:$0xff]  ;;  %v6850_v10 = vpack.c.bf16 %v2431_v43, %v2424_v41  ;;  %v2558_v3 = vld [vmem:[#allocation11 + $0x24b8] sm:$0xff]  ;;  %v2452_v11 = vld [vmem:[#allocation11 + $0x2168] sm:$0xff] }
 0x4aa   :  { %v2663_v22 = vld [vmem:[#allocation11 + $0x2800] sm:$0xff]  ;;  %v2586_v41 = vld [vmem:[#allocation11 + $0x2598] sm:$0xff]  ;;  %v2480_v43 = vld [vmem:[#allocation11 + $0x2248] sm:$0xff] }
 0x4ab   :  { %6825 = vmatpush1.bf16.msra.mxu0 %v6824_v9  ;;  %v2628_v9 = vld [vmem:[#allocation11 + $0x26e8] sm:$0xff] }
 0x4ac   :  { %7113 = vmatpush3.bf16.msra.mxu1 %v7112_v6  ;;  %6827 = vmatprep.subr.bf16.mxu0 %v6826_v13  ;;  %v6840_v6 = vpack.c.bf16 %v2388_v62, %v2381_v61  ;;  %v7128_v13 = vpack.c.bf16 %v2390_v2, %v2383_v0  ;;  %v6854_v61 = vpack.c.bf16 %v2445_v34, %v2438_v36  ;;  %v2437_v62 = vld [vmem:[#allocation11 + $0x20f0] sm:$0xff]  ;;  %v2444_v0 = vld [vmem:[#allocation11 + $0x2128] sm:$0xff]  ;;  %v2494_v34 = vld [vmem:[#allocation11 + $0x22b8] sm:$0xff] }
 0x4ad   :  { %7115 = vmatprep.subr.bf16.mxu1 %v7114_v49  ;;  %v7130_v49 = vpack.c.bf16 %v2628_v9, %v2621_v4  ;;  %v2459_v4 = vld [vmem:[#allocation11 + $0x21a0] sm:$0xff]  ;;  %v2677_v9 = vld [vmem:[#allocation11 + $0x2870] sm:$0xff]  ;;  %v2600_v36 = vld [vmem:[#allocation11 + $0x2608] sm:$0xff] }
 0x4af   :  { %6829 = vmatpush1.bf16.msra.mxu0 %v6828_v12  ;;  %v2642_v12 = vld [vmem:[#allocation11 + $0x2758] sm:$0xff] }
 0x4b0   :  { %7117 = vmatpush3.bf16.msra.mxu1 %v7116_v24  ;;  %6831 = vmatprep.subr.bf16.mxu0 %v6830_v31  ;;  %v6844_v24 = vpack.c.bf16 %v2402_v44, %v2395_v15  ;;  %v7132_v31 = vpack.c.bf16 %v2516_v19, %v2509_v18  ;;  %v7134_v55 = vpack.c.bf16 %v2642_v12, %v2635_v21  ;;  %v2451_v44 = vld [vmem:[#allocation11 + $0x2160] sm:$0xff]  ;;  %v2565_v18 = vld [vmem:[#allocation11 + $0x24f0] sm:$0xff] }
 0x4b1   :  { %7119 = vmatprep.subr.bf16.mxu1 %v7118_v39  ;;  %v6846_v39 = vpack.c.bf16 %v2417_v20, %v2410_v47  ;;  %v6858_v15 = vpack.c.bf16 %v2459_v4, %v2452_v11  ;;  %v2572_v47 = vld [vmem:[#allocation11 + $0x2528] sm:$0xff]  ;;  %v2466_v20 = vld [vmem:[#allocation11 + $0x21d8] sm:$0xff]  ;;  %v2473_v21 = vld [vmem:[#allocation11 + $0x2210] sm:$0xff] }
 0x4b2   :  { %v2691_v12 = vld [vmem:[#allocation11 + $0x28e0] sm:$0xff]  ;;  %v2614_v11 = vld [vmem:[#allocation11 + $0x2678] sm:$0xff]  ;;  %v2508_v4 = vld [vmem:[#allocation11 + $0x2328] sm:$0xff] }
 0x4b3   :  { %6833 = vmatpush1.bf16.msra.mxu0 %v6832_v46  ;;  %v2656_v46 = vld [vmem:[#allocation11 + $0x27c8] sm:$0xff] }
 0x4b4   :  { %7121 = vmatpush3.bf16.msra.mxu1 %v7120_v52  ;;  %6835 = vmatprep.subr.bf16.mxu0 %v6834_v16  ;;  %v6848_v52 = vpack.c.bf16 %v2416_v27, %v2409_v50  ;;  %v7136_v16 = vpack.c.bf16 %v2530_v38, %v2523_v29  ;;  %v7138_v5 = vpack.c.bf16 %v2656_v46, %v2649_v1  ;;  %v2465_v29 = vld [vmem:[#allocation11 + $0x21d0] sm:$0xff]  ;;  %v2487_v1 = vld [vmem:[#allocation11 + $0x2280] sm:$0xff] }
 0x4b5   :  { %7123 = vmatprep.subr.bf16.mxu1 %v7122_v54  ;;  %v2537_v54 = vld [vmem:[#allocation11 + $0x2410] sm:$0xff]  ;;  %v7148_v50 = vpack.c.bf16 %v2572_v47, %v2565_v18  ;;  %v6862_v27 = vpack.c.bf16 %v2473_v21, %v2466_v20  ;;  %v2740_v18 = vld [vmem:[#allocation11 + $0x2a68] sm:$0xff] }
 0x4b6   :  { %v2705_v46 = vld [vmem:[#allocation11 + $0x2950] sm:$0xff] }
 0x4b7   :  { %6837 = vmatpush1.bf16.msra.mxu0 %v6836_v56  ;;  %v2670_v56 = vld [vmem:[#allocation11 + $0x2838] sm:$0xff]  ;;  %v2529_v47 = vld [vmem:[#allocation11 + $0x23d0] sm:$0xff] }
 0x4b8   :  { %7125 = vmatpush3.bf16.msra.mxu1 %v7124_v57  ;;  %6839 = vmatprep.subr.bf16.mxu0 %v6838_v60  ;;  %v6852_v57 = vpack.c.bf16 %v2430_v37, %v2423_v53  ;;  %v7140_v60 = vpack.c.bf16 %v2544_v59, %v2537_v54  ;;  %v7142_v2 = vpack.c.bf16 %v2670_v56, %v2663_v22  ;;  %v2479_v37 = vld [vmem:[#allocation11 + $0x2240] sm:$0xff]  ;;  %v2486_v54 = vld [vmem:[#allocation11 + $0x2278] sm:$0xff]  ;;  %v2501_v22 = vld [vmem:[#allocation11 + $0x22f0] sm:$0xff] }
 0x4b9   :  { %7127 = vmatprep.subr.bf16.mxu1 %v7126_v17  ;;  %v2551_v17 = vld [vmem:[#allocation11 + $0x2480] sm:$0xff]  ;;  %v6866_v53 = vpack.c.bf16 %v2487_v1, %v2480_v43  ;;  %v2542_v1 = vld [vmem:[#allocation11 + $0x2438] sm:$0xff] }
 0x4ba   :  { %v2719_v56 = vld [vmem:[#allocation11 + $0x29c0] sm:$0xff] }
 0x4bb   :  { %6841 = vmatpush1.bf16.msra.mxu0 %v6840_v6  ;;  %v2684_v6 = vld [vmem:[#allocation11 + $0x28a8] sm:$0xff]  ;;  %v2535_v43 = vld [vmem:[#allocation11 + $0x2400] sm:$0xff] }
 0x4bc   :  { %7129 = vmatpush3.bf16.msra.mxu1 %v7128_v13  ;;  %6843 = vmatprep.subr.bf16.mxu0 %v6842_v14  ;;  %v6856_v13 = vpack.c.bf16 %v2444_v0, %v2437_v62  ;;  %v7144_v14 = vpack.c.bf16 %v2558_v3, %v2551_v17  ;;  %v7146_v19 = vpack.c.bf16 %v2684_v6, %v2677_v9  ;;  %v2493_v0 = vld [vmem:[#allocation11 + $0x22b0] sm:$0xff]  ;;  %v2500_v17 = vld [vmem:[#allocation11 + $0x22e8] sm:$0xff]  ;;  %v2515_v9 = vld [vmem:[#allocation11 + $0x2360] sm:$0xff] }
 0x4bd   :  { %7131 = vmatprep.subr.bf16.mxu1 %v7130_v49  ;;  %v2458_v49 = vld [vmem:[#allocation11 + $0x2198] sm:$0xff]  ;;  %v6870_v62 = vpack.c.bf16 %v2501_v22, %v2494_v34  ;;  %v6872_v6 = vpack.c.bf16 %v2500_v17, %v2493_v0  ;;  %v2571_v34 = vld [vmem:[#allocation11 + $0x2520] sm:$0xff]  ;;  %v2796_v0 = vld [vmem:[#allocation11 + $0x2c28] sm:$0xff] }
 0x4be   :  { %v2578_v17 = vld [vmem:[#allocation11 + $0x2558] sm:$0xff] }
 0x4bf   :  { %4712 = vmatmul.mubr.f32.vlgmr.msra.gmra.mrb[26].mxu1 %v7753_v25  ;;  %6845 = vmatpush1.bf16.msra.mxu0 %v6844_v24  ;;  %v2698_v24 = vld [vmem:[#allocation11 + $0x2918] sm:$0xff] }
 0x4c0   :  { %7133 = vmatpush3.bf16.msra.mxu1 %v7132_v31  ;;  %4781 = vmatprep.mubr.f32.mxu1 %v7756_v42  ;;  %v6860_v31 = vpack.c.bf16 %v2458_v49, %v2451_v44  ;;  %v7150_v38 = vpack.c.bf16 %v2698_v24, %v2691_v12  ;;  %v2514_v44 = vld [vmem:[#allocation11 + $0x2358] sm:$0xff]  ;;  %v2733_v49 = vld [vmem:[#allocation11 + $0x2a30] sm:$0xff]  ;;  %v2528_v24 = vld [vmem:[#allocation11 + $0x23c8] sm:$0xff] }
 0x4c1   :  { %6847 = vmatprep.subr.bf16.mxu0 %v6846_v39  ;;  %7135 = vmatprep.subr.bf16.mxu1 %v7134_v55  ;;  %v2472_v39 = vld [vmem:[#allocation11 + $0x2208] sm:$0xff]  ;;  %v2579_v55 = vld [vmem:[#allocation11 + $0x2560] sm:$0xff]  ;;  %v7163_v21 = vpack.c.bf16 %v2740_v18, %v2733_v49  ;;  %v2521_v12 = vld [vmem:[#allocation11 + $0x2390] sm:$0xff] }
 0x4c2   :  { %v7824_v49 = vld [vmem:[#allocation13] sm:$0x7f] }
 0x4c3   :  { %6849 = vmatpush1.bf16.msra.mxu0 %v6848_v52  ;;  %v2712_v52 = vld [vmem:[#allocation11 + $0x2988] sm:$0xff]  ;;  %v2852_v18 = vrot.slane %v7824_v49, %v7657_v48 }
 0x4c4   :  { %7137 = vmatpush3.bf16.msra.mxu1 %v7136_v16  ;;  %6851 = vmatprep.subr.bf16.mxu0 %v6850_v10  ;;  %v6864_v16 = vpack.c.bf16 %v2472_v39, %v2465_v29  ;;  %v7152_v10 = vpack.c.bf16 %v2586_v41, %v2579_v55  ;;  %v7154_v59 = vpack.c.bf16 %v2712_v52, %v2705_v46  ;;  %v2536_v29 = vld [vmem:[#allocation11 + $0x2408] sm:$0xff]  ;;  %v2543_v39 = vld [vmem:[#allocation11 + $0x2440] sm:$0xff]  ;;  %v2761_v46 = vld [vmem:[#allocation11 + $0x2b10] sm:$0xff] }
 0x4c5   :  { %7139 = vmatprep.subr.bf16.mxu1 %v7138_v5  ;;  %v2593_v5 = vld [vmem:[#allocation11 + $0x25d0] sm:$0xff]  ;;  %v6880_v55 = vpack.c.bf16 %v2528_v24, %v2521_v12  ;;  %v6882_v41 = vpack.c.bf16 %v2543_v39, %v2536_v29  ;;  %v2768_v52 = vld [vmem:[#allocation11 + $0x2b48] sm:$0xff]  ;;  %v2591_v12 = vld [vmem:[#allocation11 + $0x25c0] sm:$0xff] }
 0x4c6   :  { %v2598_v24 = vld [vmem:[#allocation11 + $0x25f8] sm:$0xff]  ;;  %v2613_v29 = vld [vmem:[#allocation11 + $0x2670] sm:$0xff] }
 0x4c7   :  { %6853 = vmatpush1.bf16.msra.mxu0 %v6852_v57  ;;  %v2726_v57 = vld [vmem:[#allocation11 + $0x29f8] sm:$0xff]  ;;  %v6900_v48 = vpack.c.bf16 %v2598_v24, %v2591_v12  ;;  %v2675_v24 = vld [vmem:[#allocation11 + $0x2860] sm:$0xff] }
 0x4c8   :  { %7141 = vmatpush3.bf16.msra.mxu1 %v7140_v60  ;;  %6855 = vmatprep.subr.bf16.mxu0 %v6854_v61  ;;  %v6868_v60 = vpack.c.bf16 %v2486_v54, %v2479_v37  ;;  %v7156_v61 = vpack.c.bf16 %v2600_v36, %v2593_v5  ;;  %v7158_v3 = vpack.c.bf16 %v2726_v57, %v2719_v56  ;;  %v2549_v37 = vld [vmem:[#allocation11 + $0x2470] sm:$0xff]  ;;  %v2556_v54 = vld [vmem:[#allocation11 + $0x24a8] sm:$0xff]  ;;  %v2775_v5 = vld [vmem:[#allocation11 + $0x2b80] sm:$0xff] }
 0x4c9   :  { %7143 = vmatprep.subr.bf16.mxu1 %v7142_v2  ;;  %v2607_v2 = vld [vmem:[#allocation11 + $0x2640] sm:$0xff]  ;;  %v2564_v36 = vld [vmem:[#allocation11 + $0x24e8] sm:$0xff]  ;;  %v6888_v22 = vpack.c.bf16 %v2556_v54, %v2549_v37  ;;  %v4874_v37 = vrot.slane %v4864_v63, %v7599_v30  ;;  %v4881_v54 = vrot.slane %v4865_v35, %v7599_v30  ;;  %v2634_v63 = vld [vmem:[#allocation11 + $0x2718] sm:$0xff] }
 0x4ca   :  { %v6890_v57 = vpack.c.bf16 %v2571_v34, %v2564_v36 }
 0x4cb   :  { %6857 = vmatpush1.bf16.msra.mxu0 %v6856_v13  ;;  %v7160_v13 = vpack.c.bf16 %v2614_v11, %v2607_v2  ;;  %v2585_v2 = vld [vmem:[#allocation11 + $0x2590] sm:$0xff] }
 0x4cc   :  { %7145 = vmatpush3.bf16.msra.mxu1 %v7144_v14  ;;  %6859 = vmatprep.subr.bf16.mxu0 %v6858_v15  ;;  %v6874_v14 = vpack.c.bf16 %v2515_v9, %v2508_v4  ;;  %v2507_v15 = vld [vmem:[#allocation11 + $0x2320] sm:$0xff]  ;;  %v6894_v4 = vpack.c.bf16 %v2585_v2, %v2578_v17  ;;  %v2577_v9 = vld [vmem:[#allocation11 + $0x2550] sm:$0xff]  ;;  %v2640_v2 = vld [vmem:[#allocation11 + $0x2748] sm:$0xff] }
 0x4cd   :  { %7147 = vmatprep.subr.bf16.mxu1 %v7146_v19  ;;  %v2522_v19 = vld [vmem:[#allocation11 + $0x2398] sm:$0xff]  ;;  %v6876_v20 = vpack.c.bf16 %v2514_v44, %v2507_v15  ;;  %v2592_v15 = vld [vmem:[#allocation11 + $0x25c8] sm:$0xff]  ;;  %v2599_v44 = vld [vmem:[#allocation11 + $0x2600] sm:$0xff] }
 0x4ce   :  { %v2633_v17 = vld [vmem:[#allocation11 + $0x2710] sm:$0xff] }
 0x4cf   :  { %6861 = vmatpush1.bf16.msra.mxu0 %v6860_v31  ;;  %v2747_v31 = vld [vmem:[#allocation11 + $0x2aa0] sm:$0xff] }
 0x4d0   :  { %7149 = vmatpush3.bf16.msra.mxu1 %v7148_v50  ;;  %6863 = vmatprep.subr.bf16.mxu0 %v6862_v27  ;;  %v6878_v50 = vpack.c.bf16 %v2529_v47, %v2522_v19  ;;  %v2754_v27 = vld [vmem:[#allocation11 + $0x2ad8] sm:$0xff]  ;;  %v2856_v47 = vrot.slane %v7824_v49, %v7665_v51 }
 0x4d1   :  { %7151 = vmatprep.subr.bf16.mxu1 %v7150_v38  ;;  %v7166_v38 = vpack.c.bf16 %v2754_v27, %v2747_v31  ;;  %v2817_v31 = vld [vmem:[#allocation11 + $0x2cd0] sm:$0xff]  ;;  %v2606_v27 = vld [vmem:[#allocation11 + $0x2638] sm:$0xff] }
 0x4d3   :  { %6865 = vmatpush1.bf16.msra.mxu0 %v6864_v16  ;;  %v2550_v16 = vld [vmem:[#allocation11 + $0x2478] sm:$0xff] }
 0x4d4   :  { %7153 = vmatpush3.bf16.msra.mxu1 %v7152_v10  ;;  %6867 = vmatprep.subr.bf16.mxu0 %v6866_v53  ;;  %v2557_v10 = vld [vmem:[#allocation11 + $0x24b0] sm:$0xff] }
 0x4d5   :  { %7155 = vmatprep.subr.bf16.mxu1 %v7154_v59  ;;  %v6886_v53 = vpack.c.bf16 %v2557_v10, %v2550_v16  ;;  %v2782_v59 = vld [vmem:[#allocation11 + $0x2bb8] sm:$0xff]  ;;  %v2620_v10 = vld [vmem:[#allocation11 + $0x26a8] sm:$0xff] }
 0x4d6   :  { %v7172_v56 = vpack.c.bf16 %v2782_v59, %v2775_v5  ;;  %v2838_v16 = vld [vmem:[#allocation11 + $0x2d78] sm:$0xff] }
 0x4d7   :  { %6869 = vmatpush1.bf16.msra.mxu0 %v6868_v60  ;;  %v2563_v60 = vld [vmem:[#allocation11 + $0x24e0] sm:$0xff] }
 0x4d8   :  { %7157 = vmatpush3.bf16.msra.mxu1 %v7156_v61  ;;  %6871 = vmatprep.subr.bf16.mxu0 %v6870_v62  ;;  %v2570_v61 = vld [vmem:[#allocation11 + $0x2518] sm:$0xff]  ;;  %v2789_v62 = vld [vmem:[#allocation11 + $0x2bf0] sm:$0xff] }
 0x4d9   :  { %7159 = vmatprep.subr.bf16.mxu1 %v7158_v3  ;;  %v6892_v3 = vpack.c.bf16 %v2570_v61, %v2563_v60  ;;  %v7175_v11 = vpack.c.bf16 %v2796_v0, %v2789_v62  ;;  %v2641_v60 = vld [vmem:[#allocation11 + $0x2750] sm:$0xff] }
 0x4da   :  { %v6910_v0 = vpack.c.bf16 %v2641_v60, %v2634_v63  ;;  %v2746_v63 = vld [vmem:[#allocation11 + $0x2a98] sm:$0xff]  ;;  %v2753_v60 = vld [vmem:[#allocation11 + $0x2ad0] sm:$0xff] }
 0x4db   :  { %6873 = vmatpush1.bf16.msra.mxu0 %v6872_v6  ;;  %v2584_v6 = vld [vmem:[#allocation11 + $0x2588] sm:$0xff] }
 0x4dc   :  { %7161 = vmatpush3.bf16.msra.mxu1 %v7160_v13  ;;  %6875 = vmatprep.subr.bf16.mxu0 %v6874_v14  ;;  %v2803_v13 = vld [vmem:[#allocation11 + $0x2c60] sm:$0xff]  ;;  %v2810_v14 = vld [vmem:[#allocation11 + $0x2c98] sm:$0xff]  ;;  %v6896_v19 = vpack.c.bf16 %v2584_v6, %v2577_v9 }
 0x4dd   :  { %7162 = vmatprep.subr.bf16.mxu1 %v7466_v40  ;;  %v2647_v9 = vld [vmem:[#allocation11 + $0x2780] sm:$0xff]  ;;  %v2654_v6 = vld [vmem:[#allocation11 + $0x27b8] sm:$0xff] }
 0x4de   :  { %4219 = vmatmul.mubr.f32.vlgmr.msra.gmra.mrb[10].mxu0 %v7753_v25  ;;  %v6884_v25 = vpack.c.bf16 %v2542_v1, %v2535_v43  ;;  %v6902_v1 = vpack.c.bf16 %v2613_v29, %v2606_v27  ;;  %v2697_v27 = vld [vmem:[#allocation11 + $0x2910] sm:$0xff] }
 0x4df   :  { %4782 = vmatmul.mubr.f32.vlgmr.msra.gmra.mrb[28].mxu1 %v7767_v7  ;;  %6877 = vmatpush1.bf16.msra.mxu0 %v6876_v20  ;;  %v7178_v20 = vpack.c.bf16 %v2810_v14, %v2803_v13  ;;  %v2662_v13 = vld [vmem:[#allocation11 + $0x27f8] sm:$0xff]  ;;  %v2669_v14 = vld [vmem:[#allocation11 + $0x2830] sm:$0xff] }
 0x4e0   :  { %4289 = vmatprep.mubr.f32.mxu0 %v7756_v42  ;;  %7164 = vmatpush3.bf16.msra.mxu1 %v7163_v21  ;;  %v7169_v42 = vpack.c.bf16 %v2768_v52, %v2761_v46  ;;  %v6898_v21 = vpack.c.bf16 %v2599_v44, %v2592_v15  ;;  %v2612_v46 = vld [vmem:[#allocation11 + $0x2668] sm:$0xff]  ;;  %v2831_v52 = vld [vmem:[#allocation11 + $0x2d40] sm:$0xff]  ;;  %v6916_v15 = vpack.c.bf16 %v2654_v6, %v2647_v9 }
 0x4e1   :  { %6879 = vmatprep.subr.bf16.mxu0 %v6878_v50  ;;  %7165 = vmatprep.subr.bf16.mxu1 %v7466_v40  ;;  %v2824_v50 = vld [vmem:[#allocation11 + $0x2d08] sm:$0xff]  ;;  %v7184_v59 = vpack.c.bf16 %v2838_v16, %v2831_v52  ;;  %v6918_v44 = vpack.c.bf16 %v2669_v14, %v2662_v13  ;;  %v2718_v52 = vld [vmem:[#allocation11 + $0x29b8] sm:$0xff]  ;;  %v2725_v16 = vld [vmem:[#allocation11 + $0x29f0] sm:$0xff] }
 0x4e2   :  { %5404 = vmatprep.mubr.msk.f32.mxu1 %vm7467_vm0, %v7465_v32  ;;  %v7181_v51 = vpack.c.bf16 %v2824_v50, %v2817_v31  ;;  %v2682_v31 = vld [vmem:[#allocation11 + $0x2898] sm:$0xff]  ;;  %v2773_v13 = vld [vmem:[#allocation11 + $0x2b70] sm:$0xff]  ;;  %v2780_v14 = vld [vmem:[#allocation11 + $0x2ba8] sm:$0xff] }
 0x4e3   :  { %6881 = vmatpush1.bf16.msra.mxu0 %v6880_v55  ;;  %v2690_v50 = vld [vmem:[#allocation11 + $0x28d8] sm:$0xff]  ;;  %v6924_v29 = vpack.c.bf16 %v2682_v31, %v2675_v24  ;;  %v2801_v24 = vld [vmem:[#allocation11 + $0x2c50] sm:$0xff]  ;;  %v2808_v31 = vld [vmem:[#allocation11 + $0x2c88] sm:$0xff] }
 0x4e4   :  { %7167 = vmatpush3.bf16.msra.mxu1 %v7166_v38  ;;  %6883 = vmatprep.subr.bf16.mxu0 %v6882_v41  ;;  %v2605_v41 = vld [vmem:[#allocation11 + $0x2630] sm:$0xff] }
 0x4e5   :  { %7168 = vmatprep.subr.bf16.mxu1 %v7466_v40  ;;  %v6904_v5 = vpack.c.bf16 %v2612_v46, %v2605_v41  ;;  %v2711_v41 = vld [vmem:[#allocation11 + $0x2980] sm:$0xff]  ;;  %v2710_v46 = vld [vmem:[#allocation11 + $0x2978] sm:$0xff] }
 0x4e7   :  { %6885 = vmatpush1.bf16.msra.mxu0 %v6884_v25  ;;  %v2627_v25 = vld [vmem:[#allocation11 + $0x26e0] sm:$0xff] }
 0x4e8   :  { %7170 = vmatpush3.bf16.msra.mxu1 %v7169_v42  ;;  %6887 = vmatprep.subr.bf16.mxu0 %v6886_v53 }
 0x4e9   :  { %7171 = vmatprep.subr.bf16.mxu1 %v7466_v40 }
 0x4eb   :  { %6889 = vmatpush1.bf16.msra.mxu0 %v6888_v22  ;;  %v6906_v22 = vpack.c.bf16 %v2627_v25, %v2620_v10 }
 0x4ec   :  { %7173 = vmatpush3.bf16.msra.mxu1 %v7172_v56  ;;  %6891 = vmatprep.subr.bf16.mxu0 %v6890_v57  ;;  %v2619_v56 = vld [vmem:[#allocation11 + $0x26a0] sm:$0xff]  ;;  %v2626_v57 = vld [vmem:[#allocation11 + $0x26d8] sm:$0xff] }
 0x4ed   :  { %7174 = vmatprep.subr.bf16.mxu1 %v7466_v40  ;;  %v6908_v35 = vpack.c.bf16 %v2626_v57, %v2619_v56  ;;  %v2731_v56 = vld [vmem:[#allocation11 + $0x2a20] sm:$0xff]  ;;  %v2738_v57 = vld [vmem:[#allocation11 + $0x2a58] sm:$0xff] }
 0x4ef   :  { %6893 = vmatpush1.bf16.msra.mxu0 %v6892_v3  ;;  %v2648_v3 = vld [vmem:[#allocation11 + $0x2788] sm:$0xff] }
 0x4f0   :  { %7176 = vmatpush3.bf16.msra.mxu1 %v7175_v11  ;;  %6895 = vmatprep.subr.bf16.mxu0 %v6894_v4  ;;  %v2655_v11 = vld [vmem:[#allocation11 + $0x27c0] sm:$0xff] }
 0x4f1   :  { %7177 = vmatprep.subr.bf16.mxu1 %v7466_v40  ;;  %v6914_v4 = vpack.c.bf16 %v2655_v11, %v2648_v3  ;;  %v2759_v3 = vld [vmem:[#allocation11 + $0x2b00] sm:$0xff]  ;;  %v2766_v11 = vld [vmem:[#allocation11 + $0x2b38] sm:$0xff] }
 0x4f2   :  { %v3865_v39 = vpop.f32.mrb[16].mxu1  ;;  %v6948_v9 = vpack.c.bf16 %v2766_v11, %v2759_v3  ;;  %v2864_v3 = vrot.slane %v7824_v49, %v831_v28 }
 0x4f3   :  { %v7190_v55 = vadd.f32 %v3865_v39, %v2852_v18  ;;  %v3867_v38 = vpop.f32.mrb[17].mxu1  ;;  %6897 = vmatpush1.bf16.msra.mxu0 %v6896_v19  ;;  %v2661_v18 = vld [vmem:[#allocation11 + $0x27f0] sm:$0xff]  ;;  %v2668_v19 = vld [vmem:[#allocation11 + $0x2828] sm:$0xff]  ;;  %v6926_v39 = vpack.c.bf16 %v2697_v27, %v2690_v50  ;;  %v2823_v27 = vld [vmem:[#allocation11 + $0x2d00] sm:$0xff] }
 0x4f4   :  { %v7191_v43 = vadd.f32 %v3867_v38, %v2856_v47  ;;  %7179 = vmatpush3.bf16.msra.mxu1 %v7178_v20  ;;  %6899 = vmatprep.subr.bf16.mxu0 %v6898_v21  ;;  %v2676_v47 = vld [vmem:[#allocation11 + $0x2868] sm:$0xff]  ;;  %v2683_v20 = vld [vmem:[#allocation11 + $0x28a0] sm:$0xff]  ;;  %v6920_v21 = vpack.c.bf16 %v2668_v19, %v2661_v18 }
 0x4f5   :  { %7180 = vmatprep.subr.bf16.mxu1 %v7466_v40  ;;  %v6922_v12 = vpack.c.bf16 %v2683_v20, %v2676_v47  ;;  %v2696_v38 = vld [vmem:[#allocation11 + $0x2908] sm:$0xff]  ;;  %v2787_v19 = vld [vmem:[#allocation11 + $0x2be0] sm:$0xff]  ;;  %v2802_v47 = vld [vmem:[#allocation11 + $0x2c58] sm:$0xff] }
 0x4f6   :  { %v4866_v42 = vcombine.low %v7190_v55, %v7191_v43  ;;  %v4867_v53 = vcombine.high %v7190_v55, %v7191_v43  ;;  %v2689_v55 = vld [vmem:[#allocation11 + $0x28d0] sm:$0xff]  ;;  %v2816_v50 = vld [vmem:[#allocation11 + $0x2cc8] sm:$0xff] }
 0x4f7   :  { %6901 = vmatpush1.bf16.msra.mxu0 %v6900_v48  ;;  %v2704_v48 = vld [vmem:[#allocation11 + $0x2948] sm:$0xff]  ;;  %v6928_v43 = vpack.c.bf16 %v2696_v38, %v2689_v55  ;;  %v2809_v20 = vld [vmem:[#allocation11 + $0x2c90] sm:$0xff]  ;;  %v6962_v55 = vpack.c.bf16 %v2823_v27, %v2816_v50  ;;  %v2815_v38 = vld [vmem:[#allocation11 + $0x2cc0] sm:$0xff] }
 0x4f8   :  { %v4888_v36 = vrot.slane %v4866_v42, %v7599_v30  ;;  %v4895_v34 = vrot.slane %v4867_v53, %v7599_v30  ;;  %7182 = vmatpush3.bf16.msra.mxu1 %v7181_v51  ;;  %6903 = vmatprep.subr.bf16.mxu0 %v6902_v1  ;;  %v6930_v51 = vpack.c.bf16 %v2711_v41, %v2704_v48  ;;  %v2703_v1 = vld [vmem:[#allocation11 + $0x2940] sm:$0xff]  ;;  %v2822_v48 = vld [vmem:[#allocation11 + $0x2cf8] sm:$0xff] }
 0x4f9   :  { %7183 = vmatprep.subr.bf16.mxu1 %v7466_v40  ;;  %v6912_v40 = vpack.c.bf16 %v2640_v2, %v2633_v17  ;;  %v6932_v42 = vpack.c.bf16 %v2710_v46, %v2703_v1  ;;  %v2830_v41 = vld [vmem:[#allocation11 + $0x2d38] sm:$0xff]  ;;  %v6964_v46 = vpack.c.bf16 %v2822_v48, %v2815_v38 }
 0x4fa   :  { %v4896_v61 = vcombine.low %v4874_v37, %v4888_v36  ;;  %v4897_v62 = vcombine.high %v4874_v37, %v4888_v36  ;;  %v4898_v8 = vcombine.low %v4881_v54, %v4895_v34  ;;  %v4899_v45 = vcombine.high %v4881_v54, %v4895_v34  ;;  %v2717_v54 = vld [vmem:[#allocation11 + $0x29b0] sm:$0xff]  ;;  %v2739_v36 = vld [vmem:[#allocation11 + $0x2a60] sm:$0xff] }
 0x4fb   :  { %6905 = vmatpush1.bf16.msra.mxu0 %v6904_v5  ;;  %v6934_v37 = vpack.c.bf16 %v2725_v16, %v2718_v52  ;;  %v2724_v5 = vld [vmem:[#allocation11 + $0x29e8] sm:$0xff] }
 0x4fc   :  { %4943 = vst [vmem:[#allocation14] sm:$0xff] %v4896_v61  ;;  %4950 = vst [vmem:[#allocation14 + $0xe] sm:$0xff] %v4897_v62  ;;  %7185 = vmatpush3.bf16.msra.mxu1 %v7184_v59  ;;  %6907 = vmatprep.subr.bf16.mxu0 %v6906_v22  ;;  %v2732_v59 = vld [vmem:[#allocation11 + $0x2a28] sm:$0xff]  ;;  %v6936_v34 = vpack.c.bf16 %v2724_v5, %v2717_v54  ;;  %v6940_v61 = vpack.c.bf16 %v2738_v57, %v2731_v56 }
 0x4fd   :  { %4952 = vst [vmem:[#allocation14 + $0x1c] sm:$0xff] %v4898_v8  ;;  %4954 = vst [vmem:[#allocation14 + $0x2a] sm:$0xff] %v4899_v45  ;;  %v6938_v22 = vpack.c.bf16 %v2739_v36, %v2732_v59  ;;  %v6942_v62 = vpack.c.bf16 %v2753_v60, %v2746_v63  ;;  %v2745_v8 = vld [vmem:[#allocation11 + $0x2a90] sm:$0xff]  ;;  %v2752_v45 = vld [vmem:[#allocation11 + $0x2ac8] sm:$0xff] }
 0x4fe   :  { %v6944_v17 = vpack.c.bf16 %v2752_v45, %v2745_v8 }
 0x4ff   :  { %5405 = vmatmul.mubr.f32.vlgmr.msra.gmra.mrb[30].mxu1 %v7774_v58  ;;  %6909 = vmatpush1.bf16.msra.mxu0 %v6908_v35  ;;  %v2760_v35 = vld [vmem:[#allocation11 + $0x2b08] sm:$0xff] }
 0x500   :  { %6911 = vmatprep.subr.bf16.mxu0 %v6910_v0  ;;  %v2767_v0 = vld [vmem:[#allocation11 + $0x2b40] sm:$0xff] }
 0x501   :  { %v6946_v2 = vpack.c.bf16 %v2767_v0, %v2760_v35 }
 0x503   :  { %6913 = vmatpush1.bf16.msra.mxu0 %v6912_v40  ;;  %v2774_v40 = vld [vmem:[#allocation11 + $0x2b78] sm:$0xff] }
 0x504   :  { %6915 = vmatprep.subr.bf16.mxu0 %v6914_v4  ;;  %v2781_v4 = vld [vmem:[#allocation11 + $0x2bb0] sm:$0xff] }
 0x505   :  { %v6950_v6 = vpack.c.bf16 %v2781_v4, %v2774_v40 }
 0x507   :  { %6917 = vmatpush1.bf16.msra.mxu0 %v6916_v15  ;;  %v2788_v15 = vld [vmem:[#allocation11 + $0x2be8] sm:$0xff] }
 0x508   :  { %6919 = vmatprep.subr.bf16.mxu0 %v6918_v44  ;;  %v2795_v44 = vld [vmem:[#allocation11 + $0x2c20] sm:$0xff] }
 0x509   :  { %v6954_v18 = vpack.c.bf16 %v2795_v44, %v2788_v15 }
 0x50b   :  { %6921 = vmatpush1.bf16.msra.mxu0 %v6920_v21 }
 0x50c   :  { %6923 = vmatprep.subr.bf16.mxu0 %v6922_v12  ;;  %v6958_v12 = vpack.c.bf16 %v2809_v20, %v2802_v47 }
 0x50f   :  { %6925 = vmatpush1.bf16.msra.mxu0 %v6924_v29  ;;  %v6960_v29 = vpack.c.bf16 %v2808_v31, %v2801_v24 }
 0x510   :  { %6927 = vmatprep.subr.bf16.mxu0 %v6926_v39  ;;  %v2868_v39 = vrot.slane %v7824_v49, %v835_v33 }
 0x512   :  { %v5135_v10 = vpop.f32.mrb[18].mxu1 }
 0x513   :  { %v5136_v25 = vpop.f32.mrb[19].mxu1  ;;  %6929 = vmatpush1.bf16.msra.mxu0 %v6928_v43  ;;  %v2837_v43 = vld [vmem:[#allocation11 + $0x2d70] sm:$0xff] }
 0x514   :  { %v7844_v53 = vadd.f32 %v5136_v25, %v5135_v10  ;;  %6931 = vmatprep.subr.bf16.mxu0 %v6930_v51  ;;  %v6966_v10 = vpack.c.bf16 %v2837_v43, %v2830_v41  ;;  %v2829_v25 = vld [vmem:[#allocation11 + $0x2d30] sm:$0xff] }
 0x516   :  { %v4434_v52 = vadd.f32 %v7844_v53, %v2868_v39 }
 0x517   :  { %6933 = vmatpush1.bf16.msra.mxu0 %v6932_v42  ;;  %v2836_v42 = vld [vmem:[#allocation11 + $0x2d68] sm:$0xff] }
 0x518   :  { %6935 = vmatprep.subr.bf16.mxu0 %v6934_v37  ;;  %v6968_v33 = vpack.c.bf16 %v2836_v42, %v2829_v25 }
 0x51b   :  { %6937 = vmatpush1.bf16.msra.mxu0 %v6936_v34 }
 0x51c   :  { %6939 = vmatprep.subr.bf16.mxu0 %v6938_v22 }
 0x51e   :  { %4290 = vmatmul.mubr.f32.vlgmr.msra.gmra.mrb[10].mxu0 %v7767_v7  ;;  %v6952_v7 = vpack.c.bf16 %v2780_v14, %v2773_v13 }
 0x51f   :  { %6941 = vmatpush1.bf16.msra.mxu0 %v6940_v61  ;;  %4360 = vmatprep.mubr.f32.mxu0 %v7465_v32  ;;  %v2794_v32 = vld [vmem:[#allocation11 + $0x2c18] sm:$0xff] }
 0x520   :  { %6943 = vmatprep.subr.bf16.mxu0 %v6942_v62  ;;  %v6956_v21 = vpack.c.bf16 %v2794_v32, %v2787_v19 }
 0x523   :  { %6945 = vmatpush1.bf16.msra.mxu0 %v6944_v17 }
 0x524   :  { %6947 = vmatprep.subr.bf16.mxu0 %v6946_v2 }
 0x527   :  { %6949 = vmatpush1.bf16.msra.mxu0 %v6948_v9 }
 0x528   :  { %6951 = vmatprep.subr.bf16.mxu0 %v6950_v6 }
 0x52b   :  { %6953 = vmatpush1.bf16.msra.mxu0 %v6952_v7 }
 0x52c   :  { %6955 = vmatprep.subr.bf16.mxu0 %v6954_v18 }
 0x52f   :  { %6957 = vmatpush1.bf16.msra.mxu0 %v6956_v21 }
 0x530   :  { %6959 = vmatprep.subr.bf16.mxu0 %v6958_v12 }
 0x532   :  { %v5170_v51 = vpop.f32.mrb[20].mxu1 }
 0x533   :  { %v5171_v1 = vpop.f32.mrb[21].mxu1  ;;  %6961 = vmatpush1.bf16.msra.mxu0 %v6960_v29 }
 0x534   :  { %v5172_v16 = vadd.f32 %v5171_v1, %v5170_v51  ;;  %6963 = vmatprep.subr.bf16.mxu0 %v6962_v55 }
 0x536   :  { %v4504_v37 = vadd.f32 %v5172_v16, %v4434_v52 }
 0x537   :  { %6965 = vmatpush1.bf16.msra.mxu0 %v6964_v46 }
 0x538   :  { %6967 = vmatprep.subr.bf16.mxu0 %v6966_v10 }
 0x53b   :  { %6969 = vmatpush1.bf16.msra.mxu0 %v6968_v33 }
 0x53e   :  { %4361 = vmatmul.mubr.f32.vlgmr.msra.gmra.mrb[10].mxu0 %v7774_v58  ;;  %v2860_v58 = vrot.slane %v7824_v49, %v7702_v26 }
 0x552   :  { %v5205_v54 = vpop.f32.mrb[22].mxu1 }
 0x553   :  { %v5206_v5 = vpop.f32.mrb[23].mxu1 }
 0x554   :  { %v5207_v59 = vadd.f32 %v5206_v5, %v5205_v54 }
 0x556   :  { %v4574_v36 = vadd.f32 %v5207_v59, %v4504_v37 }
 0x572   :  { %v5240_v34 = vpop.f32.mrb[24].mxu1 }
 0x573   :  { %v5241_v22 = vpop.f32.mrb[25].mxu1 }
 0x574   :  { %v5242_v56 = vadd.f32 %v5241_v22, %v5240_v34 }
 0x576   :  { %v4644_v53 = vadd.f32 %v5242_v56, %v4574_v36 }
 0x592   :  { %v5275_v57 = vpop.f32.mrb[26].mxu1 }
 0x593   :  { %v5276_v63 = vpop.f32.mrb[27].mxu1 }
 0x594   :  { %v5277_v60 = vadd.f32 %v5276_v63, %v5275_v57 }
 0x596   :  { %v4714_v61 = vadd.f32 %v5277_v60, %v4644_v53 }
 0x5b2   :  { %v5310_v62 = vpop.f32.mrb[28].mxu1 }
 0x5b3   :  { %v5311_v8 = vpop.f32.mrb[29].mxu1 }
 0x5b4   :  { %v5312_v45 = vadd.f32 %v5311_v8, %v5310_v62 }
 0x5b6   :  { %v4784_v35 = vadd.f32 %v5312_v45, %v4714_v61 }
 0x5d2   :  { %v4853_v0 = vpop.f32.mrb[30].mxu1 }
 0x5d3   :  { %v4854_v17 = vadd.f32 %v4853_v0, %v4784_v35  ;;  %v5406_v2 = vpop.f32.mrb[31].mxu1 }
 0x5d5   :  { %v4902_v9 = vcombine.high %v4854_v17, %v4854_v17  ;;  %v4923_v15 = vrot.slane %v4854_v17, %v7599_v30 }
 0x5d7   :  { %v4930_v44 = vrot.slane %v4902_v9, %v7599_v30 }
 0x611   :  { %v4362_v11 = vpop.f32.mrb[10].mxu0 }
 0x612   :  { %v7192_v40 = vadd.f32 %v4362_v11, %v2860_v58  ;;  %v4364_v4 = vpop.f32.mrb[11].mxu0 }
 0x613   :  { %v7193_v6 = vadd.f32 %v4364_v4, %v2864_v3 }
 0x615   :  { %v4900_v13 = vcombine.low %v7192_v40, %v7193_v6  ;;  %v4901_v14 = vcombine.high %v7192_v40, %v7193_v6 }
 0x617   :  { %v4909_v26 = vrot.slane %v4900_v13, %v7599_v30  ;;  %v4916_v23 = vrot.slane %v4901_v14, %v7599_v30 }
 0x619   :  { %v4931_v28 = vcombine.low %v4909_v26, %v4923_v15  ;;  %v4932_v49 = vcombine.high %v4909_v26, %v4923_v15  ;;  %v4933_v7 = vcombine.low %v4916_v23, %v4930_v44  ;;  %v4934_v18 = vcombine.high %v4916_v23, %v4930_v44 }
 0x61b   :  { %4949 = vst.msk [vmem:[#allocation14 + $0x8] sm:$0x3f] %vm4948_vm6, %v4931_v28  ;;  %4951 = vst.msk [vmem:[#allocation14 + $0x16] sm:$0x3f] %vm4948_vm6, %v4932_v49 }
 0x61c   :  { %4953 = vst.msk [vmem:[#allocation14 + $0x24] sm:$0x3f] %vm4948_vm6, %v4933_v7  ;;  %4955 = vst.msk [vmem:[#allocation14 + $0x32] sm:$0x3f] %vm4948_vm6, %v4934_v18 }
 0x61d   :  { %4960 = vsyncadd [#allocation4], 672  ;;  %s7468_s6 = smov [#allocation14]  }
 0x61e   :  { %s4961_s18 = sshll.u32 %s7468_s6, 4  ;;  %s4962_s18 = int_to_ptr.vmem [resolvable:$true] %s4961_s18 }
 0x61f   :  { %s7417_s19 = scalar_lea.vmem %s4962_s18, 224  ;;  %s7421_s20 = scalar_lea.vmem %s4962_s18, 896 }
 0x620   :  { %p7418_p0 = scmp.ne.s32.totalorder %s4962_s18, %s7417_s19  ;;  %p7422_p1 = scmp.lt.s32.totalorder %s4962_s18, %s4962_s18 }
 0x621   :  { %p7423_p2 = scmp.lt.s32.totalorder %s7421_s20, %s7417_s19 }
 0x623   :  { %p7424_p3 = por %p7423_p2, %p7422_p1 }
 0x625   :  { %p7425_p4 = pnand %p7424_p3, %p7418_p0 }
 0x627   :  { %7428 = shalt.err (!%p7425_p4)
}
 0x628   :  { %s7429_s23 = scalar_lea.hbm %s7884_s7, 224 }
 0x629   :  { %p7430_p5 = scmp.ne.s32.totalorder %s7884_s7, %s7429_s23  ;;  %p7433_p6 = scmp.lt.u32.totalorder %s7429_s23, %s7884_s7 }
 0x62b   :  { %p7435_p7 = pnand %p7433_p6, %p7430_p5 }
 0x62d   :  { %7438 = shalt.err (!%p7435_p7)
}
 0x62e   :  { %4967 = dma.vmem_to_hbm [thread:$0]  %s4962_s18, 224, %s7884_s7, [#allocation4], %s7459_s27, %s7459_s27, %s7460_s28  }
 0x62f   :  { %7447 = dma.done.wait [#allocation4], 896  }
 0x630   :  { %7448 = vsyncadd [#allocation4], 4294966400 }
 0x631   :  { %4971 = vsyncpa [#allocation3], 1 }
 0x632   :  { %4972 = vsyncpa [#allocation6], 1 }
 0x633   :  { %4973 = vsyncpa [#allocation9], 1 }
 0x634   :  { %4974 = vsyncpa [#allocation12], 1 }
 0x635   :  { %4975 = vsyncpa [#allocation4], 1 }

</bundles_post_ra>
